<compile_context>
chip_gen: v5e
topology: v5e:2x2
jax: 0.10.0
libtpu: 0.0.40
codegen_flags: <defaults>
</compile_context>

<pallas_src>
import jax
import jax.numpy as jnp
from jax.experimental import pallas as pl
from jax.experimental.pallas import tpu as pltpu

LANE = 128
SUBLANE = 8
BN_EPS = 1e-5


# --------------------------------------------------------------------------- #
# Kernel
# --------------------------------------------------------------------------- #
def baseline_kernel(alpha_ref,            # SMEM (2,)  PReLU slopes (f32)
                    x_ref,                # (TB, DP)        bf16
                    w1_ref, b1_ref,       # (DP, 1024) bf16, (1, 1024) f32   fc1+bn1
                    w2_ref, b2_ref,       # (1024, 512) bf16, (1, 512) f32   fc2+bn2
                    w3_ref, b3_ref,       # (512, CP) bf16, (1, CP) f32      fc3+bn3
                    o_ref):               # (TB, CP) f32
    a1 = alpha_ref[0]
    a2 = alpha_ref[1]

    # fc1 + bn1 (folded) + PReLU.  Dropout = identity at inference.
    h = jnp.dot(x_ref[...], w1_ref[...],
                preferred_element_type=jnp.float32) + b1_ref[...]
    h = jnp.where(h >= 0.0, h, a1 * h)

    # fc2 + bn2 (folded) + PReLU.  Cast back to bf16 to stay on the bf16 MXU path.
    h = jnp.dot(h.astype(w2_ref.dtype), w2_ref[...],
                preferred_element_type=jnp.float32) + b2_ref[...]
    h = jnp.where(h >= 0.0, h, a2 * h)

    # fc3 + bn3 (folded) + sigmoid; output block is lane-dense (CP = n*128).
    z = jnp.dot(h.astype(w3_ref.dtype), w3_ref[...],
                preferred_element_type=jnp.float32) + b3_ref[...]
    o_ref[...] = pl.reciprocal(1.0 + jnp.exp(-z), approx=True).astype(o_ref.dtype)


# --------------------------------------------------------------------------- #
# One-time parameter preparation (hoisted off the per-call path)
# --------------------------------------------------------------------------- #
def _round_up(n, m):
    return ((n + m - 1) // m) * m


def _fold_bn(w, b, gamma, beta, mean, var, eps=BN_EPS):
    """Fold eval-mode BatchNorm1d into the preceding Linear (W:[in,out], b:[out])."""
    s = gamma / jnp.sqrt(var + eps)
    return w * s[None, :], (b - mean) * s + beta


def prepare_params(params):
    """Fold BN, pad, cast to bf16.  Call ONCE; reuse the result for every forward."""
    (w1, b1, g1, be1, m1, v1, a1,
     w2, b2, g2, be2, m2, v2, a2,
     w3, b3, g3, be3, m3, v3) = params

    # Fold in f32 for accuracy, cast to bf16 only at the end.
    w1f, b1f = _fold_bn(w1, b1, g1, be1, m1, v1)
    w2f, b2f = _fold_bn(w2, b2, g2, be2, m2, v2)
    w3f, b3f = _fold_bn(w3, b3, g3, be3, m3, v3)

    D = w1f.shape[0]
    C = w3f.shape[1]
    DP = _round_up(D, LANE)          # lane-align fc1 K dimension
    CP = _round_up(C, LANE)          # lane-dense head for an unmasked final store

    w1p = jnp.zeros((DP, w1f.shape[1]), jnp.float32).at[:D, :].set(w1f)
    w3p = jnp.zeros((w3f.shape[0], CP), jnp.float32).at[:, :C].set(w3f)
    b3p = jnp.zeros((CP,), jnp.float32).at[:C].set(b3f)

    return {
        "w1": w1p.astype(jnp.bfloat16), "b1": b1f.reshape(1, -1),
        "w2": w2f.astype(jnp.bfloat16), "b2": b2f.reshape(1, -1),
        "w3": w3p.astype(jnp.bfloat16), "b3": b3p.reshape(1, -1),
        "alphas": jnp.stack([a1, a2]).astype(jnp.float32).reshape(2),
        "num_classes": int(C),
        "inputsize": int(D),
    }


# --------------------------------------------------------------------------- #
# Forward
# --------------------------------------------------------------------------- #
def _pick_tile(bp):
    """bp is a multiple of 8.  Largest tile <= 256 that divides bp AND yields a
    grid of >= 2 steps (pipelining + v7x dual-TC sharding); else the full batch."""
    cap = min(256, bp // 2)
    cap -= cap % SUBLANE
    for tb in range(cap, 0, -SUBLANE):
        if bp % tb == 0:
            return tb
    return bp


_const = lambda i: (0, 0)   # resident weights/biases: same block every step


def _wspec(shape, mode):
    if mode is None:
        return pl.BlockSpec(shape, _const)
    return pl.BlockSpec(shape, _const, pipeline_mode=mode)


def _make_call(BP, TB, DP, H1, H2, CP, weight_mode):
    return pl.pallas_call(
        baseline_kernel,
        out_shape=jax.ShapeDtypeStruct((BP, CP), jnp.float32),
        grid=(BP // TB,),
        in_specs=[
            pl.BlockSpec(memory_space=pltpu.MemorySpace.SMEM),      # PReLU alphas
            pl.BlockSpec((TB, DP), lambda i: (i, 0)),               # x (batch-tiled)
            _wspec((DP, H1), weight_mode), _wspec((1, H1), weight_mode),
            _wspec((H1, H2), weight_mode), _wspec((1, H2), weight_mode),
            _wspec((H2, CP), weight_mode), _wspec((1, CP), weight_mode),
        ],
        out_specs=pl.BlockSpec((TB, CP), lambda i: (i, 0)),
        compiler_params=pltpu.CompilerParams(
            dimension_semantics=("parallel",)),
    )


def baseline_forward(x, prepped):
    w1, b1 = prepped["w1"], prepped["b1"]
    w2, b2 = prepped["w2"], prepped["b2"]
    w3, b3 = prepped["w3"], prepped["b3"]
    alphas = prepped["alphas"]
    C = prepped["num_classes"]
    D = prepped["inputsize"]

    B, Din = x.shape
    assert Din == D
    DP, H1 = w1.shape
    H2 = w2.shape[1]
    CP = w3.shape[1]

    # Pad batch to a sublane multiple and features to the lane-aligned DP.
    BP = _round_up(max(B, SUBLANE), SUBLANE)
    xp = x.astype(jnp.bfloat16)
    if (BP, DP) != (B, D):
        xp = jnp.zeros((BP, DP), jnp.bfloat16).at[:B, :D].set(xp)

    TB = _pick_tile(BP)
    args = (alphas, xp, w1, b1, w2, b2, w3, b3)

    # TODO(synk): for very large inputsize (D ~ 4K+ on v7x's 64 MiB VMEM) add a
    # K-reduction grid axis over W1 with an f32 accumulator instead of keeping
    # W1 fully resident.  Not needed at these shapes.
    try:
        # Resident weights never rotate -> single-buffer them to halve VMEM use.
        out = _make_call(BP, TB, DP, H1, H2, CP, pl.Buffered(1))(*args)
    except Exception:
        # Fallback: default (double) buffering if single-buffer mode is rejected.
        out = _make_call(BP, TB, DP, H1, H2, CP, None)(*args)

    return out[:B, :C]


# --------------------------------------------------------------------------- #
# Pure-JAX eval-mode reference (un-folded BN, f32) for correctness checking
# --------------------------------------------------------------------------- #
def _reference(x, params):
    (w1, b1, g1, be1, m1, v1, a1,
     w2, b2, g2, be2, m2, v2, a2,
     w3, b3, g3, be3, m3, v3) = params

    def bn(y, g, be, m, v):
        return (y - m) / jnp.sqrt(v + BN_EPS) * g + be

    def prelu(y, a):
        return jnp.where(y >= 0, y, a * y)

    h = prelu(bn(x @ w1 + b1, g1, be1, m1, v1), a1)   # dropout = identity (eval)
    h = prelu(bn(h @ w2 + b2, g2, be2, m2, v2), a2)
    z = bn(h @ w3 + b3, g3, be3, m3, v3)
    return 1.0 / (1.0 + jnp.exp(-z))


def make_params(key, inputsize, num_classes):
    H1, H2 = 1024, 512
    ks = jax.random.split(key, 18)

    def lin(kw, kb, din, dout):
        bound = 1.0 / jnp.sqrt(jnp.float32(din))
        w = jax.random.uniform(kw, (din, dout), jnp.float32, -bound, bound)
        b = jax.random.uniform(kb, (dout,), jnp.float32, -bound, bound)
        return w, b

    def bn(kg, kb, km, kv, d):
        gamma = 1.0 + 0.1 * jax.random.normal(kg, (d,), jnp.float32)
        beta = 0.1 * jax.random.normal(kb, (d,), jnp.float32)
        mean = 0.1 * jax.random.normal(km, (d,), jnp.float32)
        var = jax.random.uniform(kv, (d,), jnp.float32, 0.5, 1.5)
        return gamma, beta, mean, var

    w1, b1 = lin(ks[0], ks[1], inputsize, H1)
    g1, be1, m1, v1 = bn(ks[2], ks[3], ks[4], ks[5], H1)
    w2, b2 = lin(ks[6], ks[7], H1, H2)
    g2, be2, m2, v2 = bn(ks[8], ks[9], ks[10], ks[11], H2)
    w3, b3 = lin(ks[12], ks[13], H2, num_classes)
    g3, be3, m3, v3 = bn(ks[14], ks[15], ks[16], ks[17], num_classes)

    a1 = jnp.array(0.25, jnp.float32)   # nn.PReLU() default init
    a2 = jnp.array(0.25, jnp.float32)

    return (w1, b1, g1, be1, m1, v1, a1,
            w2, b2, g2, be2, m2, v2, a2,
            w3, b3, g3, be3, m3, v3)


if __name__ == "__main__":
    # TODO(synk): training-mode Dropout / BatchNorm batch-statistics are not
    # implemented; this kernel realizes the inference (eval) forward pass.
    B, D, C = 16, 256, 8   # inputsize=256, num_classes=8; hidden 1024/512 fixed by the module

    key = jax.random.PRNGKey(0)
    kx, kp = jax.random.split(key)
    x = jax.random.normal(kx, (B, D), jnp.float32)
    params = make_params(kp, D, C)

    prepped = prepare_params(params)          # one-time fold/pad/cast (off hot path)
    out = baseline_forward(x, prepped)
    out = jax.block_until_ready(out)

    ref = _reference(x, params)               # f32 eval-mode reference
    assert out.shape == (B, C)
    err = float(jnp.max(jnp.abs(out.astype(jnp.float32) - ref)))
    # bf16 weights/activations + approx reciprocal -> loosened tolerance
    assert err < 5e-2, err

    print("KERNEL_OK")
</pallas_src>

<mosaic_0001>
module attributes {stable_mosaic.version = 11 : i64} {
  func.func @baseline_kernel(%arg0: i32, %arg1: memref<2xf32, #tpu.memory_space<smem>>, %arg2: memref<8x256xbf16, #tpu.memory_space<vmem>>, %arg3: memref<256x1024xbf16, #tpu.memory_space<vmem>>, %arg4: memref<1x1024xf32, #tpu.memory_space<vmem>>, %arg5: memref<1024x512xbf16, #tpu.memory_space<vmem>>, %arg6: memref<1x512xf32, #tpu.memory_space<vmem>>, %arg7: memref<512x128xbf16, #tpu.memory_space<vmem>>, %arg8: memref<1x128xf32, #tpu.memory_space<vmem>>, %arg9: memref<8x128xf32, #tpu.memory_space<vmem>>) attributes {dimension_semantics = [#tpu.dimension_semantics<parallel>], iteration_bounds = array<i64: 2>, scalar_prefetch = 0 : i64, scratch_operands = 0 : i64, tpu.core_type = #tpu.core_type<tc>, window_params = [{transform_indices = @transform_0, window_bounds = array<i64: 2>}, {transform_indices = @transform_1, window_bounds = array<i64: 8, 256>}, {pipeline_mode = #tpu.pipeline_mode<synchronous>, transform_indices = @transform_2, window_bounds = array<i64: 256, 1024>}, {pipeline_mode = #tpu.pipeline_mode<synchronous>, transform_indices = @transform_3, window_bounds = array<i64: 1, 1024>}, {pipeline_mode = #tpu.pipeline_mode<synchronous>, transform_indices = @transform_4, window_bounds = array<i64: 1024, 512>}, {pipeline_mode = #tpu.pipeline_mode<synchronous>, transform_indices = @transform_5, window_bounds = array<i64: 1, 512>}, {pipeline_mode = #tpu.pipeline_mode<synchronous>, transform_indices = @transform_6, window_bounds = array<i64: 512, 128>}, {pipeline_mode = #tpu.pipeline_mode<synchronous>, transform_indices = @transform_7, window_bounds = array<i64: 1, 128>}, {transform_indices = @transform_8, window_bounds = array<i64: 8, 128>}]} {
    %c0 = arith.constant 0 : index
    %0 = memref.load %arg1[%c0] : memref<2xf32, #tpu.memory_space<smem>>
    %c1 = arith.constant 1 : index
    %1 = memref.load %arg1[%c1] : memref<2xf32, #tpu.memory_space<smem>>
    %c0_0 = arith.constant 0 : index
    %c0_1 = arith.constant 0 : index
    %2 = vector.load %arg2[%c0_0, %c0_1] : memref<8x256xbf16, #tpu.memory_space<vmem>>, vector<8x256xbf16>
    %c0_2 = arith.constant 0 : index
    %c0_3 = arith.constant 0 : index
    %3 = vector.load %arg3[%c0_2, %c0_3] : memref<256x1024xbf16, #tpu.memory_space<vmem>>, vector<256x1024xbf16>
    %cst = arith.constant dense<0.000000e+00> : vector<8x1024xf32>
    %4 = tpu.matmul %2, %3, %cst {dimension_numbers = #tpu.dot_dimension_numbers<[1], [0], [0], [1], [0, 0, 1, 1], [], []>} : vector<8x256xbf16>, vector<256x1024xbf16>, vector<8x1024xf32> -> vector<8x1024xf32>
    %c0_4 = arith.constant 0 : index
    %c0_5 = arith.constant 0 : index
    %5 = vector.load %arg4[%c0_4, %c0_5] : memref<1x1024xf32, #tpu.memory_space<vmem>>, vector<1x1024xf32>
    %6 = vector.broadcast %5 : vector<1x1024xf32> to vector<8x1024xf32>
    %7 = arith.addf %4, %6 : vector<8x1024xf32>
    %cst_6 = arith.constant 0.000000e+00 : f32
    %8 = vector.broadcast %cst_6 : f32 to vector<8x1024xf32>
    %9 = arith.cmpf oge, %7, %8 : vector<8x1024xf32>
    %10 = vector.broadcast %0 : f32 to vector<8x1024xf32>
    %11 = arith.mulf %10, %7 : vector<8x1024xf32>
    %12 = arith.select %9, %7, %11 : vector<8x1024xi1>, vector<8x1024xf32>
    %13 = arith.truncf %12 : vector<8x1024xf32> to vector<8x1024xbf16>
    %c0_7 = arith.constant 0 : index
    %c0_8 = arith.constant 0 : index
    %14 = vector.load %arg5[%c0_7, %c0_8] : memref<1024x512xbf16, #tpu.memory_space<vmem>>, vector<1024x512xbf16>
    %cst_9 = arith.constant dense<0.000000e+00> : vector<8x512xf32>
    %15 = tpu.matmul %13, %14, %cst_9 {dimension_numbers = #tpu.dot_dimension_numbers<[1], [0], [0], [1], [0, 0, 1, 1], [], []>} : vector<8x1024xbf16>, vector<1024x512xbf16>, vector<8x512xf32> -> vector<8x512xf32>
    %c0_10 = arith.constant 0 : index
    %c0_11 = arith.constant 0 : index
    %16 = vector.load %arg6[%c0_10, %c0_11] : memref<1x512xf32, #tpu.memory_space<vmem>>, vector<1x512xf32>
    %17 = vector.broadcast %16 : vector<1x512xf32> to vector<8x512xf32>
    %18 = arith.addf %15, %17 : vector<8x512xf32>
    %cst_12 = arith.constant 0.000000e+00 : f32
    %19 = vector.broadcast %cst_12 : f32 to vector<8x512xf32>
    %20 = arith.cmpf oge, %18, %19 : vector<8x512xf32>
    %21 = vector.broadcast %1 : f32 to vector<8x512xf32>
    %22 = arith.mulf %21, %18 : vector<8x512xf32>
    %23 = arith.select %20, %18, %22 : vector<8x512xi1>, vector<8x512xf32>
    %24 = arith.truncf %23 : vector<8x512xf32> to vector<8x512xbf16>
    %c0_13 = arith.constant 0 : index
    %c0_14 = arith.constant 0 : index
    %25 = vector.load %arg7[%c0_13, %c0_14] : memref<512x128xbf16, #tpu.memory_space<vmem>>, vector<512x128xbf16>
    %cst_15 = arith.constant dense<0.000000e+00> : vector<8x128xf32>
    %26 = tpu.matmul %24, %25, %cst_15 {dimension_numbers = #tpu.dot_dimension_numbers<[1], [0], [0], [1], [0, 0, 1, 1], [], []>} : vector<8x512xbf16>, vector<512x128xbf16>, vector<8x128xf32> -> vector<8x128xf32>
    %c0_16 = arith.constant 0 : index
    %c0_17 = arith.constant 0 : index
    %27 = vector.load %arg8[%c0_16, %c0_17] : memref<1x128xf32, #tpu.memory_space<vmem>>, vector<1x128xf32>
    %28 = vector.broadcast %27 : vector<1x128xf32> to vector<8x128xf32>
    %29 = arith.addf %26, %28 : vector<8x128xf32>
    %cst_18 = arith.constant 0.000000e+00 : f32
    %30 = vector.broadcast %cst_18 : f32 to vector<8x128xf32>
    %31 = arith.subf %30, %29 : vector<8x128xf32>
    %32 = math.exp %31 : vector<8x128xf32>
    %cst_19 = arith.constant 1.000000e+00 : f32
    %33 = vector.broadcast %cst_19 : f32 to vector<8x128xf32>
    %34 = arith.addf %33, %32 : vector<8x128xf32>
    %35 = tpu.reciprocal %34 {approx = true} : vector<8x128xf32> -> vector<8x128xf32>
    %c0_20 = arith.constant 0 : index
    %c0_21 = arith.constant 0 : index
    %36 = vector.load %arg9[%c0_20, %c0_21] : memref<8x128xf32, #tpu.memory_space<vmem>>, vector<8x128xf32>
    tpu.vector_store %arg9[%c0_20, %c0_21], %35 {strides = array<i32>} : memref<8x128xf32, #tpu.memory_space<vmem>>, vector<8x128xf32>,
    return
  }
  func.func @transform_0(%arg0: i32) -> i32 {
    %c0_i32 = arith.constant 0 : i32
    %c0_i32_0 = arith.constant 0 : i32
    return %c0_i32 : i32
  }
  func.func @transform_1(%arg0: i32) -> (i32, i32) {
    %c0_i32 = arith.constant 0 : i32
    %c0_i32_0 = arith.constant 0 : i32
    return %arg0, %c0_i32 : i32, i32
  }
  func.func @transform_2(%arg0: i32) -> (i32, i32) {
    %c0_i32 = arith.constant 0 : i32
    %c0_i32_0 = arith.constant 0 : i32
    %c0_i32_1 = arith.constant 0 : i32
    return %c0_i32, %c0_i32_0 : i32, i32
  }
  func.func @transform_3(%arg0: i32) -> (i32, i32) {
    %c0_i32 = arith.constant 0 : i32
    %c0_i32_0 = arith.constant 0 : i32
    %c0_i32_1 = arith.constant 0 : i32
    return %c0_i32, %c0_i32_0 : i32, i32
  }
  func.func @transform_4(%arg0: i32) -> (i32, i32) {
    %c0_i32 = arith.constant 0 : i32
    %c0_i32_0 = arith.constant 0 : i32
    %c0_i32_1 = arith.constant 0 : i32
    return %c0_i32, %c0_i32_0 : i32, i32
  }
  func.func @transform_5(%arg0: i32) -> (i32, i32) {
    %c0_i32 = arith.constant 0 : i32
    %c0_i32_0 = arith.constant 0 : i32
    %c0_i32_1 = arith.constant 0 : i32
    return %c0_i32, %c0_i32_0 : i32, i32
  }
  func.func @transform_6(%arg0: i32) -> (i32, i32) {
    %c0_i32 = arith.constant 0 : i32
    %c0_i32_0 = arith.constant 0 : i32
    %c0_i32_1 = arith.constant 0 : i32
    return %c0_i32, %c0_i32_0 : i32, i32
  }
  func.func @transform_7(%arg0: i32) -> (i32, i32) {
    %c0_i32 = arith.constant 0 : i32
    %c0_i32_0 = arith.constant 0 : i32
    %c0_i32_1 = arith.constant 0 : i32
    return %c0_i32, %c0_i32_0 : i32, i32
  }
  func.func @transform_8(%arg0: i32) -> (i32, i32) {
    %c0_i32 = arith.constant 0 : i32
    %c0_i32_0 = arith.constant 0 : i32
    return %arg0, %c0_i32 : i32, i32
  }
}

module attributes {stable_mosaic.version = 11 : i64} {
  func.func @baseline_kernel(%arg0: i32, %arg1: memref<2xf32, #tpu.memory_space<smem>>, %arg2: memref<8x256xbf16, #tpu.memory_space<vmem>>, %arg3: memref<256x1024xbf16, #tpu.memory_space<vmem>>, %arg4: memref<1x1024xf32, #tpu.memory_space<vmem>>, %arg5: memref<1024x512xbf16, #tpu.memory_space<vmem>>, %arg6: memref<1x512xf32, #tpu.memory_space<vmem>>, %arg7: memref<512x128xbf16, #tpu.memory_space<vmem>>, %arg8: memref<1x128xf32, #tpu.memory_space<vmem>>, %arg9: memref<8x128xf32, #tpu.memory_space<vmem>>) attributes {dimension_semantics = [#tpu.dimension_semantics<parallel>], iteration_bounds = array<i64: 2>, scalar_prefetch = 0 : i64, scratch_operands = 0 : i64, tpu.core_type = #tpu.core_type<tc>, window_params = [{transform_indices = @transform_0, window_bounds = array<i64: 2>}, {transform_indices = @transform_1, window_bounds = array<i64: 8, 256>}, {pipeline_mode = #tpu.pipeline_mode<synchronous>, transform_indices = @transform_2, window_bounds = array<i64: 256, 1024>}, {pipeline_mode = #tpu.pipeline_mode<synchronous>, transform_indices = @transform_3, window_bounds = array<i64: 1, 1024>}, {pipeline_mode = #tpu.pipeline_mode<synchronous>, transform_indices = @transform_4, window_bounds = array<i64: 1024, 512>}, {pipeline_mode = #tpu.pipeline_mode<synchronous>, transform_indices = @transform_5, window_bounds = array<i64: 1, 512>}, {pipeline_mode = #tpu.pipeline_mode<synchronous>, transform_indices = @transform_6, window_bounds = array<i64: 512, 128>}, {pipeline_mode = #tpu.pipeline_mode<synchronous>, transform_indices = @transform_7, window_bounds = array<i64: 1, 128>}, {transform_indices = @transform_8, window_bounds = array<i64: 8, 128>}]} {
    %c0 = arith.constant 0 : index
    %0 = memref.load %arg1[%c0] : memref<2xf32, #tpu.memory_space<smem>>
    %c1 = arith.constant 1 : index
    %1 = memref.load %arg1[%c1] : memref<2xf32, #tpu.memory_space<smem>>
    %c0_0 = arith.constant 0 : index
    %c0_1 = arith.constant 0 : index
    %2 = vector.load %arg2[%c0_0, %c0_1] : memref<8x256xbf16, #tpu.memory_space<vmem>>, vector<8x256xbf16>
    %c0_2 = arith.constant 0 : index
    %c0_3 = arith.constant 0 : index
    %3 = vector.load %arg3[%c0_2, %c0_3] : memref<256x1024xbf16, #tpu.memory_space<vmem>>, vector<256x1024xbf16>
    %cst = arith.constant dense<0.000000e+00> : vector<8x1024xf32>
    %4 = tpu.matmul %2, %3, %cst {dimension_numbers = #tpu.dot_dimension_numbers<[1], [0], [0], [1], [0, 0, 1, 1], [], []>} : vector<8x256xbf16>, vector<256x1024xbf16>, vector<8x1024xf32> -> vector<8x1024xf32>
    %c0_4 = arith.constant 0 : index
    %c0_5 = arith.constant 0 : index
    %5 = vector.load %arg4[%c0_4, %c0_5] : memref<1x1024xf32, #tpu.memory_space<vmem>>, vector<1x1024xf32>
    %6 = vector.broadcast %5 : vector<1x1024xf32> to vector<8x1024xf32>
    %7 = arith.addf %4, %6 : vector<8x1024xf32>
    %cst_6 = arith.constant 0.000000e+00 : f32
    %8 = vector.broadcast %cst_6 : f32 to vector<8x1024xf32>
    %9 = arith.cmpf oge, %7, %8 : vector<8x1024xf32>
    %10 = vector.broadcast %0 : f32 to vector<8x1024xf32>
    %11 = arith.mulf %10, %7 : vector<8x1024xf32>
    %12 = arith.select %9, %7, %11 : vector<8x1024xi1>, vector<8x1024xf32>
    %13 = arith.truncf %12 : vector<8x1024xf32> to vector<8x1024xbf16>
    %c0_7 = arith.constant 0 : index
    %c0_8 = arith.constant 0 : index
    %14 = vector.load %arg5[%c0_7, %c0_8] : memref<1024x512xbf16, #tpu.memory_space<vmem>>, vector<1024x512xbf16>
    %cst_9 = arith.constant dense<0.000000e+00> : vector<8x512xf32>
    %15 = tpu.matmul %13, %14, %cst_9 {dimension_numbers = #tpu.dot_dimension_numbers<[1], [0], [0], [1], [0, 0, 1, 1], [], []>} : vector<8x1024xbf16>, vector<1024x512xbf16>, vector<8x512xf32> -> vector<8x512xf32>
    %c0_10 = arith.constant 0 : index
    %c0_11 = arith.constant 0 : index
    %16 = vector.load %arg6[%c0_10, %c0_11] : memref<1x512xf32, #tpu.memory_space<vmem>>, vector<1x512xf32>
    %17 = vector.broadcast %16 : vector<1x512xf32> to vector<8x512xf32>
    %18 = arith.addf %15, %17 : vector<8x512xf32>
    %cst_12 = arith.constant 0.000000e+00 : f32
    %19 = vector.broadcast %cst_12 : f32 to vector<8x512xf32>
    %20 = arith.cmpf oge, %18, %19 : vector<8x512xf32>
    %21 = vector.broadcast %1 : f32 to vector<8x512xf32>
    %22 = arith.mulf %21, %18 : vector<8x512xf32>
    %23 = arith.select %20, %18, %22 : vector<8x512xi1>, vector<8x512xf32>
    %24 = arith.truncf %23 : vector<8x512xf32> to vector<8x512xbf16>
    %c0_13 = arith.constant 0 : index
    %c0_14 = arith.constant 0 : index
    %25 = vector.load %arg7[%c0_13, %c0_14] : memref<512x128xbf16, #tpu.memory_space<vmem>>, vector<512x128xbf16>
    %cst_15 = arith.constant dense<0.000000e+00> : vector<8x128xf32>
    %26 = tpu.matmul %24, %25, %cst_15 {dimension_numbers = #tpu.dot_dimension_numbers<[1], [0], [0], [1], [0, 0, 1, 1], [], []>} : vector<8x512xbf16>, vector<512x128xbf16>, vector<8x128xf32> -> vector<8x128xf32>
    %c0_16 = arith.constant 0 : index
    %c0_17 = arith.constant 0 : index
    %27 = vector.load %arg8[%c0_16, %c0_17] : memref<1x128xf32, #tpu.memory_space<vmem>>, vector<1x128xf32>
    %28 = vector.broadcast %27 : vector<1x128xf32> to vector<8x128xf32>
    %29 = arith.addf %26, %28 : vector<8x128xf32>
    %cst_18 = arith.constant 0.000000e+00 : f32
    %30 = vector.broadcast %cst_18 : f32 to vector<8x128xf32>
    %31 = arith.subf %30, %29 : vector<8x128xf32>
    %32 = math.exp %31 : vector<8x128xf32>
    %cst_19 = arith.constant 1.000000e+00 : f32
    %33 = vector.broadcast %cst_19 : f32 to vector<8x128xf32>
    %34 = arith.addf %33, %32 : vector<8x128xf32>
    %35 = tpu.reciprocal %34 {approx = true} : vector<8x128xf32> -> vector<8x128xf32>
    %c0_20 = arith.constant 0 : index
    %c0_21 = arith.constant 0 : index
    %36 = vector.load %arg9[%c0_20, %c0_21] : memref<8x128xf32, #tpu.memory_space<vmem>>, vector<8x128xf32>
    tpu.vector_store %arg9[%c0_20, %c0_21], %35 {strides = array<i32>} : memref<8x128xf32, #tpu.memory_space<vmem>>, vector<8x128xf32>,
    return
  }
  func.func @transform_0(%arg0: i32) -> i32 {
    %c0_i32 = arith.constant 0 : i32
    %c0_i32_0 = arith.constant 0 : i32
    return %c0_i32 : i32
  }
  func.func @transform_1(%arg0: i32) -> (i32, i32) {
    %c0_i32 = arith.constant 0 : i32
    %c0_i32_0 = arith.constant 0 : i32
    return %arg0, %c0_i32 : i32, i32
  }
  func.func @transform_2(%arg0: i32) -> (i32, i32) {
    %c0_i32 = arith.constant 0 : i32
    %c0_i32_0 = arith.constant 0 : i32
    %c0_i32_1 = arith.constant 0 : i32
    return %c0_i32, %c0_i32_0 : i32, i32
  }
  func.func @transform_3(%arg0: i32) -> (i32, i32) {
    %c0_i32 = arith.constant 0 : i32
    %c0_i32_0 = arith.constant 0 : i32
    %c0_i32_1 = arith.constant 0 : i32
    return %c0_i32, %c0_i32_0 : i32, i32
  }
  func.func @transform_4(%arg0: i32) -> (i32, i32) {
    %c0_i32 = arith.constant 0 : i32
    %c0_i32_0 = arith.constant 0 : i32
    %c0_i32_1 = arith.constant 0 : i32
    return %c0_i32, %c0_i32_0 : i32, i32
  }
  func.func @transform_5(%arg0: i32) -> (i32, i32) {
    %c0_i32 = arith.constant 0 : i32
    %c0_i32_0 = arith.constant 0 : i32
    %c0_i32_1 = arith.constant 0 : i32
    return %c0_i32, %c0_i32_0 : i32, i32
  }
  func.func @transform_6(%arg0: i32) -> (i32, i32) {
    %c0_i32 = arith.constant 0 : i32
    %c0_i32_0 = arith.constant 0 : i32
    %c0_i32_1 = arith.constant 0 : i32
    return %c0_i32, %c0_i32_0 : i32, i32
  }
  func.func @transform_7(%arg0: i32) -> (i32, i32) {
    %c0_i32 = arith.constant 0 : i32
    %c0_i32_0 = arith.constant 0 : i32
    %c0_i32_1 = arith.constant 0 : i32
    return %c0_i32, %c0_i32_0 : i32, i32
  }
  func.func @transform_8(%arg0: i32) -> (i32, i32) {
    %c0_i32 = arith.constant 0 : i32
    %c0_i32_0 = arith.constant 0 : i32
    return %arg0, %c0_i32 : i32, i32
  }
}

</mosaic_0001>

<bundles_post_ra>
// kernel: tpu_custom_call.1
= control target key start
LH: loop header
LB: loop body
LE: loop exit
PB: predicated region body
PF: predicated region fallthrough
CT: control target
= control target key end

     0   :  { %s6704_s0 = inlined_call_operand.hbm [shape: f32[2], index: 0, kind: input, shape index: {}]   ;;  %s6705_s1 = inlined_call_operand.hbm [shape: bf16[16,256], index: 1, kind: input, shape index: {}]   ;;  %s6706_s2 = inlined_call_operand.hbm [shape: bf16[256,1024], index: 2, kind: input, shape index: {}]   ;;  %s6707_s3 = inlined_call_operand.hbm [shape: f32[1,1024], index: 3, kind: input, shape index: {}]   ;;  %s6708_s4 = inlined_call_operand.hbm [shape: bf16[1024,512], index: 4, kind: input, shape index: {}]   ;;  %s6709_s5 = inlined_call_operand.vmem [shape: f32[1,512], index: 5, kind: input, shape index: {}]   ;;  %s6710_s6 = inlined_call_operand.hbm [shape: bf16[512,128], index: 6, kind: input, shape index: {}]   ;;  %s6711_s7 = inlined_call_operand.vmem [shape: f32[1,128], index: 7, kind: input, shape index: {}]   ;;  %s6712_s8 = inlined_call_operand.hbm [shape: f32[16,128], index: 8, kind: output, shape index: {}]  }
   0x1   :  { %6713 = sst [smem:[#allocation19_spill]] %s6704_s0 }
   0x2   :  { %6714 = sst [smem:[#allocation20_spill]] %s6706_s2 }
   0x3   :  { %13 = vsyncpa [#allocation5], 0 }
   0x4   :  { %14 = vsyncpa [#allocation3], 0 }
   0x5   :  { %16 = vsyncpa [#allocation3 + $0x1], 0 }
   0x6   :  { %17 = vsyncpa [#allocation8], 0 }
   0x7   :  { %18 = vsyncpa [#allocation11], 0 }
   0x8   :  { %19 = vsyncpa [#allocation4], 0 }
   0x9   :  { %21 = vsyncpa [#allocation4 + $0x1], 0  ;;  %s6387_s27 = smov 0   ;;  %s6389_s28 = smov 0  }
   0xa   :  { %s6391_s29 = smov 0   ;;  %s6393_s30 = smov 0  }
   0xb LB: > { %s6715_s2 = sld [smem:[#allocation20_spill]]  ;;  %s6411_s12 = sadd.s32 4294967295, %s6329_s30   ;;  %s6329_s30 = sphi %s6393_s30, %s6727_s30   ;;  %s6325_s29 = sphi %s6391_s29, %s6726_s29   ;;  %s6321_s28 = sphi %s6389_s28, %s6725_s28   ;;  %s6317_s27 = sphi %s6387_s27, %s6724_s27  }
   0xc   : > { %p3873_p0 = scmp.ge.s32.totalorder %s6329_s30, 1  ;;  %p69_p1 = scmp.eq.s32.totalorder %s6411_s12, 0 }
   0xd   : > { %p231_p2 = scmp.lt.s32.totalorder %s6329_s30, 3  ;;  %s6331_s14 = smov [#allocation7]  }
   0xe   : > { %s254_s15 = sshll.u32 %s6331_s14, 4  ;;  %s278_s18 = sshll.u32 %s6708_s4, 4  ;;  %s255_s15 = int_to_ptr.vmem [resolvable:$true] %s254_s15  ;;  %s279_s18 = int_to_ptr.hbm [resolvable:$true] %s278_s18 }
   0xf   : > { %p6416_p3 = pnand %p3873_p0, %p231_p2  ;;  %s6332_s20 = smov [#allocation10]  }
  0x10   : > { %s280_s21 = sshll.u32 %s6332_s20, 4  ;;  %s6333_s22 = smov 512   ;;  %s281_s21 = int_to_ptr.vmem [resolvable:$true] %s280_s21 }
  0x11   : > { %s252_s11 = sshll.u32 %s6715_s2, 4  ;;  %p6001_p4 = pneg %p6416_p3  ;;  %s253_s11 = int_to_ptr.hbm [resolvable:$true] %s252_s11 }
  0x12   : > { %s6334_s23 = smov 32   ;;  %s6335_s24 = smov 256  }
  0x13   : > { %p6428_p6 = pnand %p6001_p4, %p69_p1  ;;  %s6336_s25 = smov 16  }
  0x14   : > { %s6718_s0 = sld [smem:[#allocation19_spill]]  ;;  %s267_s17 = sshll.u32 %s6707_s3, 4  ;;  %s268_s17 = int_to_ptr.hbm [resolvable:$true] %s267_s17 }
  0x15   : > { %6007 = dma.hbm_to_vmem [thread:$0]  (!%p6428_p6), %s253_s11, 16384, %s255_s15, [#allocation8], %s6333_s22, %s6333_s22, %s6334_s23  }
  0x16   : > { %6013 = dma.hbm_to_vmem [thread:$0]  (!%p6428_p6), %s279_s18, 32768, %s281_s21, [#allocation11], %s6335_s24, %s6335_s24, %s6336_s25  }
  0x17   : > { %s6337_s20 = smov [#allocation2]   ;;  %s6338_s11 = smov [#allocation9]  }
  0x18   : > { %s269_s15 = sshll.u32 %s6338_s11, 4  ;;  %s295_s22 = sshll.u32 %s6710_s6, 4  ;;  %s270_s15 = int_to_ptr.vmem [resolvable:$true] %s269_s15  ;;  %s296_s22 = int_to_ptr.hbm [resolvable:$true] %s295_s22 }
  0x19   : > { %6010 = dma.hbm_to_vmem [thread:$0]  (!%p6428_p6), %s268_s17, 128, %s270_s15, [#allocation8]  }
  0x1a   : > { %s243_s10 = sshll.u32 %s6718_s0, 4  ;;  %s6339_s23 = smov [#allocation12]   ;;  %s244_s10 = int_to_ptr.hbm [resolvable:$true] %s243_s10 }
  0x1b   : > { %6004 = dma.hbm_to_smem (!%p6428_p6), %s244_s10, 16, %s6337_s20, [#allocation5]  }
  0x1c   : > { %s297_s24 = sshll.u32 %s6339_s23, 4  ;;  %s6340_s25 = smov 64   ;;  %s298_s24 = int_to_ptr.vmem [resolvable:$true] %s297_s24 }
  0x1d   : > { %s6341_s26 = smov 4   ;;  %s3872_s9 = sadd.s32 4294967294, %s6329_s30  }
  0x1e   : > { %6016 = dma.hbm_to_vmem [thread:$0]  (!%p6428_p6), %s296_s22, 4096, %s298_s24, [#allocation11], %s6340_s25, %s6340_s25, %s6341_s26  }
  0x1f   : > { %s6453_s10 = sadd.s32 1, %s6329_s30   ;;  %s55_s14 = sadd.s32 1, %s6325_s29 }
  0x20   : > { %s52_s16 = ssub.s32 %s6329_s30, %s6453_s10  ;;  %p62_p7 = scmp.ne.s32.totalorder %s6325_s29, %s6321_s28 }
  0x21   : > { %p53_p8 = scmp.eq.s32.totalorder %s52_s16, 0  ;;  %p63_p9 = scmp.eq.s32.totalorder %s6329_s30, 0 }
  0x22   : > { %p68_p10 = scmp.ne.s32.totalorder %s6321_s28, %s6317_s27  ;;  %p218_p11 = scmp.eq.s32.totalorder %s6411_s12, 1 }
  0x23   : > { %s6465_s17 = scalar_select %p53_p8, %s6325_s29, %s55_s14  }
  0x24   : > { %p6469_p12 = por %p69_p1, %p68_p10  ;;  %p6473_p13 = por %p218_p11, %p62_p7 }
  0x25   : > { %p224_p0 = scmp.eq.s32.totalorder %s3872_s9, 1  ;;  %p64_p2 = por %p63_p9, %p62_p7 }
  0x26   : > { %s314_s11 = sand.u32 1, %s6325_s29   ;;  %p6030_p6 = scmp.lt.s32.totalorder %s6329_s30, 2 }
  0x27   : > { %p6478_p4 = por %p224_p0, %p68_p10  ;;  %s3880_s18 = sshll.u32 %s314_s11, 3 }
  0x28   : > { %s5560_s21 = sshll.u32 %s6329_s30, 3  ;;  %s318_s26 = scalar_lea.vmem [#allocation6], %s3880_s18 }
  0x29   : > { %s323_s24 = scalar_lea.hbm %s6705_s1, %s5560_s21  ;;  %s327_s14 = sshll.u32 %s318_s26, 4  ;;  %s328_s14 = int_to_ptr.vmem [resolvable:$true] %s327_s14 }
  0x2a   : > { %s325_s25 = sshll.u32 %s323_s24, 4  ;;  %p6487_p8 = pnand %p6030_p6, %p64_p2  ;;  %s326_s25 = int_to_ptr.hbm [resolvable:$true] %s325_s25 }
  0x2b   : > { %s315_s16 = scalar_lea.sflag [#allocation3], %s314_s11  ;;  %s6221_s0 = sshra.s32 %s326_s25, 4  ;;  %s6222_s0 = int_to_ptr.hbm [resolvable:$true] %s6221_s0 }
  0x2c   : > { %s6223_s2 = scalar_lea.hbm %s6222_s0, 8  ;;  %p6225_p9 = pneg %p6487_p8 }
  0x2d   : > { %p6224_p7 = scmp.ne.s32.totalorder %s6222_s0, %s6223_s2  ;;  %s6228_s18 = scalar_lea.hbm %s6705_s1, 16 }
  0x2e   : > { %p6229_p0 = scmp.lt.s32.totalorder %s6222_s0, %s6705_s1  ;;  %p6230_p2 = scmp.lt.s32.totalorder %s6228_s18, %s6223_s2 }
  0x2f   : > { %p6226_p10 = pnand %p6225_p9, %p6224_p7 }
  0x30   : > { %p6231_p6 = por %p6230_p2, %p6229_p0 }
  0x31   : > { %p6227_p11 = pneg %p6226_p10 }
  0x33   : > { %p6232_p5 = pnand %p6231_p6, %p6227_p11 }
  0x35   : > { %6235 = shalt.err (!%p6232_p5)
}
  0x36   : > { %6020 = dma.hbm_to_vmem [thread:$0]  (!%p6487_p8), %s326_s25, 128, %s328_s14, %s315_s16  }
  0x37   : > { %336 = sbr.rel (%p6416_p3) target bundleno = 799 (0x31f), region = 52 }
  0x3c   : > { %6296 = dma.done.wait (%p69_p1), [#allocation5], 16  }
  0x3d   : > { %6298 = vsyncadd (%p69_p1), [#allocation5], 4294967280  ;;  %s6508_s11 = sand.u32 1, %s6321_s28  }
  0x3e   : > { %s3885_s0 = sshll.u32 %s6508_s11, 3  ;;  %s344_s2 = scalar_lea.sflag [#allocation3], %s6508_s11 }
  0x3f   : > { %s6514_s25 = scalar_lea.vmem [#allocation6], %s3885_s0 }
  0x40   : > { %6300 = dma.done.wait (%p6469_p12), %s344_s2, 128  }
  0x41   : > { %6302 = vsyncadd (%p6469_p12), %s344_s2, 4294967168 }
  0x42   : > { %6304 = dma.done.wait (%p69_p1), [#allocation8], 16512  }
  0x43   : > { %6306 = vsyncadd (%p69_p1), [#allocation8], 4294950784 }
  0x44   : > { %6308 = dma.done.wait (%p69_p1), [#allocation11], 36864  }
  0x45   : > { %6310 = vsyncadd (%p69_p1), [#allocation11], 4294930432 }
  0x46   : > { %373 = sfence }
  0x47   : > { %v4118_v0 = vld [vmem:[#allocation7 + $0x1c0] sm:$0xf]  ;;  %v5617_v5 = vld [vmem:[#allocation7 + $0x1c4] sm:$0xf]  ;;  %s6551_s13 = sld [smem:[#allocation2]]  ;;  %s5557_s18 = sshll.u32 %s6411_s12, 3 }
  0x48   : > { %v5621_v1 = vld [vmem:[#allocation7 + $0x1dc] sm:$0xf0]  ;;  %v4120_v6 = vld [vmem:[#allocation7 + $0x1e0] sm:$0xf0]  ;;  %s6642_s14 = sld [smem:[#allocation2 + $0x1]]  ;;  %s3747_s2 = scalar_lea.hbm %s6712_s8, %s5557_s18 }
  0x49   : > { %v4374_v2 = vld [vmem:[#allocation7 + $0x3c0] sm:$0xf]  ;;  %v4119_v3 = vor.u32 %v5621_v1, %v4118_v0  ;;  %v4123_v8 = vor.u32 %v5617_v5, %v4120_v6  ;;  %v5681_v9 = vld [vmem:[#allocation7 + $0x3c4] sm:$0xf]  ;;  %s3751_s19 = sshll.u32 %s3747_s2, 4  ;;  %s3737_s26 = scalar_lea.sflag [#allocation4], %s6508_s11  ;;  %s3752_s19 = int_to_ptr.hbm [resolvable:$true] %s3751_s19 }
  0x4a   : > { %v5685_v4 = vld [vmem:[#allocation7 + $0x3dc] sm:$0xf0]  ;;  %v4376_v10 = vld [vmem:[#allocation7 + $0x3e0] sm:$0xf0]  ;;  %s6271_s21 = scalar_lea.hbm %s6712_s8, 16 }
  0x4b   : > { %v4375_v7 = vor.u32 %v5685_v4, %v4374_v2  ;;  %v4086_v11 = vld [vmem:[#allocation7 + $0x180] sm:$0xf]  ;;  %1198 = vmatpush.bf16.msra.mxu0 %v4119_v3  ;;  %v4379_v12 = vor.u32 %v5681_v9, %v4376_v10  ;;  %1224 = vmatpush.bf16.msra.mxu2 %v4123_v8  ;;  %v5609_v18 = vld [vmem:[#allocation7 + $0x184] sm:$0xf] }
  0x4c   : > { %v5613_v13 = vld [vmem:[#allocation7 + $0x19c] sm:$0xf0]  ;;  %v4088_v19 = vld [vmem:[#allocation7 + $0x1a0] sm:$0xf0] }
  0x4d   : > { %v4342_v14 = vld [vmem:[#allocation7 + $0x380] sm:$0xf]  ;;  %1211 = vmatpush.bf16.msra.mxu1 %v4375_v7  ;;  %v4087_v16 = vor.u32 %v5613_v13, %v4086_v11  ;;  %v5673_v20 = vld [vmem:[#allocation7 + $0x384] sm:$0xf]  ;;  %1237 = vmatpush.bf16.msra.mxu3 %v4379_v12  ;;  %v4091_v21 = vor.u32 %v5609_v18, %v4088_v19 }
  0x4e   : > { %v5677_v15 = vld [vmem:[#allocation7 + $0x39c] sm:$0xf0]  ;;  %v4344_v22 = vld [vmem:[#allocation7 + $0x3a0] sm:$0xf0] }
  0x4f   : > { %v4343_v17 = vor.u32 %v5677_v15, %v4342_v14  ;;  %v4054_v23 = vld [vmem:[#allocation7 + $0x140] sm:$0xf]  ;;  %v4347_v25 = vor.u32 %v5673_v20, %v4344_v22  ;;  %v5601_v28 = vld [vmem:[#allocation7 + $0x144] sm:$0xf]  ;;  %1199 = vmatpush.bf16.msra.mxu0 %v4087_v16  ;;  %1225 = vmatpush.bf16.msra.mxu2 %v4091_v21 }
  0x50   : > { %v5605_v24 = vld [vmem:[#allocation7 + $0x15c] sm:$0xf0]  ;;  %v4056_v30 = vld [vmem:[#allocation7 + $0x160] sm:$0xf0] }
  0x51   : > { %v4310_v26 = vld [vmem:[#allocation7 + $0x340] sm:$0xf]  ;;  %v4055_v29 = vor.u32 %v5605_v24, %v4054_v23  ;;  %v5665_v31 = vld [vmem:[#allocation7 + $0x344] sm:$0xf]  ;;  %1212 = vmatpush.bf16.msra.mxu1 %v4343_v17  ;;  %v4059_v34 = vor.u32 %v5601_v28, %v4056_v30  ;;  %1238 = vmatpush.bf16.msra.mxu3 %v4347_v25  ;;  %v4126_v28 = vld [vmem:[#allocation7 + $0x1c8] sm:$0xf] }
  0x52   : > { %v5669_v27 = vld [vmem:[#allocation7 + $0x35c] sm:$0xf0]  ;;  %v4312_v32 = vld [vmem:[#allocation7 + $0x360] sm:$0xf0]  ;;  %v4382_v30 = vld [vmem:[#allocation7 + $0x3c8] sm:$0xf] }
  0x53   : > { %v4311_v33 = vor.u32 %v5669_v27, %v4310_v26  ;;  %v4022_v35 = vld [vmem:[#allocation7 + $0x100] sm:$0xf]  ;;  %v4315_v38 = vor.u32 %v5665_v31, %v4312_v32  ;;  %v5593_v40 = vld [vmem:[#allocation7 + $0x104] sm:$0xf]  ;;  %1200 = vmatpush.bf16.msra.mxu0 %v4055_v29  ;;  %1226 = vmatpush.bf16.msra.mxu2 %v4059_v34  ;;  %v5622_v29 = vld [vmem:[#allocation7 + $0x1e4] sm:$0xf0] }
  0x54   : > { %v5597_v36 = vld [vmem:[#allocation7 + $0x11c] sm:$0xf0]  ;;  %v4024_v41 = vld [vmem:[#allocation7 + $0x120] sm:$0xf0]  ;;  %v5686_v32 = vld [vmem:[#allocation7 + $0x3e4] sm:$0xf0] }
  0x55   : > { %v4278_v37 = vld [vmem:[#allocation7 + $0x300] sm:$0xf]  ;;  %v5657_v42 = vld [vmem:[#allocation7 + $0x304] sm:$0xf]  ;;  %v4023_v44 = vor.u32 %v5597_v36, %v4022_v35  ;;  %1213 = vmatpush.bf16.msra.mxu1 %v4311_v33  ;;  %v4027_v46 = vor.u32 %v5593_v40, %v4024_v41  ;;  %1239 = vmatpush.bf16.msra.mxu3 %v4315_v38  ;;  %v5618_v33 = vld [vmem:[#allocation7 + $0x1cc] sm:$0xf]  ;;  %v4127_v40 = vor.u32 %v5622_v29, %v4126_v28 }
  0x56   : > { %v5661_v39 = vld [vmem:[#allocation7 + $0x31c] sm:$0xf0]  ;;  %v4280_v43 = vld [vmem:[#allocation7 + $0x320] sm:$0xf0]  ;;  %v4128_v34 = vld [vmem:[#allocation7 + $0x1e8] sm:$0xf0]  ;;  %v4383_v41 = vor.u32 %v5686_v32, %v4382_v30 }
  0x57   : > { %v4279_v45 = vor.u32 %v5661_v39, %v4278_v37  ;;  %v3990_v47 = vld [vmem:[#allocation7 + $0xc0] sm:$0xf]  ;;  %v4283_v50 = vor.u32 %v5657_v42, %v4280_v43  ;;  %v5585_v52 = vld [vmem:[#allocation7 + $0xc4] sm:$0xf]  ;;  %1201 = vmatpush.bf16.msra.mxu0 %v4023_v44  ;;  %1227 = vmatpush.bf16.msra.mxu2 %v4027_v46  ;;  %v5682_v37 = vld [vmem:[#allocation7 + $0x3cc] sm:$0xf]  ;;  %v4131_v42 = vor.u32 %v5618_v33, %v4128_v34 }
  0x58   : > { %v5589_v48 = vld [vmem:[#allocation7 + $0xdc] sm:$0xf0]  ;;  %v3992_v53 = vld [vmem:[#allocation7 + $0xe0] sm:$0xf0]  ;;  %v4384_v38 = vld [vmem:[#allocation7 + $0x3e8] sm:$0xf0] }
  0x59   : > { %v4246_v49 = vld [vmem:[#allocation7 + $0x2c0] sm:$0xf]  ;;  %v5649_v54 = vld [vmem:[#allocation7 + $0x2c4] sm:$0xf]  ;;  %v3991_v56 = vor.u32 %v5589_v48, %v3990_v47  ;;  %1214 = vmatpush.bf16.msra.mxu1 %v4279_v45  ;;  %v3995_v58 = vor.u32 %v5585_v52, %v3992_v53  ;;  %1240 = vmatpush.bf16.msra.mxu3 %v4283_v50  ;;  %v4094_v43 = vld [vmem:[#allocation7 + $0x188] sm:$0xf]  ;;  %v4387_v46 = vor.u32 %v5682_v37, %v4384_v38 }
  0x5a   : > { %v5653_v51 = vld [vmem:[#allocation7 + $0x2dc] sm:$0xf0]  ;;  %v4248_v55 = vld [vmem:[#allocation7 + $0x2e0] sm:$0xf0]  ;;  %v5614_v44 = vld [vmem:[#allocation7 + $0x1a4] sm:$0xf0] }
  0x5b   : > { %v4247_v57 = vor.u32 %v5653_v51, %v4246_v49  ;;  %v3958_v59 = vld [vmem:[#allocation7 + $0x80] sm:$0xf]  ;;  %v4251_v62 = vor.u32 %v5649_v54, %v4248_v55  ;;  %v5577_v0 = vld [vmem:[#allocation7 + $0x84] sm:$0xf]  ;;  %1202 = vmatpush.bf16.msra.mxu0 %v3991_v56  ;;  %1228 = vmatpush.bf16.msra.mxu2 %v3995_v58  ;;  %v4350_v45 = vld [vmem:[#allocation7 + $0x388] sm:$0xf]  ;;  %v4095_v53 = vor.u32 %v5614_v44, %v4094_v43 }
  0x5c   : > { %v5581_v60 = vld [vmem:[#allocation7 + $0x9c] sm:$0xf0]  ;;  %v3960_v1 = vld [vmem:[#allocation7 + $0xa0] sm:$0xf0]  ;;  %v5678_v47 = vld [vmem:[#allocation7 + $0x3a4] sm:$0xf0] }
  0x5d   : > { %v4214_v61 = vld [vmem:[#allocation7 + $0x280] sm:$0xf]  ;;  %v5641_v2 = vld [vmem:[#allocation7 + $0x284] sm:$0xf]  ;;  %v3959_v4 = vor.u32 %v5581_v60, %v3958_v59  ;;  %1215 = vmatpush.bf16.msra.mxu1 %v4247_v57  ;;  %v3963_v6 = vor.u32 %v5577_v0, %v3960_v1  ;;  %1241 = vmatpush.bf16.msra.mxu3 %v4251_v62  ;;  %v5610_v48 = vld [vmem:[#allocation7 + $0x18c] sm:$0xf]  ;;  %v4351_v56 = vor.u32 %v5678_v47, %v4350_v45 }
  0x5e   : > { %v5645_v63 = vld [vmem:[#allocation7 + $0x29c] sm:$0xf0]  ;;  %v4216_v3 = vld [vmem:[#allocation7 + $0x2a0] sm:$0xf0]  ;;  %v4096_v49 = vld [vmem:[#allocation7 + $0x1a8] sm:$0xf0] }
  0x5f   : > { %v4215_v5 = vor.u32 %v5645_v63, %v4214_v61  ;;  %v3926_v7 = vld [vmem:[#allocation7 + $0x40] sm:$0xf]  ;;  %v4219_v10 = vor.u32 %v5641_v2, %v4216_v3  ;;  %v5569_v12 = vld [vmem:[#allocation7 + $0x44] sm:$0xf]  ;;  %1203 = vmatpush.bf16.msra.mxu0 %v3959_v4  ;;  %1229 = vmatpush.bf16.msra.mxu2 %v3963_v6  ;;  %v5674_v50 = vld [vmem:[#allocation7 + $0x38c] sm:$0xf]  ;;  %v4099_v57 = vor.u32 %v5610_v48, %v4096_v49 }
  0x60   : > { %v5573_v8 = vld [vmem:[#allocation7 + $0x5c] sm:$0xf0]  ;;  %v3928_v13 = vld [vmem:[#allocation7 + $0x60] sm:$0xf0]  ;;  %v4352_v51 = vld [vmem:[#allocation7 + $0x3a8] sm:$0xf0] }
  0x61   : > { %v4182_v9 = vld [vmem:[#allocation7 + $0x240] sm:$0xf]  ;;  %v5633_v14 = vld [vmem:[#allocation7 + $0x244] sm:$0xf]  ;;  %v3927_v16 = vor.u32 %v5573_v8, %v3926_v7  ;;  %1216 = vmatpush.bf16.msra.mxu1 %v4215_v5  ;;  %v3931_v20 = vor.u32 %v5569_v12, %v3928_v13  ;;  %1242 = vmatpush.bf16.msra.mxu3 %v4219_v10  ;;  %v404_v52 = vld [vmem:[%s6514_s25] sm:$0xff]  ;;  %v4355_v61 = vor.u32 %v5674_v50, %v4352_v51  ;;  %s401_s25 = scalar_lea.vmem [#allocation13], %s3885_s0 }
  0x62   : > { %v5637_v11 = vld [vmem:[#allocation7 + $0x25c] sm:$0xf0]  ;;  %v4184_v15 = vld [vmem:[#allocation7 + $0x260] sm:$0xf0]  ;;  %v552_v54 = vunpack.c.l.b16 %v404_v52  ;;  %v553_v55 = vunpack.c.h.b16 %v404_v52  ;;  %v4062_v58 = vld [vmem:[#allocation7 + $0x148] sm:$0xf] }
  0x63   : > { %v3894_v17 = vld [vmem:[#allocation7] sm:$0xf]  ;;  %v4183_v19 = vor.u32 %v5637_v11, %v4182_v9  ;;  %v5561_v23 = vld [vmem:[#allocation7 + $0x4] sm:$0xf]  ;;  %v4187_v24 = vor.u32 %v5633_v14, %v4184_v15  ;;  %1204 = vmatpush.bf16.msra.mxu0 %v3927_v16  ;;  %1230 = vmatpush.bf16.msra.mxu2 %v3931_v20  ;;  %v5606_v59 = vld [vmem:[#allocation7 + $0x164] sm:$0xf0] }
  0x64   : > { %v5565_v18 = vld [vmem:[#allocation7 + $0x1c] sm:$0xf0]  ;;  %v3896_v25 = vld [vmem:[#allocation7 + $0x20] sm:$0xf0]  ;;  %v4318_v60 = vld [vmem:[#allocation7 + $0x348] sm:$0xf]  ;;  %v6529_v1 = vpack.c.b16 %v552_v54, %v552_v54  ;;  %v6531_v4 = vpack.c.b16 %v553_v55, %v553_v55  ;;  %v4063_v5 = vor.u32 %v5606_v59, %v4062_v58 }
  0x65   : > { %v4150_v21 = vld [vmem:[#allocation7 + $0x200] sm:$0xf]  ;;  %v5625_v26 = vld [vmem:[#allocation7 + $0x204] sm:$0xf]  ;;  %v3895_v31 = vor.u32 %v5565_v18, %v3894_v17  ;;  %1217 = vmatpush.bf16.msra.mxu1 %v4183_v19  ;;  %v3899_v36 = vor.u32 %v5561_v23, %v3896_v25  ;;  %1243 = vmatpush.bf16.msra.mxu3 %v4187_v24  ;;  %v5670_v62 = vld [vmem:[#allocation7 + $0x364] sm:$0xf0] }
  0x66   : > { %v5629_v22 = vld [vmem:[#allocation7 + $0x21c] sm:$0xf0]  ;;  %v4152_v27 = vld [vmem:[#allocation7 + $0x220] sm:$0xf0]  ;;  %v5602_v63 = vld [vmem:[#allocation7 + $0x14c] sm:$0xf]  ;;  %v4319_v6 = vor.u32 %v5670_v62, %v4318_v60 }
  0x67   : > { %v4151_v35 = vor.u32 %v5629_v22, %v4150_v21  ;;  %v4155_v39 = vor.u32 %v5625_v26, %v4152_v27  ;;  %1205 = vmatpush.bf16.msra.mxu0 %v3895_v31  ;;  %1231 = vmatpush.bf16.msra.mxu2 %v3899_v36  ;;  %v4064_v0 = vld [vmem:[#allocation7 + $0x168] sm:$0xf0]  ;;  %v4030_v8 = vld [vmem:[#allocation7 + $0x108] sm:$0xf] }
  0x68   : > { %v5666_v2 = vld [vmem:[#allocation7 + $0x34c] sm:$0xf]  ;;  %v4067_v7 = vor.u32 %v5602_v63, %v4064_v0  ;;  %v5598_v9 = vld [vmem:[#allocation7 + $0x124] sm:$0xf0] }
  0x69   : > { %1218 = vmatpush.bf16.msra.mxu1 %v4151_v35  ;;  %1244 = vmatpush.bf16.msra.mxu3 %v4155_v39  ;;  %v4320_v3 = vld [vmem:[#allocation7 + $0x368] sm:$0xf0]  ;;  %v4286_v10 = vld [vmem:[#allocation7 + $0x308] sm:$0xf]  ;;  %v4031_v17 = vor.u32 %v5598_v9, %v4030_v8  ;;  %v5619_v8 = vld [vmem:[#allocation7 + $0x1d4] sm:$0xf] }
  0x6a   : > { %1232 = vmatmul.bf16.vlgmr.msra.gmra.mxu2 %v6529_v1  ;;  %v4323_v11 = vor.u32 %v5666_v2, %v4320_v3  ;;  %v5662_v12 = vld [vmem:[#allocation7 + $0x324] sm:$0xf0]  ;;  %v5594_v13 = vld [vmem:[#allocation7 + $0x10c] sm:$0xf]  ;;  %1206 = vmatmul.bf16.vlgmr.msra.gmra.mxu0 %v6529_v1  ;;  %v4134_v2 = vld [vmem:[#allocation7 + $0x1d0] sm:$0xf] }
  0x6b   : > { %1250 = vmatpush.bf16.msrb.mxu0 %v4127_v40  ;;  %1276 = vmatpush.bf16.msrb.mxu2 %v4131_v42  ;;  %v4032_v14 = vld [vmem:[#allocation7 + $0x128] sm:$0xf0]  ;;  %v4287_v18 = vor.u32 %v5662_v12, %v4286_v10  ;;  %v3998_v20 = vld [vmem:[#allocation7 + $0xc8] sm:$0xf]  ;;  %v5623_v3 = vld [vmem:[#allocation7 + $0x1ec] sm:$0xf0] }
  0x6c   : > { %v5658_v15 = vld [vmem:[#allocation7 + $0x30c] sm:$0xf]  ;;  %1219 = vmatmul.bf16.vlgmr.msra.gmra.mxu1 %v6531_v4  ;;  %1245 = vmatmul.bf16.vlgmr.msra.gmra.mxu3 %v6531_v4  ;;  %v4035_v19 = vor.u32 %v5594_v13, %v4032_v14  ;;  %v5590_v21 = vld [vmem:[#allocation7 + $0xe4] sm:$0xf0]  ;;  %v4136_v9 = vld [vmem:[#allocation7 + $0x1f0] sm:$0xf0] }
  0x6d   : > { %1263 = vmatpush.bf16.msrb.mxu1 %v4383_v41  ;;  %1289 = vmatpush.bf16.msrb.mxu3 %v4387_v46  ;;  %v4288_v16 = vld [vmem:[#allocation7 + $0x328] sm:$0xf0]  ;;  %v4254_v22 = vld [vmem:[#allocation7 + $0x2c8] sm:$0xf]  ;;  %v3999_v29 = vor.u32 %v5590_v21, %v3998_v20  ;;  %v5683_v12 = vld [vmem:[#allocation7 + $0x3d4] sm:$0xf] }
  0x6e   : > { %v4291_v23 = vor.u32 %v5658_v15, %v4288_v16  ;;  %v5654_v24 = vld [vmem:[#allocation7 + $0x2e4] sm:$0xf0]  ;;  %v5586_v25 = vld [vmem:[#allocation7 + $0xcc] sm:$0xf]  ;;  %v4392_v13 = vld [vmem:[#allocation7 + $0x3f0] sm:$0xf0]  ;;  %v4135_v15 = vor.u32 %v5623_v3, %v4134_v2 }
  0x6f   : > { %1251 = vmatpush.bf16.msrb.mxu0 %v4095_v53  ;;  %1277 = vmatpush.bf16.msrb.mxu2 %v4099_v57  ;;  %v4000_v26 = vld [vmem:[#allocation7 + $0xe8] sm:$0xf0]  ;;  %v4255_v30 = vor.u32 %v5654_v24, %v4254_v22  ;;  %v3966_v32 = vld [vmem:[#allocation7 + $0x88] sm:$0xf]  ;;  %v4358_v20 = vld [vmem:[#allocation7 + $0x390] sm:$0xf]  ;;  %v4395_v21 = vor.u32 %v5683_v12, %v4392_v13 }
  0x70   : > { %v5650_v27 = vld [vmem:[#allocation7 + $0x2cc] sm:$0xf]  ;;  %v4003_v31 = vor.u32 %v5586_v25, %v4000_v26  ;;  %v5582_v33 = vld [vmem:[#allocation7 + $0xa4] sm:$0xf0]  ;;  %v5679_v22 = vld [vmem:[#allocation7 + $0x3ac] sm:$0xf0] }
  0x71   : > { %1264 = vmatpush.bf16.msrb.mxu1 %v4351_v56  ;;  %1290 = vmatpush.bf16.msrb.mxu3 %v4355_v61  ;;  %v4256_v28 = vld [vmem:[#allocation7 + $0x2e8] sm:$0xf0]  ;;  %v4222_v34 = vld [vmem:[#allocation7 + $0x288] sm:$0xf]  ;;  %v3967_v41 = vor.u32 %v5582_v33, %v3966_v32  ;;  %v4104_v24 = vld [vmem:[#allocation7 + $0x1b0] sm:$0xf0] }
  0x72   : > { %v4259_v35 = vor.u32 %v5650_v27, %v4256_v28  ;;  %v5646_v36 = vld [vmem:[#allocation7 + $0x2a4] sm:$0xf0]  ;;  %v5578_v37 = vld [vmem:[#allocation7 + $0x8c] sm:$0xf]  ;;  %v5675_v25 = vld [vmem:[#allocation7 + $0x394] sm:$0xf]  ;;  %v4359_v28 = vor.u32 %v5679_v22, %v4358_v20 }
  0x73   : > { %1252 = vmatpush.bf16.msrb.mxu0 %v4063_v5  ;;  %1278 = vmatpush.bf16.msrb.mxu2 %v4067_v7  ;;  %v3968_v38 = vld [vmem:[#allocation7 + $0xa8] sm:$0xf0]  ;;  %v4223_v42 = vor.u32 %v5646_v36, %v4222_v34  ;;  %v3934_v44 = vld [vmem:[#allocation7 + $0x48] sm:$0xf]  ;;  %v4390_v5 = vld [vmem:[#allocation7 + $0x3d0] sm:$0xf] }
  0x74   : > { %v5642_v39 = vld [vmem:[#allocation7 + $0x28c] sm:$0xf]  ;;  %v3971_v43 = vor.u32 %v5578_v37, %v3968_v38  ;;  %v5574_v45 = vld [vmem:[#allocation7 + $0x64] sm:$0xf0]  ;;  %v5687_v7 = vld [vmem:[#allocation7 + $0x3ec] sm:$0xf0] }
  0x75   : > { %1265 = vmatpush.bf16.msrb.mxu1 %v4319_v6  ;;  %1291 = vmatpush.bf16.msrb.mxu3 %v4323_v11  ;;  %v4224_v40 = vld [vmem:[#allocation7 + $0x2a8] sm:$0xf0]  ;;  %v4190_v46 = vld [vmem:[#allocation7 + $0x248] sm:$0xf]  ;;  %v3935_v53 = vor.u32 %v5574_v45, %v3934_v44  ;;  %v4391_v16 = vor.u32 %v5687_v7, %v4390_v5  ;;  %v4360_v26 = vld [vmem:[#allocation7 + $0x3b0] sm:$0xf0] }
  0x76   : > { %v4227_v47 = vor.u32 %v5642_v39, %v4224_v40  ;;  %v5638_v48 = vld [vmem:[#allocation7 + $0x264] sm:$0xf0]  ;;  %v5570_v49 = vld [vmem:[#allocation7 + $0x4c] sm:$0xf]  ;;  %v4326_v32 = vld [vmem:[#allocation7 + $0x350] sm:$0xf]  ;;  %v4363_v33 = vor.u32 %v5675_v25, %v4360_v26 }
  0x77   : > { %1253 = vmatpush.bf16.msrb.mxu0 %v4031_v17  ;;  %1279 = vmatpush.bf16.msrb.mxu2 %v4035_v19  ;;  %v3936_v50 = vld [vmem:[#allocation7 + $0x68] sm:$0xf0]  ;;  %v3902_v54 = vld [vmem:[#allocation7 + $0x8] sm:$0xf]  ;;  %v4191_v56 = vor.u32 %v5638_v48, %v4190_v46  ;;  %v4139_v17 = vor.u32 %v5619_v8, %v4136_v9  ;;  %v5615_v19 = vld [vmem:[#allocation7 + $0x1ac] sm:$0xf0] }
  0x78   : > { %v5634_v51 = vld [vmem:[#allocation7 + $0x24c] sm:$0xf]  ;;  %v5566_v55 = vld [vmem:[#allocation7 + $0x24] sm:$0xf0]  ;;  %v3939_v57 = vor.u32 %v5570_v49, %v3936_v50  ;;  %v5671_v34 = vld [vmem:[#allocation7 + $0x36c] sm:$0xf0] }
  0x79   : > { %1266 = vmatpush.bf16.msrb.mxu1 %v4287_v18  ;;  %1292 = vmatpush.bf16.msrb.mxu3 %v4291_v23  ;;  %v4192_v52 = vld [vmem:[#allocation7 + $0x268] sm:$0xf0]  ;;  %v4158_v58 = vld [vmem:[#allocation7 + $0x208] sm:$0xf]  ;;  %v3903_v6 = vor.u32 %v5566_v55, %v3902_v54  ;;  %v4102_v18 = vld [vmem:[#allocation7 + $0x190] sm:$0xf]  ;;  %v4327_v40 = vor.u32 %v5671_v34, %v4326_v32 }
  0x7a   : > { %v5630_v59 = vld [vmem:[#allocation7 + $0x224] sm:$0xf0]  ;;  %v5562_v60 = vld [vmem:[#allocation7 + $0xc] sm:$0xf]  ;;  %v4195_v61 = vor.u32 %v5634_v51, %v4192_v52  ;;  %v5611_v23 = vld [vmem:[#allocation7 + $0x194] sm:$0xf]  ;;  %v4103_v27 = vor.u32 %v5615_v19, %v4102_v18 }
  0x7b   : > { %1254 = vmatpush.bf16.msrb.mxu0 %v3999_v29  ;;  %1280 = vmatpush.bf16.msrb.mxu2 %v4003_v31  ;;  %v3904_v62 = vld [vmem:[#allocation7 + $0x28] sm:$0xf0]  ;;  %v4159_v10 = vor.u32 %v5630_v59, %v4158_v58  ;;  %v4107_v29 = vor.u32 %v5611_v23, %v4104_v24  ;;  %v5607_v31 = vld [vmem:[#allocation7 + $0x16c] sm:$0xf0]  ;;  %v4072_v36 = vld [vmem:[#allocation7 + $0x170] sm:$0xf0] }
  0x7c   : > { %v5626_v63 = vld [vmem:[#allocation7 + $0x20c] sm:$0xf]  ;;  %v3907_v11 = vor.u32 %v5562_v60, %v3904_v62  ;;  %v5667_v37 = vld [vmem:[#allocation7 + $0x354] sm:$0xf]  ;;  %v4294_v44 = vld [vmem:[#allocation7 + $0x310] sm:$0xf] }
  0x7d   : > { %1267 = vmatpush.bf16.msrb.mxu1 %v4255_v30  ;;  %1293 = vmatpush.bf16.msrb.mxu3 %v4259_v35  ;;  %v4160_v0 = vld [vmem:[#allocation7 + $0x228] sm:$0xf0]  ;;  %v4070_v30 = vld [vmem:[#allocation7 + $0x150] sm:$0xf]  ;;  %v5603_v35 = vld [vmem:[#allocation7 + $0x154] sm:$0xf] }
  0x7e   : > { %v4163_v14 = vor.u32 %v5626_v63, %v4160_v0  ;;  %v4328_v38 = vld [vmem:[#allocation7 + $0x370] sm:$0xf0]  ;;  %v4071_v39 = vor.u32 %v5607_v31, %v4070_v30  ;;  %v5663_v46 = vld [vmem:[#allocation7 + $0x32c] sm:$0xf0] }
  0x7f   : > { %1255 = vmatpush.bf16.msrb.mxu0 %v3967_v41  ;;  %1281 = vmatpush.bf16.msrb.mxu2 %v3971_v43  ;;  %v4075_v41 = vor.u32 %v5603_v35, %v4072_v36  ;;  %v5599_v43 = vld [vmem:[#allocation7 + $0x12c] sm:$0xf0]  ;;  %v4331_v45 = vor.u32 %v5667_v37, %v4328_v38  ;;  %v4040_v48 = vld [vmem:[#allocation7 + $0x130] sm:$0xf0]  ;;  %v4295_v52 = vor.u32 %v5663_v46, %v4294_v44  ;;  %v4142_v37 = vld [vmem:[#allocation7 + $0x1d8] sm:$0xf] }
  0x80   : > { %v5659_v49 = vld [vmem:[#allocation7 + $0x314] sm:$0xf]  ;;  %v4006_v54 = vld [vmem:[#allocation7 + $0xd0] sm:$0xf]  ;;  %v5624_v38 = vld [vmem:[#allocation7 + $0x1f4] sm:$0xf0] }
  0x81   : > { %1268 = vmatpush.bf16.msrb.mxu1 %v4223_v42  ;;  %1294 = vmatpush.bf16.msrb.mxu3 %v4227_v47  ;;  %v4038_v42 = vld [vmem:[#allocation7 + $0x110] sm:$0xf]  ;;  %v5595_v47 = vld [vmem:[#allocation7 + $0x114] sm:$0xf]  ;;  %v5684_v46 = vld [vmem:[#allocation7 + $0x3dc] sm:$0xf] }
  0x82   : > { %v4296_v50 = vld [vmem:[#allocation7 + $0x330] sm:$0xf0]  ;;  %v4039_v51 = vor.u32 %v5599_v43, %v4038_v42  ;;  %v5591_v55 = vld [vmem:[#allocation7 + $0xec] sm:$0xf0]  ;;  %v5620_v42 = vld [vmem:[#allocation7 + $0x1dc] sm:$0xf] }
  0x83   : > { %1256 = vmatpush.bf16.msrb.mxu0 %v3935_v53  ;;  %1282 = vmatpush.bf16.msrb.mxu2 %v3939_v57  ;;  %v4043_v53 = vor.u32 %v5595_v47, %v4040_v48  ;;  %v4299_v57 = vor.u32 %v5659_v49, %v4296_v50  ;;  %v5655_v58 = vld [vmem:[#allocation7 + $0x2ec] sm:$0xf0]  ;;  %v5587_v59 = vld [vmem:[#allocation7 + $0xd4] sm:$0xf]  ;;  %v4007_v63 = vor.u32 %v5591_v55, %v4006_v54  ;;  %v4144_v43 = vld [vmem:[#allocation7 + $0x1f8] sm:$0xf0] }
  0x84   : > { %v4008_v60 = vld [vmem:[#allocation7 + $0xf0] sm:$0xf0]  ;;  %v3974_v3 = vld [vmem:[#allocation7 + $0x90] sm:$0xf]  ;;  %v4400_v47 = vld [vmem:[#allocation7 + $0x3f8] sm:$0xf0]  ;;  %v4143_v49 = vor.u32 %v5624_v38, %v4142_v37 }
  0x85   : > { %1269 = vmatpush.bf16.msrb.mxu1 %v4191_v56  ;;  %1295 = vmatpush.bf16.msrb.mxu3 %v4195_v61  ;;  %v4262_v56 = vld [vmem:[#allocation7 + $0x2d0] sm:$0xf]  ;;  %v5651_v61 = vld [vmem:[#allocation7 + $0x2d4] sm:$0xf]  ;;  %v4011_v2 = vor.u32 %v5587_v59, %v4008_v60  ;;  %v4366_v54 = vld [vmem:[#allocation7 + $0x398] sm:$0xf]  ;;  %v4403_v55 = vor.u32 %v5684_v46, %v4400_v47 }
  0x86   : > { %v4264_v62 = vld [vmem:[#allocation7 + $0x2f0] sm:$0xf0]  ;;  %v4263_v0 = vor.u32 %v5655_v58, %v4262_v56  ;;  %v5583_v5 = vld [vmem:[#allocation7 + $0xac] sm:$0xf0]  ;;  %v5680_v56 = vld [vmem:[#allocation7 + $0x3b4] sm:$0xf0] }
  0x87   : > { %1257 = vmatpush.bf16.msrb.mxu0 %v3903_v6  ;;  %1283 = vmatpush.bf16.msrb.mxu2 %v3907_v11  ;;  %v4230_v6 = vld [vmem:[#allocation7 + $0x290] sm:$0xf]  ;;  %v4267_v7 = vor.u32 %v5651_v61, %v4264_v62  ;;  %v5579_v9 = vld [vmem:[#allocation7 + $0x94] sm:$0xf]  ;;  %v3975_v13 = vor.u32 %v5583_v5, %v3974_v3  ;;  %v4112_v58 = vld [vmem:[#allocation7 + $0x1b8] sm:$0xf0]  ;;  %v4367_v62 = vor.u32 %v5680_v56, %v4366_v54 }
  0x88   : > { %v5647_v8 = vld [vmem:[#allocation7 + $0x2ac] sm:$0xf0]  ;;  %v5643_v11 = vld [vmem:[#allocation7 + $0x294] sm:$0xf]  ;;  %v5676_v59 = vld [vmem:[#allocation7 + $0x39c] sm:$0xf] }
  0x89   : > { %1270 = vmatpush.bf16.msrb.mxu1 %v4159_v10  ;;  %1296 = vmatpush.bf16.msrb.mxu3 %v4163_v14  ;;  %v3976_v10 = vld [vmem:[#allocation7 + $0xb0] sm:$0xf0]  ;;  %v4231_v14 = vor.u32 %v5647_v8, %v4230_v6  ;;  %v4198_v18 = vld [vmem:[#allocation7 + $0x250] sm:$0xf]  ;;  %v4368_v60 = vld [vmem:[#allocation7 + $0x3b8] sm:$0xf0] }
  0x8a   : > { %1258 = vmatmul.bf16.vlgmr.msrb.gmra.mxu0 %v6529_v1  ;;  %1284 = vmatmul.bf16.vlgmr.msrb.gmra.mxu2 %v6529_v1  ;;  %v4232_v12 = vld [vmem:[#allocation7 + $0x2b0] sm:$0xf0]  ;;  %v5639_v20 = vld [vmem:[#allocation7 + $0x26c] sm:$0xf0]  ;;  %v4334_v3 = vld [vmem:[#allocation7 + $0x358] sm:$0xf]  ;;  %v4371_v5 = vor.u32 %v5676_v59, %v4368_v60 }
  0x8b   : > { %1302 = vmatpush.bf16.msra.mxu0 %v4135_v15  ;;  %1328 = vmatpush.bf16.msra.mxu2 %v4139_v17  ;;  %v3979_v15 = vor.u32 %v5579_v9, %v3976_v10  ;;  %v5575_v17 = vld [vmem:[#allocation7 + $0x6c] sm:$0xf0]  ;;  %v4235_v19 = vor.u32 %v5643_v11, %v4232_v12  ;;  %v3944_v22 = vld [vmem:[#allocation7 + $0x70] sm:$0xf0]  ;;  %v5672_v6 = vld [vmem:[#allocation7 + $0x374] sm:$0xf0] }
  0x8c   : > { %1271 = vmatmul.bf16.vlgmr.msrb.gmra.mxu1 %v6531_v4  ;;  %1297 = vmatmul.bf16.vlgmr.msrb.gmra.mxu3 %v6531_v4  ;;  %v5635_v23 = vld [vmem:[#allocation7 + $0x254] sm:$0xf]  ;;  %v3910_v26 = vld [vmem:[#allocation7 + $0x10] sm:$0xf]  ;;  %v4080_v8 = vld [vmem:[#allocation7 + $0x178] sm:$0xf0]  ;;  %v4335_v12 = vor.u32 %v5672_v6, %v4334_v3 }
  0x8d   : > { %1315 = vmatpush.bf16.msra.mxu1 %v4391_v16  ;;  %1341 = vmatpush.bf16.msra.mxu3 %v4395_v21  ;;  %v3942_v16 = vld [vmem:[#allocation7 + $0x50] sm:$0xf]  ;;  %v5571_v21 = vld [vmem:[#allocation7 + $0x54] sm:$0xf]  ;;  %v5668_v9 = vld [vmem:[#allocation7 + $0x35c] sm:$0xf] }
  0x8e   : > { %v4200_v24 = vld [vmem:[#allocation7 + $0x270] sm:$0xf0]  ;;  %v3943_v25 = vor.u32 %v5575_v17, %v3942_v16  ;;  %v4166_v30 = vld [vmem:[#allocation7 + $0x210] sm:$0xf]  ;;  %v4336_v10 = vld [vmem:[#allocation7 + $0x378] sm:$0xf0] }
  0x8f   : > { %1303 = vmatpush.bf16.msra.mxu0 %v4103_v27  ;;  %1329 = vmatpush.bf16.msra.mxu2 %v4107_v29  ;;  %v5567_v27 = vld [vmem:[#allocation7 + $0x2c] sm:$0xf0]  ;;  %v3947_v29 = vor.u32 %v5571_v21, %v3944_v22  ;;  %v5563_v32 = vld [vmem:[#allocation7 + $0x14] sm:$0xf]  ;;  %v4302_v16 = vld [vmem:[#allocation7 + $0x318] sm:$0xf]  ;;  %v4339_v17 = vor.u32 %v5668_v9, %v4336_v10 }
  0x90   : > { %v5631_v31 = vld [vmem:[#allocation7 + $0x22c] sm:$0xf0]  ;;  %v3912_v34 = vld [vmem:[#allocation7 + $0x30] sm:$0xf0]  ;;  %v5660_v21 = vld [vmem:[#allocation7 + $0x31c] sm:$0xf] }
  0x91   : > { %1316 = vmatpush.bf16.msra.mxu1 %v4359_v28  ;;  %1342 = vmatpush.bf16.msra.mxu3 %v4363_v33  ;;  %v4199_v28 = vor.u32 %v5639_v20, %v4198_v18  ;;  %v4203_v33 = vor.u32 %v5635_v23, %v4200_v24  ;;  %v5627_v35 = vld [vmem:[#allocation7 + $0x214] sm:$0xf]  ;;  %v4167_v44 = vor.u32 %v5631_v31, %v4166_v30  ;;  %v5664_v18 = vld [vmem:[#allocation7 + $0x334] sm:$0xf0]  ;;  %v4048_v20 = vld [vmem:[#allocation7 + $0x138] sm:$0xf0] }
  0x92   : > { %v4168_v36 = vld [vmem:[#allocation7 + $0x230] sm:$0xf0]  ;;  %v4304_v22 = vld [vmem:[#allocation7 + $0x338] sm:$0xf0]  ;;  %v4303_v24 = vor.u32 %v5664_v18, %v4302_v16  ;;  %v5656_v30 = vld [vmem:[#allocation7 + $0x2f4] sm:$0xf0] }
  0x93   : > { %1304 = vmatpush.bf16.msra.mxu0 %v4071_v39  ;;  %1330 = vmatpush.bf16.msra.mxu2 %v4075_v41  ;;  %v4398_v39 = vld [vmem:[#allocation7 + $0x3d8] sm:$0xf]  ;;  %v4171_v48 = vor.u32 %v5627_v35, %v4168_v36  ;;  %v5588_v31 = vld [vmem:[#allocation7 + $0xdc] sm:$0xf]  ;;  %v4518_v9 = vld [vmem:[#allocation10 + $0xe0] sm:$0xf] }
  0x94   : > { %v5688_v41 = vld [vmem:[#allocation7 + $0x3f4] sm:$0xf0]  ;;  %v4240_v46 = vld [vmem:[#allocation7 + $0x2b8] sm:$0xf0]  ;;  %v4774_v18 = vld [vmem:[#allocation10 + $0x2e0] sm:$0xf] }
  0x95   : > { %1317 = vmatpush.bf16.msra.mxu1 %v4327_v40  ;;  %1343 = vmatpush.bf16.msra.mxu3 %v4331_v45  ;;  %v3911_v40 = vor.u32 %v5567_v27, %v3910_v26  ;;  %v3915_v45 = vor.u32 %v5563_v32, %v3912_v34  ;;  %v4399_v50 = vor.u32 %v5688_v41, %v4398_v39  ;;  %v4014_v26 = vld [vmem:[#allocation7 + $0xd8] sm:$0xf]  ;;  %v4016_v32 = vld [vmem:[#allocation7 + $0xf8] sm:$0xf0] }
  0x96   : > { %v5592_v27 = vld [vmem:[#allocation7 + $0xf4] sm:$0xf0]  ;;  %v4272_v34 = vld [vmem:[#allocation7 + $0x2f8] sm:$0xf0]  ;;  %v4019_v37 = vor.u32 %v5588_v31, %v4016_v32  ;;  %v4614_v32 = vld [vmem:[#allocation10 + $0x1a0] sm:$0xf] }
  0x97   : > { %1305 = vmatpush.bf16.msra.mxu0 %v4039_v51  ;;  %1331 = vmatpush.bf16.msra.mxu2 %v4043_v53  ;;  %v4147_v51 = vor.u32 %v5620_v42, %v4144_v43  ;;  %v5616_v53 = vld [vmem:[#allocation7 + $0x1b4] sm:$0xf0]  ;;  %v4015_v35 = vor.u32 %v5592_v27, %v4014_v26  ;;  %v5580_v43 = vld [vmem:[#allocation7 + $0x9c] sm:$0xf]  ;;  %v4758_v27 = vld [vmem:[#allocation10 + $0x2c0] sm:$0xf] }
  0x98   : > { %v3982_v38 = vld [vmem:[#allocation7 + $0x98] sm:$0xf]  ;;  %v3952_v56 = vld [vmem:[#allocation7 + $0x78] sm:$0xf0] }
  0x99   : > { %1318 = vmatpush.bf16.msra.mxu1 %v4295_v52  ;;  %1344 = vmatpush.bf16.msra.mxu3 %v4299_v57  ;;  %v4110_v52 = vld [vmem:[#allocation7 + $0x198] sm:$0xf]  ;;  %v5612_v57 = vld [vmem:[#allocation7 + $0x19c] sm:$0xf] }
  0x9a   : > { %v4111_v61 = vor.u32 %v5616_v53, %v4110_v52  ;;  %v5584_v39 = vld [vmem:[#allocation7 + $0xb4] sm:$0xf0]  ;;  %v3920_v6 = vld [vmem:[#allocation7 + $0x38] sm:$0xf0] }
  0x9b   : > { %1306 = vmatpush.bf16.msra.mxu0 %v4007_v63  ;;  %1332 = vmatpush.bf16.msra.mxu2 %v4011_v2  ;;  %v4115_v63 = vor.u32 %v5612_v57, %v4112_v58  ;;  %v5608_v2 = vld [vmem:[#allocation7 + $0x174] sm:$0xf0]  ;;  %v3983_v47 = vor.u32 %v5584_v39, %v3982_v38  ;;  %v5636_v57 = vld [vmem:[#allocation7 + $0x25c] sm:$0xf]  ;;  %v4598_v39 = vld [vmem:[#allocation10 + $0x180] sm:$0xf] }
  0x9c   : > { %v5648_v42 = vld [vmem:[#allocation7 + $0x2b4] sm:$0xf0]  ;;  %v4208_v58 = vld [vmem:[#allocation7 + $0x278] sm:$0xf0] }
  0x9d   : > { %1319 = vmatpush.bf16.msra.mxu1 %v4263_v0  ;;  %1345 = vmatpush.bf16.msra.mxu3 %v4267_v7  ;;  %v4078_v0 = vld [vmem:[#allocation7 + $0x158] sm:$0xf]  ;;  %v5604_v7 = vld [vmem:[#allocation7 + $0x15c] sm:$0xf]  ;;  %v4211_v3 = vor.u32 %v5636_v57, %v4208_v58  ;;  %v4742_v58 = vld [vmem:[#allocation10 + $0x2a0] sm:$0xf] }
  0x9e   : > { %v4079_v11 = vor.u32 %v5608_v2, %v4078_v0  ;;  %v4206_v52 = vld [vmem:[#allocation7 + $0x258] sm:$0xf] }
  0x9f   : > { %1307 = vmatpush.bf16.msra.mxu0 %v3975_v13  ;;  %1333 = vmatpush.bf16.msra.mxu2 %v3979_v15  ;;  %v4083_v13 = vor.u32 %v5604_v7, %v4080_v8  ;;  %v5600_v15 = vld [vmem:[#allocation7 + $0x134] sm:$0xf0]  ;;  %v5628_v7 = vld [vmem:[#allocation7 + $0x21c] sm:$0xf] }
  0xa0   : > { %v5640_v54 = vld [vmem:[#allocation7 + $0x274] sm:$0xf0]  ;;  %v4176_v8 = vld [vmem:[#allocation7 + $0x238] sm:$0xf0] }
  0xa1   : > { %1320 = vmatpush.bf16.msra.mxu1 %v4231_v14  ;;  %1346 = vmatpush.bf16.msra.mxu3 %v4235_v19  ;;  %v4046_v14 = vld [vmem:[#allocation7 + $0x118] sm:$0xf]  ;;  %v5596_v19 = vld [vmem:[#allocation7 + $0x11c] sm:$0xf]  ;;  %v4179_v16 = vor.u32 %v5628_v7, %v4176_v8 }
  0xa2   : > { %v4047_v23 = vor.u32 %v5600_v15, %v4046_v14  ;;  %v3918_v60 = vld [vmem:[#allocation7 + $0x18] sm:$0xf] }
  0xa3   : > { %1308 = vmatpush.bf16.msra.mxu0 %v3943_v25  ;;  %1334 = vmatpush.bf16.msra.mxu2 %v3947_v29  ;;  %v4051_v25 = vor.u32 %v5596_v19, %v4048_v20  ;;  %v4307_v29 = vor.u32 %v5660_v21, %v4304_v22  ;;  %v4174_v0 = vld [vmem:[#allocation7 + $0x218] sm:$0xf]  ;;  %v4502_v20 = vld [vmem:[#allocation10 + $0xc0] sm:$0xf] }
  0xa4   : > { %v5632_v2 = vld [vmem:[#allocation7 + $0x234] sm:$0xf0] }
  0xa5   : > { %1321 = vmatpush.bf16.msra.mxu1 %v4199_v28  ;;  %1347 = vmatpush.bf16.msra.mxu3 %v4203_v33  ;;  %v4270_v28 = vld [vmem:[#allocation7 + $0x2d8] sm:$0xf]  ;;  %v5652_v33 = vld [vmem:[#allocation7 + $0x2dc] sm:$0xf]  ;;  %v4175_v14 = vor.u32 %v5632_v2, %v4174_v0  ;;  %v4886_v2 = vld [vmem:[#allocation10 + $0x3c0] sm:$0xf] }
  0xa6   : > { %v4271_v36 = vor.u32 %v5656_v30, %v4270_v28  ;;  %v4275_v41 = vor.u32 %v5652_v33, %v4272_v34  ;;  %v5719_v10 = vld [vmem:[#allocation10 + $0xec] sm:$0xf0] }
  0xa7   : > { %1309 = vmatpush.bf16.msra.mxu0 %v3911_v40  ;;  %1335 = vmatpush.bf16.msra.mxu2 %v3915_v45  ;;  %v4238_v40 = vld [vmem:[#allocation7 + $0x298] sm:$0xf]  ;;  %v5644_v45 = vld [vmem:[#allocation7 + $0x29c] sm:$0xf] }
  0xa8   : > { %v4243_v53 = vor.u32 %v5644_v45, %v4240_v46  ;;  %v5783_v19 = vld [vmem:[#allocation10 + $0x2ec] sm:$0xf0] }
  0xa9   : > { %1322 = vmatpush.bf16.msra.mxu1 %v4167_v44  ;;  %1348 = vmatpush.bf16.msra.mxu3 %v4171_v48  ;;  %v3984_v44 = vld [vmem:[#allocation7 + $0xb8] sm:$0xf0]  ;;  %v4239_v48 = vor.u32 %v5648_v42, %v4238_v40  ;;  %v5715_v21 = vld [vmem:[#allocation10 + $0xcc] sm:$0xf0]  ;;  %v4454_v42 = vld [vmem:[#allocation10 + $0x60] sm:$0xf] }
  0xaa   : > { %1310 = vmatmul.bf16.vlgmr.msra.gmra.mxu0 %v6529_v1  ;;  %1336 = vmatmul.bf16.vlgmr.msra.gmra.mxu2 %v6529_v1  ;;  %v4503_v26 = vor.u32 %v5715_v21, %v4502_v20  ;;  %v5779_v28 = vld [vmem:[#allocation10 + $0x2cc] sm:$0xf0]  ;;  %v4710_v20 = vld [vmem:[#allocation10 + $0x260] sm:$0xf] }
  0xab   : > { %1354 = vmatpush.bf16.msrb.mxu0 %v4143_v49  ;;  %1380 = vmatpush.bf16.msrb.mxu2 %v4147_v51  ;;  %v3987_v49 = vor.u32 %v5580_v43, %v3984_v44  ;;  %v5576_v51 = vld [vmem:[#allocation7 + $0x74] sm:$0xf0]  ;;  %v4759_v34 = vor.u32 %v5779_v28, %v4758_v27  ;;  %v4582_v44 = vld [vmem:[#allocation10 + $0x160] sm:$0xf] }
  0xac   : > { %1323 = vmatmul.bf16.vlgmr.msra.gmra.mxu1 %v6531_v4  ;;  %1349 = vmatmul.bf16.vlgmr.msra.gmra.mxu3 %v6531_v4  ;;  %v5711_v30 = vld [vmem:[#allocation10 + $0xac] sm:$0xf0]  ;;  %v5014_v27 = vld [vmem:[#allocation10 + $0x4c0] sm:$0xf] }
  0xad   : > { %1367 = vmatpush.bf16.msrb.mxu1 %v4399_v50  ;;  %1393 = vmatpush.bf16.msrb.mxu3 %v4403_v55  ;;  %v3950_v50 = vld [vmem:[#allocation7 + $0x58] sm:$0xf]  ;;  %v5572_v55 = vld [vmem:[#allocation7 + $0x5c] sm:$0xf] }
  0xae   : > { %v3951_v59 = vor.u32 %v5576_v51, %v3950_v50  ;;  %v5743_v33 = vld [vmem:[#allocation10 + $0x1ac] sm:$0xf0] }
  0xaf   : > { %1355 = vmatpush.bf16.msrb.mxu0 %v4111_v61  ;;  %1381 = vmatpush.bf16.msrb.mxu2 %v4115_v63  ;;  %v4207_v61 = vor.u32 %v5640_v54, %v4206_v52  ;;  %v5568_v63 = vld [vmem:[#allocation7 + $0x34] sm:$0xf0]  ;;  %v4615_v38 = vor.u32 %v5743_v33, %v4614_v32  ;;  %v4566_v52 = vld [vmem:[#allocation10 + $0x140] sm:$0xf] }
  0xb0   : > { %v5739_v40 = vld [vmem:[#allocation10 + $0x18c] sm:$0xf0] }
  0xb1   : > { %1368 = vmatpush.bf16.msrb.mxu1 %v4367_v62  ;;  %1394 = vmatpush.bf16.msrb.mxu3 %v4371_v5  ;;  %v3955_v62 = vor.u32 %v5572_v55, %v3952_v56  ;;  %v5564_v5 = vld [vmem:[#allocation7 + $0x1c] sm:$0xf]  ;;  %v4599_v43 = vor.u32 %v5739_v40, %v4598_v39  ;;  %v5735_v45 = vld [vmem:[#allocation10 + $0x16c] sm:$0xf0]  ;;  %v4422_v55 = vld [vmem:[#allocation10 + $0x20] sm:$0xf] }
  0xb2   : > { %v3923_v15 = vor.u32 %v5564_v5, %v3920_v6  ;;  %v5815_v46 = vld [vmem:[#allocation10 + $0x3ec] sm:$0xf0]  ;;  %v4583_v51 = vor.u32 %v5735_v45, %v4582_v44  ;;  %v5030_v6 = vld [vmem:[#allocation10 + $0x4e0] sm:$0xf] }
  0xb3   : > { %1356 = vmatpush.bf16.msrb.mxu0 %v4079_v11  ;;  %1382 = vmatpush.bf16.msrb.mxu2 %v4083_v13  ;;  %v3919_v11 = vor.u32 %v5568_v63, %v3918_v60  ;;  %v5751_v13 = vld [vmem:[#allocation10 + $0x1ec] sm:$0xf0]  ;;  %v4982_v44 = vld [vmem:[#allocation10 + $0x480] sm:$0xf] }
  0xb4   : > { %v5699_v50 = vld [vmem:[#allocation10 + $0x4c] sm:$0xf0] }
  0xb5   : > { %1369 = vmatpush.bf16.msrb.mxu1 %v4335_v12  ;;  %1395 = vmatpush.bf16.msrb.mxu3 %v4339_v17  ;;  %v4646_v12 = vld [vmem:[#allocation10 + $0x1e0] sm:$0xf]  ;;  %v4519_v17 = vor.u32 %v5719_v10, %v4518_v9  ;;  %v5695_v56 = vld [vmem:[#allocation10 + $0x2c] sm:$0xf0] }
  0xb6   : > { %v4647_v22 = vor.u32 %v5751_v13, %v4646_v12  ;;  %v5727_v60 = vld [vmem:[#allocation10 + $0x12c] sm:$0xf0]  ;;  %v4423_v5 = vor.u32 %v5695_v56, %v4422_v55  ;;  %v4726_v9 = vld [vmem:[#allocation10 + $0x280] sm:$0xf] }
  0xb7   : > { %1357 = vmatpush.bf16.msrb.mxu0 %v4047_v23  ;;  %1383 = vmatpush.bf16.msrb.mxu2 %v4051_v25  ;;  %v4630_v23 = vld [vmem:[#allocation10 + $0x1c0] sm:$0xf]  ;;  %v4775_v25 = vor.u32 %v5783_v19, %v4774_v18  ;;  %v5691_v63 = vld [vmem:[#allocation10 + $0xc] sm:$0xf0] }
  0xb8   : > { %v5847_v7 = vld [vmem:[#allocation10 + $0x4ec] sm:$0xf0]  ;;  %v4678_v56 = vld [vmem:[#allocation10 + $0x220] sm:$0xf] }
  0xb9   : > { %1370 = vmatpush.bf16.msrb.mxu1 %v4303_v24  ;;  %1396 = vmatpush.bf16.msrb.mxu3 %v4307_v29  ;;  %v5747_v24 = vld [vmem:[#allocation10 + $0x1cc] sm:$0xf0]  ;;  %v4486_v29 = vld [vmem:[#allocation10 + $0xa0] sm:$0xf] }
  0xba   : > { %v4631_v31 = vor.u32 %v5747_v24, %v4630_v23  ;;  %v5723_v12 = vld [vmem:[#allocation10 + $0x10c] sm:$0xf0]  ;;  %v4854_v23 = vld [vmem:[#allocation10 + $0x380] sm:$0xf]  ;;  %v5031_v24 = vor.u32 %v5847_v7, %v5030_v6 }
  0xbb   : > { %1358 = vmatpush.bf16.msrb.mxu0 %v4015_v35  ;;  %1384 = vmatpush.bf16.msrb.mxu2 %v4019_v37  ;;  %v4487_v35 = vor.u32 %v5711_v30, %v4486_v29  ;;  %v5707_v37 = vld [vmem:[#allocation10 + $0x8c] sm:$0xf0]  ;;  %v5142_v30 = vld [vmem:[#allocation10 + $0x5c0] sm:$0xf] }
  0xbc   : > { %v5771_v13 = vld [vmem:[#allocation10 + $0x28c] sm:$0xf0] }
  0xbd   : > { %1371 = vmatpush.bf16.msrb.mxu1 %v4271_v36  ;;  %1397 = vmatpush.bf16.msrb.mxu3 %v4275_v41  ;;  %v4470_v36 = vld [vmem:[#allocation10 + $0x80] sm:$0xf]  ;;  %v5879_v18 = vld [vmem:[#allocation10 + $0x5ec] sm:$0xf0] }
  0xbe   : > { %v4471_v41 = vor.u32 %v5707_v37, %v4470_v36  ;;  %v5767_v21 = vld [vmem:[#allocation10 + $0x26c] sm:$0xf0]  ;;  %v4998_v37 = vld [vmem:[#allocation10 + $0x4a0] sm:$0xf] }
  0xbf   : > { %1359 = vmatpush.bf16.msrb.mxu0 %v3983_v47  ;;  %1385 = vmatpush.bf16.msrb.mxu2 %v3987_v49  ;;  %v4438_v49 = vld [vmem:[#allocation10 + $0x40] sm:$0xf]  ;;  %v5843_v28 = vld [vmem:[#allocation10 + $0x4cc] sm:$0xf0] }
  0xc0   : > { %v4439_v54 = vor.u32 %v5699_v50, %v4438_v49  ;;  %v5875_v32 = vld [vmem:[#allocation10 + $0x5cc] sm:$0xf0]  ;;  %v5015_v36 = vor.u32 %v5843_v28, %v5014_v27 }
  0xc1   : > { %1372 = vmatpush.bf16.msrb.mxu1 %v4239_v48  ;;  %1398 = vmatpush.bf16.msrb.mxu3 %v4243_v53  ;;  %v5731_v53 = vld [vmem:[#allocation10 + $0x14c] sm:$0xf0]  ;;  %v5143_v39 = vor.u32 %v5875_v32, %v5142_v30  ;;  %v5062_v30 = vld [vmem:[#allocation10 + $0x520] sm:$0xf] }
  0xc2   : > { %v4567_v57 = vor.u32 %v5731_v53, %v4566_v52  ;;  %v5835_v45 = vld [vmem:[#allocation10 + $0x48c] sm:$0xf0]  ;;  %v4966_v52 = vld [vmem:[#allocation10 + $0x460] sm:$0xf] }
  0xc3   : > { %1360 = vmatpush.bf16.msrb.mxu0 %v3951_v59  ;;  %1386 = vmatpush.bf16.msrb.mxu2 %v3955_v62  ;;  %v4550_v59 = vld [vmem:[#allocation10 + $0x120] sm:$0xf]  ;;  %v5799_v49 = vld [vmem:[#allocation10 + $0x36c] sm:$0xf0] }
  0xc4   : > { %v4406_v62 = vld [vmem:[#allocation10] sm:$0xf]  ;;  %v4551_v10 = vor.u32 %v5727_v60, %v4550_v59  ;;  %v5863_v60 = vld [vmem:[#allocation10 + $0x56c] sm:$0xf0] }
  0xc5   : > { %1373 = vmatpush.bf16.msrb.mxu1 %v4207_v61  ;;  %1399 = vmatpush.bf16.msrb.mxu3 %v4211_v3  ;;  %v5775_v61 = vld [vmem:[#allocation10 + $0x2ac] sm:$0xf0]  ;;  %v5094_v59 = vld [vmem:[#allocation10 + $0x560] sm:$0xf] }
  0xc6   : > { %v4743_v0 = vor.u32 %v5775_v61, %v4742_v58  ;;  %v5811_v3 = vld [vmem:[#allocation10 + $0x3cc] sm:$0xf0]  ;;  %v4822_v61 = vld [vmem:[#allocation10 + $0x340] sm:$0xf] }
  0xc7   : > { %1361 = vmatpush.bf16.msrb.mxu0 %v3919_v11  ;;  %1387 = vmatpush.bf16.msrb.mxu2 %v3923_v15  ;;  %v4887_v8 = vor.u32 %v5811_v3, %v4886_v2  ;;  %v4534_v11 = vld [vmem:[#allocation10 + $0x100] sm:$0xf]  ;;  %v4727_v15 = vor.u32 %v5771_v13, %v4726_v9  ;;  %v5095_v9 = vor.u32 %v5863_v60, %v5094_v59 }
  0xc8   : > { %v4950_v3 = vld [vmem:[#allocation10 + $0x440] sm:$0xf] }
  0xc9   : > { %1374 = vmatpush.bf16.msrb.mxu1 %v4175_v14  ;;  %1400 = vmatpush.bf16.msrb.mxu3 %v4179_v16  ;;  %v5158_v14 = vld [vmem:[#allocation10 + $0x5e0] sm:$0xf] }
  0xca   : > { %1362 = vmatmul.bf16.vlgmr.msrb.gmra.mxu0 %v6529_v1  ;;  %1388 = vmatmul.bf16.vlgmr.msrb.gmra.mxu2 %v6529_v1  ;;  %v5703_v1 = vld [vmem:[#allocation10 + $0x6c] sm:$0xf0]  ;;  %v4870_v16 = vld [vmem:[#allocation10 + $0x3a0] sm:$0xf]  ;;  %v5159_v29 = vor.u32 %v5879_v18, %v5158_v14 }
  0xcb   : > { %2985 = vmatpush.bf16.msra.mxu0 %v4519_v17  ;;  %3011 = vmatpush.bf16.msra.mxu2 %v4775_v25  ;;  %v4455_v48 = vor.u32 %v5703_v1, %v4454_v42  ;;  %v5807_v17 = vld [vmem:[#allocation10 + $0x3ac] sm:$0xf0]  ;;  %v4535_v25 = vor.u32 %v5723_v12, %v4534_v11  ;;  %v6556_v12 = vstv %s6551_s13  ;;  %v5078_v14 = vld [vmem:[#allocation10 + $0x540] sm:$0xf]  ;;  %s3749_s13 = sshll.u32 %s401_s25, 4  ;;  %s3750_s13 = int_to_ptr.vmem [resolvable:$true] %s3749_s13 }
  0xcc   : > { %1375 = vmatmul.bf16.vlgmr.msrb.gmra.mxu1 %v6531_v4  ;;  %1401 = vmatmul.bf16.vlgmr.msrb.gmra.mxu3 %v6531_v4  ;;  %v4902_v4 = vld [vmem:[#allocation10 + $0x3e0] sm:$0xf]  ;;  %v4871_v19 = vor.u32 %v5807_v17, %v4870_v16  ;;  %v5871_v42 = vld [vmem:[#allocation10 + $0x5ac] sm:$0xf0] }
  0xcd   : > { %2998 = vmatpush.bf16.msra.mxu1 %v4647_v22  ;;  %v4903_v47 = vor.u32 %v5815_v46, %v4902_v4  ;;  %v4407_v22 = vor.u32 %v5691_v63, %v4406_v62  ;;  %v5110_v46 = vld [vmem:[#allocation10 + $0x580] sm:$0xf]  ;;  %v5795_v62 = vld [vmem:[#allocation10 + $0x34c] sm:$0xf0] }
  0xce   : > { %v5755_v11 = vld [vmem:[#allocation10 + $0x20c] sm:$0xf0]  ;;  %v4934_v17 = vld [vmem:[#allocation10 + $0x420] sm:$0xf] }
  0xcf   : > { %2986 = vmatpush.bf16.msra.mxu0 %v4503_v26  ;;  %3012 = vmatpush.bf16.msra.mxu2 %v4759_v34  ;;  %v5803_v26 = vld [vmem:[#allocation10 + $0x38c] sm:$0xf0]  ;;  %v4694_v34 = vld [vmem:[#allocation10 + $0x240] sm:$0xf] }
  0xd0   : > { %3024 = vmatpush.bf16.msra.mxu3 %v4903_v47  ;;  %v4855_v33 = vor.u32 %v5803_v26, %v4854_v23  ;;  %v5867_v47 = vld [vmem:[#allocation10 + $0x58c] sm:$0xf0]  ;;  %v4806_v18 = vld [vmem:[#allocation10 + $0x320] sm:$0xf] }
  0xd1   : > { %2999 = vmatpush.bf16.msra.mxu1 %v4631_v31  ;;  %v4711_v31 = vor.u32 %v5767_v21, %v4710_v20  ;;  %v5111_v55 = vor.u32 %v5867_v47, %v5110_v46  ;;  %v4520_v46 = vld [vmem:[#allocation10 + $0xf0] sm:$0xf0] }
  0xd3   : > { %2987 = vmatpush.bf16.msra.mxu0 %v4487_v35  ;;  %3013 = vmatpush.bf16.msra.mxu2 %v4743_v0  ;;  %v5763_v35 = vld [vmem:[#allocation10 + $0x24c] sm:$0xf0] }
  0xd4   : > { %3025 = vmatpush.bf16.msra.mxu3 %v4887_v8  ;;  %v4695_v40 = vor.u32 %v5763_v35, %v4694_v34  ;;  %v5827_v8 = vld [vmem:[#allocation10 + $0x44c] sm:$0xf0]  ;;  %v4918_v35 = vld [vmem:[#allocation10 + $0x400] sm:$0xf] }
  0xd5   : > { %3000 = vmatpush.bf16.msra.mxu1 %v4615_v38  ;;  %v5839_v38 = vld [vmem:[#allocation10 + $0x4ac] sm:$0xf0]  ;;  %v4951_v21 = vor.u32 %v5827_v8, %v4950_v3 }
  0xd6   : > { %v4999_v1 = vor.u32 %v5839_v38, %v4998_v37  ;;  %v4790_v37 = vld [vmem:[#allocation10 + $0x300] sm:$0xf]  ;;  %v5787_v38 = vld [vmem:[#allocation10 + $0x30c] sm:$0xf0] }
  0xd7   : > { %2988 = vmatpush.bf16.msra.mxu0 %v4471_v41  ;;  %3014 = vmatpush.bf16.msra.mxu2 %v4727_v15  ;;  %v5126_v41 = vld [vmem:[#allocation10 + $0x5a0] sm:$0xf]  ;;  %v5859_v15 = vld [vmem:[#allocation10 + $0x54c] sm:$0xf0] }
  0xd8   : > { %3026 = vmatpush.bf16.msra.mxu3 %v4871_v19  ;;  %v5127_v4 = vor.u32 %v5871_v42, %v5126_v41  ;;  %v5791_v19 = vld [vmem:[#allocation10 + $0x32c] sm:$0xf0]  ;;  %v5079_v28 = vor.u32 %v5859_v15, %v5078_v14  ;;  %v5717_v42 = vld [vmem:[#allocation10 + $0xe4] sm:$0xf]  ;;  %v4632_v15 = vld [vmem:[#allocation10 + $0x1d0] sm:$0xf0] }
  0xd9   : > { %3001 = vmatpush.bf16.msra.mxu1 %v4599_v43  ;;  %v6549_v43 = vld [vmem:[#allocation9] sm:$0xff]  ;;  %v4807_v23 = vor.u32 %v5791_v19, %v4806_v18  ;;  %v5745_v14 = vld [vmem:[#allocation10 + $0x1c4] sm:$0xf]  ;;  %v5935_v18 = vld [vmem:[#allocation10 + $0x7ac] sm:$0xf0] }
  0xda   : > { %v535_v50 = vperm.slane %v6549_v43, 0  ;;  %v536_v0 = vperm.slane %v6549_v43, 1 }
  0xdb   : > { %2989 = vmatpush.bf16.msra.mxu0 %v4455_v48  ;;  %3015 = vmatpush.bf16.msra.mxu2 %v4711_v31  ;;  %v4838_v48 = vld [vmem:[#allocation10 + $0x360] sm:$0xf]  ;;  %v5855_v31 = vld [vmem:[#allocation10 + $0x52c] sm:$0xf0] }
  0xdc   : > { %3027 = vmatpush.bf16.msra.mxu3 %v4855_v33  ;;  %v4839_v53 = vor.u32 %v5799_v49, %v4838_v48  ;;  %v5063_v47 = vor.u32 %v5855_v31, %v5062_v30  ;;  %v5046_v49 = vld [vmem:[#allocation10 + $0x500] sm:$0xf] }
  0xdd   : > { %3002 = vmatpush.bf16.msra.mxu1 %v4583_v51  ;;  %v4983_v51 = vor.u32 %v5835_v45, %v4982_v44  ;;  %v5270_v44 = vld [vmem:[#allocation10 + $0x6c0] sm:$0xf]  ;;  %v5907_v45 = vld [vmem:[#allocation10 + $0x6cc] sm:$0xf0] }
  0xde   : > { %v5271_v48 = vor.u32 %v5907_v45, %v5270_v44 }
  0xdf   : > { %2990 = vmatpush.bf16.msra.mxu0 %v4439_v54  ;;  %3016 = vmatpush.bf16.msra.mxu2 %v4695_v40  ;;  %v5831_v54 = vld [vmem:[#allocation10 + $0x46c] sm:$0xf0] }
  0xe0   : > { %3028 = vmatpush.bf16.msra.mxu3 %v4839_v53  ;;  %v4967_v2 = vor.u32 %v5831_v54, %v4966_v52  ;;  %v5414_v52 = vld [vmem:[#allocation10 + $0x7e0] sm:$0xf]  ;;  %v5943_v53 = vld [vmem:[#allocation10 + $0x7ec] sm:$0xf0] }
  0xe1   : > { %3003 = vmatpush.bf16.msra.mxu1 %v4567_v57  ;;  %v5759_v57 = vld [vmem:[#allocation10 + $0x22c] sm:$0xf0]  ;;  %v5415_v54 = vor.u32 %v5943_v53, %v5414_v52  ;;  %v5733_v52 = vld [vmem:[#allocation10 + $0x164] sm:$0xf]  ;;  %v4584_v53 = vld [vmem:[#allocation10 + $0x170] sm:$0xf0] }
  0xe2   : > { %v4679_v58 = vor.u32 %v5759_v57, %v4678_v56  ;;  %v4648_v56 = vld [vmem:[#allocation10 + $0x1f0] sm:$0xf0]  ;;  %v5254_v57 = vld [vmem:[#allocation10 + $0x6a0] sm:$0xf] }
  0xe3   : > { %2991 = vmatpush.bf16.msra.mxu0 %v4423_v5  ;;  %v4823_v5 = vor.u32 %v5795_v62, %v4822_v61  ;;  %v4523_v61 = vor.u32 %v5717_v42, %v4520_v46  ;;  %v5903_v62 = vld [vmem:[#allocation10 + $0x6ac] sm:$0xf0] }
  0xe4   : > { %3017 = vmatpush.bf16.msra.mxu2 %v4679_v58  ;;  %v5255_v3 = vor.u32 %v5903_v62, %v5254_v57  ;;  %v538_v57 = vperm.slane %v6549_v43, 3  ;;  %v4587_v62 = vor.u32 %v5733_v52, %v4584_v53  ;;  %v5773_v52 = vld [vmem:[#allocation10 + $0x2a4] sm:$0xf]  ;;  %v4744_v53 = vld [vmem:[#allocation10 + $0x2b0] sm:$0xf0] }
  0xe5   : > { %3004 = vmatpush.bf16.msra.mxu1 %v4551_v10  ;;  %v4662_v10 = vld [vmem:[#allocation10 + $0x200] sm:$0xf]  ;;  %3029 = vmatpush.bf16.msra.mxu3 %v4823_v5 }
  0xe6   : > { %v4663_v13 = vor.u32 %v5755_v11, %v4662_v10  ;;  %v5398_v5 = vld [vmem:[#allocation10 + $0x7c0] sm:$0xf]  ;;  %v5899_v11 = vld [vmem:[#allocation10 + $0x68c] sm:$0xf0] }
  0xe7   : > { %2992 = vmatpush.bf16.msra.mxu0 %v4407_v22  ;;  %v1207_v63 = vpop.f32.mrf.mxu0  ;;  %v5823_v22 = vld [vmem:[#allocation10 + $0x42c] sm:$0xf0]  ;;  %v5238_v10 = vld [vmem:[#allocation10 + $0x680] sm:$0xf] }
  0xe8   : > { %v1208_v6 = vadd.f32 %v1207_v63, %v535_v50  ;;  %3018 = vmatpush.bf16.msra.mxu2 %v4663_v13  ;;  %v4935_v34 = vor.u32 %v5823_v22, %v4934_v17  ;;  %v5851_v50 = vld [vmem:[#allocation10 + $0x50c] sm:$0xf0]  ;;  %v5239_v17 = vor.u32 %v5899_v11, %v5238_v10  ;;  %v5709_v22 = vld [vmem:[#allocation10 + $0xa4] sm:$0xf] }
  0xe9   : > { %3005 = vmatpush.bf16.msra.mxu1 %v4535_v25  ;;  %v1220_v7 = vpop.f32.mrf.mxu1  ;;  %v5911_v25 = vld [vmem:[#allocation10 + $0x6ec] sm:$0xf0]  ;;  %3030 = vmatpush.bf16.msra.mxu3 %v4807_v23  ;;  %v4488_v23 = vld [vmem:[#allocation10 + $0xb0] sm:$0xf0] }
  0xea   : > { %v1221_v16 = vadd.f32 %v1220_v7, %v1208_v6  ;;  %v5939_v6 = vld [vmem:[#allocation10 + $0x7cc] sm:$0xf0]  ;;  %v4504_v7 = vld [vmem:[#allocation10 + $0xd0] sm:$0xf0]  ;;  %v4491_v31 = vor.u32 %v5709_v22, %v4488_v23 }
  0xeb   : > { %3037 = vmatpush.bf16.msrb.mxu0 %v5031_v24  ;;  %v5286_v24 = vld [vmem:[#allocation10 + $0x6e0] sm:$0xf]  ;;  %v4424_v22 = vld [vmem:[#allocation10 + $0x30] sm:$0xf0] }
  0xec   : > { %vm1406_vm0 = vcmp.ge.f32.partialorder %v1221_v16, 0.0  ;;  %v1415_v26 = vmul.f32 %v6556_v12, %v1221_v16 }
  0xed   : > { %3050 = vmatpush.bf16.msrb.mxu1 %v5159_v29  ;;  %v1233_v20 = vpop.f32.mrf.mxu2  ;;  %v5287_v29 = vor.u32 %v5911_v25, %v5286_v24  ;;  %v4635_v24 = vor.u32 %v5745_v14, %v4632_v15  ;;  %v5781_v15 = vld [vmem:[#allocation10 + $0x2e4] sm:$0xf] }
  0xee   : > { %v1234_v27 = vadd.f32 %v1233_v20, %v536_v0  ;;  %v1423_v32 = vsel %vm1406_vm0, %v1221_v16, %v1415_v26  ;;  %v5713_v0 = vld [vmem:[#allocation10 + $0xc4] sm:$0xf]  ;;  %v5382_v16 = vld [vmem:[#allocation10 + $0x7a0] sm:$0xf] }
  0xef   : > { %3038 = vmatpush.bf16.msrb.mxu0 %v5015_v36  ;;  %v1246_v33 = vpop.f32.mrf.mxu3  ;;  %v5819_v36 = vld [vmem:[#allocation10 + $0x40c] sm:$0xf0]  ;;  %v1209_v40 = vpop.f32.mrf.mxu0  ;;  %3063 = vmatpush.bf16.msrb.mxu2 %v5287_v29  ;;  %v4507_v19 = vor.u32 %v5713_v0, %v4504_v7  ;;  %v5222_v20 = vld [vmem:[#allocation10 + $0x660] sm:$0xf]  ;;  %v5383_v25 = vor.u32 %v5935_v18, %v5382_v16  ;;  %v5741_v26 = vld [vmem:[#allocation10 + $0x1a4] sm:$0xf] }
  0xf0   : > { %v1247_v41 = vadd.f32 %v1246_v33, %v1234_v27  ;;  %v4919_v60 = vor.u32 %v5819_v36, %v4918_v35  ;;  %v4616_v27 = vld [vmem:[#allocation10 + $0x1b0] sm:$0xf0]  ;;  %v5931_v29 = vld [vmem:[#allocation10 + $0x78c] sm:$0xf0]  ;;  %v537_v36 = vperm.slane %v6549_v43, 2 }
  0xf1   : > { %3051 = vmatpush.bf16.msrb.mxu1 %v5143_v39  ;;  %v6559_v39 = vpack.c.bf16 %v1423_v32, %v1423_v32  ;;  %v5705_v32 = vld [vmem:[#allocation10 + $0x84] sm:$0xf]  ;;  %v4472_v33 = vld [vmem:[#allocation10 + $0x90] sm:$0xf0]  ;;  %v5206_v40 = vld [vmem:[#allocation10 + $0x640] sm:$0xf] }
  0xf2   : > { %vm1407_vm1 = vcmp.ge.f32.partialorder %v1247_v41, 0.0  ;;  %v4475_v42 = vor.u32 %v5705_v32, %v4472_v33  ;;  %v5334_v0 = vld [vmem:[#allocation10 + $0x740] sm:$0xf]  ;;  %v4568_v7 = vld [vmem:[#allocation10 + $0x150] sm:$0xf0] }
  0xf3   : > { %3039 = vmatpush.bf16.msrb.mxu0 %v4999_v1  ;;  %v4791_v1 = vor.u32 %v5787_v38, %v4790_v37  ;;  %3064 = vmatpush.bf16.msrb.mxu2 %v5271_v48  ;;  %v5737_v37 = vld [vmem:[#allocation10 + $0x184] sm:$0xf]  ;;  %v4600_v38 = vld [vmem:[#allocation10 + $0x190] sm:$0xf0]  ;;  %v5927_v48 = vld [vmem:[#allocation10 + $0x76c] sm:$0xf0] }
  0xf4   : > { %2993 = vmatmul.bf16.vlgmr.msra.gmra.mxu0 %v6559_v39  ;;  %v4603_v46 = vor.u32 %v5737_v37, %v4600_v38  ;;  %v4776_v16 = vld [vmem:[#allocation10 + $0x2f0] sm:$0xf0]  ;;  %v5689_v33 = vld [vmem:[#allocation10 + $0x4] sm:$0xf] }
  0xf5   : > { %3052 = vmatpush.bf16.msrb.mxu1 %v5127_v4  ;;  %v1222_v4 = vpop.f32.mrf.mxu1  ;;  %3031 = vmatpush.bf16.msra.mxu3 %v4791_v1  ;;  %v1235_v59 = vpop.f32.mrf.mxu2  ;;  %v5701_v1 = vld [vmem:[#allocation10 + $0x64] sm:$0xf]  ;;  %v4408_v37 = vld [vmem:[#allocation10 + $0x10] sm:$0xf0] }
  0xf6   : > { %v4456_v4 = vld [vmem:[#allocation10 + $0x70] sm:$0xf0]  ;;  %v5697_v59 = vld [vmem:[#allocation10 + $0x44] sm:$0xf] }
  0xf7   : > { %3040 = vmatpush.bf16.msrb.mxu0 %v4983_v51  ;;  %v1416_v51 = vmul.f32 %v6556_v12, %v1247_v41  ;;  %v1248_v13 = vpop.f32.mrf.mxu3  ;;  %3065 = vmatpush.bf16.msrb.mxu2 %v5255_v3 }
  0xf9   : > { %3053 = vmatpush.bf16.msrb.mxu1 %v5111_v55  ;;  %v5749_v55 = vld [vmem:[#allocation10 + $0x1e4] sm:$0xf]  ;;  %v1424_v58 = vsel %vm1407_vm1, %v1247_v41, %v1416_v51  ;;  %3076 = vmatpush.bf16.msrb.mxu3 %v5415_v54  ;;  %v5891_v41 = vld [vmem:[#allocation10 + $0x64c] sm:$0xf0]  ;;  %v5190_v54 = vld [vmem:[#allocation10 + $0x620] sm:$0xf] }
  0xfa   : > { %v6563_v63 = vpack.c.bf16 %v1424_v58, %v1424_v58  ;;  %v4651_v8 = vor.u32 %v5749_v55, %v4648_v56  ;;  %v5207_v44 = vor.u32 %v5891_v41, %v5206_v40  ;;  %v5887_v55 = vld [vmem:[#allocation10 + $0x62c] sm:$0xf0]  ;;  %v4459_v58 = vor.u32 %v5701_v1, %v4456_v4  ;;  %v5302_v41 = vld [vmem:[#allocation10 + $0x700] sm:$0xf]  ;;  %v5721_v1 = vld [vmem:[#allocation10 + $0x104] sm:$0xf] }
  0xfb   : > { %3041 = vmatpush.bf16.msrb.mxu0 %v4967_v2  ;;  %v5047_v2 = vor.u32 %v5851_v50, %v5046_v49  ;;  %3066 = vmatpush.bf16.msrb.mxu2 %v5239_v17 }
  0xfc   : > { %3006 = vmatmul.bf16.vlgmr.msra.gmra.mxu1 %v6563_v63 }
  0xfd   : > { %3054 = vmatpush.bf16.msrb.mxu1 %v5095_v9  ;;  %v5399_v9 = vor.u32 %v5939_v6, %v5398_v5  ;;  %v5729_v6 = vld [vmem:[#allocation10 + $0x144] sm:$0xf] }
  0xfe   : > { %v4571_v23 = vor.u32 %v5729_v6, %v4568_v7  ;;  %v4712_v6 = vld [vmem:[#allocation10 + $0x270] sm:$0xf0] }
  0xff   : > { %3042 = vmatpush.bf16.msrb.mxu0 %v4951_v21  ;;  %v5895_v21 = vld [vmem:[#allocation10 + $0x66c] sm:$0xf0]  ;;  %3077 = vmatpush.bf16.msrb.mxu3 %v5399_v9 }
 0x100   : > { %v5223_v30 = vor.u32 %v5895_v21, %v5222_v20  ;;  %v5883_v9 = vld [vmem:[#allocation10 + $0x60c] sm:$0xf0]  ;;  %v5693_v21 = vld [vmem:[#allocation10 + $0x24] sm:$0xf] }
 0x101   : > { %3055 = vmatpush.bf16.msrb.mxu1 %v5079_v28  ;;  %v5366_v28 = vld [vmem:[#allocation10 + $0x780] sm:$0xf]  ;;  %v4427_v32 = vor.u32 %v5693_v21, %v4424_v22 }
 0x102   : > { %v5367_v35 = vor.u32 %v5931_v29, %v5366_v28  ;;  %3067 = vmatpush.bf16.msrb.mxu2 %v5223_v30  ;;  %v5725_v28 = vld [vmem:[#allocation10 + $0x124] sm:$0xf]  ;;  %v4552_v29 = vld [vmem:[#allocation10 + $0x130] sm:$0xf0] }
 0x103   : > { %3043 = vmatpush.bf16.msrb.mxu0 %v4935_v34  ;;  %3078 = vmatpush.bf16.msrb.mxu3 %v5383_v25  ;;  %v4619_v34 = vor.u32 %v5741_v26, %v4616_v27  ;;  %v4779_v26 = vor.u32 %v5781_v15, %v4776_v16  ;;  %v5919_v27 = vld [vmem:[#allocation10 + $0x72c] sm:$0xf0]  ;;  %v4555_v38 = vor.u32 %v5725_v28, %v4552_v29  ;;  %v5797_v16 = vld [vmem:[#allocation10 + $0x364] sm:$0xf]  ;;  %v4824_v28 = vld [vmem:[#allocation10 + $0x350] sm:$0xf0] }
 0x104   : > { %v540_v29 = vperm.slane %v6549_v43, 5 }
 0x105   : > { %3056 = vmatpush.bf16.msrb.mxu1 %v5063_v47  ;;  %v5350_v47 = vld [vmem:[#allocation10 + $0x760] sm:$0xf] }
 0x106   : > { %v5351_v51 = vor.u32 %v5927_v48, %v5350_v47  ;;  %3068 = vmatpush.bf16.msrb.mxu2 %v5207_v44  ;;  %v4536_v44 = vld [vmem:[#allocation10 + $0x110] sm:$0xf0] }
 0x107   : > { %3044 = vmatpush.bf16.msrb.mxu0 %v4919_v60  ;;  %v1259_v45 = vpop.f32.mrf.mxu0  ;;  %3079 = vmatpush.bf16.msrb.mxu3 %v5367_v35  ;;  %v5191_v60 = vor.u32 %v5887_v55, %v5190_v54  ;;  %v4760_v35 = vld [vmem:[#allocation10 + $0x2d0] sm:$0xf0]  ;;  %v4539_v55 = vor.u32 %v5721_v1, %v4536_v44 }
 0x108   : > { %v1260_v49 = vadd.f32 %v1259_v45, %v537_v36  ;;  %v4904_v47 = vld [vmem:[#allocation10 + $0x3f0] sm:$0xf0] }
 0x109   : > { %3057 = vmatpush.bf16.msrb.mxu1 %v5047_v2  ;;  %v1272_v50 = vpop.f32.mrf.mxu1  ;;  %v5923_v2 = vld [vmem:[#allocation10 + $0x74c] sm:$0xf0] }
 0x10a   : > { %v1273_v56 = vadd.f32 %v1272_v50, %v1260_v49  ;;  %v5335_v5 = vor.u32 %v5923_v2, %v5334_v0  ;;  %3069 = vmatpush.bf16.msrb.mxu2 %v5191_v60  ;;  %v4411_v50 = vor.u32 %v5689_v33, %v4408_v37  ;;  %v5769_v60 = vld [vmem:[#allocation10 + $0x284] sm:$0xf]  ;;  %v4872_v2 = vld [vmem:[#allocation10 + $0x3b0] sm:$0xf0] }
 0x10b   : > { %3089 = vmatpush.bf16.msra.mxu0 %v4523_v61  ;;  %v4440_v61 = vld [vmem:[#allocation10 + $0x50] sm:$0xf0]  ;;  %3080 = vmatpush.bf16.msrb.mxu3 %v5351_v51  ;;  %v5805_v0 = vld [vmem:[#allocation10 + $0x3a4] sm:$0xf] }
 0x10c   : > { %vm1408_vm2 = vcmp.ge.f32.partialorder %v1273_v56, 0.0  ;;  %v1417_v3 = vmul.f32 %v6556_v12, %v1273_v56  ;;  %v4443_v13 = vor.u32 %v5697_v59, %v4440_v61  ;;  %v4728_v61 = vld [vmem:[#allocation10 + $0x290] sm:$0xf0] }
 0x10d   : > { %3102 = vmatpush.bf16.msra.mxu1 %v4651_v8  ;;  %v5174_v8 = vld [vmem:[#allocation10 + $0x600] sm:$0xf]  ;;  %v1285_v11 = vpop.f32.mrf.mxu2 }
 0x10e   : > { %v1425_v10 = vsel %vm1408_vm2, %v1273_v56, %v1417_v3  ;;  %v5175_v14 = vor.u32 %v5883_v9, %v5174_v8  ;;  %v1286_v18 = vadd.f32 %v1285_v11, %v538_v57  ;;  %v4747_v56 = vor.u32 %v5773_v52, %v4744_v53  ;;  %v5809_v57 = vld [vmem:[#allocation10 + $0x3c4] sm:$0xf]  ;;  %v4856_v9 = vld [vmem:[#allocation10 + $0x390] sm:$0xf0] }
 0x10f   : > { %3090 = vmatpush.bf16.msra.mxu0 %v4507_v19  ;;  %v6569_v17 = vpack.c.bf16 %v1425_v10, %v1425_v10  ;;  %v1298_v19 = vpop.f32.mrf.mxu3  ;;  %v1261_v20 = vpop.f32.mrf.mxu0  ;;  %3081 = vmatpush.bf16.msrb.mxu3 %v5335_v5  ;;  %v4875_v3 = vor.u32 %v5805_v0, %v4872_v2  ;;  %v5765_v5 = vld [vmem:[#allocation10 + $0x264] sm:$0xf]  ;;  %v539_v10 = vperm.slane %v6549_v43, 4 }
 0x110   : > { %v1299_v30 = vadd.f32 %v1298_v19, %v1286_v18  ;;  %3070 = vmatpush.bf16.msrb.mxu2 %v5175_v14  ;;  %v4715_v7 = vor.u32 %v5765_v5, %v4712_v6  ;;  %v5801_v8 = vld [vmem:[#allocation10 + $0x384] sm:$0xf]  ;;  %v4696_v14 = vld [vmem:[#allocation10 + $0x250] sm:$0xf0] }
 0x111   : > { %3103 = vmatpush.bf16.msra.mxu1 %v4635_v24  ;;  %v5318_v24 = vld [vmem:[#allocation10 + $0x720] sm:$0xf]  ;;  %v1274_v25 = vpop.f32.mrf.mxu1  ;;  %3019 = vmatmul.bf16.vlgmr.msra.gmra.mxu2 %v6569_v17  ;;  %v4859_v11 = vor.u32 %v5801_v8, %v4856_v9  ;;  %v4840_v18 = vld [vmem:[#allocation10 + $0x370] sm:$0xf0]  ;;  %v5877_v52 = vld [vmem:[#allocation10 + $0x5e4] sm:$0xf] }
 0x112   : > { %vm1409_vm3 = vcmp.ge.f32.partialorder %v1299_v30, 0.0  ;;  %v1418_v36 = vmul.f32 %v6556_v12, %v1299_v30  ;;  %v4843_v22 = vor.u32 %v5797_v16, %v4840_v18  ;;  %v5873_v5 = vld [vmem:[#allocation10 + $0x5c4] sm:$0xf]  ;;  %v5144_v6 = vld [vmem:[#allocation10 + $0x5d0] sm:$0xf0] }
 0x113   : > { %3091 = vmatpush.bf16.msra.mxu0 %v4491_v31  ;;  %v5319_v31 = vor.u32 %v5919_v27, %v5318_v24  ;;  %v4680_v24 = vld [vmem:[#allocation10 + $0x230] sm:$0xf0]  ;;  %v5793_v27 = vld [vmem:[#allocation10 + $0x344] sm:$0xf] }
 0x114   : > { %3115 = vmatpush.bf16.msra.mxu2 %v4779_v26  ;;  %v1426_v45 = vsel %vm1409_vm3, %v1299_v30, %v1418_v36  ;;  %v5845_v30 = vld [vmem:[#allocation10 + $0x4e4] sm:$0xf]  ;;  %v4827_v33 = vor.u32 %v5793_v27, %v4824_v28  ;;  %v4984_v9 = vld [vmem:[#allocation10 + $0x490] sm:$0xf0] }
 0x115   : > { %3104 = vmatpush.bf16.msra.mxu1 %v4619_v34  ;;  %v5777_v34 = vld [vmem:[#allocation10 + $0x2c4] sm:$0xf]  ;;  %3082 = vmatpush.bf16.msrb.mxu3 %v5319_v31  ;;  %v6573_v48 = vpack.c.bf16 %v1426_v45, %v1426_v45  ;;  %v1287_v49 = vpop.f32.mrf.mxu2  ;;  %v5032_v31 = vld [vmem:[#allocation10 + $0x4f0] sm:$0xf0] }
 0x116   : > { %v4763_v40 = vor.u32 %v5777_v34, %v4760_v35  ;;  %v5753_v34 = vld [vmem:[#allocation10 + $0x204] sm:$0xf]  ;;  %v4664_v35 = vld [vmem:[#allocation10 + $0x210] sm:$0xf0] }
 0x117   : > { %3092 = vmatpush.bf16.msra.mxu0 %v4475_v42  ;;  %v5915_v42 = vld [vmem:[#allocation10 + $0x70c] sm:$0xf0]  ;;  %v1300_v54 = vpop.f32.mrf.mxu3  ;;  %3032 = vmatmul.bf16.vlgmr.msra.gmra.mxu3 %v6573_v48  ;;  %v4667_v36 = vor.u32 %v5753_v34, %v4664_v35  ;;  %v5016_v45 = vld [vmem:[#allocation10 + $0x4d0] sm:$0xf0]  ;;  %v5833_v8 = vld [vmem:[#allocation10 + $0x484] sm:$0xf] }
 0x118   : > { %v5303_v4 = vor.u32 %v5915_v42, %v5302_v41  ;;  %3116 = vmatpush.bf16.msra.mxu2 %v4763_v40  ;;  %v5035_v40 = vor.u32 %v5845_v30, %v5032_v31  ;;  %v5841_v41 = vld [vmem:[#allocation10 + $0x4c4] sm:$0xf]  ;;  %v5160_v54 = vld [vmem:[#allocation10 + $0x5f0] sm:$0xf0] }
 0x119   : > { %3105 = vmatpush.bf16.msra.mxu1 %v4603_v46  ;;  %v5813_v46 = vld [vmem:[#allocation10 + $0x3e4] sm:$0xf]  ;;  %v5019_v53 = vor.u32 %v5841_v41, %v5016_v45  ;;  %v4968_v16 = vld [vmem:[#allocation10 + $0x470] sm:$0xf0] }
 0x11a   : > { %v4907_v51 = vor.u32 %v5813_v46, %v4904_v47  ;;  %3083 = vmatpush.bf16.msrb.mxu3 %v5303_v4  ;;  %v5789_v46 = vld [vmem:[#allocation10 + $0x324] sm:$0xf]  ;;  %v4808_v47 = vld [vmem:[#allocation10 + $0x330] sm:$0xf0] }
 0x11b   : > { %3093 = vmatpush.bf16.msra.mxu0 %v4459_v58  ;;  %v4888_v58 = vld [vmem:[#allocation10 + $0x3d0] sm:$0xf0]  ;;  %v5861_v27 = vld [vmem:[#allocation10 + $0x564] sm:$0xf] }
 0x11c   : > { %v4891_v59 = vor.u32 %v5809_v57, %v4888_v58  ;;  %3117 = vmatpush.bf16.msra.mxu2 %v4747_v56  ;;  %v4792_v56 = vld [vmem:[#allocation10 + $0x310] sm:$0xf0]  ;;  %v5837_v58 = vld [vmem:[#allocation10 + $0x4a4] sm:$0xf] }
 0x11d   : > { %3106 = vmatpush.bf16.msra.mxu1 %v4587_v62  ;;  %v4731_v62 = vor.u32 %v5769_v60, %v4728_v61  ;;  %v5096_v28 = vld [vmem:[#allocation10 + $0x570] sm:$0xf0]  ;;  %v5817_v41 = vld [vmem:[#allocation10 + $0x404] sm:$0xf] }
 0x11e   : > { %3128 = vmatpush.bf16.msra.mxu3 %v4907_v51  ;;  %v4936_v30 = vld [vmem:[#allocation10 + $0x430] sm:$0xf0]  ;;  %v5099_v34 = vor.u32 %v5861_v27, %v5096_v28 }
 0x11f   : > { %3094 = vmatpush.bf16.msra.mxu0 %v4443_v13  ;;  %v5761_v13 = vld [vmem:[#allocation10 + $0x244] sm:$0xf]  ;;  %v5288_v45 = vld [vmem:[#allocation10 + $0x6f0] sm:$0xf0] }
 0x120   : > { %3118 = vmatpush.bf16.msra.mxu2 %v4731_v62  ;;  %v4699_v15 = vor.u32 %v5761_v13, %v4696_v14  ;;  %v5163_v62 = vor.u32 %v5877_v52, %v5160_v54  ;;  %v5869_v13 = vld [vmem:[#allocation10 + $0x5a4] sm:$0xf]  ;;  %v5128_v14 = vld [vmem:[#allocation10 + $0x5b0] sm:$0xf0] }
 0x121   : > { %3107 = vmatpush.bf16.msra.mxu1 %v4571_v23  ;;  %v5757_v23 = vld [vmem:[#allocation10 + $0x224] sm:$0xf]  ;;  %v5131_v18 = vor.u32 %v5869_v13, %v5128_v14  ;;  %v5400_v27 = vld [vmem:[#allocation10 + $0x7d0] sm:$0xf0] }
 0x122   : > { %3129 = vmatpush.bf16.msra.mxu3 %v4891_v59  ;;  %v4683_v25 = vor.u32 %v5757_v23, %v4680_v24  ;;  %v5000_v59 = vld [vmem:[#allocation10 + $0x4b0] sm:$0xf0] }
 0x123   : > { %3095 = vmatpush.bf16.msra.mxu0 %v4427_v32  ;;  %v5003_v2 = vor.u32 %v5837_v58, %v5000_v59  ;;  %v4952_v23 = vld [vmem:[#allocation10 + $0x450] sm:$0xf0] }
 0x124   : > { %3119 = vmatpush.bf16.msra.mxu2 %v4715_v7 }
 0x125   : > { %3108 = vmatpush.bf16.msra.mxu1 %v4555_v38 }
 0x126   : > { %3130 = vmatpush.bf16.msra.mxu3 %v4875_v3 }
 0x127   : > { %3096 = vmatpush.bf16.msra.mxu0 %v4411_v50  ;;  %v1311_v19 = vpop.f32.mrf.mxu0  ;;  %v4811_v50 = vor.u32 %v5789_v46, %v4808_v47  ;;  %v5720_v46 = vld [vmem:[#allocation10 + $0xf4] sm:$0xf0] }
 0x128   : > { %v1312_v20 = vadd.f32 %v1311_v19, %v539_v10  ;;  %3120 = vmatpush.bf16.msra.mxu2 %v4699_v15  ;;  %v5147_v10 = vor.u32 %v5873_v5, %v5144_v6  ;;  %v5829_v15 = vld [vmem:[#allocation10 + $0x464] sm:$0xf] }
 0x129   : > { %3109 = vmatpush.bf16.msra.mxu1 %v4539_v55  ;;  %v1324_v21 = vpop.f32.mrf.mxu1  ;;  %v5785_v55 = vld [vmem:[#allocation10 + $0x304] sm:$0xf]  ;;  %v4971_v19 = vor.u32 %v5829_v15, %v4968_v16  ;;  %v5752_v15 = vld [vmem:[#allocation10 + $0x1f4] sm:$0xf0] }
 0x12a   : > { %3131 = vmatpush.bf16.msra.mxu3 %v4859_v11  ;;  %v1325_v26 = vadd.f32 %v1324_v21, %v1312_v20  ;;  %v4795_v60 = vor.u32 %v5785_v55, %v4792_v56  ;;  %v4987_v11 = vor.u32 %v5833_v8, %v4984_v9  ;;  %v5865_v20 = vld [vmem:[#allocation10 + $0x584] sm:$0xf]  ;;  %v5112_v21 = vld [vmem:[#allocation10 + $0x590] sm:$0xf0] }
 0x12b   : > { %v5115_v24 = vor.u32 %v5865_v20, %v5112_v21  ;;  %v5905_v56 = vld [vmem:[#allocation10 + $0x6c4] sm:$0xf]  ;;  %v4494_v20 = vld [vmem:[#allocation10 + $0xa8] sm:$0xf]  ;;  %v5712_v21 = vld [vmem:[#allocation10 + $0xb4] sm:$0xf0] }
 0x12c   : > { %vm1410_vm4 = vcmp.ge.f32.partialorder %v1325_v26, 0.0  ;;  %v1419_v32 = vmul.f32 %v6556_v12, %v1325_v26  ;;  %3121 = vmatpush.bf16.msra.mxu2 %v4683_v25  ;;  %v541_v25 = vperm.slane %v6549_v43, 6  ;;  %v5849_v6 = vld [vmem:[#allocation10 + $0x504] sm:$0xf] }
 0x12d   : > { %v1337_v38 = vpop.f32.mrf.mxu2  ;;  %v5941_v9 = vld [vmem:[#allocation10 + $0x7e4] sm:$0xf] }
 0x12e   : > { %3132 = vmatpush.bf16.msra.mxu3 %v4843_v22  ;;  %v1427_v37 = vsel %vm1410_vm4, %v1325_v26, %v1419_v32  ;;  %v1338_v1 = vadd.f32 %v1337_v38, %v540_v29  ;;  %v5825_v22 = vld [vmem:[#allocation10 + $0x444] sm:$0xf]  ;;  %v5080_v38 = vld [vmem:[#allocation10 + $0x550] sm:$0xf0] }
 0x12f   : > { %v6579_v42 = vpack.c.bf16 %v1427_v37, %v1427_v37  ;;  %v1350_v44 = vpop.f32.mrf.mxu3  ;;  %v1313_v4 = vpop.f32.mrf.mxu0  ;;  %v4955_v26 = vor.u32 %v5825_v22, %v4952_v23  ;;  %v5821_v29 = vld [vmem:[#allocation10 + $0x424] sm:$0xf] }
 0x130   : > { %v1351_v51 = vadd.f32 %v1350_v44, %v1338_v1  ;;  %3122 = vmatpush.bf16.msra.mxu2 %v4667_v36  ;;  %v4939_v35 = vor.u32 %v5821_v29, %v4936_v30  ;;  %v542_v36 = vperm.slane %v6549_v43, 7  ;;  %v5857_v37 = vld [vmem:[#allocation10 + $0x544] sm:$0xf]  ;;  %v4920_v1 = vld [vmem:[#allocation10 + $0x410] sm:$0xf0] }
 0x131   : > { %v1326_v49 = vpop.f32.mrf.mxu1  ;;  %3045 = vmatmul.bf16.vlgmr.msrb.gmra.mxu0 %v6579_v42  ;;  %v5909_v44 = vld [vmem:[#allocation10 + $0x6e4] sm:$0xf]  ;;  %v4526_v4 = vld [vmem:[#allocation10 + $0xe8] sm:$0xf]  ;;  %v5064_v43 = vld [vmem:[#allocation10 + $0x530] sm:$0xf0] }
 0x132   : > { %3133 = vmatpush.bf16.msra.mxu3 %v4827_v33  ;;  %3141 = vmatpush.bf16.msrb.mxu0 %v5035_v40  ;;  %vm1411_vm5 = vcmp.ge.f32.partialorder %v1351_v51, 0.0  ;;  %v1420_v57 = vmul.f32 %v6556_v12, %v1351_v51  ;;  %v5083_v49 = vor.u32 %v5857_v37, %v5080_v38  ;;  %v5291_v54 = vor.u32 %v5909_v44, %v5288_v45  ;;  %v5901_v16 = vld [vmem:[#allocation10 + $0x6a4] sm:$0xf]  ;;  %v5708_v37 = vld [vmem:[#allocation10 + $0x94] sm:$0xf0] }
 0x133   : > { %v4527_v55 = vor.u32 %v5720_v46, %v4526_v4  ;;  %v5384_v45 = vld [vmem:[#allocation10 + $0x7b0] sm:$0xf0]  ;;  %v4622_v4 = vld [vmem:[#allocation10 + $0x1a8] sm:$0xf]  ;;  %v5744_v46 = vld [vmem:[#allocation10 + $0x1b4] sm:$0xf0] }
 0x134   : > { %v1428_v61 = vsel %vm1411_vm5, %v1351_v51, %v1420_v57  ;;  %v5853_v51 = vld [vmem:[#allocation10 + $0x524] sm:$0xf] }
 0x135   : > { %v6583_v0 = vpack.c.bf16 %v1428_v61, %v1428_v61  ;;  %v1339_v3 = vpop.f32.mrf.mxu2  ;;  %v5272_v61 = vld [vmem:[#allocation10 + $0x6d0] sm:$0xf0]  ;;  %v5067_v5 = vor.u32 %v5853_v51, %v5064_v43 }
 0x136   : > { %3134 = vmatpush.bf16.msra.mxu3 %v4811_v50  ;;  %3142 = vmatpush.bf16.msrb.mxu0 %v5019_v53  ;;  %v4923_v50 = vor.u32 %v5817_v41, %v4920_v1  ;;  %v5275_v13 = vor.u32 %v5905_v56, %v5272_v61  ;;  %v5933_v41 = vld [vmem:[#allocation10 + $0x7a4] sm:$0xf]  ;;  %v5224_v51 = vld [vmem:[#allocation10 + $0x670] sm:$0xf0]  ;;  %v4606_v56 = vld [vmem:[#allocation10 + $0x188] sm:$0xf] }
 0x137   : > { %v1352_v7 = vpop.f32.mrf.mxu3  ;;  %3058 = vmatmul.bf16.vlgmr.msrb.gmra.mxu1 %v6583_v0  ;;  %v5387_v43 = vor.u32 %v5933_v41, %v5384_v45  ;;  %v5700_v61 = vld [vmem:[#allocation10 + $0x54] sm:$0xf0] }
 0x138   : > { %3154 = vmatpush.bf16.msrb.mxu1 %v5163_v62  ;;  %v4510_v62 = vld [vmem:[#allocation10 + $0xc8] sm:$0xf]  ;;  %v5048_v7 = vld [vmem:[#allocation10 + $0x510] sm:$0xf0]  ;;  %v5728_v41 = vld [vmem:[#allocation10 + $0x134] sm:$0xf0] }
 0x139   : > { %v5051_v22 = vor.u32 %v5849_v6, %v5048_v7  ;;  %v5925_v6 = vld [vmem:[#allocation10 + $0x764] sm:$0xf] }
 0x13a   : > { %3135 = vmatpush.bf16.msra.mxu3 %v4795_v60  ;;  %3143 = vmatpush.bf16.msrb.mxu0 %v5003_v2  ;;  %v5716_v2 = vld [vmem:[#allocation10 + $0xd4] sm:$0xf0] }
 0x13b   : > { %v4511_v14 = vor.u32 %v5716_v2, %v4510_v62  ;;  %v5889_v62 = vld [vmem:[#allocation10 + $0x644] sm:$0xf]  ;;  %v5208_v2 = vld [vmem:[#allocation10 + $0x650] sm:$0xf0] }
 0x13c   : > { %3155 = vmatpush.bf16.msrb.mxu1 %v5147_v10  ;;  %v5416_v10 = vld [vmem:[#allocation10 + $0x7f0] sm:$0xf0] }
 0x13e   : > { %3144 = vmatpush.bf16.msrb.mxu0 %v4987_v11  ;;  %v4654_v11 = vld [vmem:[#allocation10 + $0x1e8] sm:$0xf] }
 0x140   : > { %3156 = vmatpush.bf16.msrb.mxu1 %v5131_v18  ;;  %v5256_v18 = vld [vmem:[#allocation10 + $0x6b0] sm:$0xf0] }
 0x141   : > { %3097 = vmatmul.bf16.vlgmr.msra.gmra.mxu0 %v6559_v39  ;;  %v5259_v30 = vor.u32 %v5901_v16, %v5256_v18  ;;  %v5192_v16 = vld [vmem:[#allocation10 + $0x630] sm:$0xf0] }
 0x142   : > { %3145 = vmatpush.bf16.msrb.mxu0 %v4971_v19 }
 0x144   : > { %3157 = vmatpush.bf16.msrb.mxu1 %v5115_v24  ;;  %v5419_v24 = vor.u32 %v5941_v9, %v5416_v10  ;;  %v4590_v9 = vld [vmem:[#allocation10 + $0x168] sm:$0xf]  ;;  %v5736_v10 = vld [vmem:[#allocation10 + $0x174] sm:$0xf0] }
 0x146   : > { %3146 = vmatpush.bf16.msrb.mxu0 %v4955_v26  ;;  %v5937_v26 = vld [vmem:[#allocation10 + $0x7c4] sm:$0xf] }
 0x147   : > { %v1363_v31 = vpop.f32.mrf.mxu0  ;;  %3110 = vmatmul.bf16.vlgmr.msra.gmra.mxu1 %v6563_v63  ;;  %v5403_v38 = vor.u32 %v5937_v26, %v5400_v27  ;;  %v5881_v26 = vld [vmem:[#allocation10 + $0x604] sm:$0xf]  ;;  %v4414_v27 = vld [vmem:[#allocation10 + $0x8] sm:$0xf] }
 0x148   : > { %v1364_v32 = vadd.f32 %v1363_v31, %v541_v25  ;;  %3158 = vmatpush.bf16.msrb.mxu1 %v5099_v34  ;;  %v4655_v25 = vor.u32 %v5752_v15, %v4654_v11  ;;  %v4495_v31 = vor.u32 %v5712_v21, %v4494_v20  ;;  %v5211_v11 = vor.u32 %v5889_v62, %v5208_v2  ;;  %v5885_v15 = vld [vmem:[#allocation10 + $0x624] sm:$0xf]  ;;  %v5006_v62 = vld [vmem:[#allocation10 + $0x4a8] sm:$0xf]  ;;  %v5840_v2 = vld [vmem:[#allocation10 + $0x4b4] sm:$0xf0] }
 0x149   : > { %v1376_v33 = vpop.f32.mrf.mxu1  ;;  %v5921_v20 = vld [vmem:[#allocation10 + $0x744] sm:$0xf] }
 0x14a   : > { %v1377_v40 = vadd.f32 %v1376_v33, %v1364_v32  ;;  %3147 = vmatpush.bf16.msrb.mxu0 %v4939_v35  ;;  %v4638_v32 = vld [vmem:[#allocation10 + $0x1c8] sm:$0xf]  ;;  %v5897_v33 = vld [vmem:[#allocation10 + $0x684] sm:$0xf]  ;;  %v5240_v35 = vld [vmem:[#allocation10 + $0x690] sm:$0xf0] }
 0x14b   : > { %v5243_v1 = vor.u32 %v5897_v33, %v5240_v35  ;;  %v5784_v35 = vld [vmem:[#allocation10 + $0x2f4] sm:$0xf0] }
 0x14c   : > { %vm1412_vm6 = vcmp.ge.f32.partialorder %v1377_v40, 0.0  ;;  %v1421_v47 = vmul.f32 %v6556_v12, %v1377_v40  ;;  %3159 = vmatpush.bf16.msrb.mxu1 %v5083_v49  ;;  %v5704_v49 = vld [vmem:[#allocation10 + $0x74] sm:$0xf0] }
 0x14d   : > { %v1389_v53 = vpop.f32.mrf.mxu2 }
 0x14e   : > { %v1429_v52 = vsel %vm1412_vm6, %v1377_v40, %v1421_v47  ;;  %v1390_v58 = vadd.f32 %v1389_v53, %v542_v36  ;;  %3148 = vmatpush.bf16.msrb.mxu0 %v4923_v50  ;;  %v4478_v36 = vld [vmem:[#allocation10 + $0x88] sm:$0xf]  ;;  %v5893_v50 = vld [vmem:[#allocation10 + $0x664] sm:$0xf] }
 0x14f   : > { %v6591_v57 = vpack.c.bf16 %v1429_v52, %v1429_v52  ;;  %v1402_v59 = vpop.f32.mrf.mxu3  ;;  %v1365_v60 = vpop.f32.mrf.mxu0  ;;  %v4479_v44 = vor.u32 %v5708_v37, %v4478_v36  ;;  %v4462_v47 = vld [vmem:[#allocation10 + $0x68] sm:$0xf]  ;;  %v4623_v52 = vor.u32 %v5744_v46, %v4622_v4  ;;  %v5929_v53 = vld [vmem:[#allocation10 + $0x784] sm:$0xf] }
 0x150   : > { %v1403_v8 = vadd.f32 %v1402_v59, %v1390_v58  ;;  %3160 = vmatpush.bf16.msrb.mxu1 %v5067_v5  ;;  %v5740_v58 = vld [vmem:[#allocation10 + $0x194] sm:$0xf0]  ;;  %v5227_v59 = vor.u32 %v5893_v50, %v5224_v51  ;;  %v4446_v60 = vld [vmem:[#allocation10 + $0x48] sm:$0xf]  ;;  %v5917_v36 = vld [vmem:[#allocation10 + $0x724] sm:$0xf] }
 0x151   : > { %v1378_v3 = vpop.f32.mrf.mxu1  ;;  %3071 = vmatmul.bf16.vlgmr.msrb.gmra.mxu2 %v6591_v57  ;;  %3149 = vmatmul.bf16.vlgmr.msrb.gmra.mxu0 %v6579_v42  ;;  %v4607_v5 = vor.u32 %v5740_v58, %v4606_v56  ;;  %v4447_v7 = vor.u32 %v5700_v61, %v4446_v60  ;;  %v4766_v4 = vld [vmem:[#allocation10 + $0x2c8] sm:$0xf]  ;;  %v5780_v51 = vld [vmem:[#allocation10 + $0x2d4] sm:$0xf0] }
 0x152   : > { %3167 = vmatpush.bf16.msrb.mxu2 %v5291_v54  ;;  %3193 = vmatpush.bf16.msra.mxu0 %v4527_v55  ;;  %vm1413_vm7 = vcmp.ge.f32.partialorder %v1403_v8, 0.0  ;;  %v1422_v19 = vmul.f32 %v6556_v12, %v1403_v8  ;;  %v5748_v12 = vld [vmem:[#allocation10 + $0x1d4] sm:$0xf0]  ;;  %v4463_v54 = vor.u32 %v5704_v49, %v4462_v47  ;;  %v5368_v55 = vld [vmem:[#allocation10 + $0x790] sm:$0xf0]  ;;  %v4767_v61 = vor.u32 %v5780_v51, %v4766_v4 }
 0x153   : > { %v4639_v40 = vor.u32 %v5748_v12, %v4638_v32  ;;  %v5371_v3 = vor.u32 %v5929_v53, %v5368_v55  ;;  %v5848_v32 = vld [vmem:[#allocation10 + $0x4f4] sm:$0xf0]  ;;  %v5022_v46 = vld [vmem:[#allocation10 + $0x4c8] sm:$0xf] }
 0x154   : > { %v1430_v23 = vsel %vm1413_vm7, %v1403_v8, %v1422_v19  ;;  %3161 = vmatpush.bf16.msrb.mxu1 %v5051_v22  ;;  %v5352_v8 = vld [vmem:[#allocation10 + $0x770] sm:$0xf0]  ;;  %v4591_v19 = vor.u32 %v5736_v10, %v4590_v9  ;;  %v5844_v47 = vld [vmem:[#allocation10 + $0x4d4] sm:$0xf0]  ;;  %v4542_v53 = vld [vmem:[#allocation10 + $0x108] sm:$0xf] }
 0x155   : > { %v6596_v28 = vpack.c.bf16 %v1430_v23, %v1430_v23  ;;  %v1391_v29 = vpop.f32.mrf.mxu2  ;;  %v5355_v18 = vor.u32 %v5925_v6, %v5352_v8  ;;  %v5336_v22 = vld [vmem:[#allocation10 + $0x750] sm:$0xf0]  ;;  %v4574_v23 = vld [vmem:[#allocation10 + $0x148] sm:$0xf]  ;;  %v5023_v56 = vor.u32 %v5844_v47, %v5022_v46  ;;  %v5816_v58 = vld [vmem:[#allocation10 + $0x3f4] sm:$0xf0] }
 0x156   : > { %3168 = vmatpush.bf16.msrb.mxu2 %v5275_v13  ;;  %3194 = vmatpush.bf16.msra.mxu0 %v4511_v14  ;;  %v4430_v13 = vld [vmem:[#allocation10 + $0x28] sm:$0xf]  ;;  %v5696_v14 = vld [vmem:[#allocation10 + $0x34] sm:$0xf0]  ;;  %v5339_v12 = vor.u32 %v5921_v20, %v5336_v22 }
 0x157   : > { %v1404_v34 = vpop.f32.mrf.mxu3  ;;  %3084 = vmatmul.bf16.vlgmr.msrb.gmra.mxu3 %v6596_v28  ;;  %3162 = vmatmul.bf16.vlgmr.msrb.gmra.mxu1 %v6583_v0  ;;  %v4431_v21 = vor.u32 %v5696_v14, %v4430_v13  ;;  %v5692_v29 = vld [vmem:[#allocation10 + $0x14] sm:$0xf0]  ;;  %v4910_v55 = vld [vmem:[#allocation10 + $0x3e8] sm:$0xf] }
 0x158   : > { %3180 = vmatpush.bf16.msrb.mxu3 %v5419_v24  ;;  %3206 = vmatpush.bf16.msra.mxu1 %v4655_v25  ;;  %v5732_v24 = vld [vmem:[#allocation10 + $0x154] sm:$0xf0]  ;;  %v5195_v25 = vor.u32 %v5885_v15, %v5192_v16  ;;  %v4782_v34 = vld [vmem:[#allocation10 + $0x2e8] sm:$0xf]  ;;  %v4415_v37 = vor.u32 %v5692_v29, %v4414_v27  ;;  %v4911_v8 = vor.u32 %v5816_v58, %v4910_v55 }
 0x159   : > { %v4575_v33 = vor.u32 %v5732_v24, %v4574_v23  ;;  %v4783_v45 = vor.u32 %v5784_v35, %v4782_v34  ;;  %v5880_v60 = vld [vmem:[#allocation10 + $0x5f4] sm:$0xf0]  ;;  %v4750_v6 = vld [vmem:[#allocation10 + $0x2a8] sm:$0xf] }
 0x15a   : > { %3169 = vmatpush.bf16.msrb.mxu2 %v5259_v30  ;;  %3195 = vmatpush.bf16.msra.mxu0 %v4495_v31  ;;  %v5176_v30 = vld [vmem:[#allocation10 + $0x610] sm:$0xf0]  ;;  %v5038_v31 = vld [vmem:[#allocation10 + $0x4e8] sm:$0xf]  ;;  %v5812_v13 = vld [vmem:[#allocation10 + $0x3d4] sm:$0xf0] }
 0x15b   : > { %v4894_v10 = vld [vmem:[#allocation10 + $0x3c8] sm:$0xf]  ;;  %v5876_v15 = vld [vmem:[#allocation10 + $0x5d4] sm:$0xf0] }
 0x15c   : > { %3181 = vmatpush.bf16.msrb.mxu3 %v5403_v38  ;;  %3207 = vmatpush.bf16.msra.mxu1 %v4639_v40  ;;  %v5320_v38 = vld [vmem:[#allocation10 + $0x730] sm:$0xf0]  ;;  %v4558_v40 = vld [vmem:[#allocation10 + $0x128] sm:$0xf]  ;;  %v5772_v22 = vld [vmem:[#allocation10 + $0x294] sm:$0xf0]  ;;  %v4895_v23 = vor.u32 %v5812_v13, %v4894_v10 }
 0x15d   : > { %v5323_v49 = vor.u32 %v5917_v36, %v5320_v38  ;;  %v4559_v50 = vor.u32 %v5728_v41, %v4558_v40  ;;  %v5150_v14 = vld [vmem:[#allocation10 + $0x5c8] sm:$0xf]  ;;  %v5768_v35 = vld [vmem:[#allocation10 + $0x274] sm:$0xf0] }
 0x15e   : > { %3170 = vmatpush.bf16.msrb.mxu2 %v5243_v1  ;;  %3196 = vmatpush.bf16.msra.mxu0 %v4479_v44  ;;  %v5179_v1 = vor.u32 %v5881_v26, %v5176_v30  ;;  %v5039_v44 = vor.u32 %v5848_v32, %v5038_v31  ;;  %v6607_v20 = vld [vmem:[%s6709_s5] sm:$0xf]  ;;  %v5151_v24 = vor.u32 %v5876_v15, %v5150_v14  ;;  %v5808_v26 = vld [vmem:[#allocation10 + $0x3b4] sm:$0xf0] }
 0x15f   : > { %v5134_v29 = vld [vmem:[#allocation10 + $0x5a8] sm:$0xf]  ;;  %v5872_v30 = vld [vmem:[#allocation10 + $0x5b4] sm:$0xf0]  ;;  %v1697_v31 = vperm.slane %v6607_v20, 0 }
 0x160   : > { %3182 = vmatpush.bf16.msrb.mxu3 %v5387_v43  ;;  %3208 = vmatpush.bf16.msra.mxu1 %v4623_v52  ;;  %v5913_v43 = vld [vmem:[#allocation10 + $0x704] sm:$0xf]  ;;  %v5304_v52 = vld [vmem:[#allocation10 + $0x710] sm:$0xf0]  ;;  %v4718_v34 = vld [vmem:[#allocation10 + $0x268] sm:$0xf]  ;;  %v5135_v38 = vor.u32 %v5872_v30, %v5134_v29 }
 0x161   : > { %3123 = vmatmul.bf16.vlgmr.msra.gmra.mxu2 %v6569_v17  ;;  %v4862_v40 = vld [vmem:[#allocation10 + $0x388] sm:$0xf]  ;;  %v4719_v46 = vor.u32 %v5768_v35, %v4718_v34  ;;  %v5764_v51 = vld [vmem:[#allocation10 + $0x254] sm:$0xf0] }
 0x162   : > { %3197 = vmatpush.bf16.msra.mxu0 %v4463_v54  ;;  %3171 = vmatpush.bf16.msrb.mxu2 %v5227_v59  ;;  %v5724_v54 = vld [vmem:[#allocation10 + $0x114] sm:$0xf0]  ;;  %v5166_v59 = vld [vmem:[#allocation10 + $0x5e8] sm:$0xf] }
 0x163   : > { %v5167_v9 = vor.u32 %v5880_v60, %v5166_v59  ;;  %v4958_v47 = vld [vmem:[#allocation10 + $0x448] sm:$0xf]  ;;  %v5864_v59 = vld [vmem:[#allocation10 + $0x574] sm:$0xf0] }
 0x164   : > { %3183 = vmatpush.bf16.msrb.mxu3 %v5371_v3  ;;  %3209 = vmatpush.bf16.msra.mxu1 %v4607_v5  ;;  %v5307_v3 = vor.u32 %v5913_v43, %v5304_v52  ;;  %v4543_v5 = vor.u32 %v5724_v54, %v4542_v53  ;;  %v4846_v53 = vld [vmem:[#allocation10 + $0x368] sm:$0xf]  ;;  %v5860_v14 = vld [vmem:[#allocation10 + $0x554] sm:$0xf0] }
 0x165   : > { %v5102_v58 = vld [vmem:[#allocation10 + $0x568] sm:$0xf] }
 0x166   : > { %3198 = vmatpush.bf16.msra.mxu0 %v4447_v7  ;;  %3172 = vmatpush.bf16.msrb.mxu2 %v5211_v11  ;;  %v5776_v7 = vld [vmem:[#allocation10 + $0x2b4] sm:$0xf0]  ;;  %v5007_v11 = vor.u32 %v5840_v2, %v5006_v62  ;;  %v4942_v62 = vld [vmem:[#allocation10 + $0x428] sm:$0xf] }
 0x167   : > { %3136 = vmatmul.bf16.vlgmr.msra.gmra.mxu3 %v6573_v48  ;;  %v4751_v16 = vor.u32 %v5776_v7, %v4750_v6  ;;  %v5824_v2 = vld [vmem:[#allocation10 + $0x434] sm:$0xf0]  ;;  %v5086_v13 = vld [vmem:[#allocation10 + $0x548] sm:$0xf] }
 0x168   : > { %3184 = vmatpush.bf16.msrb.mxu3 %v5355_v18  ;;  %3210 = vmatpush.bf16.msra.mxu1 %v4591_v19  ;;  %v4990_v18 = vld [vmem:[#allocation10 + $0x488] sm:$0xf]  ;;  %v5836_v19 = vld [vmem:[#allocation10 + $0x494] sm:$0xf0]  ;;  %v4943_v10 = vor.u32 %v5824_v2, %v4942_v62 }
 0x169   : > { %v4991_v27 = vor.u32 %v5836_v19, %v4990_v18  ;;  %v4926_v18 = vld [vmem:[#allocation10 + $0x408] sm:$0xf]  ;;  %v5820_v19 = vld [vmem:[#allocation10 + $0x414] sm:$0xf0] }
 0x16a   : > { %3199 = vmatpush.bf16.msra.mxu0 %v4431_v21  ;;  %3173 = vmatpush.bf16.msrb.mxu2 %v5195_v25  ;;  %v4734_v21 = vld [vmem:[#allocation10 + $0x288] sm:$0xf]  ;;  %v5904_v2 = vld [vmem:[#allocation10 + $0x6b4] sm:$0xf0] }
 0x16b   : > { %v4878_v25 = vld [vmem:[#allocation10 + $0x3a8] sm:$0xf]  ;;  %v4735_v32 = vor.u32 %v5772_v22, %v4734_v21  ;;  %v5756_v21 = vld [vmem:[#allocation10 + $0x214] sm:$0xf0]  ;;  %v5718_v22 = vld [vmem:[#allocation10 + $0xec] sm:$0xf] }
 0x16c   : > { %3185 = vmatpush.bf16.msrb.mxu3 %v5339_v12  ;;  %3211 = vmatpush.bf16.msra.mxu1 %v4575_v33  ;;  %v4974_v12 = vld [vmem:[#allocation10 + $0x468] sm:$0xf]  ;;  %v5832_v33 = vld [vmem:[#allocation10 + $0x474] sm:$0xf0] }
 0x16d   : > { %v4975_v41 = vor.u32 %v5832_v33, %v4974_v12  ;;  %v4814_v29 = vld [vmem:[#allocation10 + $0x328] sm:$0xf]  ;;  %v5856_v33 = vld [vmem:[#allocation10 + $0x534] sm:$0xf0] }
 0x16e   : > { %3200 = vmatpush.bf16.msra.mxu0 %v4415_v37  ;;  %3174 = vmatpush.bf16.msrb.mxu2 %v5179_v1  ;;  %v4879_v37 = vor.u32 %v5808_v26, %v4878_v25  ;;  %v5804_v1 = vld [vmem:[#allocation10 + $0x394] sm:$0xf0]  ;;  %v5087_v25 = vor.u32 %v5860_v14, %v5086_v13  ;;  %v5294_v26 = vld [vmem:[#allocation10 + $0x6e8] sm:$0xf] }
 0x16f   : > { %v4863_v43 = vor.u32 %v5804_v1, %v4862_v40  ;;  %v5070_v12 = vld [vmem:[#allocation10 + $0x528] sm:$0xf]  ;;  %v4512_v40 = vld [vmem:[#allocation10 + $0xd8] sm:$0xf0] }
 0x170   : > { %3186 = vmatpush.bf16.msrb.mxu3 %v5323_v49  ;;  %3212 = vmatpush.bf16.msra.mxu1 %v4559_v50  ;;  %v5828_v49 = vld [vmem:[#allocation10 + $0x454] sm:$0xf0]  ;;  %v4702_v50 = vld [vmem:[#allocation10 + $0x248] sm:$0xf]  ;;  %v5071_v1 = vor.u32 %v5856_v33, %v5070_v12 }
 0x171   : > { %3201 = vmatmul.bf16.vlgmr.msra.gmra.mxu0 %v6559_v39  ;;  %3175 = vmatmul.bf16.vlgmr.msrb.gmra.mxu2 %v6591_v57  ;;  %v2994_v36 = vpop.f32.mrf.mxu0  ;;  %v4959_v55 = vor.u32 %v5828_v49, %v4958_v47  ;;  %v5852_v47 = vld [vmem:[#allocation10 + $0x514] sm:$0xf0]  ;;  %v5422_v49 = vld [vmem:[#allocation10 + $0x7e8] sm:$0xf] }
 0x172   : > { %3245 = vmatpush.bf16.msrb.mxu0 %v5039_v44  ;;  %3219 = vmatpush.bf16.msra.mxu2 %v4783_v45  ;;  %v5118_v44 = vld [vmem:[#allocation10 + $0x588] sm:$0xf]  ;;  %v5868_v45 = vld [vmem:[#allocation10 + $0x594] sm:$0xf0]  ;;  %v2995_v4 = vadd.f32 %v2994_v36, %v1697_v31  ;;  %v4927_v31 = vor.u32 %v5820_v19, %v4926_v18 }
 0x173   : > { %v5119_v52 = vor.u32 %v5868_v45, %v5118_v44  ;;  %v5908_v44 = vld [vmem:[#allocation10 + $0x6d4] sm:$0xf0]  ;;  %v4798_v45 = vld [vmem:[#allocation10 + $0x308] sm:$0xf] }
 0x174   : > { %3187 = vmatpush.bf16.msrb.mxu3 %v5307_v3  ;;  %3213 = vmatpush.bf16.msra.mxu1 %v4543_v5  ;;  %v4686_v3 = vld [vmem:[#allocation10 + $0x228] sm:$0xf]  ;;  %v5760_v5 = vld [vmem:[#allocation10 + $0x234] sm:$0xf0] }
 0x175   : > { %v4687_v15 = vor.u32 %v5760_v5, %v4686_v3  ;;  %v5262_v62 = vld [vmem:[#allocation10 + $0x6a8] sm:$0xf]  ;;  %v5932_v33 = vld [vmem:[#allocation10 + $0x794] sm:$0xf0] }
 0x176   : > { %3246 = vmatpush.bf16.msrb.mxu0 %v5023_v56  ;;  %3220 = vmatpush.bf16.msra.mxu2 %v4767_v61  ;;  %v5800_v56 = vld [vmem:[#allocation10 + $0x374] sm:$0xf0]  ;;  %v4703_v61 = vor.u32 %v5764_v51, %v4702_v50  ;;  %v5406_v3 = vld [vmem:[#allocation10 + $0x7c8] sm:$0xf] }
 0x177   : > { %3214 = vmatmul.bf16.vlgmr.msra.gmra.mxu1 %v6563_v63  ;;  %3188 = vmatmul.bf16.vlgmr.msrb.gmra.mxu3 %v6596_v28  ;;  %v4847_v7 = vor.u32 %v5800_v56, %v4846_v53  ;;  %v5944_v51 = vld [vmem:[#allocation10 + $0x7f4] sm:$0xf0]  ;;  %v5390_v18 = vld [vmem:[#allocation10 + $0x7a8] sm:$0xf] }
 0x178   : > { %3232 = vmatpush.bf16.msra.mxu3 %v4911_v8  ;;  %3258 = vmatpush.bf16.msrb.mxu1 %v5167_v9  ;;  %v5103_v8 = vor.u32 %v5864_v59, %v5102_v58  ;;  %v4830_v9 = vld [vmem:[#allocation10 + $0x348] sm:$0xf]  ;;  %v5423_v59 = vor.u32 %v5944_v51, %v5422_v49  ;;  %v5734_v49 = vld [vmem:[#allocation10 + $0x16c] sm:$0xf] }
 0x179   : > { %v3007_v54 = vpop.f32.mrf.mxu1  ;;  %v2996_v6 = vpop.f32.mrf.mxu0  ;;  %v5694_v51 = vld [vmem:[#allocation10 + $0x2c] sm:$0xf] }
 0x17a   : > { %3247 = vmatpush.bf16.msrb.mxu0 %v5007_v11  ;;  %3221 = vmatpush.bf16.msra.mxu2 %v4751_v16  ;;  %v6612_v60 = vadd.f32 %v3007_v54, %v2995_v4  ;;  %v5796_v11 = vld [vmem:[#allocation10 + $0x354] sm:$0xf0]  ;;  %v4670_v16 = vld [vmem:[#allocation10 + $0x208] sm:$0xf]  ;;  %v5710_v54 = vld [vmem:[#allocation10 + $0xac] sm:$0xf] }
 0x17b   : > { %v4671_v34 = vor.u32 %v5756_v21, %v4670_v16  ;;  %v5788_v4 = vld [vmem:[#allocation10 + $0x314] sm:$0xf0] }
 0x17c   : > { %3233 = vmatpush.bf16.msra.mxu3 %v4895_v23  ;;  %3259 = vmatpush.bf16.msrb.mxu1 %v5151_v24  ;;  %v4528_v23 = vld [vmem:[#allocation10 + $0xf8] sm:$0xf0]  ;;  %v4831_v24 = vor.u32 %v5796_v11, %v4830_v9  ;;  %v4799_v56 = vor.u32 %v5788_v4, %v4798_v45  ;;  %v5940_v6 = vld [vmem:[#allocation10 + $0x7d4] sm:$0xf0]  ;;  %v5706_v9 = vld [vmem:[#allocation10 + $0x8c] sm:$0xf]  ;;  %v5263_v11 = vor.u32 %v5904_v2, %v5262_v62 }
 0x17d   : > { %v4531_v35 = vor.u32 %v5718_v22, %v4528_v23  ;;  %v5407_v13 = vor.u32 %v5940_v6, %v5406_v3  ;;  %v5900_v16 = vld [vmem:[#allocation10 + $0x694] sm:$0xf0]  ;;  %v5742_v22 = vld [vmem:[#allocation10 + $0x1ac] sm:$0xf]  ;;  %v4624_v23 = vld [vmem:[#allocation10 + $0x1b8] sm:$0xf0] }
 0x17e   : > { %3248 = vmatpush.bf16.msrb.mxu0 %v4991_v27  ;;  %3222 = vmatpush.bf16.msra.mxu2 %v4735_v32  ;;  %v5912_v27 = vld [vmem:[#allocation10 + $0x6f4] sm:$0xf0]  ;;  %v5358_v4 = vld [vmem:[#allocation10 + $0x768] sm:$0xf]  ;;  %v5730_v2 = vld [vmem:[#allocation10 + $0x14c] sm:$0xf] }
 0x17f   : > { %v5792_v32 = vld [vmem:[#allocation10 + $0x334] sm:$0xf0]  ;;  %v5295_v36 = vor.u32 %v5912_v27, %v5294_v26  ;;  %v4576_v3 = vld [vmem:[#allocation10 + $0x158] sm:$0xf0] }
 0x180   : > { %3234 = vmatpush.bf16.msra.mxu3 %v4879_v37  ;;  %3260 = vmatpush.bf16.msrb.mxu1 %v5135_v38  ;;  %v5278_v37 = vld [vmem:[#allocation10 + $0x6c8] sm:$0xf]  ;;  %v5714_v38 = vld [vmem:[#allocation10 + $0xcc] sm:$0xf]  ;;  %v5936_v21 = vld [vmem:[#allocation10 + $0x7b4] sm:$0xf0] }
 0x181   : > { %v3009_v30 = vpop.f32.mrf.mxu1  ;;  %v4515_v50 = vor.u32 %v5714_v38, %v4512_v40  ;;  %v5279_v53 = vor.u32 %v5908_v44, %v5278_v37  ;;  %v5391_v27 = vor.u32 %v5936_v21, %v5390_v18  ;;  %v5698_v37 = vld [vmem:[#allocation10 + $0x4c] sm:$0xf]  ;;  %v4448_v38 = vld [vmem:[#allocation10 + $0x58] sm:$0xf0]  ;;  %v5214_v44 = vld [vmem:[#allocation10 + $0x648] sm:$0xf] }
 0x182   : > { %3249 = vmatpush.bf16.msrb.mxu0 %v4975_v41  ;;  %3223 = vmatpush.bf16.msra.mxu2 %v4719_v46  ;;  %v4815_v41 = vor.u32 %v5792_v32, %v4814_v29  ;;  %v5054_v46 = vld [vmem:[#allocation10 + $0x508] sm:$0xf]  ;;  %v4627_v29 = vor.u32 %v5742_v22, %v4624_v23  ;;  %v5892_v45 = vld [vmem:[#allocation10 + $0x654] sm:$0xf0]  ;;  %v4416_v6 = vld [vmem:[#allocation10 + $0x18] sm:$0xf0] }
 0x183   : > { %v5055_v58 = vor.u32 %v5852_v47, %v5054_v46  ;;  %v5230_v30 = vld [vmem:[#allocation10 + $0x668] sm:$0xf]  ;;  %v4451_v46 = vor.u32 %v5698_v37, %v4448_v38  ;;  %v5928_v47 = vld [vmem:[#allocation10 + $0x774] sm:$0xf0]  ;;  %v5722_v37 = vld [vmem:[#allocation10 + $0x10c] sm:$0xf] }
 0x184   : > { %3235 = vmatpush.bf16.msra.mxu3 %v4863_v43  ;;  %3261 = vmatpush.bf16.msrb.mxu1 %v5119_v52  ;;  %v5750_v43 = vld [vmem:[#allocation10 + $0x1ec] sm:$0xf]  ;;  %v4656_v52 = vld [vmem:[#allocation10 + $0x1f8] sm:$0xf0]  ;;  %v5374_v32 = vld [vmem:[#allocation10 + $0x788] sm:$0xf] }
 0x185   : > { %v5924_v62 = vld [vmem:[#allocation10 + $0x754] sm:$0xf0]  ;;  %v5326_v21 = vld [vmem:[#allocation10 + $0x728] sm:$0xf]  ;;  %v4544_v38 = vld [vmem:[#allocation10 + $0x118] sm:$0xf0] }
 0x186   : > { %3250 = vmatpush.bf16.msrb.mxu0 %v4959_v55  ;;  %3224 = vmatpush.bf16.msra.mxu2 %v4703_v61  ;;  %v4496_v55 = vld [vmem:[#allocation10 + $0xb8] sm:$0xf0]  ;;  %v4659_v61 = vor.u32 %v5750_v43, %v4656_v52  ;;  %v5215_v52 = vor.u32 %v5892_v45, %v5214_v44  ;;  %v5920_v22 = vld [vmem:[#allocation10 + $0x734] sm:$0xf0]  ;;  %v5878_v45 = vld [vmem:[#allocation10 + $0x5ec] sm:$0xf] }
 0x187   : > { %v4499_v5 = vor.u32 %v5710_v54, %v4496_v55  ;;  %v4432_v43 = vld [vmem:[#allocation10 + $0x38] sm:$0xf0]  ;;  %v5198_v55 = vld [vmem:[#allocation10 + $0x628] sm:$0xf] }
 0x188   : > { %3236 = vmatpush.bf16.msra.mxu3 %v4847_v7  ;;  %3262 = vmatpush.bf16.msrb.mxu1 %v5103_v8  ;;  %v5746_v7 = vld [vmem:[#allocation10 + $0x1cc] sm:$0xf]  ;;  %v4640_v8 = vld [vmem:[#allocation10 + $0x1d8] sm:$0xf0] }
 0x189   : > { %v4643_v14 = vor.u32 %v5746_v7, %v4640_v8  ;;  %v4912_v44 = vld [vmem:[#allocation10 + $0x3f8] sm:$0xf0] }
 0x18a   : > { %3251 = vmatpush.bf16.msrb.mxu0 %v4943_v10  ;;  %3225 = vmatpush.bf16.msra.mxu2 %v4687_v15  ;;  %v4480_v10 = vld [vmem:[#allocation10 + $0x98] sm:$0xf0]  ;;  %v5246_v15 = vld [vmem:[#allocation10 + $0x688] sm:$0xf] }
 0x18b   : > { %v4483_v19 = vor.u32 %v5706_v9, %v4480_v10  ;;  %v5247_v26 = vor.u32 %v5900_v16, %v5246_v15  ;;  %v5846_v9 = vld [vmem:[#allocation10 + $0x4ec] sm:$0xf]  ;;  %v5040_v10 = vld [vmem:[#allocation10 + $0x4f8] sm:$0xf0]  ;;  %v5884_v15 = vld [vmem:[#allocation10 + $0x614] sm:$0xf0] }
 0x18c   : > { %3237 = vmatpush.bf16.msra.mxu3 %v4831_v24  ;;  %3263 = vmatpush.bf16.msrb.mxu1 %v5087_v25  ;;  %v5702_v24 = vld [vmem:[#allocation10 + $0x6c] sm:$0xf]  ;;  %v4464_v25 = vld [vmem:[#allocation10 + $0x78] sm:$0xf0]  ;;  %v5043_v23 = vor.u32 %v5846_v9, %v5040_v10 }
 0x18d   : > { %v4467_v12 = vor.u32 %v5702_v24, %v4464_v25  ;;  %v5782_v16 = vld [vmem:[#allocation10 + $0x2ec] sm:$0xf]  ;;  %v4560_v25 = vld [vmem:[#allocation10 + $0x138] sm:$0xf0] }
 0x18e   : > { %3252 = vmatpush.bf16.msrb.mxu0 %v4927_v31  ;;  %3226 = vmatpush.bf16.msra.mxu2 %v4671_v34  ;;  %v5896_v31 = vld [vmem:[#allocation10 + $0x674] sm:$0xf0]  ;;  %v5738_v34 = vld [vmem:[#allocation10 + $0x18c] sm:$0xf] }
 0x18f   : > { %v5231_v40 = vor.u32 %v5896_v31, %v5230_v30  ;;  %v5726_v24 = vld [vmem:[#allocation10 + $0x12c] sm:$0xf]  ;;  %v5327_v31 = vor.u32 %v5920_v22, %v5326_v21 }
 0x190   : > { %3238 = vmatpush.bf16.msra.mxu3 %v4815_v41  ;;  %3264 = vmatpush.bf16.msrb.mxu1 %v5071_v1  ;;  %v5375_v41 = vor.u32 %v5932_v33, %v5374_v32  ;;  %v5778_v32 = vld [vmem:[#allocation10 + $0x2cc] sm:$0xf]  ;;  %v5310_v33 = vld [vmem:[#allocation10 + $0x708] sm:$0xf] }
 0x191   : > { %3227 = vmatmul.bf16.vlgmr.msra.gmra.mxu2 %v6569_v17  ;;  %3253 = vmatmul.bf16.vlgmr.msrb.gmra.mxu0 %v6579_v42  ;;  %v5766_v22 = vld [vmem:[#allocation10 + $0x26c] sm:$0xf] }
 0x192   : > { %3297 = vmatpush.bf16.msra.mxu0 %v4531_v35  ;;  %3271 = vmatpush.bf16.msrb.mxu2 %v5295_v36  ;;  %v4608_v35 = vld [vmem:[#allocation10 + $0x198] sm:$0xf0] }
 0x193   : > { %v4611_v1 = vor.u32 %v5738_v34, %v4608_v35  ;;  %v4563_v34 = vor.u32 %v5726_v24, %v4560_v25  ;;  %v5916_v35 = vld [vmem:[#allocation10 + $0x714] sm:$0xf0] }
 0x194   : > { %3239 = vmatpush.bf16.msra.mxu3 %v4799_v56  ;;  %3265 = vmatpush.bf16.msrb.mxu1 %v5055_v58  ;;  %v6618_v36 = vpop.f32.mrf.mxu2  ;;  %v5888_v56 = vld [vmem:[#allocation10 + $0x634] sm:$0xf0]  ;;  %v5342_v58 = vld [vmem:[#allocation10 + $0x748] sm:$0xf] }
 0x195   : > { %v5199_v8 = vor.u32 %v5888_v56, %v5198_v55  ;;  %v5810_v56 = vld [vmem:[#allocation10 + $0x3cc] sm:$0xf] }
 0x196   : > { %3298 = vmatpush.bf16.msra.mxu0 %v4515_v50  ;;  %3272 = vmatpush.bf16.msrb.mxu2 %v5279_v53  ;;  %v4592_v50 = vld [vmem:[#allocation10 + $0x178] sm:$0xf0]  ;;  %v5359_v53 = vor.u32 %v5928_v47, %v5358_v4 }
 0x197   : > { %3240 = vmatmul.bf16.vlgmr.msra.gmra.mxu3 %v6573_v48  ;;  %3266 = vmatmul.bf16.vlgmr.msrb.gmra.mxu1 %v6583_v0  ;;  %v4595_v54 = vor.u32 %v5734_v49, %v4592_v50  ;;  %v5168_v4 = vld [vmem:[#allocation10 + $0x5f8] sm:$0xf0]  ;;  %v5311_v50 = vor.u32 %v5916_v35, %v5310_v33 }
 0x198   : > { %3284 = vmatpush.bf16.msrb.mxu3 %v5423_v59  ;;  %3310 = vmatpush.bf16.msra.mxu1 %v4659_v61  ;;  %v4435_v61 = vor.u32 %v5694_v51, %v4432_v43  ;;  %v5008_v47 = vld [vmem:[#allocation10 + $0x4b8] sm:$0xf0]  ;;  %v4547_v51 = vor.u32 %v5722_v37, %v4544_v38 }
 0x199   : > { %v4704_v35 = vld [vmem:[#allocation10 + $0x258] sm:$0xf0] }
 0x19a   : > { %3299 = vmatpush.bf16.msra.mxu0 %v4499_v5  ;;  %3273 = vmatpush.bf16.msrb.mxu2 %v5263_v11  ;;  %v6620_v59 = vpop.f32.mrf.mxu3  ;;  %v5690_v5 = vld [vmem:[#allocation10 + $0xc] sm:$0xf]  ;;  %v5343_v11 = vor.u32 %v5924_v62, %v5342_v58  ;;  %v4896_v58 = vld [vmem:[#allocation10 + $0x3d8] sm:$0xf0] }
 0x19b   : > { %v4419_v18 = vor.u32 %v5690_v5, %v4416_v6  ;;  %v5152_v62 = vld [vmem:[#allocation10 + $0x5d8] sm:$0xf0]  ;;  %v5770_v6 = vld [vmem:[#allocation10 + $0x28c] sm:$0xf] }
 0x19c   : > { %3285 = vmatpush.bf16.msrb.mxu3 %v5407_v13  ;;  %3311 = vmatpush.bf16.msra.mxu1 %v4643_v14  ;;  %v3022_v7 = vpop.f32.mrf.mxu2  ;;  %v4579_v13 = vor.u32 %v5730_v2, %v4576_v3  ;;  %v5182_v14 = vld [vmem:[#allocation10 + $0x608] sm:$0xf]  ;;  %v5834_v2 = vld [vmem:[#allocation10 + $0x48c] sm:$0xf]  ;;  %v4992_v3 = vld [vmem:[#allocation10 + $0x498] sm:$0xf0] }
 0x19d   : > { %v4736_v7 = vld [vmem:[#allocation10 + $0x298] sm:$0xf0]  ;;  %v4995_v10 = vor.u32 %v5834_v2, %v4992_v3 }
 0x19e   : > { %3300 = vmatpush.bf16.msra.mxu0 %v4483_v19  ;;  %3274 = vmatpush.bf16.msrb.mxu2 %v5247_v26  ;;  %v4784_v19 = vld [vmem:[#allocation10 + $0x2f8] sm:$0xf0]  ;;  %v5183_v26 = vor.u32 %v5884_v15, %v5182_v14  ;;  %v5870_v14 = vld [vmem:[#allocation10 + $0x5ac] sm:$0xf] }
 0x19f   : > { %v4787_v30 = vor.u32 %v5782_v16, %v4784_v19  ;;  %v5136_v15 = vld [vmem:[#allocation10 + $0x5b8] sm:$0xf0]  ;;  %v5830_v16 = vld [vmem:[#allocation10 + $0x46c] sm:$0xf]  ;;  %v4739_v19 = vor.u32 %v5770_v6, %v4736_v7 }
 0x1a0   : > { %3286 = vmatpush.bf16.msrb.mxu3 %v5391_v27  ;;  %3312 = vmatpush.bf16.msra.mxu1 %v4627_v29  ;;  %v5842_v27 = vld [vmem:[#allocation10 + $0x4cc] sm:$0xf]  ;;  %v5024_v29 = vld [vmem:[#allocation10 + $0x4d8] sm:$0xf0]  ;;  %v5139_v24 = vor.u32 %v5870_v14, %v5136_v15 }
 0x1a1   : > { %v5910_v6 = vld [vmem:[#allocation10 + $0x6ec] sm:$0xf]  ;;  %v4816_v14 = vld [vmem:[#allocation10 + $0x338] sm:$0xf0] }
 0x1a2   : > { %3301 = vmatpush.bf16.msra.mxu0 %v4467_v12  ;;  %3275 = vmatpush.bf16.msrb.mxu2 %v5231_v40  ;;  %v4768_v12 = vld [vmem:[#allocation10 + $0x2d8] sm:$0xf0]  ;;  %v3035_v40 = vpop.f32.mrf.mxu3 }
 0x1a3   : > { %v4771_v49 = vor.u32 %v5778_v32, %v4768_v12  ;;  %v4960_v32 = vld [vmem:[#allocation10 + $0x458] sm:$0xf0] }
 0x1a4   : > { %3287 = vmatpush.bf16.msrb.mxu3 %v5375_v41  ;;  %3313 = vmatpush.bf16.msra.mxu1 %v4611_v1  ;;  %v5027_v41 = vor.u32 %v5842_v27, %v5024_v29  ;;  %v5814_v1 = vld [vmem:[#allocation10 + $0x3ec] sm:$0xf]  ;;  %v4864_v27 = vld [vmem:[#allocation10 + $0x398] sm:$0xf0] }
 0x1a5   : > { %v4915_v43 = vor.u32 %v5814_v1, %v4912_v44  ;;  %v5866_v29 = vld [vmem:[#allocation10 + $0x58c] sm:$0xf]  ;;  %v4848_v1 = vld [vmem:[#allocation10 + $0x378] sm:$0xf0] }
 0x1a6   : > { %3302 = vmatpush.bf16.msra.mxu0 %v4451_v46  ;;  %3276 = vmatpush.bf16.msrb.mxu2 %v5215_v52  ;;  %v5838_v46 = vld [vmem:[#allocation10 + $0x4ac] sm:$0xf]  ;;  %v5952_v15 = vld [vmem:[#allocation12 + $0x38] sm:$0xff] }
 0x1a7   : > { %v5774_v52 = vld [vmem:[#allocation10 + $0x2ac] sm:$0xf]  ;;  %v5011_v55 = vor.u32 %v5838_v46, %v5008_v47  ;;  %v4944_v46 = vld [vmem:[#allocation10 + $0x438] sm:$0xf0] }
 0x1a8   : > { %3288 = vmatpush.bf16.msrb.mxu3 %v5359_v53  ;;  %3314 = vmatpush.bf16.msra.mxu1 %v4595_v54  ;;  %v4752_v53 = vld [vmem:[#allocation10 + $0x2b8] sm:$0xf0]  ;;  %v5171_v54 = vor.u32 %v5878_v45, %v5168_v4  ;;  %v5862_v44 = vld [vmem:[#allocation10 + $0x56c] sm:$0xf] }
 0x1a9   : > { %v4755_v5 = vor.u32 %v5774_v52, %v4752_v53  ;;  %v5104_v45 = vld [vmem:[#allocation10 + $0x578] sm:$0xf0]  ;;  %v5822_v4 = vld [vmem:[#allocation10 + $0x42c] sm:$0xf] }
 0x1aa   : > { %3303 = vmatpush.bf16.msra.mxu0 %v4435_v61  ;;  %3277 = vmatpush.bf16.msrb.mxu2 %v5199_v8  ;;  %v5874_v61 = vld [vmem:[#allocation10 + $0x5cc] sm:$0xf]  ;;  %v4947_v52 = vor.u32 %v5822_v4, %v4944_v46  ;;  %v5408_v4 = vld [vmem:[#allocation10 + $0x7d8] sm:$0xf0] }
 0x1ab   : > { %v5155_v9 = vor.u32 %v5874_v61, %v5152_v62  ;;  %v5794_v53 = vld [vmem:[#allocation10 + $0x34c] sm:$0xf]  ;;  %v4928_v61 = vld [vmem:[#allocation10 + $0x418] sm:$0xf0] }
 0x1ac   : > { %3289 = vmatpush.bf16.msrb.mxu3 %v5343_v11  ;;  %3315 = vmatpush.bf16.msra.mxu1 %v4579_v13  ;;  %v5806_v11 = vld [vmem:[#allocation10 + $0x3ac] sm:$0xf]  ;;  %v4880_v13 = vld [vmem:[#allocation10 + $0x3b8] sm:$0xf0] }
 0x1ad   : > { %v4883_v21 = vor.u32 %v5806_v11, %v4880_v13  ;;  %v5296_v11 = vld [vmem:[#allocation10 + $0x6f8] sm:$0xf0]  ;;  %v5790_v13 = vld [vmem:[#allocation10 + $0x32c] sm:$0xf] }
 0x1ae   : > { %3304 = vmatpush.bf16.msra.mxu0 %v4419_v18  ;;  %3278 = vmatpush.bf16.msrb.mxu2 %v5183_v26  ;;  %v6624_v8 = vpop.f32.mrf.mxu0  ;;  %v4976_v18 = vld [vmem:[#allocation10 + $0x478] sm:$0xf0]  ;;  %v5802_v26 = vld [vmem:[#allocation10 + $0x38c] sm:$0xf] }
 0x1af   : > { %v4979_v25 = vor.u32 %v5830_v16, %v4976_v18  ;;  %v4867_v33 = vor.u32 %v5802_v26, %v4864_v27  ;;  %v5854_v16 = vld [vmem:[#allocation10 + $0x52c] sm:$0xf]  ;;  %v5072_v18 = vld [vmem:[#allocation10 + $0x538] sm:$0xf0] }
 0x1b0   : > { %3290 = vmatpush.bf16.msrb.mxu3 %v5327_v31  ;;  %3316 = vmatpush.bf16.msra.mxu1 %v4563_v34  ;;  %v5826_v31 = vld [vmem:[#allocation10 + $0x44c] sm:$0xf]  ;;  %v5075_v26 = vor.u32 %v5854_v16, %v5072_v18  ;;  %v5960_v46 = vld [vmem:[#allocation12 + $0x78] sm:$0xff] }
 0x1b1   : > { %3305 = vmatmul.bf16.vlgmr.msra.gmra.mxu0 %v6559_v39  ;;  %3279 = vmatmul.bf16.vlgmr.msrb.gmra.mxu2 %v6591_v57  ;;  %v4899_v39 = vor.u32 %v5810_v56, %v4896_v58  ;;  %v5762_v34 = vld [vmem:[#allocation10 + $0x24c] sm:$0xf]  ;;  %v4963_v40 = vor.u32 %v5826_v31, %v4960_v32  ;;  %v5088_v56 = vld [vmem:[#allocation10 + $0x558] sm:$0xf0] }
 0x1b2   : > { %3349 = vmatpush.bf16.msrb.mxu0 %v5043_v23  ;;  %3323 = vmatpush.bf16.msra.mxu2 %v4787_v30  ;;  %v4720_v23 = vld [vmem:[#allocation10 + $0x278] sm:$0xf0]  ;;  %v4707_v47 = vor.u32 %v5762_v34, %v4704_v35  ;;  %v5818_v58 = vld [vmem:[#allocation10 + $0x40c] sm:$0xf] }
 0x1b3   : > { %v5120_v30 = vld [vmem:[#allocation10 + $0x598] sm:$0xf0]  ;;  %v4723_v12 = vor.u32 %v5766_v22, %v4720_v23  ;;  %v4819_v22 = vor.u32 %v5790_v13, %v4816_v14  ;;  %v5906_v23 = vld [vmem:[#allocation10 + $0x6cc] sm:$0xf]  ;;  %v5947_v13 = vld [vmem:[#allocation12 + $0x10] sm:$0xff] }
 0x1b4   : > { %3291 = vmatpush.bf16.msrb.mxu3 %v5311_v50  ;;  %3317 = vmatpush.bf16.msra.mxu1 %v4547_v51  ;;  %v5123_v38 = vor.u32 %v5866_v29, %v5120_v30  ;;  %v5758_v50 = vld [vmem:[#allocation10 + $0x22c] sm:$0xf]  ;;  %v4688_v51 = vld [vmem:[#allocation10 + $0x238] sm:$0xf0] }
 0x1b5   : > { %v4691_v62 = vor.u32 %v5758_v50, %v4688_v51  ;;  %v5786_v27 = vld [vmem:[#allocation10 + $0x30c] sm:$0xf]  ;;  %v4800_v29 = vld [vmem:[#allocation10 + $0x318] sm:$0xf0]  ;;  %v5949_v51 = vld [vmem:[#allocation12 + $0x20] sm:$0xff] }
 0x1b6   : > { %3350 = vmatpush.bf16.msrb.mxu0 %v5027_v41  ;;  %3324 = vmatpush.bf16.msra.mxu2 %v4771_v49  ;;  %v3048_v37 = vpop.f32.mrf.mxu0  ;;  %v5798_v41 = vld [vmem:[#allocation10 + $0x36c] sm:$0xf]  ;;  %v5056_v31 = vld [vmem:[#allocation10 + $0x518] sm:$0xf0]  ;;  %v4803_v35 = vor.u32 %v5786_v27, %v4800_v29 }
 0x1b7   : > { %3292 = vmatmul.bf16.vlgmr.msrb.gmra.mxu3 %v6596_v28  ;;  %3318 = vmatmul.bf16.vlgmr.msra.gmra.mxu1 %v6563_v63  ;;  %v6628_v63 = vpop.f32.mrf.mxu1  ;;  %v4851_v49 = vor.u32 %v5798_v41, %v4848_v1  ;;  %v5850_v30 = vld [vmem:[#allocation10 + $0x50c] sm:$0xf]  ;;  %v5264_v1 = vld [vmem:[#allocation10 + $0x6b8] sm:$0xf0] }
 0x1b8   : > { %3336 = vmatpush.bf16.msra.mxu3 %v4915_v43  ;;  %3362 = vmatpush.bf16.msrb.mxu1 %v5171_v54  ;;  %v5107_v43 = vor.u32 %v5862_v44, %v5104_v45  ;;  %v4832_v54 = vld [vmem:[#allocation10 + $0x358] sm:$0xf0]  ;;  %v5942_v32 = vld [vmem:[#allocation10 + $0x7ec] sm:$0xf] }
 0x1b9   : > { %v4835_v3 = vor.u32 %v5794_v53, %v4832_v54  ;;  %v5902_v41 = vld [vmem:[#allocation10 + $0x6ac] sm:$0xf]  ;;  %v5959_v53 = vld [vmem:[#allocation12 + $0x70] sm:$0xff]  ;;  %v5956_v27 = vld [vmem:[#allocation12 + $0x58] sm:$0xff] }
 0x1ba   : > { %3351 = vmatpush.bf16.msrb.mxu0 %v5011_v55  ;;  %3325 = vmatpush.bf16.msra.mxu2 %v4755_v5  ;;  %v5858_v55 = vld [vmem:[#allocation10 + $0x54c] sm:$0xf] }
 0x1bb   : > { %v5754_v5 = vld [vmem:[#allocation10 + $0x20c] sm:$0xf] }
 0x1bc   : > { %3337 = vmatpush.bf16.msra.mxu3 %v4899_v39  ;;  %3363 = vmatpush.bf16.msrb.mxu1 %v5155_v9  ;;  %v4672_v39 = vld [vmem:[#allocation10 + $0x218] sm:$0xf0]  ;;  %v5091_v9 = vor.u32 %v5858_v55, %v5088_v56  ;;  %v5950_v44 = vld [vmem:[#allocation12 + $0x28] sm:$0xff] }
 0x1bd   : > { %v5938_v45 = vld [vmem:[#allocation10 + $0x7cc] sm:$0xf] }
 0x1be   : > { %3352 = vmatpush.bf16.msrb.mxu0 %v4995_v10  ;;  %3326 = vmatpush.bf16.msra.mxu2 %v4739_v19  ;;  %v6630_v7 = vpop.f32.mrf.mxu0  ;;  %v4931_v10 = vor.u32 %v5818_v58, %v4928_v61  ;;  %v4675_v19 = vor.u32 %v5754_v5, %v4672_v39  ;;  %v5898_v50 = vld [vmem:[#allocation10 + $0x68c] sm:$0xf]  ;;  %v5232_v61 = vld [vmem:[#allocation10 + $0x678] sm:$0xf0] }
 0x1bf   : > { %v3061_v2 = vpop.f32.mrf.mxu1  ;;  %v5894_v58 = vld [vmem:[#allocation10 + $0x66c] sm:$0xf]  ;;  %v5376_v5 = vld [vmem:[#allocation10 + $0x798] sm:$0xf0] }
 0x1c0   : > { %3338 = vmatpush.bf16.msra.mxu3 %v4883_v21  ;;  %3364 = vmatpush.bf16.msrb.mxu1 %v5139_v24  ;;  %v5299_v21 = vor.u32 %v5910_v6, %v5296_v11  ;;  %v5280_v24 = vld [vmem:[#allocation10 + $0x6d8] sm:$0xf0]  ;;  %v3021_v2 = vadd.f32 %v6618_v36, %v6612_v60  ;;  %v5235_v6 = vor.u32 %v5894_v58, %v5232_v61  ;;  %v5926_v60 = vld [vmem:[#allocation10 + $0x76c] sm:$0xf] }
 0x1c1   : > { %v5283_v34 = vor.u32 %v5906_v23, %v5280_v24  ;;  %v5216_v11 = vld [vmem:[#allocation10 + $0x658] sm:$0xf0]  ;;  %v5946_v24 = vld [vmem:[#allocation12 + $0x8] sm:$0xff] }
 0x1c2   : > { %3353 = vmatpush.bf16.msrb.mxu0 %v4979_v25  ;;  %3327 = vmatpush.bf16.msra.mxu2 %v4723_v12  ;;  %v5951_v25 = vld [vmem:[#allocation12 + $0x30] sm:$0xff]  ;;  %v5424_v12 = vld [vmem:[#allocation10 + $0x7f8] sm:$0xf0] }
 0x1c3   : > { %v5360_v36 = vld [vmem:[#allocation10 + $0x778] sm:$0xf0] }
 0x1c4   : > { %3339 = vmatpush.bf16.msra.mxu3 %v4867_v33  ;;  %3365 = vmatpush.bf16.msrb.mxu1 %v5123_v38  ;;  %v5059_v38 = vor.u32 %v5850_v30, %v5056_v31  ;;  %v5200_v23 = vld [vmem:[#allocation10 + $0x638] sm:$0xf0]  ;;  %v6650_v30 = vstv %s6642_s14  ;;  %s6265_s14 = sshra.s32 %s3752_s19, 4  ;;  %s6266_s14 = int_to_ptr.hbm [resolvable:$true] %s6265_s14 }
 0x1c5   : > { %s6267_s12 = scalar_lea.hbm %s6266_s14, 8  ;;  %p6272_p12 = scmp.lt.s32.totalorder %s6266_s14, %s6712_s8 }
 0x1c6   : > { %3354 = vmatpush.bf16.msrb.mxu0 %v4963_v40  ;;  %3328 = vmatpush.bf16.msra.mxu2 %v4707_v47  ;;  %v3100_v37 = vpop.f32.mrf.mxu0  ;;  %v5427_v40 = vor.u32 %v5942_v32, %v5424_v12  ;;  %v5267_v47 = vor.u32 %v5902_v41, %v5264_v1  ;;  %v5328_v41 = vld [vmem:[#allocation10 + $0x738] sm:$0xf0]  ;;  %v5955_v1 = vld [vmem:[#allocation12 + $0x50] sm:$0xff]  ;;  %p6268_p1 = scmp.ne.s32.totalorder %s6266_s14, %s6267_s12  ;;  %p6273_p8 = scmp.lt.s32.totalorder %s6271_s21, %s6267_s12 }
 0x1c7   : > { %v6632_v33 = vpop.f32.mrf.mxu1  ;;  %v5945_v37 = vld [vmem:[#allocation12] sm:$0xff] }
 0x1c8   : > { %3340 = vmatpush.bf16.msra.mxu3 %v4851_v49  ;;  %3366 = vmatpush.bf16.msrb.mxu1 %v5107_v43  ;;  %v5411_v49 = vor.u32 %v5938_v45, %v5408_v4  ;;  %v5934_v43 = vld [vmem:[#allocation10 + $0x7ac] sm:$0xf]  ;;  %p6269_p3 = pnand %p6268_p1, %p6473_p13  ;;  %p6274_p7 = por %p6273_p8, %p6272_p12 }
 0x1ca   : > { %3355 = vmatpush.bf16.msrb.mxu0 %v4947_v52  ;;  %3329 = vmatpush.bf16.msra.mxu2 %v4691_v62  ;;  %v5392_v52 = vld [vmem:[#allocation10 + $0x7b8] sm:$0xf0]  ;;  %p6270_p5 = pneg %p6269_p3 }
 0x1cb   : > { %v5395_v56 = vor.u32 %v5934_v43, %v5392_v52  ;;  %v5948_v62 = vld [vmem:[#allocation12 + $0x18] sm:$0xff] }
 0x1cc   : > { %3341 = vmatpush.bf16.msra.mxu3 %v4835_v3  ;;  %3367 = vmatpush.bf16.msrb.mxu1 %v5091_v9  ;;  %v5930_v3 = vld [vmem:[#allocation10 + $0x78c] sm:$0xf]  ;;  %p6275_p9 = pnand %p6274_p7, %p6270_p5 }
 0x1cd   : > { %v5379_v9 = vor.u32 %v5930_v3, %v5376_v5 }
 0x1ce   : > { %3356 = vmatpush.bf16.msrb.mxu0 %v4931_v10  ;;  %3330 = vmatpush.bf16.msra.mxu2 %v4675_v19  ;;  %v6638_v55 = vpop.f32.mrf.mxu0  ;;  %v5890_v10 = vld [vmem:[#allocation10 + $0x64c] sm:$0xf] }
 0x1cf   : > { %v5219_v18 = vor.u32 %v5890_v10, %v5216_v11 }
 0x1d0   : > { %3342 = vmatpush.bf16.msra.mxu3 %v4819_v22  ;;  %3368 = vmatpush.bf16.msrb.mxu1 %v5075_v26  ;;  %v5886_v22 = vld [vmem:[#allocation10 + $0x62c] sm:$0xf]  ;;  %v5344_v26 = vld [vmem:[#allocation10 + $0x758] sm:$0xf0] }
 0x1d1   : > { %3357 = vmatmul.bf16.vlgmr.msrb.gmra.mxu0 %v6579_v42  ;;  %3331 = vmatmul.bf16.vlgmr.msra.gmra.mxu2 %v6569_v17  ;;  %v5248_v42 = vld [vmem:[#allocation10 + $0x698] sm:$0xf0]  ;;  %v3113_v17 = vpop.f32.mrf.mxu1  ;;  %v5203_v32 = vor.u32 %v5886_v22, %v5200_v23  ;;  %v5962_v23 = vld [vmem:[#allocation12 + $0x88] sm:$0xff] }
 0x1d2   : > { %3678 = vmatpush.bf16.msra.mxu0 %v5952_v15  ;;  %3375 = vmatpush.bf16.msrb.mxu2 %v5299_v21  ;;  %v5251_v54 = vor.u32 %v5898_v50, %v5248_v42  ;;  %v5957_v15 = vld [vmem:[#allocation12 + $0x60] sm:$0xff]  ;;  %v5363_v21 = vor.u32 %v5926_v60, %v5360_v36  ;;  %v5954_v50 = vld [vmem:[#allocation12 + $0x48] sm:$0xff]  ;;  %v1698_v17 = vperm.slane %v6607_v20, 1 }
 0x1d4   : > { %3343 = vmatpush.bf16.msra.mxu3 %v4803_v35  ;;  %3369 = vmatpush.bf16.msrb.mxu1 %v5059_v38  ;;  %v3072_v39 = vpop.f32.mrf.mxu2  ;;  %v5184_v35 = vld [vmem:[#allocation10 + $0x618] sm:$0xf0] }
 0x1d6   : > { %3679 = vmatpush.bf16.msra.mxu0 %v5951_v25  ;;  %3376 = vmatpush.bf16.msrb.mxu2 %v5283_v34  ;;  %v3152_v19 = vpop.f32.mrf.mxu0  ;;  %v5882_v34 = vld [vmem:[#allocation10 + $0x60c] sm:$0xf] }
 0x1d7   : > { %3344 = vmatmul.bf16.vlgmr.msra.gmra.mxu3 %v6573_v48  ;;  %3370 = vmatmul.bf16.vlgmr.msrb.gmra.mxu1 %v6583_v0  ;;  %v5958_v48 = vld [vmem:[#allocation12 + $0x68] sm:$0xff]  ;;  %v3034_v0 = vadd.f32 %v6620_v59, %v3021_v2  ;;  %v5187_v4 = vor.u32 %v5882_v34, %v5184_v35 }
 0x1d8   : > { %3388 = vmatpush.bf16.msrb.mxu3 %v5427_v40  ;;  %3691 = vmatpush.bf16.msra.mxu1 %v5960_v46  ;;  %v5918_v40 = vld [vmem:[#allocation10 + $0x72c] sm:$0xf] }
 0x1d9   : > { %v3047_v14 = vadd.f32 %v6624_v8, %v3034_v0  ;;  %v6647_v59 = vpop.f32.mrf.mxu1  ;;  %v5922_v8 = vld [vmem:[#allocation10 + $0x74c] sm:$0xf]  ;;  %v5331_v46 = vor.u32 %v5918_v40, %v5328_v41 }
 0x1da   : > { %3680 = vmatpush.bf16.msra.mxu0 %v5950_v44  ;;  %3377 = vmatpush.bf16.msrb.mxu2 %v5267_v47  ;;  %v3085_v29 = vpop.f32.mrf.mxu3  ;;  %v5347_v12 = vor.u32 %v5922_v8, %v5344_v26  ;;  %v5914_v47 = vld [vmem:[#allocation10 + $0x70c] sm:$0xf] }
 0x1db   : > { %v3060_v16 = vadd.f32 %v6628_v63, %v3047_v14 }
 0x1dc   : > { %3389 = vmatpush.bf16.msrb.mxu3 %v5411_v49  ;;  %3692 = vmatpush.bf16.msra.mxu1 %v5959_v53  ;;  %v3074_v31 = vpop.f32.mrf.mxu2  ;;  %v5312_v49 = vld [vmem:[#allocation10 + $0x718] sm:$0xf0]  ;;  %v5953_v53 = vld [vmem:[#allocation12 + $0x40] sm:$0xff] }
 0x1dd   : > { %v3073_v25 = vadd.f32 %v3072_v39, %v3060_v16  ;;  %v5315_v52 = vor.u32 %v5914_v47, %v5312_v49  ;;  %v5964_v16 = vld [vmem:[#allocation12 + $0x98] sm:$0xff] }
 0x1de   : > { %3681 = vmatpush.bf16.msra.mxu0 %v5949_v51  ;;  %3378 = vmatpush.bf16.msrb.mxu2 %v5251_v54  ;;  %v3099_v54 = vadd.f32 %v6630_v7, %v1698_v17  ;;  %v5973_v17 = vld [vmem:[#allocation12 + $0xe0] sm:$0xff] }
 0x1df   : > { %v3086_v63 = vadd.f32 %v3085_v29, %v3073_v25  ;;  %v5961_v25 = vld [vmem:[#allocation12 + $0x80] sm:$0xff] }
 0x1e0   : > { %3390 = vmatpush.bf16.msrb.mxu3 %v5395_v56  ;;  %3693 = vmatpush.bf16.msra.mxu1 %v5958_v48  ;;  %v3112_v58 = vadd.f32 %v6632_v33, %v3099_v54  ;;  %v5972_v54 = vld [vmem:[#allocation12 + $0xd8] sm:$0xff] }
 0x1e1   : > { %vm3401_vm8 = vcmp.ge.f32.partialorder %v3086_v63, 0.0  ;;  %v3406_v38 = vmul.f32 %v6650_v30, %v3086_v63  ;;  %v3165_v45 = vpop.f32.mrf.mxu1 }
 0x1e2   : > { %3682 = vmatpush.bf16.msra.mxu0 %v5948_v62  ;;  %3379 = vmatpush.bf16.msrb.mxu2 %v5235_v6  ;;  %v3087_v51 = vpop.f32.mrf.mxu3 }
 0x1e3   : > { %v3410_v44 = vsel %vm3401_vm8, %v3086_v63, %v3406_v38  ;;  %v5975_v51 = vld [vmem:[#allocation12 + $0xf0] sm:$0xff] }
 0x1e4   : > { %3391 = vmatpush.bf16.msrb.mxu3 %v5379_v9  ;;  %3694 = vmatpush.bf16.msra.mxu1 %v5957_v15  ;;  %v3414_v42 = vpack.c.bf16 %v3410_v44, %v3410_v44  ;;  %v3124_v43 = vpop.f32.mrf.mxu2  ;;  %v5968_v9 = vld [vmem:[#allocation12 + $0xb8] sm:$0xff]  ;;  %v5965_v15 = vld [vmem:[#allocation12 + $0xa0] sm:$0xff] }
 0x1e5   : > { %v3125_v62 = vadd.f32 %v3124_v43, %v3112_v58  ;;  %v5971_v58 = vld [vmem:[#allocation12 + $0xd0] sm:$0xff] }
 0x1e6   : > { %3683 = vmatpush.bf16.msra.mxu0 %v5947_v13  ;;  %3380 = vmatpush.bf16.msrb.mxu2 %v5219_v18  ;;  %v5967_v13 = vld [vmem:[#allocation12 + $0xb0] sm:$0xff] }
 0x1e7   : > { %v5963_v18 = vld [vmem:[#allocation12 + $0x90] sm:$0xff] }
 0x1e8   : > { %3392 = vmatpush.bf16.msrb.mxu3 %v5363_v21  ;;  %3695 = vmatpush.bf16.msra.mxu1 %v5956_v27  ;;  %v6085_v27 = vld [vmem:[%s6709_s5] sm:$0xf] }
 0x1e9   : > { %v1699_v29 = vperm.slane %v6085_v27, 2 }
 0x1ea   : > { %3684 = vmatpush.bf16.msra.mxu0 %v5946_v24  ;;  %3381 = vmatpush.bf16.msrb.mxu2 %v5203_v32  ;;  %v3137_v56 = vpop.f32.mrf.mxu3 }
 0x1eb   : > { %v3138_v3 = vadd.f32 %v3137_v56, %v3125_v62 }
 0x1ec   : > { %3393 = vmatpush.bf16.msrb.mxu3 %v5347_v12  ;;  %3696 = vmatpush.bf16.msra.mxu1 %v5955_v1  ;;  %v3126_v61 = vpop.f32.mrf.mxu2 }
 0x1ed   : > { %v3151_v48 = vadd.f32 %v6638_v55, %v3138_v3  ;;  %v5966_v55 = vld [vmem:[#allocation12 + $0xa8] sm:$0xff] }
 0x1ee   : > { %3685 = vmatpush.bf16.msra.mxu0 %v5945_v37  ;;  %3382 = vmatpush.bf16.msrb.mxu2 %v5187_v4  ;;  %v3202_v2 = vpop.f32.mrf.mxu0  ;;  %v5976_v4 = vld [vmem:[#allocation12 + $0xf8] sm:$0xff]  ;;  %v5970_v3 = vld [vmem:[#allocation12 + $0xc8] sm:$0xff] }
 0x1ef   : > { %v3203_v31 = vadd.f32 %v3202_v2, %v1699_v29 }
 0x1f0   : > { %3394 = vmatpush.bf16.msrb.mxu3 %v5331_v46  ;;  %3697 = vmatpush.bf16.msra.mxu1 %v5954_v50 }
 0x1f1   : > { %3686 = vmatmul.bf16.vlgmr.msra.gmra.mxu0 %v3414_v42  ;;  %3383 = vmatmul.bf16.vlgmr.msrb.gmra.mxu2 %v6591_v57  ;;  %v3164_v57 = vadd.f32 %v6647_v59, %v3151_v48  ;;  %v5969_v48 = vld [vmem:[#allocation12 + $0xc0] sm:$0xff] }
 0x1f2   : > { %v3139_v5 = vpop.f32.mrf.mxu3  ;;  %3704 = vmatpush.bf16.msra.mxu2 %v5968_v9 }
 0x1f4   : > { %3395 = vmatpush.bf16.msrb.mxu3 %v5315_v52  ;;  %3698 = vmatpush.bf16.msra.mxu1 %v5953_v53  ;;  %v3215_v0 = vpop.f32.mrf.mxu1  ;;  %v3176_v20 = vpop.f32.mrf.mxu2  ;;  %v5974_v52 = vld [vmem:[#allocation12 + $0xe8] sm:$0xff] }
 0x1f5   : > { %v3177_v6 = vadd.f32 %v3176_v20, %v3164_v57  ;;  %v3216_v32 = vadd.f32 %v3215_v0, %v3203_v31 }
 0x1f6   : > { %v3204_v39 = vpop.f32.mrf.mxu0  ;;  %3705 = vmatpush.bf16.msra.mxu2 %v5967_v13 }
 0x1f7   : > { %3396 = vmatmul.bf16.vlgmr.msrb.gmra.mxu3 %v6596_v28  ;;  %v1700_v39 = vperm.slane %v6085_v27, 3 }
 0x1f8   : > { %3717 = vmatpush.bf16.msra.mxu3 %v5976_v4 }
 0x1fa   : > { %v3189_v7 = vpop.f32.mrf.mxu3  ;;  %3706 = vmatpush.bf16.msra.mxu2 %v5966_v55 }
 0x1fb   : > { %v3190_v10 = vadd.f32 %v3189_v7, %v3177_v6 }
 0x1fc   : > { %v3217_v11 = vpop.f32.mrf.mxu1  ;;  %v3178_v28 = vpop.f32.mrf.mxu2  ;;  %3718 = vmatpush.bf16.msra.mxu3 %v5975_v51 }
 0x1fd   : > { %vm3402_vm9 = vcmp.ge.f32.partialorder %v3190_v10, 0.0  ;;  %v3407_v33 = vmul.f32 %v6650_v30, %v3190_v10 }
 0x1fe   : > { %3707 = vmatpush.bf16.msra.mxu2 %v5965_v15 }
 0x1ff   : > { %v3411_v14 = vsel %vm3402_vm9, %v3190_v10, %v3407_v33 }
 0x200   : > { %v3415_v60 = vpack.c.bf16 %v3411_v14, %v3411_v14  ;;  %3719 = vmatpush.bf16.msra.mxu3 %v5974_v52 }
 0x202   : > { %v3191_v36 = vpop.f32.mrf.mxu3  ;;  %3699 = vmatmul.bf16.vlgmr.msra.gmra.mxu1 %v3415_v60  ;;  %3708 = vmatpush.bf16.msra.mxu2 %v5964_v16 }
 0x204   : > { %3720 = vmatpush.bf16.msra.mxu3 %v5973_v17 }
 0x206   : > { %3709 = vmatpush.bf16.msra.mxu2 %v5963_v18 }
 0x208   : > { %3721 = vmatpush.bf16.msra.mxu3 %v5972_v54 }
 0x20a   : > { %3710 = vmatpush.bf16.msra.mxu2 %v5962_v23 }
 0x20c   : > { %3722 = vmatpush.bf16.msra.mxu3 %v5971_v58 }
 0x20e   : > { %v3254_v59 = vpop.f32.mrf.mxu0  ;;  %3711 = vmatpush.bf16.msra.mxu2 %v5961_v25 }
 0x210   : > { %3723 = vmatpush.bf16.msra.mxu3 %v5970_v3 }
 0x214   : > { %v3228_v19 = vpop.f32.mrf.mxu2  ;;  %v3267_v21 = vpop.f32.mrf.mxu1  ;;  %3724 = vmatpush.bf16.msra.mxu3 %v5969_v48 }
 0x215   : > { %v3229_v12 = vadd.f32 %v3228_v19, %v3216_v32 }
 0x216   : > { %v3256_v22 = vpop.f32.mrf.mxu0 }
 0x21a   : > { %v3241_v24 = vpop.f32.mrf.mxu3 }
 0x21b   : > { %v3242_v35 = vadd.f32 %v3241_v24, %v3229_v12 }
 0x21c   : > { %v3230_v8 = vpop.f32.mrf.mxu2  ;;  %v3269_v26 = vpop.f32.mrf.mxu1 }
 0x21d   : > { %v3255_v37 = vadd.f32 %v3254_v59, %v3242_v35 }
 0x21f   : > { %v3268_v1 = vadd.f32 %v3267_v21, %v3255_v37  ;;  %v6080_v21 = vld [vmem:[%s6711_s7] ss:$0 sm:$0xff] }
 0x222   : > { %v3243_v63 = vpop.f32.mrf.mxu3 }
 0x22e   : > { %v3306_v34 = vpop.f32.mrf.mxu0 }
 0x22f   : > { %v3307_v6 = vadd.f32 %v3306_v34, %v1700_v39 }
 0x234   : > { %v3280_v38 = vpop.f32.mrf.mxu2  ;;  %v3319_v40 = vpop.f32.mrf.mxu1 }
 0x235   : > { %v3281_v44 = vadd.f32 %v3280_v38, %v3268_v1  ;;  %v3320_v9 = vadd.f32 %v3319_v40, %v3307_v6 }
 0x236   : > { %v3308_v41 = vpop.f32.mrf.mxu0 }
 0x23a   : > { %v3293_v45 = vpop.f32.mrf.mxu3 }
 0x23b   : > { %v3294_v46 = vadd.f32 %v3293_v45, %v3281_v44 }
 0x23c   : > { %v3282_v49 = vpop.f32.mrf.mxu2  ;;  %v3321_v50 = vpop.f32.mrf.mxu1 }
 0x23d   : > { %vm3403_vm10 = vcmp.ge.f32.partialorder %v3294_v46, 0.0  ;;  %v3408_v47 = vmul.f32 %v6650_v30, %v3294_v46 }
 0x23f   : > { %v3412_v42 = vsel %vm3403_vm10, %v3294_v46, %v3408_v47 }
 0x240   : > { %v3416_v43 = vpack.c.bf16 %v3412_v42, %v3412_v42 }
 0x242   : > { %v3295_v53 = vpop.f32.mrf.mxu3  ;;  %3712 = vmatmul.bf16.vlgmr.msra.gmra.mxu2 %v3416_v43 }
 0x24e   : > { %v3358_v56 = vpop.f32.mrf.mxu0 }
 0x254   : > { %v3332_v61 = vpop.f32.mrf.mxu2  ;;  %v3371_v62 = vpop.f32.mrf.mxu1 }
 0x255   : > { %v3333_v7 = vadd.f32 %v3332_v61, %v3320_v9 }
 0x256   : > { %v3360_v2 = vpop.f32.mrf.mxu0 }
 0x25a   : > { %v3345_v5 = vpop.f32.mrf.mxu3 }
 0x25b   : > { %v3346_v11 = vadd.f32 %v3345_v5, %v3333_v7 }
 0x25c   : > { %v3334_v0 = vpop.f32.mrf.mxu2  ;;  %v3373_v20 = vpop.f32.mrf.mxu1 }
 0x25d   : > { %v3359_v28 = vadd.f32 %v3358_v56, %v3346_v11 }
 0x25f   : > { %v3372_v14 = vadd.f32 %v3371_v62, %v3359_v28 }
 0x262   : > { %v3347_v57 = vpop.f32.mrf.mxu3 }
 0x26e   : > { %v3687_v10 = vpop.f32.mrf.mxu0 }
 0x26f   : > { %v3688_v22 = vadd.f32 %v6080_v21, %v3687_v10 }
 0x274   : > { %v3384_v33 = vpop.f32.mrf.mxu2 }
 0x275   : > { %v3385_v60 = vadd.f32 %v3384_v33, %v3372_v14 }
 0x276   : > { %v3689_v13 = vpop.f32.mrf.mxu0 }
 0x27a   : > { %v3397_v55 = vpop.f32.mrf.mxu3 }
 0x27b   : > { %v3398_v36 = vadd.f32 %v3397_v55, %v3385_v60 }
 0x27c   : > { %v3386_v16 = vpop.f32.mrf.mxu2 }
 0x27d   : > { %vm3404_vm11 = vcmp.ge.f32.partialorder %v3398_v36, 0.0  ;;  %v3409_v15 = vmul.f32 %v6650_v30, %v3398_v36 }
 0x27f   : > { %v3413_v59 = vsel %vm3404_vm11, %v3398_v36, %v3409_v15  ;;  %v3700_v23 = vpop.f32.mrf.mxu1 }
 0x280   : > { %v3417_v18 = vpack.c.bf16 %v3413_v59, %v3413_v59  ;;  %v3701_v24 = vadd.f32 %v3700_v23, %v3688_v22 }
 0x282   : > { %v3399_v19 = vpop.f32.mrf.mxu3  ;;  %3725 = vmatmul.bf16.vlgmr.msra.gmra.mxu3 %v3417_v18 }
 0x287   : > { %v3702_v25 = vpop.f32.mrf.mxu1 }
 0x2c5   : > { %v3713_v8 = vpop.f32.mrf.mxu2 }
 0x2c6   : > { %v3714_v27 = vadd.f32 %v3713_v8, %v3701_v24 }
 0x2cd   : > { %v3715_v26 = vpop.f32.mrf.mxu2 }
 0x305   : > { %v3726_v29 = vpop.f32.mrf.mxu3 }
 0x306   : > { %v3727_v30 = vadd.f32 %v3726_v29, %v3714_v27 }
 0x308   : > { %v3730_v63 = vsub.f32 0.0, %v3727_v30 }
 0x30a   : > { %v3731_v31 = vmul.f32 1.442695, %v3730_v63 }
 0x30c   : > { %6081 = vpow2.f32 %v3731_v31 }
 0x30d   : > { %v3728_v32 = vpop.f32.mrf.mxu3 }
 0x312   : > { %v6082_v12 = vpop.eup %6081 }
 0x313   : > { %v3733_v34 = vadd.f32 1.0, %v6082_v12 }
 0x315   : > { %6083 = vrcp.f32 %v3733_v34 }
 0x31b   : > { %v6084_v35 = vpop.eup %6083 }
 0x31c   : > { %3735 = vst [vmem:[%s401_s25] sm:$0xff] %v6084_v35 }
 0x31d   : > { %6278 = shalt.err (!%p6275_p9)
}
 0x31e   : > { %5999 = dma.vmem_to_hbm [thread:$0]  (%p6473_p13), %s3750_s13, 128, %s3752_s19, %s3737_s26  }
 0x31f PF: > { %s3763_s11 = sand.u32 1, %s6317_s27   ;;  %p6723_p10 = scmp.ge.s32.totalorder %s6329_s30, 2 }
 0x320   : > { %s3764_s18 = scalar_lea.sflag [#allocation4], %s3763_s11 }
 0x321   : > { %p6022_p11 = pnand %p6723_p10, %p6478_p4 }
 0x323   : > { %p6023_p0 = pneg %p6022_p11 }
 0x325   : > { %6312 = dma.done.wait (%p6023_p0), %s3764_s18, 128  }
 0x326   : > { %6314 = vsyncadd (%p6023_p0), %s3764_s18, 4294967168  ;;  %p24_p2 = scmp.ge.s32.totalorder %s6453_s10, 4   ;;  %s6724_s27 = smov %s6321_s28 }
 0x327   : > { %s6725_s28 = smov %s6325_s29  ;;  %s6726_s29 = smov %s6465_s17 }
 0x328   : > { %s6727_s30 = smov %s6453_s10  ;;  %26 = sbr.rel (!%p24_p2) target bundleno = 11 (0xb), region = 118 }
 0x32d   :  { %3770 = vsyncpa [#allocation3], 1 }
 0x32e   :  { %3772 = vsyncpa [#allocation3 + $0x1], 1 }
 0x32f   :  { %3773 = vsyncpa [#allocation8], 1 }
 0x330   :  { %3774 = vsyncpa [#allocation11], 1 }
 0x331   :  { %3775 = vsyncpa [#allocation4], 1 }
 0x332   :  { %3777 = vsyncpa [#allocation4 + $0x1], 1 }
 0x333   :  { %3778 = vsyncpa [#allocation5], 1 }
 0x334   :  { %3780 = vsyncpa [#allocation5 + $0x1], 1 }

// kernel: tpu_custom_call.1
= control target key start
LH: loop header
LB: loop body
LE: loop exit
PB: predicated region body
PF: predicated region fallthrough
CT: control target
= control target key end

     0   :  { %s6704_s0 = inlined_call_operand.hbm [shape: f32[2], index: 0, kind: input, shape index: {}]   ;;  %s6705_s1 = inlined_call_operand.hbm [shape: bf16[16,256], index: 1, kind: input, shape index: {}]   ;;  %s6706_s2 = inlined_call_operand.hbm [shape: bf16[256,1024], index: 2, kind: input, shape index: {}]   ;;  %s6707_s3 = inlined_call_operand.hbm [shape: f32[1,1024], index: 3, kind: input, shape index: {}]   ;;  %s6708_s4 = inlined_call_operand.hbm [shape: bf16[1024,512], index: 4, kind: input, shape index: {}]   ;;  %s6709_s5 = inlined_call_operand.vmem [shape: f32[1,512], index: 5, kind: input, shape index: {}]   ;;  %s6710_s6 = inlined_call_operand.hbm [shape: bf16[512,128], index: 6, kind: input, shape index: {}]   ;;  %s6711_s7 = inlined_call_operand.vmem [shape: f32[1,128], index: 7, kind: input, shape index: {}]   ;;  %s6712_s8 = inlined_call_operand.hbm [shape: f32[16,128], index: 8, kind: output, shape index: {}]  }
   0x1   :  { %6713 = sst [smem:[#allocation19_spill]] %s6704_s0 }
   0x2   :  { %6714 = sst [smem:[#allocation20_spill]] %s6706_s2 }
   0x3   :  { %13 = vsyncpa [#allocation5], 0 }
   0x4   :  { %14 = vsyncpa [#allocation3], 0 }
   0x5   :  { %16 = vsyncpa [#allocation3 + $0x1], 0 }
   0x6   :  { %17 = vsyncpa [#allocation8], 0 }
   0x7   :  { %18 = vsyncpa [#allocation11], 0 }
   0x8   :  { %19 = vsyncpa [#allocation4], 0 }
   0x9   :  { %21 = vsyncpa [#allocation4 + $0x1], 0  ;;  %s6387_s27 = smov 0   ;;  %s6389_s28 = smov 0  }
   0xa   :  { %s6391_s29 = smov 0   ;;  %s6393_s30 = smov 0  }
   0xb LB: > { %s6715_s2 = sld [smem:[#allocation20_spill]]  ;;  %s6411_s12 = sadd.s32 4294967295, %s6329_s30   ;;  %s6329_s30 = sphi %s6393_s30, %s6727_s30   ;;  %s6325_s29 = sphi %s6391_s29, %s6726_s29   ;;  %s6321_s28 = sphi %s6389_s28, %s6725_s28   ;;  %s6317_s27 = sphi %s6387_s27, %s6724_s27  }
   0xc   : > { %p3873_p0 = scmp.ge.s32.totalorder %s6329_s30, 1  ;;  %p69_p1 = scmp.eq.s32.totalorder %s6411_s12, 0 }
   0xd   : > { %p231_p2 = scmp.lt.s32.totalorder %s6329_s30, 3  ;;  %s6331_s14 = smov [#allocation7]  }
   0xe   : > { %s254_s15 = sshll.u32 %s6331_s14, 4  ;;  %s278_s18 = sshll.u32 %s6708_s4, 4  ;;  %s255_s15 = int_to_ptr.vmem [resolvable:$true] %s254_s15  ;;  %s279_s18 = int_to_ptr.hbm [resolvable:$true] %s278_s18 }
   0xf   : > { %p6416_p3 = pnand %p3873_p0, %p231_p2  ;;  %s6332_s20 = smov [#allocation10]  }
  0x10   : > { %s280_s21 = sshll.u32 %s6332_s20, 4  ;;  %s6333_s22 = smov 512   ;;  %s281_s21 = int_to_ptr.vmem [resolvable:$true] %s280_s21 }
  0x11   : > { %s252_s11 = sshll.u32 %s6715_s2, 4  ;;  %p6001_p4 = pneg %p6416_p3  ;;  %s253_s11 = int_to_ptr.hbm [resolvable:$true] %s252_s11 }
  0x12   : > { %s6334_s23 = smov 32   ;;  %s6335_s24 = smov 256  }
  0x13   : > { %p6428_p6 = pnand %p6001_p4, %p69_p1  ;;  %s6336_s25 = smov 16  }
  0x14   : > { %s6718_s0 = sld [smem:[#allocation19_spill]]  ;;  %s267_s17 = sshll.u32 %s6707_s3, 4  ;;  %s268_s17 = int_to_ptr.hbm [resolvable:$true] %s267_s17 }
  0x15   : > { %6007 = dma.hbm_to_vmem [thread:$0]  (!%p6428_p6), %s253_s11, 16384, %s255_s15, [#allocation8], %s6333_s22, %s6333_s22, %s6334_s23  }
  0x16   : > { %6013 = dma.hbm_to_vmem [thread:$0]  (!%p6428_p6), %s279_s18, 32768, %s281_s21, [#allocation11], %s6335_s24, %s6335_s24, %s6336_s25  }
  0x17   : > { %s6337_s20 = smov [#allocation2]   ;;  %s6338_s11 = smov [#allocation9]  }
  0x18   : > { %s269_s15 = sshll.u32 %s6338_s11, 4  ;;  %s295_s22 = sshll.u32 %s6710_s6, 4  ;;  %s270_s15 = int_to_ptr.vmem [resolvable:$true] %s269_s15  ;;  %s296_s22 = int_to_ptr.hbm [resolvable:$true] %s295_s22 }
  0x19   : > { %6010 = dma.hbm_to_vmem [thread:$0]  (!%p6428_p6), %s268_s17, 128, %s270_s15, [#allocation8]  }
  0x1a   : > { %s243_s10 = sshll.u32 %s6718_s0, 4  ;;  %s6339_s23 = smov [#allocation12]   ;;  %s244_s10 = int_to_ptr.hbm [resolvable:$true] %s243_s10 }
  0x1b   : > { %6004 = dma.hbm_to_smem (!%p6428_p6), %s244_s10, 16, %s6337_s20, [#allocation5]  }
  0x1c   : > { %s297_s24 = sshll.u32 %s6339_s23, 4  ;;  %s6340_s25 = smov 64   ;;  %s298_s24 = int_to_ptr.vmem [resolvable:$true] %s297_s24 }
  0x1d   : > { %s6341_s26 = smov 4   ;;  %s3872_s9 = sadd.s32 4294967294, %s6329_s30  }
  0x1e   : > { %6016 = dma.hbm_to_vmem [thread:$0]  (!%p6428_p6), %s296_s22, 4096, %s298_s24, [#allocation11], %s6340_s25, %s6340_s25, %s6341_s26  }
  0x1f   : > { %s6453_s10 = sadd.s32 1, %s6329_s30   ;;  %s55_s14 = sadd.s32 1, %s6325_s29 }
  0x20   : > { %s52_s16 = ssub.s32 %s6329_s30, %s6453_s10  ;;  %p62_p7 = scmp.ne.s32.totalorder %s6325_s29, %s6321_s28 }
  0x21   : > { %p53_p8 = scmp.eq.s32.totalorder %s52_s16, 0  ;;  %p63_p9 = scmp.eq.s32.totalorder %s6329_s30, 0 }
  0x22   : > { %p68_p10 = scmp.ne.s32.totalorder %s6321_s28, %s6317_s27  ;;  %p218_p11 = scmp.eq.s32.totalorder %s6411_s12, 1 }
  0x23   : > { %s6465_s17 = scalar_select %p53_p8, %s6325_s29, %s55_s14  }
  0x24   : > { %p6469_p12 = por %p69_p1, %p68_p10  ;;  %p6473_p13 = por %p218_p11, %p62_p7 }
  0x25   : > { %p224_p0 = scmp.eq.s32.totalorder %s3872_s9, 1  ;;  %p64_p2 = por %p63_p9, %p62_p7 }
  0x26   : > { %s314_s11 = sand.u32 1, %s6325_s29   ;;  %p6030_p6 = scmp.lt.s32.totalorder %s6329_s30, 2 }
  0x27   : > { %p6478_p4 = por %p224_p0, %p68_p10  ;;  %s3880_s18 = sshll.u32 %s314_s11, 3 }
  0x28   : > { %s5560_s21 = sshll.u32 %s6329_s30, 3  ;;  %s318_s26 = scalar_lea.vmem [#allocation6], %s3880_s18 }
  0x29   : > { %s323_s24 = scalar_lea.hbm %s6705_s1, %s5560_s21  ;;  %s327_s14 = sshll.u32 %s318_s26, 4  ;;  %s328_s14 = int_to_ptr.vmem [resolvable:$true] %s327_s14 }
  0x2a   : > { %s325_s25 = sshll.u32 %s323_s24, 4  ;;  %p6487_p8 = pnand %p6030_p6, %p64_p2  ;;  %s326_s25 = int_to_ptr.hbm [resolvable:$true] %s325_s25 }
  0x2b   : > { %s315_s16 = scalar_lea.sflag [#allocation3], %s314_s11  ;;  %s6221_s0 = sshra.s32 %s326_s25, 4  ;;  %s6222_s0 = int_to_ptr.hbm [resolvable:$true] %s6221_s0 }
  0x2c   : > { %s6223_s2 = scalar_lea.hbm %s6222_s0, 8  ;;  %p6225_p9 = pneg %p6487_p8 }
  0x2d   : > { %p6224_p7 = scmp.ne.s32.totalorder %s6222_s0, %s6223_s2  ;;  %s6228_s18 = scalar_lea.hbm %s6705_s1, 16 }
  0x2e   : > { %p6229_p0 = scmp.lt.s32.totalorder %s6222_s0, %s6705_s1  ;;  %p6230_p2 = scmp.lt.s32.totalorder %s6228_s18, %s6223_s2 }
  0x2f   : > { %p6226_p10 = pnand %p6225_p9, %p6224_p7 }
  0x30   : > { %p6231_p6 = por %p6230_p2, %p6229_p0 }
  0x31   : > { %p6227_p11 = pneg %p6226_p10 }
  0x33   : > { %p6232_p5 = pnand %p6231_p6, %p6227_p11 }
  0x35   : > { %6235 = shalt.err (!%p6232_p5)
}
  0x36   : > { %6020 = dma.hbm_to_vmem [thread:$0]  (!%p6487_p8), %s326_s25, 128, %s328_s14, %s315_s16  }
  0x37   : > { %336 = sbr.rel (%p6416_p3) target bundleno = 799 (0x31f), region = 52 }
  0x3c   : > { %6296 = dma.done.wait (%p69_p1), [#allocation5], 16  }
  0x3d   : > { %6298 = vsyncadd (%p69_p1), [#allocation5], 4294967280  ;;  %s6508_s11 = sand.u32 1, %s6321_s28  }
  0x3e   : > { %s3885_s0 = sshll.u32 %s6508_s11, 3  ;;  %s344_s2 = scalar_lea.sflag [#allocation3], %s6508_s11 }
  0x3f   : > { %s6514_s25 = scalar_lea.vmem [#allocation6], %s3885_s0 }
  0x40   : > { %6300 = dma.done.wait (%p6469_p12), %s344_s2, 128  }
  0x41   : > { %6302 = vsyncadd (%p6469_p12), %s344_s2, 4294967168 }
  0x42   : > { %6304 = dma.done.wait (%p69_p1), [#allocation8], 16512  }
  0x43   : > { %6306 = vsyncadd (%p69_p1), [#allocation8], 4294950784 }
  0x44   : > { %6308 = dma.done.wait (%p69_p1), [#allocation11], 36864  }
  0x45   : > { %6310 = vsyncadd (%p69_p1), [#allocation11], 4294930432 }
  0x46   : > { %373 = sfence }
  0x47   : > { %v4118_v0 = vld [vmem:[#allocation7 + $0x1c0] sm:$0xf]  ;;  %v5617_v5 = vld [vmem:[#allocation7 + $0x1c4] sm:$0xf]  ;;  %s6551_s13 = sld [smem:[#allocation2]]  ;;  %s5557_s18 = sshll.u32 %s6411_s12, 3 }
  0x48   : > { %v5621_v1 = vld [vmem:[#allocation7 + $0x1dc] sm:$0xf0]  ;;  %v4120_v6 = vld [vmem:[#allocation7 + $0x1e0] sm:$0xf0]  ;;  %s6642_s14 = sld [smem:[#allocation2 + $0x1]]  ;;  %s3747_s2 = scalar_lea.hbm %s6712_s8, %s5557_s18 }
  0x49   : > { %v4374_v2 = vld [vmem:[#allocation7 + $0x3c0] sm:$0xf]  ;;  %v4119_v3 = vor.u32 %v5621_v1, %v4118_v0  ;;  %v4123_v8 = vor.u32 %v5617_v5, %v4120_v6  ;;  %v5681_v9 = vld [vmem:[#allocation7 + $0x3c4] sm:$0xf]  ;;  %s3751_s19 = sshll.u32 %s3747_s2, 4  ;;  %s3737_s26 = scalar_lea.sflag [#allocation4], %s6508_s11  ;;  %s3752_s19 = int_to_ptr.hbm [resolvable:$true] %s3751_s19 }
  0x4a   : > { %v5685_v4 = vld [vmem:[#allocation7 + $0x3dc] sm:$0xf0]  ;;  %v4376_v10 = vld [vmem:[#allocation7 + $0x3e0] sm:$0xf0]  ;;  %s6271_s21 = scalar_lea.hbm %s6712_s8, 16 }
  0x4b   : > { %v4375_v7 = vor.u32 %v5685_v4, %v4374_v2  ;;  %v4086_v11 = vld [vmem:[#allocation7 + $0x180] sm:$0xf]  ;;  %1198 = vmatpush.bf16.msra.mxu0 %v4119_v3  ;;  %v4379_v12 = vor.u32 %v5681_v9, %v4376_v10  ;;  %1224 = vmatpush.bf16.msra.mxu2 %v4123_v8  ;;  %v5609_v18 = vld [vmem:[#allocation7 + $0x184] sm:$0xf] }
  0x4c   : > { %v5613_v13 = vld [vmem:[#allocation7 + $0x19c] sm:$0xf0]  ;;  %v4088_v19 = vld [vmem:[#allocation7 + $0x1a0] sm:$0xf0] }
  0x4d   : > { %v4342_v14 = vld [vmem:[#allocation7 + $0x380] sm:$0xf]  ;;  %1211 = vmatpush.bf16.msra.mxu1 %v4375_v7  ;;  %v4087_v16 = vor.u32 %v5613_v13, %v4086_v11  ;;  %v5673_v20 = vld [vmem:[#allocation7 + $0x384] sm:$0xf]  ;;  %1237 = vmatpush.bf16.msra.mxu3 %v4379_v12  ;;  %v4091_v21 = vor.u32 %v5609_v18, %v4088_v19 }
  0x4e   : > { %v5677_v15 = vld [vmem:[#allocation7 + $0x39c] sm:$0xf0]  ;;  %v4344_v22 = vld [vmem:[#allocation7 + $0x3a0] sm:$0xf0] }
  0x4f   : > { %v4343_v17 = vor.u32 %v5677_v15, %v4342_v14  ;;  %v4054_v23 = vld [vmem:[#allocation7 + $0x140] sm:$0xf]  ;;  %v4347_v25 = vor.u32 %v5673_v20, %v4344_v22  ;;  %v5601_v28 = vld [vmem:[#allocation7 + $0x144] sm:$0xf]  ;;  %1199 = vmatpush.bf16.msra.mxu0 %v4087_v16  ;;  %1225 = vmatpush.bf16.msra.mxu2 %v4091_v21 }
  0x50   : > { %v5605_v24 = vld [vmem:[#allocation7 + $0x15c] sm:$0xf0]  ;;  %v4056_v30 = vld [vmem:[#allocation7 + $0x160] sm:$0xf0] }
  0x51   : > { %v4310_v26 = vld [vmem:[#allocation7 + $0x340] sm:$0xf]  ;;  %v4055_v29 = vor.u32 %v5605_v24, %v4054_v23  ;;  %v5665_v31 = vld [vmem:[#allocation7 + $0x344] sm:$0xf]  ;;  %1212 = vmatpush.bf16.msra.mxu1 %v4343_v17  ;;  %v4059_v34 = vor.u32 %v5601_v28, %v4056_v30  ;;  %1238 = vmatpush.bf16.msra.mxu3 %v4347_v25  ;;  %v4126_v28 = vld [vmem:[#allocation7 + $0x1c8] sm:$0xf] }
  0x52   : > { %v5669_v27 = vld [vmem:[#allocation7 + $0x35c] sm:$0xf0]  ;;  %v4312_v32 = vld [vmem:[#allocation7 + $0x360] sm:$0xf0]  ;;  %v4382_v30 = vld [vmem:[#allocation7 + $0x3c8] sm:$0xf] }
  0x53   : > { %v4311_v33 = vor.u32 %v5669_v27, %v4310_v26  ;;  %v4022_v35 = vld [vmem:[#allocation7 + $0x100] sm:$0xf]  ;;  %v4315_v38 = vor.u32 %v5665_v31, %v4312_v32  ;;  %v5593_v40 = vld [vmem:[#allocation7 + $0x104] sm:$0xf]  ;;  %1200 = vmatpush.bf16.msra.mxu0 %v4055_v29  ;;  %1226 = vmatpush.bf16.msra.mxu2 %v4059_v34  ;;  %v5622_v29 = vld [vmem:[#allocation7 + $0x1e4] sm:$0xf0] }
  0x54   : > { %v5597_v36 = vld [vmem:[#allocation7 + $0x11c] sm:$0xf0]  ;;  %v4024_v41 = vld [vmem:[#allocation7 + $0x120] sm:$0xf0]  ;;  %v5686_v32 = vld [vmem:[#allocation7 + $0x3e4] sm:$0xf0] }
  0x55   : > { %v4278_v37 = vld [vmem:[#allocation7 + $0x300] sm:$0xf]  ;;  %v5657_v42 = vld [vmem:[#allocation7 + $0x304] sm:$0xf]  ;;  %v4023_v44 = vor.u32 %v5597_v36, %v4022_v35  ;;  %1213 = vmatpush.bf16.msra.mxu1 %v4311_v33  ;;  %v4027_v46 = vor.u32 %v5593_v40, %v4024_v41  ;;  %1239 = vmatpush.bf16.msra.mxu3 %v4315_v38  ;;  %v5618_v33 = vld [vmem:[#allocation7 + $0x1cc] sm:$0xf]  ;;  %v4127_v40 = vor.u32 %v5622_v29, %v4126_v28 }
  0x56   : > { %v5661_v39 = vld [vmem:[#allocation7 + $0x31c] sm:$0xf0]  ;;  %v4280_v43 = vld [vmem:[#allocation7 + $0x320] sm:$0xf0]  ;;  %v4128_v34 = vld [vmem:[#allocation7 + $0x1e8] sm:$0xf0]  ;;  %v4383_v41 = vor.u32 %v5686_v32, %v4382_v30 }
  0x57   : > { %v4279_v45 = vor.u32 %v5661_v39, %v4278_v37  ;;  %v3990_v47 = vld [vmem:[#allocation7 + $0xc0] sm:$0xf]  ;;  %v4283_v50 = vor.u32 %v5657_v42, %v4280_v43  ;;  %v5585_v52 = vld [vmem:[#allocation7 + $0xc4] sm:$0xf]  ;;  %1201 = vmatpush.bf16.msra.mxu0 %v4023_v44  ;;  %1227 = vmatpush.bf16.msra.mxu2 %v4027_v46  ;;  %v5682_v37 = vld [vmem:[#allocation7 + $0x3cc] sm:$0xf]  ;;  %v4131_v42 = vor.u32 %v5618_v33, %v4128_v34 }
  0x58   : > { %v5589_v48 = vld [vmem:[#allocation7 + $0xdc] sm:$0xf0]  ;;  %v3992_v53 = vld [vmem:[#allocation7 + $0xe0] sm:$0xf0]  ;;  %v4384_v38 = vld [vmem:[#allocation7 + $0x3e8] sm:$0xf0] }
  0x59   : > { %v4246_v49 = vld [vmem:[#allocation7 + $0x2c0] sm:$0xf]  ;;  %v5649_v54 = vld [vmem:[#allocation7 + $0x2c4] sm:$0xf]  ;;  %v3991_v56 = vor.u32 %v5589_v48, %v3990_v47  ;;  %1214 = vmatpush.bf16.msra.mxu1 %v4279_v45  ;;  %v3995_v58 = vor.u32 %v5585_v52, %v3992_v53  ;;  %1240 = vmatpush.bf16.msra.mxu3 %v4283_v50  ;;  %v4094_v43 = vld [vmem:[#allocation7 + $0x188] sm:$0xf]  ;;  %v4387_v46 = vor.u32 %v5682_v37, %v4384_v38 }
  0x5a   : > { %v5653_v51 = vld [vmem:[#allocation7 + $0x2dc] sm:$0xf0]  ;;  %v4248_v55 = vld [vmem:[#allocation7 + $0x2e0] sm:$0xf0]  ;;  %v5614_v44 = vld [vmem:[#allocation7 + $0x1a4] sm:$0xf0] }
  0x5b   : > { %v4247_v57 = vor.u32 %v5653_v51, %v4246_v49  ;;  %v3958_v59 = vld [vmem:[#allocation7 + $0x80] sm:$0xf]  ;;  %v4251_v62 = vor.u32 %v5649_v54, %v4248_v55  ;;  %v5577_v0 = vld [vmem:[#allocation7 + $0x84] sm:$0xf]  ;;  %1202 = vmatpush.bf16.msra.mxu0 %v3991_v56  ;;  %1228 = vmatpush.bf16.msra.mxu2 %v3995_v58  ;;  %v4350_v45 = vld [vmem:[#allocation7 + $0x388] sm:$0xf]  ;;  %v4095_v53 = vor.u32 %v5614_v44, %v4094_v43 }
  0x5c   : > { %v5581_v60 = vld [vmem:[#allocation7 + $0x9c] sm:$0xf0]  ;;  %v3960_v1 = vld [vmem:[#allocation7 + $0xa0] sm:$0xf0]  ;;  %v5678_v47 = vld [vmem:[#allocation7 + $0x3a4] sm:$0xf0] }
  0x5d   : > { %v4214_v61 = vld [vmem:[#allocation7 + $0x280] sm:$0xf]  ;;  %v5641_v2 = vld [vmem:[#allocation7 + $0x284] sm:$0xf]  ;;  %v3959_v4 = vor.u32 %v5581_v60, %v3958_v59  ;;  %1215 = vmatpush.bf16.msra.mxu1 %v4247_v57  ;;  %v3963_v6 = vor.u32 %v5577_v0, %v3960_v1  ;;  %1241 = vmatpush.bf16.msra.mxu3 %v4251_v62  ;;  %v5610_v48 = vld [vmem:[#allocation7 + $0x18c] sm:$0xf]  ;;  %v4351_v56 = vor.u32 %v5678_v47, %v4350_v45 }
  0x5e   : > { %v5645_v63 = vld [vmem:[#allocation7 + $0x29c] sm:$0xf0]  ;;  %v4216_v3 = vld [vmem:[#allocation7 + $0x2a0] sm:$0xf0]  ;;  %v4096_v49 = vld [vmem:[#allocation7 + $0x1a8] sm:$0xf0] }
  0x5f   : > { %v4215_v5 = vor.u32 %v5645_v63, %v4214_v61  ;;  %v3926_v7 = vld [vmem:[#allocation7 + $0x40] sm:$0xf]  ;;  %v4219_v10 = vor.u32 %v5641_v2, %v4216_v3  ;;  %v5569_v12 = vld [vmem:[#allocation7 + $0x44] sm:$0xf]  ;;  %1203 = vmatpush.bf16.msra.mxu0 %v3959_v4  ;;  %1229 = vmatpush.bf16.msra.mxu2 %v3963_v6  ;;  %v5674_v50 = vld [vmem:[#allocation7 + $0x38c] sm:$0xf]  ;;  %v4099_v57 = vor.u32 %v5610_v48, %v4096_v49 }
  0x60   : > { %v5573_v8 = vld [vmem:[#allocation7 + $0x5c] sm:$0xf0]  ;;  %v3928_v13 = vld [vmem:[#allocation7 + $0x60] sm:$0xf0]  ;;  %v4352_v51 = vld [vmem:[#allocation7 + $0x3a8] sm:$0xf0] }
  0x61   : > { %v4182_v9 = vld [vmem:[#allocation7 + $0x240] sm:$0xf]  ;;  %v5633_v14 = vld [vmem:[#allocation7 + $0x244] sm:$0xf]  ;;  %v3927_v16 = vor.u32 %v5573_v8, %v3926_v7  ;;  %1216 = vmatpush.bf16.msra.mxu1 %v4215_v5  ;;  %v3931_v20 = vor.u32 %v5569_v12, %v3928_v13  ;;  %1242 = vmatpush.bf16.msra.mxu3 %v4219_v10  ;;  %v404_v52 = vld [vmem:[%s6514_s25] sm:$0xff]  ;;  %v4355_v61 = vor.u32 %v5674_v50, %v4352_v51  ;;  %s401_s25 = scalar_lea.vmem [#allocation13], %s3885_s0 }
  0x62   : > { %v5637_v11 = vld [vmem:[#allocation7 + $0x25c] sm:$0xf0]  ;;  %v4184_v15 = vld [vmem:[#allocation7 + $0x260] sm:$0xf0]  ;;  %v552_v54 = vunpack.c.l.b16 %v404_v52  ;;  %v553_v55 = vunpack.c.h.b16 %v404_v52  ;;  %v4062_v58 = vld [vmem:[#allocation7 + $0x148] sm:$0xf] }
  0x63   : > { %v3894_v17 = vld [vmem:[#allocation7] sm:$0xf]  ;;  %v4183_v19 = vor.u32 %v5637_v11, %v4182_v9  ;;  %v5561_v23 = vld [vmem:[#allocation7 + $0x4] sm:$0xf]  ;;  %v4187_v24 = vor.u32 %v5633_v14, %v4184_v15  ;;  %1204 = vmatpush.bf16.msra.mxu0 %v3927_v16  ;;  %1230 = vmatpush.bf16.msra.mxu2 %v3931_v20  ;;  %v5606_v59 = vld [vmem:[#allocation7 + $0x164] sm:$0xf0] }
  0x64   : > { %v5565_v18 = vld [vmem:[#allocation7 + $0x1c] sm:$0xf0]  ;;  %v3896_v25 = vld [vmem:[#allocation7 + $0x20] sm:$0xf0]  ;;  %v4318_v60 = vld [vmem:[#allocation7 + $0x348] sm:$0xf]  ;;  %v6529_v1 = vpack.c.b16 %v552_v54, %v552_v54  ;;  %v6531_v4 = vpack.c.b16 %v553_v55, %v553_v55  ;;  %v4063_v5 = vor.u32 %v5606_v59, %v4062_v58 }
  0x65   : > { %v4150_v21 = vld [vmem:[#allocation7 + $0x200] sm:$0xf]  ;;  %v5625_v26 = vld [vmem:[#allocation7 + $0x204] sm:$0xf]  ;;  %v3895_v31 = vor.u32 %v5565_v18, %v3894_v17  ;;  %1217 = vmatpush.bf16.msra.mxu1 %v4183_v19  ;;  %v3899_v36 = vor.u32 %v5561_v23, %v3896_v25  ;;  %1243 = vmatpush.bf16.msra.mxu3 %v4187_v24  ;;  %v5670_v62 = vld [vmem:[#allocation7 + $0x364] sm:$0xf0] }
  0x66   : > { %v5629_v22 = vld [vmem:[#allocation7 + $0x21c] sm:$0xf0]  ;;  %v4152_v27 = vld [vmem:[#allocation7 + $0x220] sm:$0xf0]  ;;  %v5602_v63 = vld [vmem:[#allocation7 + $0x14c] sm:$0xf]  ;;  %v4319_v6 = vor.u32 %v5670_v62, %v4318_v60 }
  0x67   : > { %v4151_v35 = vor.u32 %v5629_v22, %v4150_v21  ;;  %v4155_v39 = vor.u32 %v5625_v26, %v4152_v27  ;;  %1205 = vmatpush.bf16.msra.mxu0 %v3895_v31  ;;  %1231 = vmatpush.bf16.msra.mxu2 %v3899_v36  ;;  %v4064_v0 = vld [vmem:[#allocation7 + $0x168] sm:$0xf0]  ;;  %v4030_v8 = vld [vmem:[#allocation7 + $0x108] sm:$0xf] }
  0x68   : > { %v5666_v2 = vld [vmem:[#allocation7 + $0x34c] sm:$0xf]  ;;  %v4067_v7 = vor.u32 %v5602_v63, %v4064_v0  ;;  %v5598_v9 = vld [vmem:[#allocation7 + $0x124] sm:$0xf0] }
  0x69   : > { %1218 = vmatpush.bf16.msra.mxu1 %v4151_v35  ;;  %1244 = vmatpush.bf16.msra.mxu3 %v4155_v39  ;;  %v4320_v3 = vld [vmem:[#allocation7 + $0x368] sm:$0xf0]  ;;  %v4286_v10 = vld [vmem:[#allocation7 + $0x308] sm:$0xf]  ;;  %v4031_v17 = vor.u32 %v5598_v9, %v4030_v8  ;;  %v5619_v8 = vld [vmem:[#allocation7 + $0x1d4] sm:$0xf] }
  0x6a   : > { %1232 = vmatmul.bf16.vlgmr.msra.gmra.mxu2 %v6529_v1  ;;  %v4323_v11 = vor.u32 %v5666_v2, %v4320_v3  ;;  %v5662_v12 = vld [vmem:[#allocation7 + $0x324] sm:$0xf0]  ;;  %v5594_v13 = vld [vmem:[#allocation7 + $0x10c] sm:$0xf]  ;;  %1206 = vmatmul.bf16.vlgmr.msra.gmra.mxu0 %v6529_v1  ;;  %v4134_v2 = vld [vmem:[#allocation7 + $0x1d0] sm:$0xf] }
  0x6b   : > { %1250 = vmatpush.bf16.msrb.mxu0 %v4127_v40  ;;  %1276 = vmatpush.bf16.msrb.mxu2 %v4131_v42  ;;  %v4032_v14 = vld [vmem:[#allocation7 + $0x128] sm:$0xf0]  ;;  %v4287_v18 = vor.u32 %v5662_v12, %v4286_v10  ;;  %v3998_v20 = vld [vmem:[#allocation7 + $0xc8] sm:$0xf]  ;;  %v5623_v3 = vld [vmem:[#allocation7 + $0x1ec] sm:$0xf0] }
  0x6c   : > { %v5658_v15 = vld [vmem:[#allocation7 + $0x30c] sm:$0xf]  ;;  %1219 = vmatmul.bf16.vlgmr.msra.gmra.mxu1 %v6531_v4  ;;  %1245 = vmatmul.bf16.vlgmr.msra.gmra.mxu3 %v6531_v4  ;;  %v4035_v19 = vor.u32 %v5594_v13, %v4032_v14  ;;  %v5590_v21 = vld [vmem:[#allocation7 + $0xe4] sm:$0xf0]  ;;  %v4136_v9 = vld [vmem:[#allocation7 + $0x1f0] sm:$0xf0] }
  0x6d   : > { %1263 = vmatpush.bf16.msrb.mxu1 %v4383_v41  ;;  %1289 = vmatpush.bf16.msrb.mxu3 %v4387_v46  ;;  %v4288_v16 = vld [vmem:[#allocation7 + $0x328] sm:$0xf0]  ;;  %v4254_v22 = vld [vmem:[#allocation7 + $0x2c8] sm:$0xf]  ;;  %v3999_v29 = vor.u32 %v5590_v21, %v3998_v20  ;;  %v5683_v12 = vld [vmem:[#allocation7 + $0x3d4] sm:$0xf] }
  0x6e   : > { %v4291_v23 = vor.u32 %v5658_v15, %v4288_v16  ;;  %v5654_v24 = vld [vmem:[#allocation7 + $0x2e4] sm:$0xf0]  ;;  %v5586_v25 = vld [vmem:[#allocation7 + $0xcc] sm:$0xf]  ;;  %v4392_v13 = vld [vmem:[#allocation7 + $0x3f0] sm:$0xf0]  ;;  %v4135_v15 = vor.u32 %v5623_v3, %v4134_v2 }
  0x6f   : > { %1251 = vmatpush.bf16.msrb.mxu0 %v4095_v53  ;;  %1277 = vmatpush.bf16.msrb.mxu2 %v4099_v57  ;;  %v4000_v26 = vld [vmem:[#allocation7 + $0xe8] sm:$0xf0]  ;;  %v4255_v30 = vor.u32 %v5654_v24, %v4254_v22  ;;  %v3966_v32 = vld [vmem:[#allocation7 + $0x88] sm:$0xf]  ;;  %v4358_v20 = vld [vmem:[#allocation7 + $0x390] sm:$0xf]  ;;  %v4395_v21 = vor.u32 %v5683_v12, %v4392_v13 }
  0x70   : > { %v5650_v27 = vld [vmem:[#allocation7 + $0x2cc] sm:$0xf]  ;;  %v4003_v31 = vor.u32 %v5586_v25, %v4000_v26  ;;  %v5582_v33 = vld [vmem:[#allocation7 + $0xa4] sm:$0xf0]  ;;  %v5679_v22 = vld [vmem:[#allocation7 + $0x3ac] sm:$0xf0] }
  0x71   : > { %1264 = vmatpush.bf16.msrb.mxu1 %v4351_v56  ;;  %1290 = vmatpush.bf16.msrb.mxu3 %v4355_v61  ;;  %v4256_v28 = vld [vmem:[#allocation7 + $0x2e8] sm:$0xf0]  ;;  %v4222_v34 = vld [vmem:[#allocation7 + $0x288] sm:$0xf]  ;;  %v3967_v41 = vor.u32 %v5582_v33, %v3966_v32  ;;  %v4104_v24 = vld [vmem:[#allocation7 + $0x1b0] sm:$0xf0] }
  0x72   : > { %v4259_v35 = vor.u32 %v5650_v27, %v4256_v28  ;;  %v5646_v36 = vld [vmem:[#allocation7 + $0x2a4] sm:$0xf0]  ;;  %v5578_v37 = vld [vmem:[#allocation7 + $0x8c] sm:$0xf]  ;;  %v5675_v25 = vld [vmem:[#allocation7 + $0x394] sm:$0xf]  ;;  %v4359_v28 = vor.u32 %v5679_v22, %v4358_v20 }
  0x73   : > { %1252 = vmatpush.bf16.msrb.mxu0 %v4063_v5  ;;  %1278 = vmatpush.bf16.msrb.mxu2 %v4067_v7  ;;  %v3968_v38 = vld [vmem:[#allocation7 + $0xa8] sm:$0xf0]  ;;  %v4223_v42 = vor.u32 %v5646_v36, %v4222_v34  ;;  %v3934_v44 = vld [vmem:[#allocation7 + $0x48] sm:$0xf]  ;;  %v4390_v5 = vld [vmem:[#allocation7 + $0x3d0] sm:$0xf] }
  0x74   : > { %v5642_v39 = vld [vmem:[#allocation7 + $0x28c] sm:$0xf]  ;;  %v3971_v43 = vor.u32 %v5578_v37, %v3968_v38  ;;  %v5574_v45 = vld [vmem:[#allocation7 + $0x64] sm:$0xf0]  ;;  %v5687_v7 = vld [vmem:[#allocation7 + $0x3ec] sm:$0xf0] }
  0x75   : > { %1265 = vmatpush.bf16.msrb.mxu1 %v4319_v6  ;;  %1291 = vmatpush.bf16.msrb.mxu3 %v4323_v11  ;;  %v4224_v40 = vld [vmem:[#allocation7 + $0x2a8] sm:$0xf0]  ;;  %v4190_v46 = vld [vmem:[#allocation7 + $0x248] sm:$0xf]  ;;  %v3935_v53 = vor.u32 %v5574_v45, %v3934_v44  ;;  %v4391_v16 = vor.u32 %v5687_v7, %v4390_v5  ;;  %v4360_v26 = vld [vmem:[#allocation7 + $0x3b0] sm:$0xf0] }
  0x76   : > { %v4227_v47 = vor.u32 %v5642_v39, %v4224_v40  ;;  %v5638_v48 = vld [vmem:[#allocation7 + $0x264] sm:$0xf0]  ;;  %v5570_v49 = vld [vmem:[#allocation7 + $0x4c] sm:$0xf]  ;;  %v4326_v32 = vld [vmem:[#allocation7 + $0x350] sm:$0xf]  ;;  %v4363_v33 = vor.u32 %v5675_v25, %v4360_v26 }
  0x77   : > { %1253 = vmatpush.bf16.msrb.mxu0 %v4031_v17  ;;  %1279 = vmatpush.bf16.msrb.mxu2 %v4035_v19  ;;  %v3936_v50 = vld [vmem:[#allocation7 + $0x68] sm:$0xf0]  ;;  %v3902_v54 = vld [vmem:[#allocation7 + $0x8] sm:$0xf]  ;;  %v4191_v56 = vor.u32 %v5638_v48, %v4190_v46  ;;  %v4139_v17 = vor.u32 %v5619_v8, %v4136_v9  ;;  %v5615_v19 = vld [vmem:[#allocation7 + $0x1ac] sm:$0xf0] }
  0x78   : > { %v5634_v51 = vld [vmem:[#allocation7 + $0x24c] sm:$0xf]  ;;  %v5566_v55 = vld [vmem:[#allocation7 + $0x24] sm:$0xf0]  ;;  %v3939_v57 = vor.u32 %v5570_v49, %v3936_v50  ;;  %v5671_v34 = vld [vmem:[#allocation7 + $0x36c] sm:$0xf0] }
  0x79   : > { %1266 = vmatpush.bf16.msrb.mxu1 %v4287_v18  ;;  %1292 = vmatpush.bf16.msrb.mxu3 %v4291_v23  ;;  %v4192_v52 = vld [vmem:[#allocation7 + $0x268] sm:$0xf0]  ;;  %v4158_v58 = vld [vmem:[#allocation7 + $0x208] sm:$0xf]  ;;  %v3903_v6 = vor.u32 %v5566_v55, %v3902_v54  ;;  %v4102_v18 = vld [vmem:[#allocation7 + $0x190] sm:$0xf]  ;;  %v4327_v40 = vor.u32 %v5671_v34, %v4326_v32 }
  0x7a   : > { %v5630_v59 = vld [vmem:[#allocation7 + $0x224] sm:$0xf0]  ;;  %v5562_v60 = vld [vmem:[#allocation7 + $0xc] sm:$0xf]  ;;  %v4195_v61 = vor.u32 %v5634_v51, %v4192_v52  ;;  %v5611_v23 = vld [vmem:[#allocation7 + $0x194] sm:$0xf]  ;;  %v4103_v27 = vor.u32 %v5615_v19, %v4102_v18 }
  0x7b   : > { %1254 = vmatpush.bf16.msrb.mxu0 %v3999_v29  ;;  %1280 = vmatpush.bf16.msrb.mxu2 %v4003_v31  ;;  %v3904_v62 = vld [vmem:[#allocation7 + $0x28] sm:$0xf0]  ;;  %v4159_v10 = vor.u32 %v5630_v59, %v4158_v58  ;;  %v4107_v29 = vor.u32 %v5611_v23, %v4104_v24  ;;  %v5607_v31 = vld [vmem:[#allocation7 + $0x16c] sm:$0xf0]  ;;  %v4072_v36 = vld [vmem:[#allocation7 + $0x170] sm:$0xf0] }
  0x7c   : > { %v5626_v63 = vld [vmem:[#allocation7 + $0x20c] sm:$0xf]  ;;  %v3907_v11 = vor.u32 %v5562_v60, %v3904_v62  ;;  %v5667_v37 = vld [vmem:[#allocation7 + $0x354] sm:$0xf]  ;;  %v4294_v44 = vld [vmem:[#allocation7 + $0x310] sm:$0xf] }
  0x7d   : > { %1267 = vmatpush.bf16.msrb.mxu1 %v4255_v30  ;;  %1293 = vmatpush.bf16.msrb.mxu3 %v4259_v35  ;;  %v4160_v0 = vld [vmem:[#allocation7 + $0x228] sm:$0xf0]  ;;  %v4070_v30 = vld [vmem:[#allocation7 + $0x150] sm:$0xf]  ;;  %v5603_v35 = vld [vmem:[#allocation7 + $0x154] sm:$0xf] }
  0x7e   : > { %v4163_v14 = vor.u32 %v5626_v63, %v4160_v0  ;;  %v4328_v38 = vld [vmem:[#allocation7 + $0x370] sm:$0xf0]  ;;  %v4071_v39 = vor.u32 %v5607_v31, %v4070_v30  ;;  %v5663_v46 = vld [vmem:[#allocation7 + $0x32c] sm:$0xf0] }
  0x7f   : > { %1255 = vmatpush.bf16.msrb.mxu0 %v3967_v41  ;;  %1281 = vmatpush.bf16.msrb.mxu2 %v3971_v43  ;;  %v4075_v41 = vor.u32 %v5603_v35, %v4072_v36  ;;  %v5599_v43 = vld [vmem:[#allocation7 + $0x12c] sm:$0xf0]  ;;  %v4331_v45 = vor.u32 %v5667_v37, %v4328_v38  ;;  %v4040_v48 = vld [vmem:[#allocation7 + $0x130] sm:$0xf0]  ;;  %v4295_v52 = vor.u32 %v5663_v46, %v4294_v44  ;;  %v4142_v37 = vld [vmem:[#allocation7 + $0x1d8] sm:$0xf] }
  0x80   : > { %v5659_v49 = vld [vmem:[#allocation7 + $0x314] sm:$0xf]  ;;  %v4006_v54 = vld [vmem:[#allocation7 + $0xd0] sm:$0xf]  ;;  %v5624_v38 = vld [vmem:[#allocation7 + $0x1f4] sm:$0xf0] }
  0x81   : > { %1268 = vmatpush.bf16.msrb.mxu1 %v4223_v42  ;;  %1294 = vmatpush.bf16.msrb.mxu3 %v4227_v47  ;;  %v4038_v42 = vld [vmem:[#allocation7 + $0x110] sm:$0xf]  ;;  %v5595_v47 = vld [vmem:[#allocation7 + $0x114] sm:$0xf]  ;;  %v5684_v46 = vld [vmem:[#allocation7 + $0x3dc] sm:$0xf] }
  0x82   : > { %v4296_v50 = vld [vmem:[#allocation7 + $0x330] sm:$0xf0]  ;;  %v4039_v51 = vor.u32 %v5599_v43, %v4038_v42  ;;  %v5591_v55 = vld [vmem:[#allocation7 + $0xec] sm:$0xf0]  ;;  %v5620_v42 = vld [vmem:[#allocation7 + $0x1dc] sm:$0xf] }
  0x83   : > { %1256 = vmatpush.bf16.msrb.mxu0 %v3935_v53  ;;  %1282 = vmatpush.bf16.msrb.mxu2 %v3939_v57  ;;  %v4043_v53 = vor.u32 %v5595_v47, %v4040_v48  ;;  %v4299_v57 = vor.u32 %v5659_v49, %v4296_v50  ;;  %v5655_v58 = vld [vmem:[#allocation7 + $0x2ec] sm:$0xf0]  ;;  %v5587_v59 = vld [vmem:[#allocation7 + $0xd4] sm:$0xf]  ;;  %v4007_v63 = vor.u32 %v5591_v55, %v4006_v54  ;;  %v4144_v43 = vld [vmem:[#allocation7 + $0x1f8] sm:$0xf0] }
  0x84   : > { %v4008_v60 = vld [vmem:[#allocation7 + $0xf0] sm:$0xf0]  ;;  %v3974_v3 = vld [vmem:[#allocation7 + $0x90] sm:$0xf]  ;;  %v4400_v47 = vld [vmem:[#allocation7 + $0x3f8] sm:$0xf0]  ;;  %v4143_v49 = vor.u32 %v5624_v38, %v4142_v37 }
  0x85   : > { %1269 = vmatpush.bf16.msrb.mxu1 %v4191_v56  ;;  %1295 = vmatpush.bf16.msrb.mxu3 %v4195_v61  ;;  %v4262_v56 = vld [vmem:[#allocation7 + $0x2d0] sm:$0xf]  ;;  %v5651_v61 = vld [vmem:[#allocation7 + $0x2d4] sm:$0xf]  ;;  %v4011_v2 = vor.u32 %v5587_v59, %v4008_v60  ;;  %v4366_v54 = vld [vmem:[#allocation7 + $0x398] sm:$0xf]  ;;  %v4403_v55 = vor.u32 %v5684_v46, %v4400_v47 }
  0x86   : > { %v4264_v62 = vld [vmem:[#allocation7 + $0x2f0] sm:$0xf0]  ;;  %v4263_v0 = vor.u32 %v5655_v58, %v4262_v56  ;;  %v5583_v5 = vld [vmem:[#allocation7 + $0xac] sm:$0xf0]  ;;  %v5680_v56 = vld [vmem:[#allocation7 + $0x3b4] sm:$0xf0] }
  0x87   : > { %1257 = vmatpush.bf16.msrb.mxu0 %v3903_v6  ;;  %1283 = vmatpush.bf16.msrb.mxu2 %v3907_v11  ;;  %v4230_v6 = vld [vmem:[#allocation7 + $0x290] sm:$0xf]  ;;  %v4267_v7 = vor.u32 %v5651_v61, %v4264_v62  ;;  %v5579_v9 = vld [vmem:[#allocation7 + $0x94] sm:$0xf]  ;;  %v3975_v13 = vor.u32 %v5583_v5, %v3974_v3  ;;  %v4112_v58 = vld [vmem:[#allocation7 + $0x1b8] sm:$0xf0]  ;;  %v4367_v62 = vor.u32 %v5680_v56, %v4366_v54 }
  0x88   : > { %v5647_v8 = vld [vmem:[#allocation7 + $0x2ac] sm:$0xf0]  ;;  %v5643_v11 = vld [vmem:[#allocation7 + $0x294] sm:$0xf]  ;;  %v5676_v59 = vld [vmem:[#allocation7 + $0x39c] sm:$0xf] }
  0x89   : > { %1270 = vmatpush.bf16.msrb.mxu1 %v4159_v10  ;;  %1296 = vmatpush.bf16.msrb.mxu3 %v4163_v14  ;;  %v3976_v10 = vld [vmem:[#allocation7 + $0xb0] sm:$0xf0]  ;;  %v4231_v14 = vor.u32 %v5647_v8, %v4230_v6  ;;  %v4198_v18 = vld [vmem:[#allocation7 + $0x250] sm:$0xf]  ;;  %v4368_v60 = vld [vmem:[#allocation7 + $0x3b8] sm:$0xf0] }
  0x8a   : > { %1258 = vmatmul.bf16.vlgmr.msrb.gmra.mxu0 %v6529_v1  ;;  %1284 = vmatmul.bf16.vlgmr.msrb.gmra.mxu2 %v6529_v1  ;;  %v4232_v12 = vld [vmem:[#allocation7 + $0x2b0] sm:$0xf0]  ;;  %v5639_v20 = vld [vmem:[#allocation7 + $0x26c] sm:$0xf0]  ;;  %v4334_v3 = vld [vmem:[#allocation7 + $0x358] sm:$0xf]  ;;  %v4371_v5 = vor.u32 %v5676_v59, %v4368_v60 }
  0x8b   : > { %1302 = vmatpush.bf16.msra.mxu0 %v4135_v15  ;;  %1328 = vmatpush.bf16.msra.mxu2 %v4139_v17  ;;  %v3979_v15 = vor.u32 %v5579_v9, %v3976_v10  ;;  %v5575_v17 = vld [vmem:[#allocation7 + $0x6c] sm:$0xf0]  ;;  %v4235_v19 = vor.u32 %v5643_v11, %v4232_v12  ;;  %v3944_v22 = vld [vmem:[#allocation7 + $0x70] sm:$0xf0]  ;;  %v5672_v6 = vld [vmem:[#allocation7 + $0x374] sm:$0xf0] }
  0x8c   : > { %1271 = vmatmul.bf16.vlgmr.msrb.gmra.mxu1 %v6531_v4  ;;  %1297 = vmatmul.bf16.vlgmr.msrb.gmra.mxu3 %v6531_v4  ;;  %v5635_v23 = vld [vmem:[#allocation7 + $0x254] sm:$0xf]  ;;  %v3910_v26 = vld [vmem:[#allocation7 + $0x10] sm:$0xf]  ;;  %v4080_v8 = vld [vmem:[#allocation7 + $0x178] sm:$0xf0]  ;;  %v4335_v12 = vor.u32 %v5672_v6, %v4334_v3 }
  0x8d   : > { %1315 = vmatpush.bf16.msra.mxu1 %v4391_v16  ;;  %1341 = vmatpush.bf16.msra.mxu3 %v4395_v21  ;;  %v3942_v16 = vld [vmem:[#allocation7 + $0x50] sm:$0xf]  ;;  %v5571_v21 = vld [vmem:[#allocation7 + $0x54] sm:$0xf]  ;;  %v5668_v9 = vld [vmem:[#allocation7 + $0x35c] sm:$0xf] }
  0x8e   : > { %v4200_v24 = vld [vmem:[#allocation7 + $0x270] sm:$0xf0]  ;;  %v3943_v25 = vor.u32 %v5575_v17, %v3942_v16  ;;  %v4166_v30 = vld [vmem:[#allocation7 + $0x210] sm:$0xf]  ;;  %v4336_v10 = vld [vmem:[#allocation7 + $0x378] sm:$0xf0] }
  0x8f   : > { %1303 = vmatpush.bf16.msra.mxu0 %v4103_v27  ;;  %1329 = vmatpush.bf16.msra.mxu2 %v4107_v29  ;;  %v5567_v27 = vld [vmem:[#allocation7 + $0x2c] sm:$0xf0]  ;;  %v3947_v29 = vor.u32 %v5571_v21, %v3944_v22  ;;  %v5563_v32 = vld [vmem:[#allocation7 + $0x14] sm:$0xf]  ;;  %v4302_v16 = vld [vmem:[#allocation7 + $0x318] sm:$0xf]  ;;  %v4339_v17 = vor.u32 %v5668_v9, %v4336_v10 }
  0x90   : > { %v5631_v31 = vld [vmem:[#allocation7 + $0x22c] sm:$0xf0]  ;;  %v3912_v34 = vld [vmem:[#allocation7 + $0x30] sm:$0xf0]  ;;  %v5660_v21 = vld [vmem:[#allocation7 + $0x31c] sm:$0xf] }
  0x91   : > { %1316 = vmatpush.bf16.msra.mxu1 %v4359_v28  ;;  %1342 = vmatpush.bf16.msra.mxu3 %v4363_v33  ;;  %v4199_v28 = vor.u32 %v5639_v20, %v4198_v18  ;;  %v4203_v33 = vor.u32 %v5635_v23, %v4200_v24  ;;  %v5627_v35 = vld [vmem:[#allocation7 + $0x214] sm:$0xf]  ;;  %v4167_v44 = vor.u32 %v5631_v31, %v4166_v30  ;;  %v5664_v18 = vld [vmem:[#allocation7 + $0x334] sm:$0xf0]  ;;  %v4048_v20 = vld [vmem:[#allocation7 + $0x138] sm:$0xf0] }
  0x92   : > { %v4168_v36 = vld [vmem:[#allocation7 + $0x230] sm:$0xf0]  ;;  %v4304_v22 = vld [vmem:[#allocation7 + $0x338] sm:$0xf0]  ;;  %v4303_v24 = vor.u32 %v5664_v18, %v4302_v16  ;;  %v5656_v30 = vld [vmem:[#allocation7 + $0x2f4] sm:$0xf0] }
  0x93   : > { %1304 = vmatpush.bf16.msra.mxu0 %v4071_v39  ;;  %1330 = vmatpush.bf16.msra.mxu2 %v4075_v41  ;;  %v4398_v39 = vld [vmem:[#allocation7 + $0x3d8] sm:$0xf]  ;;  %v4171_v48 = vor.u32 %v5627_v35, %v4168_v36  ;;  %v5588_v31 = vld [vmem:[#allocation7 + $0xdc] sm:$0xf]  ;;  %v4518_v9 = vld [vmem:[#allocation10 + $0xe0] sm:$0xf] }
  0x94   : > { %v5688_v41 = vld [vmem:[#allocation7 + $0x3f4] sm:$0xf0]  ;;  %v4240_v46 = vld [vmem:[#allocation7 + $0x2b8] sm:$0xf0]  ;;  %v4774_v18 = vld [vmem:[#allocation10 + $0x2e0] sm:$0xf] }
  0x95   : > { %1317 = vmatpush.bf16.msra.mxu1 %v4327_v40  ;;  %1343 = vmatpush.bf16.msra.mxu3 %v4331_v45  ;;  %v3911_v40 = vor.u32 %v5567_v27, %v3910_v26  ;;  %v3915_v45 = vor.u32 %v5563_v32, %v3912_v34  ;;  %v4399_v50 = vor.u32 %v5688_v41, %v4398_v39  ;;  %v4014_v26 = vld [vmem:[#allocation7 + $0xd8] sm:$0xf]  ;;  %v4016_v32 = vld [vmem:[#allocation7 + $0xf8] sm:$0xf0] }
  0x96   : > { %v5592_v27 = vld [vmem:[#allocation7 + $0xf4] sm:$0xf0]  ;;  %v4272_v34 = vld [vmem:[#allocation7 + $0x2f8] sm:$0xf0]  ;;  %v4019_v37 = vor.u32 %v5588_v31, %v4016_v32  ;;  %v4614_v32 = vld [vmem:[#allocation10 + $0x1a0] sm:$0xf] }
  0x97   : > { %1305 = vmatpush.bf16.msra.mxu0 %v4039_v51  ;;  %1331 = vmatpush.bf16.msra.mxu2 %v4043_v53  ;;  %v4147_v51 = vor.u32 %v5620_v42, %v4144_v43  ;;  %v5616_v53 = vld [vmem:[#allocation7 + $0x1b4] sm:$0xf0]  ;;  %v4015_v35 = vor.u32 %v5592_v27, %v4014_v26  ;;  %v5580_v43 = vld [vmem:[#allocation7 + $0x9c] sm:$0xf]  ;;  %v4758_v27 = vld [vmem:[#allocation10 + $0x2c0] sm:$0xf] }
  0x98   : > { %v3982_v38 = vld [vmem:[#allocation7 + $0x98] sm:$0xf]  ;;  %v3952_v56 = vld [vmem:[#allocation7 + $0x78] sm:$0xf0] }
  0x99   : > { %1318 = vmatpush.bf16.msra.mxu1 %v4295_v52  ;;  %1344 = vmatpush.bf16.msra.mxu3 %v4299_v57  ;;  %v4110_v52 = vld [vmem:[#allocation7 + $0x198] sm:$0xf]  ;;  %v5612_v57 = vld [vmem:[#allocation7 + $0x19c] sm:$0xf] }
  0x9a   : > { %v4111_v61 = vor.u32 %v5616_v53, %v4110_v52  ;;  %v5584_v39 = vld [vmem:[#allocation7 + $0xb4] sm:$0xf0]  ;;  %v3920_v6 = vld [vmem:[#allocation7 + $0x38] sm:$0xf0] }
  0x9b   : > { %1306 = vmatpush.bf16.msra.mxu0 %v4007_v63  ;;  %1332 = vmatpush.bf16.msra.mxu2 %v4011_v2  ;;  %v4115_v63 = vor.u32 %v5612_v57, %v4112_v58  ;;  %v5608_v2 = vld [vmem:[#allocation7 + $0x174] sm:$0xf0]  ;;  %v3983_v47 = vor.u32 %v5584_v39, %v3982_v38  ;;  %v5636_v57 = vld [vmem:[#allocation7 + $0x25c] sm:$0xf]  ;;  %v4598_v39 = vld [vmem:[#allocation10 + $0x180] sm:$0xf] }
  0x9c   : > { %v5648_v42 = vld [vmem:[#allocation7 + $0x2b4] sm:$0xf0]  ;;  %v4208_v58 = vld [vmem:[#allocation7 + $0x278] sm:$0xf0] }
  0x9d   : > { %1319 = vmatpush.bf16.msra.mxu1 %v4263_v0  ;;  %1345 = vmatpush.bf16.msra.mxu3 %v4267_v7  ;;  %v4078_v0 = vld [vmem:[#allocation7 + $0x158] sm:$0xf]  ;;  %v5604_v7 = vld [vmem:[#allocation7 + $0x15c] sm:$0xf]  ;;  %v4211_v3 = vor.u32 %v5636_v57, %v4208_v58  ;;  %v4742_v58 = vld [vmem:[#allocation10 + $0x2a0] sm:$0xf] }
  0x9e   : > { %v4079_v11 = vor.u32 %v5608_v2, %v4078_v0  ;;  %v4206_v52 = vld [vmem:[#allocation7 + $0x258] sm:$0xf] }
  0x9f   : > { %1307 = vmatpush.bf16.msra.mxu0 %v3975_v13  ;;  %1333 = vmatpush.bf16.msra.mxu2 %v3979_v15  ;;  %v4083_v13 = vor.u32 %v5604_v7, %v4080_v8  ;;  %v5600_v15 = vld [vmem:[#allocation7 + $0x134] sm:$0xf0]  ;;  %v5628_v7 = vld [vmem:[#allocation7 + $0x21c] sm:$0xf] }
  0xa0   : > { %v5640_v54 = vld [vmem:[#allocation7 + $0x274] sm:$0xf0]  ;;  %v4176_v8 = vld [vmem:[#allocation7 + $0x238] sm:$0xf0] }
  0xa1   : > { %1320 = vmatpush.bf16.msra.mxu1 %v4231_v14  ;;  %1346 = vmatpush.bf16.msra.mxu3 %v4235_v19  ;;  %v4046_v14 = vld [vmem:[#allocation7 + $0x118] sm:$0xf]  ;;  %v5596_v19 = vld [vmem:[#allocation7 + $0x11c] sm:$0xf]  ;;  %v4179_v16 = vor.u32 %v5628_v7, %v4176_v8 }
  0xa2   : > { %v4047_v23 = vor.u32 %v5600_v15, %v4046_v14  ;;  %v3918_v60 = vld [vmem:[#allocation7 + $0x18] sm:$0xf] }
  0xa3   : > { %1308 = vmatpush.bf16.msra.mxu0 %v3943_v25  ;;  %1334 = vmatpush.bf16.msra.mxu2 %v3947_v29  ;;  %v4051_v25 = vor.u32 %v5596_v19, %v4048_v20  ;;  %v4307_v29 = vor.u32 %v5660_v21, %v4304_v22  ;;  %v4174_v0 = vld [vmem:[#allocation7 + $0x218] sm:$0xf]  ;;  %v4502_v20 = vld [vmem:[#allocation10 + $0xc0] sm:$0xf] }
  0xa4   : > { %v5632_v2 = vld [vmem:[#allocation7 + $0x234] sm:$0xf0] }
  0xa5   : > { %1321 = vmatpush.bf16.msra.mxu1 %v4199_v28  ;;  %1347 = vmatpush.bf16.msra.mxu3 %v4203_v33  ;;  %v4270_v28 = vld [vmem:[#allocation7 + $0x2d8] sm:$0xf]  ;;  %v5652_v33 = vld [vmem:[#allocation7 + $0x2dc] sm:$0xf]  ;;  %v4175_v14 = vor.u32 %v5632_v2, %v4174_v0  ;;  %v4886_v2 = vld [vmem:[#allocation10 + $0x3c0] sm:$0xf] }
  0xa6   : > { %v4271_v36 = vor.u32 %v5656_v30, %v4270_v28  ;;  %v4275_v41 = vor.u32 %v5652_v33, %v4272_v34  ;;  %v5719_v10 = vld [vmem:[#allocation10 + $0xec] sm:$0xf0] }
  0xa7   : > { %1309 = vmatpush.bf16.msra.mxu0 %v3911_v40  ;;  %1335 = vmatpush.bf16.msra.mxu2 %v3915_v45  ;;  %v4238_v40 = vld [vmem:[#allocation7 + $0x298] sm:$0xf]  ;;  %v5644_v45 = vld [vmem:[#allocation7 + $0x29c] sm:$0xf] }
  0xa8   : > { %v4243_v53 = vor.u32 %v5644_v45, %v4240_v46  ;;  %v5783_v19 = vld [vmem:[#allocation10 + $0x2ec] sm:$0xf0] }
  0xa9   : > { %1322 = vmatpush.bf16.msra.mxu1 %v4167_v44  ;;  %1348 = vmatpush.bf16.msra.mxu3 %v4171_v48  ;;  %v3984_v44 = vld [vmem:[#allocation7 + $0xb8] sm:$0xf0]  ;;  %v4239_v48 = vor.u32 %v5648_v42, %v4238_v40  ;;  %v5715_v21 = vld [vmem:[#allocation10 + $0xcc] sm:$0xf0]  ;;  %v4454_v42 = vld [vmem:[#allocation10 + $0x60] sm:$0xf] }
  0xaa   : > { %1310 = vmatmul.bf16.vlgmr.msra.gmra.mxu0 %v6529_v1  ;;  %1336 = vmatmul.bf16.vlgmr.msra.gmra.mxu2 %v6529_v1  ;;  %v4503_v26 = vor.u32 %v5715_v21, %v4502_v20  ;;  %v5779_v28 = vld [vmem:[#allocation10 + $0x2cc] sm:$0xf0]  ;;  %v4710_v20 = vld [vmem:[#allocation10 + $0x260] sm:$0xf] }
  0xab   : > { %1354 = vmatpush.bf16.msrb.mxu0 %v4143_v49  ;;  %1380 = vmatpush.bf16.msrb.mxu2 %v4147_v51  ;;  %v3987_v49 = vor.u32 %v5580_v43, %v3984_v44  ;;  %v5576_v51 = vld [vmem:[#allocation7 + $0x74] sm:$0xf0]  ;;  %v4759_v34 = vor.u32 %v5779_v28, %v4758_v27  ;;  %v4582_v44 = vld [vmem:[#allocation10 + $0x160] sm:$0xf] }
  0xac   : > { %1323 = vmatmul.bf16.vlgmr.msra.gmra.mxu1 %v6531_v4  ;;  %1349 = vmatmul.bf16.vlgmr.msra.gmra.mxu3 %v6531_v4  ;;  %v5711_v30 = vld [vmem:[#allocation10 + $0xac] sm:$0xf0]  ;;  %v5014_v27 = vld [vmem:[#allocation10 + $0x4c0] sm:$0xf] }
  0xad   : > { %1367 = vmatpush.bf16.msrb.mxu1 %v4399_v50  ;;  %1393 = vmatpush.bf16.msrb.mxu3 %v4403_v55  ;;  %v3950_v50 = vld [vmem:[#allocation7 + $0x58] sm:$0xf]  ;;  %v5572_v55 = vld [vmem:[#allocation7 + $0x5c] sm:$0xf] }
  0xae   : > { %v3951_v59 = vor.u32 %v5576_v51, %v3950_v50  ;;  %v5743_v33 = vld [vmem:[#allocation10 + $0x1ac] sm:$0xf0] }
  0xaf   : > { %1355 = vmatpush.bf16.msrb.mxu0 %v4111_v61  ;;  %1381 = vmatpush.bf16.msrb.mxu2 %v4115_v63  ;;  %v4207_v61 = vor.u32 %v5640_v54, %v4206_v52  ;;  %v5568_v63 = vld [vmem:[#allocation7 + $0x34] sm:$0xf0]  ;;  %v4615_v38 = vor.u32 %v5743_v33, %v4614_v32  ;;  %v4566_v52 = vld [vmem:[#allocation10 + $0x140] sm:$0xf] }
  0xb0   : > { %v5739_v40 = vld [vmem:[#allocation10 + $0x18c] sm:$0xf0] }
  0xb1   : > { %1368 = vmatpush.bf16.msrb.mxu1 %v4367_v62  ;;  %1394 = vmatpush.bf16.msrb.mxu3 %v4371_v5  ;;  %v3955_v62 = vor.u32 %v5572_v55, %v3952_v56  ;;  %v5564_v5 = vld [vmem:[#allocation7 + $0x1c] sm:$0xf]  ;;  %v4599_v43 = vor.u32 %v5739_v40, %v4598_v39  ;;  %v5735_v45 = vld [vmem:[#allocation10 + $0x16c] sm:$0xf0]  ;;  %v4422_v55 = vld [vmem:[#allocation10 + $0x20] sm:$0xf] }
  0xb2   : > { %v3923_v15 = vor.u32 %v5564_v5, %v3920_v6  ;;  %v5815_v46 = vld [vmem:[#allocation10 + $0x3ec] sm:$0xf0]  ;;  %v4583_v51 = vor.u32 %v5735_v45, %v4582_v44  ;;  %v5030_v6 = vld [vmem:[#allocation10 + $0x4e0] sm:$0xf] }
  0xb3   : > { %1356 = vmatpush.bf16.msrb.mxu0 %v4079_v11  ;;  %1382 = vmatpush.bf16.msrb.mxu2 %v4083_v13  ;;  %v3919_v11 = vor.u32 %v5568_v63, %v3918_v60  ;;  %v5751_v13 = vld [vmem:[#allocation10 + $0x1ec] sm:$0xf0]  ;;  %v4982_v44 = vld [vmem:[#allocation10 + $0x480] sm:$0xf] }
  0xb4   : > { %v5699_v50 = vld [vmem:[#allocation10 + $0x4c] sm:$0xf0] }
  0xb5   : > { %1369 = vmatpush.bf16.msrb.mxu1 %v4335_v12  ;;  %1395 = vmatpush.bf16.msrb.mxu3 %v4339_v17  ;;  %v4646_v12 = vld [vmem:[#allocation10 + $0x1e0] sm:$0xf]  ;;  %v4519_v17 = vor.u32 %v5719_v10, %v4518_v9  ;;  %v5695_v56 = vld [vmem:[#allocation10 + $0x2c] sm:$0xf0] }
  0xb6   : > { %v4647_v22 = vor.u32 %v5751_v13, %v4646_v12  ;;  %v5727_v60 = vld [vmem:[#allocation10 + $0x12c] sm:$0xf0]  ;;  %v4423_v5 = vor.u32 %v5695_v56, %v4422_v55  ;;  %v4726_v9 = vld [vmem:[#allocation10 + $0x280] sm:$0xf] }
  0xb7   : > { %1357 = vmatpush.bf16.msrb.mxu0 %v4047_v23  ;;  %1383 = vmatpush.bf16.msrb.mxu2 %v4051_v25  ;;  %v4630_v23 = vld [vmem:[#allocation10 + $0x1c0] sm:$0xf]  ;;  %v4775_v25 = vor.u32 %v5783_v19, %v4774_v18  ;;  %v5691_v63 = vld [vmem:[#allocation10 + $0xc] sm:$0xf0] }
  0xb8   : > { %v5847_v7 = vld [vmem:[#allocation10 + $0x4ec] sm:$0xf0]  ;;  %v4678_v56 = vld [vmem:[#allocation10 + $0x220] sm:$0xf] }
  0xb9   : > { %1370 = vmatpush.bf16.msrb.mxu1 %v4303_v24  ;;  %1396 = vmatpush.bf16.msrb.mxu3 %v4307_v29  ;;  %v5747_v24 = vld [vmem:[#allocation10 + $0x1cc] sm:$0xf0]  ;;  %v4486_v29 = vld [vmem:[#allocation10 + $0xa0] sm:$0xf] }
  0xba   : > { %v4631_v31 = vor.u32 %v5747_v24, %v4630_v23  ;;  %v5723_v12 = vld [vmem:[#allocation10 + $0x10c] sm:$0xf0]  ;;  %v4854_v23 = vld [vmem:[#allocation10 + $0x380] sm:$0xf]  ;;  %v5031_v24 = vor.u32 %v5847_v7, %v5030_v6 }
  0xbb   : > { %1358 = vmatpush.bf16.msrb.mxu0 %v4015_v35  ;;  %1384 = vmatpush.bf16.msrb.mxu2 %v4019_v37  ;;  %v4487_v35 = vor.u32 %v5711_v30, %v4486_v29  ;;  %v5707_v37 = vld [vmem:[#allocation10 + $0x8c] sm:$0xf0]  ;;  %v5142_v30 = vld [vmem:[#allocation10 + $0x5c0] sm:$0xf] }
  0xbc   : > { %v5771_v13 = vld [vmem:[#allocation10 + $0x28c] sm:$0xf0] }
  0xbd   : > { %1371 = vmatpush.bf16.msrb.mxu1 %v4271_v36  ;;  %1397 = vmatpush.bf16.msrb.mxu3 %v4275_v41  ;;  %v4470_v36 = vld [vmem:[#allocation10 + $0x80] sm:$0xf]  ;;  %v5879_v18 = vld [vmem:[#allocation10 + $0x5ec] sm:$0xf0] }
  0xbe   : > { %v4471_v41 = vor.u32 %v5707_v37, %v4470_v36  ;;  %v5767_v21 = vld [vmem:[#allocation10 + $0x26c] sm:$0xf0]  ;;  %v4998_v37 = vld [vmem:[#allocation10 + $0x4a0] sm:$0xf] }
  0xbf   : > { %1359 = vmatpush.bf16.msrb.mxu0 %v3983_v47  ;;  %1385 = vmatpush.bf16.msrb.mxu2 %v3987_v49  ;;  %v4438_v49 = vld [vmem:[#allocation10 + $0x40] sm:$0xf]  ;;  %v5843_v28 = vld [vmem:[#allocation10 + $0x4cc] sm:$0xf0] }
  0xc0   : > { %v4439_v54 = vor.u32 %v5699_v50, %v4438_v49  ;;  %v5875_v32 = vld [vmem:[#allocation10 + $0x5cc] sm:$0xf0]  ;;  %v5015_v36 = vor.u32 %v5843_v28, %v5014_v27 }
  0xc1   : > { %1372 = vmatpush.bf16.msrb.mxu1 %v4239_v48  ;;  %1398 = vmatpush.bf16.msrb.mxu3 %v4243_v53  ;;  %v5731_v53 = vld [vmem:[#allocation10 + $0x14c] sm:$0xf0]  ;;  %v5143_v39 = vor.u32 %v5875_v32, %v5142_v30  ;;  %v5062_v30 = vld [vmem:[#allocation10 + $0x520] sm:$0xf] }
  0xc2   : > { %v4567_v57 = vor.u32 %v5731_v53, %v4566_v52  ;;  %v5835_v45 = vld [vmem:[#allocation10 + $0x48c] sm:$0xf0]  ;;  %v4966_v52 = vld [vmem:[#allocation10 + $0x460] sm:$0xf] }
  0xc3   : > { %1360 = vmatpush.bf16.msrb.mxu0 %v3951_v59  ;;  %1386 = vmatpush.bf16.msrb.mxu2 %v3955_v62  ;;  %v4550_v59 = vld [vmem:[#allocation10 + $0x120] sm:$0xf]  ;;  %v5799_v49 = vld [vmem:[#allocation10 + $0x36c] sm:$0xf0] }
  0xc4   : > { %v4406_v62 = vld [vmem:[#allocation10] sm:$0xf]  ;;  %v4551_v10 = vor.u32 %v5727_v60, %v4550_v59  ;;  %v5863_v60 = vld [vmem:[#allocation10 + $0x56c] sm:$0xf0] }
  0xc5   : > { %1373 = vmatpush.bf16.msrb.mxu1 %v4207_v61  ;;  %1399 = vmatpush.bf16.msrb.mxu3 %v4211_v3  ;;  %v5775_v61 = vld [vmem:[#allocation10 + $0x2ac] sm:$0xf0]  ;;  %v5094_v59 = vld [vmem:[#allocation10 + $0x560] sm:$0xf] }
  0xc6   : > { %v4743_v0 = vor.u32 %v5775_v61, %v4742_v58  ;;  %v5811_v3 = vld [vmem:[#allocation10 + $0x3cc] sm:$0xf0]  ;;  %v4822_v61 = vld [vmem:[#allocation10 + $0x340] sm:$0xf] }
  0xc7   : > { %1361 = vmatpush.bf16.msrb.mxu0 %v3919_v11  ;;  %1387 = vmatpush.bf16.msrb.mxu2 %v3923_v15  ;;  %v4887_v8 = vor.u32 %v5811_v3, %v4886_v2  ;;  %v4534_v11 = vld [vmem:[#allocation10 + $0x100] sm:$0xf]  ;;  %v4727_v15 = vor.u32 %v5771_v13, %v4726_v9  ;;  %v5095_v9 = vor.u32 %v5863_v60, %v5094_v59 }
  0xc8   : > { %v4950_v3 = vld [vmem:[#allocation10 + $0x440] sm:$0xf] }
  0xc9   : > { %1374 = vmatpush.bf16.msrb.mxu1 %v4175_v14  ;;  %1400 = vmatpush.bf16.msrb.mxu3 %v4179_v16  ;;  %v5158_v14 = vld [vmem:[#allocation10 + $0x5e0] sm:$0xf] }
  0xca   : > { %1362 = vmatmul.bf16.vlgmr.msrb.gmra.mxu0 %v6529_v1  ;;  %1388 = vmatmul.bf16.vlgmr.msrb.gmra.mxu2 %v6529_v1  ;;  %v5703_v1 = vld [vmem:[#allocation10 + $0x6c] sm:$0xf0]  ;;  %v4870_v16 = vld [vmem:[#allocation10 + $0x3a0] sm:$0xf]  ;;  %v5159_v29 = vor.u32 %v5879_v18, %v5158_v14 }
  0xcb   : > { %2985 = vmatpush.bf16.msra.mxu0 %v4519_v17  ;;  %3011 = vmatpush.bf16.msra.mxu2 %v4775_v25  ;;  %v4455_v48 = vor.u32 %v5703_v1, %v4454_v42  ;;  %v5807_v17 = vld [vmem:[#allocation10 + $0x3ac] sm:$0xf0]  ;;  %v4535_v25 = vor.u32 %v5723_v12, %v4534_v11  ;;  %v6556_v12 = vstv %s6551_s13  ;;  %v5078_v14 = vld [vmem:[#allocation10 + $0x540] sm:$0xf]  ;;  %s3749_s13 = sshll.u32 %s401_s25, 4  ;;  %s3750_s13 = int_to_ptr.vmem [resolvable:$true] %s3749_s13 }
  0xcc   : > { %1375 = vmatmul.bf16.vlgmr.msrb.gmra.mxu1 %v6531_v4  ;;  %1401 = vmatmul.bf16.vlgmr.msrb.gmra.mxu3 %v6531_v4  ;;  %v4902_v4 = vld [vmem:[#allocation10 + $0x3e0] sm:$0xf]  ;;  %v4871_v19 = vor.u32 %v5807_v17, %v4870_v16  ;;  %v5871_v42 = vld [vmem:[#allocation10 + $0x5ac] sm:$0xf0] }
  0xcd   : > { %2998 = vmatpush.bf16.msra.mxu1 %v4647_v22  ;;  %v4903_v47 = vor.u32 %v5815_v46, %v4902_v4  ;;  %v4407_v22 = vor.u32 %v5691_v63, %v4406_v62  ;;  %v5110_v46 = vld [vmem:[#allocation10 + $0x580] sm:$0xf]  ;;  %v5795_v62 = vld [vmem:[#allocation10 + $0x34c] sm:$0xf0] }
  0xce   : > { %v5755_v11 = vld [vmem:[#allocation10 + $0x20c] sm:$0xf0]  ;;  %v4934_v17 = vld [vmem:[#allocation10 + $0x420] sm:$0xf] }
  0xcf   : > { %2986 = vmatpush.bf16.msra.mxu0 %v4503_v26  ;;  %3012 = vmatpush.bf16.msra.mxu2 %v4759_v34  ;;  %v5803_v26 = vld [vmem:[#allocation10 + $0x38c] sm:$0xf0]  ;;  %v4694_v34 = vld [vmem:[#allocation10 + $0x240] sm:$0xf] }
  0xd0   : > { %3024 = vmatpush.bf16.msra.mxu3 %v4903_v47  ;;  %v4855_v33 = vor.u32 %v5803_v26, %v4854_v23  ;;  %v5867_v47 = vld [vmem:[#allocation10 + $0x58c] sm:$0xf0]  ;;  %v4806_v18 = vld [vmem:[#allocation10 + $0x320] sm:$0xf] }
  0xd1   : > { %2999 = vmatpush.bf16.msra.mxu1 %v4631_v31  ;;  %v4711_v31 = vor.u32 %v5767_v21, %v4710_v20  ;;  %v5111_v55 = vor.u32 %v5867_v47, %v5110_v46  ;;  %v4520_v46 = vld [vmem:[#allocation10 + $0xf0] sm:$0xf0] }
  0xd3   : > { %2987 = vmatpush.bf16.msra.mxu0 %v4487_v35  ;;  %3013 = vmatpush.bf16.msra.mxu2 %v4743_v0  ;;  %v5763_v35 = vld [vmem:[#allocation10 + $0x24c] sm:$0xf0] }
  0xd4   : > { %3025 = vmatpush.bf16.msra.mxu3 %v4887_v8  ;;  %v4695_v40 = vor.u32 %v5763_v35, %v4694_v34  ;;  %v5827_v8 = vld [vmem:[#allocation10 + $0x44c] sm:$0xf0]  ;;  %v4918_v35 = vld [vmem:[#allocation10 + $0x400] sm:$0xf] }
  0xd5   : > { %3000 = vmatpush.bf16.msra.mxu1 %v4615_v38  ;;  %v5839_v38 = vld [vmem:[#allocation10 + $0x4ac] sm:$0xf0]  ;;  %v4951_v21 = vor.u32 %v5827_v8, %v4950_v3 }
  0xd6   : > { %v4999_v1 = vor.u32 %v5839_v38, %v4998_v37  ;;  %v4790_v37 = vld [vmem:[#allocation10 + $0x300] sm:$0xf]  ;;  %v5787_v38 = vld [vmem:[#allocation10 + $0x30c] sm:$0xf0] }
  0xd7   : > { %2988 = vmatpush.bf16.msra.mxu0 %v4471_v41  ;;  %3014 = vmatpush.bf16.msra.mxu2 %v4727_v15  ;;  %v5126_v41 = vld [vmem:[#allocation10 + $0x5a0] sm:$0xf]  ;;  %v5859_v15 = vld [vmem:[#allocation10 + $0x54c] sm:$0xf0] }
  0xd8   : > { %3026 = vmatpush.bf16.msra.mxu3 %v4871_v19  ;;  %v5127_v4 = vor.u32 %v5871_v42, %v5126_v41  ;;  %v5791_v19 = vld [vmem:[#allocation10 + $0x32c] sm:$0xf0]  ;;  %v5079_v28 = vor.u32 %v5859_v15, %v5078_v14  ;;  %v5717_v42 = vld [vmem:[#allocation10 + $0xe4] sm:$0xf]  ;;  %v4632_v15 = vld [vmem:[#allocation10 + $0x1d0] sm:$0xf0] }
  0xd9   : > { %3001 = vmatpush.bf16.msra.mxu1 %v4599_v43  ;;  %v6549_v43 = vld [vmem:[#allocation9] sm:$0xff]  ;;  %v4807_v23 = vor.u32 %v5791_v19, %v4806_v18  ;;  %v5745_v14 = vld [vmem:[#allocation10 + $0x1c4] sm:$0xf]  ;;  %v5935_v18 = vld [vmem:[#allocation10 + $0x7ac] sm:$0xf0] }
  0xda   : > { %v535_v50 = vperm.slane %v6549_v43, 0  ;;  %v536_v0 = vperm.slane %v6549_v43, 1 }
  0xdb   : > { %2989 = vmatpush.bf16.msra.mxu0 %v4455_v48  ;;  %3015 = vmatpush.bf16.msra.mxu2 %v4711_v31  ;;  %v4838_v48 = vld [vmem:[#allocation10 + $0x360] sm:$0xf]  ;;  %v5855_v31 = vld [vmem:[#allocation10 + $0x52c] sm:$0xf0] }
  0xdc   : > { %3027 = vmatpush.bf16.msra.mxu3 %v4855_v33  ;;  %v4839_v53 = vor.u32 %v5799_v49, %v4838_v48  ;;  %v5063_v47 = vor.u32 %v5855_v31, %v5062_v30  ;;  %v5046_v49 = vld [vmem:[#allocation10 + $0x500] sm:$0xf] }
  0xdd   : > { %3002 = vmatpush.bf16.msra.mxu1 %v4583_v51  ;;  %v4983_v51 = vor.u32 %v5835_v45, %v4982_v44  ;;  %v5270_v44 = vld [vmem:[#allocation10 + $0x6c0] sm:$0xf]  ;;  %v5907_v45 = vld [vmem:[#allocation10 + $0x6cc] sm:$0xf0] }
  0xde   : > { %v5271_v48 = vor.u32 %v5907_v45, %v5270_v44 }
  0xdf   : > { %2990 = vmatpush.bf16.msra.mxu0 %v4439_v54  ;;  %3016 = vmatpush.bf16.msra.mxu2 %v4695_v40  ;;  %v5831_v54 = vld [vmem:[#allocation10 + $0x46c] sm:$0xf0] }
  0xe0   : > { %3028 = vmatpush.bf16.msra.mxu3 %v4839_v53  ;;  %v4967_v2 = vor.u32 %v5831_v54, %v4966_v52  ;;  %v5414_v52 = vld [vmem:[#allocation10 + $0x7e0] sm:$0xf]  ;;  %v5943_v53 = vld [vmem:[#allocation10 + $0x7ec] sm:$0xf0] }
  0xe1   : > { %3003 = vmatpush.bf16.msra.mxu1 %v4567_v57  ;;  %v5759_v57 = vld [vmem:[#allocation10 + $0x22c] sm:$0xf0]  ;;  %v5415_v54 = vor.u32 %v5943_v53, %v5414_v52  ;;  %v5733_v52 = vld [vmem:[#allocation10 + $0x164] sm:$0xf]  ;;  %v4584_v53 = vld [vmem:[#allocation10 + $0x170] sm:$0xf0] }
  0xe2   : > { %v4679_v58 = vor.u32 %v5759_v57, %v4678_v56  ;;  %v4648_v56 = vld [vmem:[#allocation10 + $0x1f0] sm:$0xf0]  ;;  %v5254_v57 = vld [vmem:[#allocation10 + $0x6a0] sm:$0xf] }
  0xe3   : > { %2991 = vmatpush.bf16.msra.mxu0 %v4423_v5  ;;  %v4823_v5 = vor.u32 %v5795_v62, %v4822_v61  ;;  %v4523_v61 = vor.u32 %v5717_v42, %v4520_v46  ;;  %v5903_v62 = vld [vmem:[#allocation10 + $0x6ac] sm:$0xf0] }
  0xe4   : > { %3017 = vmatpush.bf16.msra.mxu2 %v4679_v58  ;;  %v5255_v3 = vor.u32 %v5903_v62, %v5254_v57  ;;  %v538_v57 = vperm.slane %v6549_v43, 3  ;;  %v4587_v62 = vor.u32 %v5733_v52, %v4584_v53  ;;  %v5773_v52 = vld [vmem:[#allocation10 + $0x2a4] sm:$0xf]  ;;  %v4744_v53 = vld [vmem:[#allocation10 + $0x2b0] sm:$0xf0] }
  0xe5   : > { %3004 = vmatpush.bf16.msra.mxu1 %v4551_v10  ;;  %v4662_v10 = vld [vmem:[#allocation10 + $0x200] sm:$0xf]  ;;  %3029 = vmatpush.bf16.msra.mxu3 %v4823_v5 }
  0xe6   : > { %v4663_v13 = vor.u32 %v5755_v11, %v4662_v10  ;;  %v5398_v5 = vld [vmem:[#allocation10 + $0x7c0] sm:$0xf]  ;;  %v5899_v11 = vld [vmem:[#allocation10 + $0x68c] sm:$0xf0] }
  0xe7   : > { %2992 = vmatpush.bf16.msra.mxu0 %v4407_v22  ;;  %v1207_v63 = vpop.f32.mrf.mxu0  ;;  %v5823_v22 = vld [vmem:[#allocation10 + $0x42c] sm:$0xf0]  ;;  %v5238_v10 = vld [vmem:[#allocation10 + $0x680] sm:$0xf] }
  0xe8   : > { %v1208_v6 = vadd.f32 %v1207_v63, %v535_v50  ;;  %3018 = vmatpush.bf16.msra.mxu2 %v4663_v13  ;;  %v4935_v34 = vor.u32 %v5823_v22, %v4934_v17  ;;  %v5851_v50 = vld [vmem:[#allocation10 + $0x50c] sm:$0xf0]  ;;  %v5239_v17 = vor.u32 %v5899_v11, %v5238_v10  ;;  %v5709_v22 = vld [vmem:[#allocation10 + $0xa4] sm:$0xf] }
  0xe9   : > { %3005 = vmatpush.bf16.msra.mxu1 %v4535_v25  ;;  %v1220_v7 = vpop.f32.mrf.mxu1  ;;  %v5911_v25 = vld [vmem:[#allocation10 + $0x6ec] sm:$0xf0]  ;;  %3030 = vmatpush.bf16.msra.mxu3 %v4807_v23  ;;  %v4488_v23 = vld [vmem:[#allocation10 + $0xb0] sm:$0xf0] }
  0xea   : > { %v1221_v16 = vadd.f32 %v1220_v7, %v1208_v6  ;;  %v5939_v6 = vld [vmem:[#allocation10 + $0x7cc] sm:$0xf0]  ;;  %v4504_v7 = vld [vmem:[#allocation10 + $0xd0] sm:$0xf0]  ;;  %v4491_v31 = vor.u32 %v5709_v22, %v4488_v23 }
  0xeb   : > { %3037 = vmatpush.bf16.msrb.mxu0 %v5031_v24  ;;  %v5286_v24 = vld [vmem:[#allocation10 + $0x6e0] sm:$0xf]  ;;  %v4424_v22 = vld [vmem:[#allocation10 + $0x30] sm:$0xf0] }
  0xec   : > { %vm1406_vm0 = vcmp.ge.f32.partialorder %v1221_v16, 0.0  ;;  %v1415_v26 = vmul.f32 %v6556_v12, %v1221_v16 }
  0xed   : > { %3050 = vmatpush.bf16.msrb.mxu1 %v5159_v29  ;;  %v1233_v20 = vpop.f32.mrf.mxu2  ;;  %v5287_v29 = vor.u32 %v5911_v25, %v5286_v24  ;;  %v4635_v24 = vor.u32 %v5745_v14, %v4632_v15  ;;  %v5781_v15 = vld [vmem:[#allocation10 + $0x2e4] sm:$0xf] }
  0xee   : > { %v1234_v27 = vadd.f32 %v1233_v20, %v536_v0  ;;  %v1423_v32 = vsel %vm1406_vm0, %v1221_v16, %v1415_v26  ;;  %v5713_v0 = vld [vmem:[#allocation10 + $0xc4] sm:$0xf]  ;;  %v5382_v16 = vld [vmem:[#allocation10 + $0x7a0] sm:$0xf] }
  0xef   : > { %3038 = vmatpush.bf16.msrb.mxu0 %v5015_v36  ;;  %v1246_v33 = vpop.f32.mrf.mxu3  ;;  %v5819_v36 = vld [vmem:[#allocation10 + $0x40c] sm:$0xf0]  ;;  %v1209_v40 = vpop.f32.mrf.mxu0  ;;  %3063 = vmatpush.bf16.msrb.mxu2 %v5287_v29  ;;  %v4507_v19 = vor.u32 %v5713_v0, %v4504_v7  ;;  %v5222_v20 = vld [vmem:[#allocation10 + $0x660] sm:$0xf]  ;;  %v5383_v25 = vor.u32 %v5935_v18, %v5382_v16  ;;  %v5741_v26 = vld [vmem:[#allocation10 + $0x1a4] sm:$0xf] }
  0xf0   : > { %v1247_v41 = vadd.f32 %v1246_v33, %v1234_v27  ;;  %v4919_v60 = vor.u32 %v5819_v36, %v4918_v35  ;;  %v4616_v27 = vld [vmem:[#allocation10 + $0x1b0] sm:$0xf0]  ;;  %v5931_v29 = vld [vmem:[#allocation10 + $0x78c] sm:$0xf0]  ;;  %v537_v36 = vperm.slane %v6549_v43, 2 }
  0xf1   : > { %3051 = vmatpush.bf16.msrb.mxu1 %v5143_v39  ;;  %v6559_v39 = vpack.c.bf16 %v1423_v32, %v1423_v32  ;;  %v5705_v32 = vld [vmem:[#allocation10 + $0x84] sm:$0xf]  ;;  %v4472_v33 = vld [vmem:[#allocation10 + $0x90] sm:$0xf0]  ;;  %v5206_v40 = vld [vmem:[#allocation10 + $0x640] sm:$0xf] }
  0xf2   : > { %vm1407_vm1 = vcmp.ge.f32.partialorder %v1247_v41, 0.0  ;;  %v4475_v42 = vor.u32 %v5705_v32, %v4472_v33  ;;  %v5334_v0 = vld [vmem:[#allocation10 + $0x740] sm:$0xf]  ;;  %v4568_v7 = vld [vmem:[#allocation10 + $0x150] sm:$0xf0] }
  0xf3   : > { %3039 = vmatpush.bf16.msrb.mxu0 %v4999_v1  ;;  %v4791_v1 = vor.u32 %v5787_v38, %v4790_v37  ;;  %3064 = vmatpush.bf16.msrb.mxu2 %v5271_v48  ;;  %v5737_v37 = vld [vmem:[#allocation10 + $0x184] sm:$0xf]  ;;  %v4600_v38 = vld [vmem:[#allocation10 + $0x190] sm:$0xf0]  ;;  %v5927_v48 = vld [vmem:[#allocation10 + $0x76c] sm:$0xf0] }
  0xf4   : > { %2993 = vmatmul.bf16.vlgmr.msra.gmra.mxu0 %v6559_v39  ;;  %v4603_v46 = vor.u32 %v5737_v37, %v4600_v38  ;;  %v4776_v16 = vld [vmem:[#allocation10 + $0x2f0] sm:$0xf0]  ;;  %v5689_v33 = vld [vmem:[#allocation10 + $0x4] sm:$0xf] }
  0xf5   : > { %3052 = vmatpush.bf16.msrb.mxu1 %v5127_v4  ;;  %v1222_v4 = vpop.f32.mrf.mxu1  ;;  %3031 = vmatpush.bf16.msra.mxu3 %v4791_v1  ;;  %v1235_v59 = vpop.f32.mrf.mxu2  ;;  %v5701_v1 = vld [vmem:[#allocation10 + $0x64] sm:$0xf]  ;;  %v4408_v37 = vld [vmem:[#allocation10 + $0x10] sm:$0xf0] }
  0xf6   : > { %v4456_v4 = vld [vmem:[#allocation10 + $0x70] sm:$0xf0]  ;;  %v5697_v59 = vld [vmem:[#allocation10 + $0x44] sm:$0xf] }
  0xf7   : > { %3040 = vmatpush.bf16.msrb.mxu0 %v4983_v51  ;;  %v1416_v51 = vmul.f32 %v6556_v12, %v1247_v41  ;;  %v1248_v13 = vpop.f32.mrf.mxu3  ;;  %3065 = vmatpush.bf16.msrb.mxu2 %v5255_v3 }
  0xf9   : > { %3053 = vmatpush.bf16.msrb.mxu1 %v5111_v55  ;;  %v5749_v55 = vld [vmem:[#allocation10 + $0x1e4] sm:$0xf]  ;;  %v1424_v58 = vsel %vm1407_vm1, %v1247_v41, %v1416_v51  ;;  %3076 = vmatpush.bf16.msrb.mxu3 %v5415_v54  ;;  %v5891_v41 = vld [vmem:[#allocation10 + $0x64c] sm:$0xf0]  ;;  %v5190_v54 = vld [vmem:[#allocation10 + $0x620] sm:$0xf] }
  0xfa   : > { %v6563_v63 = vpack.c.bf16 %v1424_v58, %v1424_v58  ;;  %v4651_v8 = vor.u32 %v5749_v55, %v4648_v56  ;;  %v5207_v44 = vor.u32 %v5891_v41, %v5206_v40  ;;  %v5887_v55 = vld [vmem:[#allocation10 + $0x62c] sm:$0xf0]  ;;  %v4459_v58 = vor.u32 %v5701_v1, %v4456_v4  ;;  %v5302_v41 = vld [vmem:[#allocation10 + $0x700] sm:$0xf]  ;;  %v5721_v1 = vld [vmem:[#allocation10 + $0x104] sm:$0xf] }
  0xfb   : > { %3041 = vmatpush.bf16.msrb.mxu0 %v4967_v2  ;;  %v5047_v2 = vor.u32 %v5851_v50, %v5046_v49  ;;  %3066 = vmatpush.bf16.msrb.mxu2 %v5239_v17 }
  0xfc   : > { %3006 = vmatmul.bf16.vlgmr.msra.gmra.mxu1 %v6563_v63 }
  0xfd   : > { %3054 = vmatpush.bf16.msrb.mxu1 %v5095_v9  ;;  %v5399_v9 = vor.u32 %v5939_v6, %v5398_v5  ;;  %v5729_v6 = vld [vmem:[#allocation10 + $0x144] sm:$0xf] }
  0xfe   : > { %v4571_v23 = vor.u32 %v5729_v6, %v4568_v7  ;;  %v4712_v6 = vld [vmem:[#allocation10 + $0x270] sm:$0xf0] }
  0xff   : > { %3042 = vmatpush.bf16.msrb.mxu0 %v4951_v21  ;;  %v5895_v21 = vld [vmem:[#allocation10 + $0x66c] sm:$0xf0]  ;;  %3077 = vmatpush.bf16.msrb.mxu3 %v5399_v9 }
 0x100   : > { %v5223_v30 = vor.u32 %v5895_v21, %v5222_v20  ;;  %v5883_v9 = vld [vmem:[#allocation10 + $0x60c] sm:$0xf0]  ;;  %v5693_v21 = vld [vmem:[#allocation10 + $0x24] sm:$0xf] }
 0x101   : > { %3055 = vmatpush.bf16.msrb.mxu1 %v5079_v28  ;;  %v5366_v28 = vld [vmem:[#allocation10 + $0x780] sm:$0xf]  ;;  %v4427_v32 = vor.u32 %v5693_v21, %v4424_v22 }
 0x102   : > { %v5367_v35 = vor.u32 %v5931_v29, %v5366_v28  ;;  %3067 = vmatpush.bf16.msrb.mxu2 %v5223_v30  ;;  %v5725_v28 = vld [vmem:[#allocation10 + $0x124] sm:$0xf]  ;;  %v4552_v29 = vld [vmem:[#allocation10 + $0x130] sm:$0xf0] }
 0x103   : > { %3043 = vmatpush.bf16.msrb.mxu0 %v4935_v34  ;;  %3078 = vmatpush.bf16.msrb.mxu3 %v5383_v25  ;;  %v4619_v34 = vor.u32 %v5741_v26, %v4616_v27  ;;  %v4779_v26 = vor.u32 %v5781_v15, %v4776_v16  ;;  %v5919_v27 = vld [vmem:[#allocation10 + $0x72c] sm:$0xf0]  ;;  %v4555_v38 = vor.u32 %v5725_v28, %v4552_v29  ;;  %v5797_v16 = vld [vmem:[#allocation10 + $0x364] sm:$0xf]  ;;  %v4824_v28 = vld [vmem:[#allocation10 + $0x350] sm:$0xf0] }
 0x104   : > { %v540_v29 = vperm.slane %v6549_v43, 5 }
 0x105   : > { %3056 = vmatpush.bf16.msrb.mxu1 %v5063_v47  ;;  %v5350_v47 = vld [vmem:[#allocation10 + $0x760] sm:$0xf] }
 0x106   : > { %v5351_v51 = vor.u32 %v5927_v48, %v5350_v47  ;;  %3068 = vmatpush.bf16.msrb.mxu2 %v5207_v44  ;;  %v4536_v44 = vld [vmem:[#allocation10 + $0x110] sm:$0xf0] }
 0x107   : > { %3044 = vmatpush.bf16.msrb.mxu0 %v4919_v60  ;;  %v1259_v45 = vpop.f32.mrf.mxu0  ;;  %3079 = vmatpush.bf16.msrb.mxu3 %v5367_v35  ;;  %v5191_v60 = vor.u32 %v5887_v55, %v5190_v54  ;;  %v4760_v35 = vld [vmem:[#allocation10 + $0x2d0] sm:$0xf0]  ;;  %v4539_v55 = vor.u32 %v5721_v1, %v4536_v44 }
 0x108   : > { %v1260_v49 = vadd.f32 %v1259_v45, %v537_v36  ;;  %v4904_v47 = vld [vmem:[#allocation10 + $0x3f0] sm:$0xf0] }
 0x109   : > { %3057 = vmatpush.bf16.msrb.mxu1 %v5047_v2  ;;  %v1272_v50 = vpop.f32.mrf.mxu1  ;;  %v5923_v2 = vld [vmem:[#allocation10 + $0x74c] sm:$0xf0] }
 0x10a   : > { %v1273_v56 = vadd.f32 %v1272_v50, %v1260_v49  ;;  %v5335_v5 = vor.u32 %v5923_v2, %v5334_v0  ;;  %3069 = vmatpush.bf16.msrb.mxu2 %v5191_v60  ;;  %v4411_v50 = vor.u32 %v5689_v33, %v4408_v37  ;;  %v5769_v60 = vld [vmem:[#allocation10 + $0x284] sm:$0xf]  ;;  %v4872_v2 = vld [vmem:[#allocation10 + $0x3b0] sm:$0xf0] }
 0x10b   : > { %3089 = vmatpush.bf16.msra.mxu0 %v4523_v61  ;;  %v4440_v61 = vld [vmem:[#allocation10 + $0x50] sm:$0xf0]  ;;  %3080 = vmatpush.bf16.msrb.mxu3 %v5351_v51  ;;  %v5805_v0 = vld [vmem:[#allocation10 + $0x3a4] sm:$0xf] }
 0x10c   : > { %vm1408_vm2 = vcmp.ge.f32.partialorder %v1273_v56, 0.0  ;;  %v1417_v3 = vmul.f32 %v6556_v12, %v1273_v56  ;;  %v4443_v13 = vor.u32 %v5697_v59, %v4440_v61  ;;  %v4728_v61 = vld [vmem:[#allocation10 + $0x290] sm:$0xf0] }
 0x10d   : > { %3102 = vmatpush.bf16.msra.mxu1 %v4651_v8  ;;  %v5174_v8 = vld [vmem:[#allocation10 + $0x600] sm:$0xf]  ;;  %v1285_v11 = vpop.f32.mrf.mxu2 }
 0x10e   : > { %v1425_v10 = vsel %vm1408_vm2, %v1273_v56, %v1417_v3  ;;  %v5175_v14 = vor.u32 %v5883_v9, %v5174_v8  ;;  %v1286_v18 = vadd.f32 %v1285_v11, %v538_v57  ;;  %v4747_v56 = vor.u32 %v5773_v52, %v4744_v53  ;;  %v5809_v57 = vld [vmem:[#allocation10 + $0x3c4] sm:$0xf]  ;;  %v4856_v9 = vld [vmem:[#allocation10 + $0x390] sm:$0xf0] }
 0x10f   : > { %3090 = vmatpush.bf16.msra.mxu0 %v4507_v19  ;;  %v6569_v17 = vpack.c.bf16 %v1425_v10, %v1425_v10  ;;  %v1298_v19 = vpop.f32.mrf.mxu3  ;;  %v1261_v20 = vpop.f32.mrf.mxu0  ;;  %3081 = vmatpush.bf16.msrb.mxu3 %v5335_v5  ;;  %v4875_v3 = vor.u32 %v5805_v0, %v4872_v2  ;;  %v5765_v5 = vld [vmem:[#allocation10 + $0x264] sm:$0xf]  ;;  %v539_v10 = vperm.slane %v6549_v43, 4 }
 0x110   : > { %v1299_v30 = vadd.f32 %v1298_v19, %v1286_v18  ;;  %3070 = vmatpush.bf16.msrb.mxu2 %v5175_v14  ;;  %v4715_v7 = vor.u32 %v5765_v5, %v4712_v6  ;;  %v5801_v8 = vld [vmem:[#allocation10 + $0x384] sm:$0xf]  ;;  %v4696_v14 = vld [vmem:[#allocation10 + $0x250] sm:$0xf0] }
 0x111   : > { %3103 = vmatpush.bf16.msra.mxu1 %v4635_v24  ;;  %v5318_v24 = vld [vmem:[#allocation10 + $0x720] sm:$0xf]  ;;  %v1274_v25 = vpop.f32.mrf.mxu1  ;;  %3019 = vmatmul.bf16.vlgmr.msra.gmra.mxu2 %v6569_v17  ;;  %v4859_v11 = vor.u32 %v5801_v8, %v4856_v9  ;;  %v4840_v18 = vld [vmem:[#allocation10 + $0x370] sm:$0xf0]  ;;  %v5877_v52 = vld [vmem:[#allocation10 + $0x5e4] sm:$0xf] }
 0x112   : > { %vm1409_vm3 = vcmp.ge.f32.partialorder %v1299_v30, 0.0  ;;  %v1418_v36 = vmul.f32 %v6556_v12, %v1299_v30  ;;  %v4843_v22 = vor.u32 %v5797_v16, %v4840_v18  ;;  %v5873_v5 = vld [vmem:[#allocation10 + $0x5c4] sm:$0xf]  ;;  %v5144_v6 = vld [vmem:[#allocation10 + $0x5d0] sm:$0xf0] }
 0x113   : > { %3091 = vmatpush.bf16.msra.mxu0 %v4491_v31  ;;  %v5319_v31 = vor.u32 %v5919_v27, %v5318_v24  ;;  %v4680_v24 = vld [vmem:[#allocation10 + $0x230] sm:$0xf0]  ;;  %v5793_v27 = vld [vmem:[#allocation10 + $0x344] sm:$0xf] }
 0x114   : > { %3115 = vmatpush.bf16.msra.mxu2 %v4779_v26  ;;  %v1426_v45 = vsel %vm1409_vm3, %v1299_v30, %v1418_v36  ;;  %v5845_v30 = vld [vmem:[#allocation10 + $0x4e4] sm:$0xf]  ;;  %v4827_v33 = vor.u32 %v5793_v27, %v4824_v28  ;;  %v4984_v9 = vld [vmem:[#allocation10 + $0x490] sm:$0xf0] }
 0x115   : > { %3104 = vmatpush.bf16.msra.mxu1 %v4619_v34  ;;  %v5777_v34 = vld [vmem:[#allocation10 + $0x2c4] sm:$0xf]  ;;  %3082 = vmatpush.bf16.msrb.mxu3 %v5319_v31  ;;  %v6573_v48 = vpack.c.bf16 %v1426_v45, %v1426_v45  ;;  %v1287_v49 = vpop.f32.mrf.mxu2  ;;  %v5032_v31 = vld [vmem:[#allocation10 + $0x4f0] sm:$0xf0] }
 0x116   : > { %v4763_v40 = vor.u32 %v5777_v34, %v4760_v35  ;;  %v5753_v34 = vld [vmem:[#allocation10 + $0x204] sm:$0xf]  ;;  %v4664_v35 = vld [vmem:[#allocation10 + $0x210] sm:$0xf0] }
 0x117   : > { %3092 = vmatpush.bf16.msra.mxu0 %v4475_v42  ;;  %v5915_v42 = vld [vmem:[#allocation10 + $0x70c] sm:$0xf0]  ;;  %v1300_v54 = vpop.f32.mrf.mxu3  ;;  %3032 = vmatmul.bf16.vlgmr.msra.gmra.mxu3 %v6573_v48  ;;  %v4667_v36 = vor.u32 %v5753_v34, %v4664_v35  ;;  %v5016_v45 = vld [vmem:[#allocation10 + $0x4d0] sm:$0xf0]  ;;  %v5833_v8 = vld [vmem:[#allocation10 + $0x484] sm:$0xf] }
 0x118   : > { %v5303_v4 = vor.u32 %v5915_v42, %v5302_v41  ;;  %3116 = vmatpush.bf16.msra.mxu2 %v4763_v40  ;;  %v5035_v40 = vor.u32 %v5845_v30, %v5032_v31  ;;  %v5841_v41 = vld [vmem:[#allocation10 + $0x4c4] sm:$0xf]  ;;  %v5160_v54 = vld [vmem:[#allocation10 + $0x5f0] sm:$0xf0] }
 0x119   : > { %3105 = vmatpush.bf16.msra.mxu1 %v4603_v46  ;;  %v5813_v46 = vld [vmem:[#allocation10 + $0x3e4] sm:$0xf]  ;;  %v5019_v53 = vor.u32 %v5841_v41, %v5016_v45  ;;  %v4968_v16 = vld [vmem:[#allocation10 + $0x470] sm:$0xf0] }
 0x11a   : > { %v4907_v51 = vor.u32 %v5813_v46, %v4904_v47  ;;  %3083 = vmatpush.bf16.msrb.mxu3 %v5303_v4  ;;  %v5789_v46 = vld [vmem:[#allocation10 + $0x324] sm:$0xf]  ;;  %v4808_v47 = vld [vmem:[#allocation10 + $0x330] sm:$0xf0] }
 0x11b   : > { %3093 = vmatpush.bf16.msra.mxu0 %v4459_v58  ;;  %v4888_v58 = vld [vmem:[#allocation10 + $0x3d0] sm:$0xf0]  ;;  %v5861_v27 = vld [vmem:[#allocation10 + $0x564] sm:$0xf] }
 0x11c   : > { %v4891_v59 = vor.u32 %v5809_v57, %v4888_v58  ;;  %3117 = vmatpush.bf16.msra.mxu2 %v4747_v56  ;;  %v4792_v56 = vld [vmem:[#allocation10 + $0x310] sm:$0xf0]  ;;  %v5837_v58 = vld [vmem:[#allocation10 + $0x4a4] sm:$0xf] }
 0x11d   : > { %3106 = vmatpush.bf16.msra.mxu1 %v4587_v62  ;;  %v4731_v62 = vor.u32 %v5769_v60, %v4728_v61  ;;  %v5096_v28 = vld [vmem:[#allocation10 + $0x570] sm:$0xf0]  ;;  %v5817_v41 = vld [vmem:[#allocation10 + $0x404] sm:$0xf] }
 0x11e   : > { %3128 = vmatpush.bf16.msra.mxu3 %v4907_v51  ;;  %v4936_v30 = vld [vmem:[#allocation10 + $0x430] sm:$0xf0]  ;;  %v5099_v34 = vor.u32 %v5861_v27, %v5096_v28 }
 0x11f   : > { %3094 = vmatpush.bf16.msra.mxu0 %v4443_v13  ;;  %v5761_v13 = vld [vmem:[#allocation10 + $0x244] sm:$0xf]  ;;  %v5288_v45 = vld [vmem:[#allocation10 + $0x6f0] sm:$0xf0] }
 0x120   : > { %3118 = vmatpush.bf16.msra.mxu2 %v4731_v62  ;;  %v4699_v15 = vor.u32 %v5761_v13, %v4696_v14  ;;  %v5163_v62 = vor.u32 %v5877_v52, %v5160_v54  ;;  %v5869_v13 = vld [vmem:[#allocation10 + $0x5a4] sm:$0xf]  ;;  %v5128_v14 = vld [vmem:[#allocation10 + $0x5b0] sm:$0xf0] }
 0x121   : > { %3107 = vmatpush.bf16.msra.mxu1 %v4571_v23  ;;  %v5757_v23 = vld [vmem:[#allocation10 + $0x224] sm:$0xf]  ;;  %v5131_v18 = vor.u32 %v5869_v13, %v5128_v14  ;;  %v5400_v27 = vld [vmem:[#allocation10 + $0x7d0] sm:$0xf0] }
 0x122   : > { %3129 = vmatpush.bf16.msra.mxu3 %v4891_v59  ;;  %v4683_v25 = vor.u32 %v5757_v23, %v4680_v24  ;;  %v5000_v59 = vld [vmem:[#allocation10 + $0x4b0] sm:$0xf0] }
 0x123   : > { %3095 = vmatpush.bf16.msra.mxu0 %v4427_v32  ;;  %v5003_v2 = vor.u32 %v5837_v58, %v5000_v59  ;;  %v4952_v23 = vld [vmem:[#allocation10 + $0x450] sm:$0xf0] }
 0x124   : > { %3119 = vmatpush.bf16.msra.mxu2 %v4715_v7 }
 0x125   : > { %3108 = vmatpush.bf16.msra.mxu1 %v4555_v38 }
 0x126   : > { %3130 = vmatpush.bf16.msra.mxu3 %v4875_v3 }
 0x127   : > { %3096 = vmatpush.bf16.msra.mxu0 %v4411_v50  ;;  %v1311_v19 = vpop.f32.mrf.mxu0  ;;  %v4811_v50 = vor.u32 %v5789_v46, %v4808_v47  ;;  %v5720_v46 = vld [vmem:[#allocation10 + $0xf4] sm:$0xf0] }
 0x128   : > { %v1312_v20 = vadd.f32 %v1311_v19, %v539_v10  ;;  %3120 = vmatpush.bf16.msra.mxu2 %v4699_v15  ;;  %v5147_v10 = vor.u32 %v5873_v5, %v5144_v6  ;;  %v5829_v15 = vld [vmem:[#allocation10 + $0x464] sm:$0xf] }
 0x129   : > { %3109 = vmatpush.bf16.msra.mxu1 %v4539_v55  ;;  %v1324_v21 = vpop.f32.mrf.mxu1  ;;  %v5785_v55 = vld [vmem:[#allocation10 + $0x304] sm:$0xf]  ;;  %v4971_v19 = vor.u32 %v5829_v15, %v4968_v16  ;;  %v5752_v15 = vld [vmem:[#allocation10 + $0x1f4] sm:$0xf0] }
 0x12a   : > { %3131 = vmatpush.bf16.msra.mxu3 %v4859_v11  ;;  %v1325_v26 = vadd.f32 %v1324_v21, %v1312_v20  ;;  %v4795_v60 = vor.u32 %v5785_v55, %v4792_v56  ;;  %v4987_v11 = vor.u32 %v5833_v8, %v4984_v9  ;;  %v5865_v20 = vld [vmem:[#allocation10 + $0x584] sm:$0xf]  ;;  %v5112_v21 = vld [vmem:[#allocation10 + $0x590] sm:$0xf0] }
 0x12b   : > { %v5115_v24 = vor.u32 %v5865_v20, %v5112_v21  ;;  %v5905_v56 = vld [vmem:[#allocation10 + $0x6c4] sm:$0xf]  ;;  %v4494_v20 = vld [vmem:[#allocation10 + $0xa8] sm:$0xf]  ;;  %v5712_v21 = vld [vmem:[#allocation10 + $0xb4] sm:$0xf0] }
 0x12c   : > { %vm1410_vm4 = vcmp.ge.f32.partialorder %v1325_v26, 0.0  ;;  %v1419_v32 = vmul.f32 %v6556_v12, %v1325_v26  ;;  %3121 = vmatpush.bf16.msra.mxu2 %v4683_v25  ;;  %v541_v25 = vperm.slane %v6549_v43, 6  ;;  %v5849_v6 = vld [vmem:[#allocation10 + $0x504] sm:$0xf] }
 0x12d   : > { %v1337_v38 = vpop.f32.mrf.mxu2  ;;  %v5941_v9 = vld [vmem:[#allocation10 + $0x7e4] sm:$0xf] }
 0x12e   : > { %3132 = vmatpush.bf16.msra.mxu3 %v4843_v22  ;;  %v1427_v37 = vsel %vm1410_vm4, %v1325_v26, %v1419_v32  ;;  %v1338_v1 = vadd.f32 %v1337_v38, %v540_v29  ;;  %v5825_v22 = vld [vmem:[#allocation10 + $0x444] sm:$0xf]  ;;  %v5080_v38 = vld [vmem:[#allocation10 + $0x550] sm:$0xf0] }
 0x12f   : > { %v6579_v42 = vpack.c.bf16 %v1427_v37, %v1427_v37  ;;  %v1350_v44 = vpop.f32.mrf.mxu3  ;;  %v1313_v4 = vpop.f32.mrf.mxu0  ;;  %v4955_v26 = vor.u32 %v5825_v22, %v4952_v23  ;;  %v5821_v29 = vld [vmem:[#allocation10 + $0x424] sm:$0xf] }
 0x130   : > { %v1351_v51 = vadd.f32 %v1350_v44, %v1338_v1  ;;  %3122 = vmatpush.bf16.msra.mxu2 %v4667_v36  ;;  %v4939_v35 = vor.u32 %v5821_v29, %v4936_v30  ;;  %v542_v36 = vperm.slane %v6549_v43, 7  ;;  %v5857_v37 = vld [vmem:[#allocation10 + $0x544] sm:$0xf]  ;;  %v4920_v1 = vld [vmem:[#allocation10 + $0x410] sm:$0xf0] }
 0x131   : > { %v1326_v49 = vpop.f32.mrf.mxu1  ;;  %3045 = vmatmul.bf16.vlgmr.msrb.gmra.mxu0 %v6579_v42  ;;  %v5909_v44 = vld [vmem:[#allocation10 + $0x6e4] sm:$0xf]  ;;  %v4526_v4 = vld [vmem:[#allocation10 + $0xe8] sm:$0xf]  ;;  %v5064_v43 = vld [vmem:[#allocation10 + $0x530] sm:$0xf0] }
 0x132   : > { %3133 = vmatpush.bf16.msra.mxu3 %v4827_v33  ;;  %3141 = vmatpush.bf16.msrb.mxu0 %v5035_v40  ;;  %vm1411_vm5 = vcmp.ge.f32.partialorder %v1351_v51, 0.0  ;;  %v1420_v57 = vmul.f32 %v6556_v12, %v1351_v51  ;;  %v5083_v49 = vor.u32 %v5857_v37, %v5080_v38  ;;  %v5291_v54 = vor.u32 %v5909_v44, %v5288_v45  ;;  %v5901_v16 = vld [vmem:[#allocation10 + $0x6a4] sm:$0xf]  ;;  %v5708_v37 = vld [vmem:[#allocation10 + $0x94] sm:$0xf0] }
 0x133   : > { %v4527_v55 = vor.u32 %v5720_v46, %v4526_v4  ;;  %v5384_v45 = vld [vmem:[#allocation10 + $0x7b0] sm:$0xf0]  ;;  %v4622_v4 = vld [vmem:[#allocation10 + $0x1a8] sm:$0xf]  ;;  %v5744_v46 = vld [vmem:[#allocation10 + $0x1b4] sm:$0xf0] }
 0x134   : > { %v1428_v61 = vsel %vm1411_vm5, %v1351_v51, %v1420_v57  ;;  %v5853_v51 = vld [vmem:[#allocation10 + $0x524] sm:$0xf] }
 0x135   : > { %v6583_v0 = vpack.c.bf16 %v1428_v61, %v1428_v61  ;;  %v1339_v3 = vpop.f32.mrf.mxu2  ;;  %v5272_v61 = vld [vmem:[#allocation10 + $0x6d0] sm:$0xf0]  ;;  %v5067_v5 = vor.u32 %v5853_v51, %v5064_v43 }
 0x136   : > { %3134 = vmatpush.bf16.msra.mxu3 %v4811_v50  ;;  %3142 = vmatpush.bf16.msrb.mxu0 %v5019_v53  ;;  %v4923_v50 = vor.u32 %v5817_v41, %v4920_v1  ;;  %v5275_v13 = vor.u32 %v5905_v56, %v5272_v61  ;;  %v5933_v41 = vld [vmem:[#allocation10 + $0x7a4] sm:$0xf]  ;;  %v5224_v51 = vld [vmem:[#allocation10 + $0x670] sm:$0xf0]  ;;  %v4606_v56 = vld [vmem:[#allocation10 + $0x188] sm:$0xf] }
 0x137   : > { %v1352_v7 = vpop.f32.mrf.mxu3  ;;  %3058 = vmatmul.bf16.vlgmr.msrb.gmra.mxu1 %v6583_v0  ;;  %v5387_v43 = vor.u32 %v5933_v41, %v5384_v45  ;;  %v5700_v61 = vld [vmem:[#allocation10 + $0x54] sm:$0xf0] }
 0x138   : > { %3154 = vmatpush.bf16.msrb.mxu1 %v5163_v62  ;;  %v4510_v62 = vld [vmem:[#allocation10 + $0xc8] sm:$0xf]  ;;  %v5048_v7 = vld [vmem:[#allocation10 + $0x510] sm:$0xf0]  ;;  %v5728_v41 = vld [vmem:[#allocation10 + $0x134] sm:$0xf0] }
 0x139   : > { %v5051_v22 = vor.u32 %v5849_v6, %v5048_v7  ;;  %v5925_v6 = vld [vmem:[#allocation10 + $0x764] sm:$0xf] }
 0x13a   : > { %3135 = vmatpush.bf16.msra.mxu3 %v4795_v60  ;;  %3143 = vmatpush.bf16.msrb.mxu0 %v5003_v2  ;;  %v5716_v2 = vld [vmem:[#allocation10 + $0xd4] sm:$0xf0] }
 0x13b   : > { %v4511_v14 = vor.u32 %v5716_v2, %v4510_v62  ;;  %v5889_v62 = vld [vmem:[#allocation10 + $0x644] sm:$0xf]  ;;  %v5208_v2 = vld [vmem:[#allocation10 + $0x650] sm:$0xf0] }
 0x13c   : > { %3155 = vmatpush.bf16.msrb.mxu1 %v5147_v10  ;;  %v5416_v10 = vld [vmem:[#allocation10 + $0x7f0] sm:$0xf0] }
 0x13e   : > { %3144 = vmatpush.bf16.msrb.mxu0 %v4987_v11  ;;  %v4654_v11 = vld [vmem:[#allocation10 + $0x1e8] sm:$0xf] }
 0x140   : > { %3156 = vmatpush.bf16.msrb.mxu1 %v5131_v18  ;;  %v5256_v18 = vld [vmem:[#allocation10 + $0x6b0] sm:$0xf0] }
 0x141   : > { %3097 = vmatmul.bf16.vlgmr.msra.gmra.mxu0 %v6559_v39  ;;  %v5259_v30 = vor.u32 %v5901_v16, %v5256_v18  ;;  %v5192_v16 = vld [vmem:[#allocation10 + $0x630] sm:$0xf0] }
 0x142   : > { %3145 = vmatpush.bf16.msrb.mxu0 %v4971_v19 }
 0x144   : > { %3157 = vmatpush.bf16.msrb.mxu1 %v5115_v24  ;;  %v5419_v24 = vor.u32 %v5941_v9, %v5416_v10  ;;  %v4590_v9 = vld [vmem:[#allocation10 + $0x168] sm:$0xf]  ;;  %v5736_v10 = vld [vmem:[#allocation10 + $0x174] sm:$0xf0] }
 0x146   : > { %3146 = vmatpush.bf16.msrb.mxu0 %v4955_v26  ;;  %v5937_v26 = vld [vmem:[#allocation10 + $0x7c4] sm:$0xf] }
 0x147   : > { %v1363_v31 = vpop.f32.mrf.mxu0  ;;  %3110 = vmatmul.bf16.vlgmr.msra.gmra.mxu1 %v6563_v63  ;;  %v5403_v38 = vor.u32 %v5937_v26, %v5400_v27  ;;  %v5881_v26 = vld [vmem:[#allocation10 + $0x604] sm:$0xf]  ;;  %v4414_v27 = vld [vmem:[#allocation10 + $0x8] sm:$0xf] }
 0x148   : > { %v1364_v32 = vadd.f32 %v1363_v31, %v541_v25  ;;  %3158 = vmatpush.bf16.msrb.mxu1 %v5099_v34  ;;  %v4655_v25 = vor.u32 %v5752_v15, %v4654_v11  ;;  %v4495_v31 = vor.u32 %v5712_v21, %v4494_v20  ;;  %v5211_v11 = vor.u32 %v5889_v62, %v5208_v2  ;;  %v5885_v15 = vld [vmem:[#allocation10 + $0x624] sm:$0xf]  ;;  %v5006_v62 = vld [vmem:[#allocation10 + $0x4a8] sm:$0xf]  ;;  %v5840_v2 = vld [vmem:[#allocation10 + $0x4b4] sm:$0xf0] }
 0x149   : > { %v1376_v33 = vpop.f32.mrf.mxu1  ;;  %v5921_v20 = vld [vmem:[#allocation10 + $0x744] sm:$0xf] }
 0x14a   : > { %v1377_v40 = vadd.f32 %v1376_v33, %v1364_v32  ;;  %3147 = vmatpush.bf16.msrb.mxu0 %v4939_v35  ;;  %v4638_v32 = vld [vmem:[#allocation10 + $0x1c8] sm:$0xf]  ;;  %v5897_v33 = vld [vmem:[#allocation10 + $0x684] sm:$0xf]  ;;  %v5240_v35 = vld [vmem:[#allocation10 + $0x690] sm:$0xf0] }
 0x14b   : > { %v5243_v1 = vor.u32 %v5897_v33, %v5240_v35  ;;  %v5784_v35 = vld [vmem:[#allocation10 + $0x2f4] sm:$0xf0] }
 0x14c   : > { %vm1412_vm6 = vcmp.ge.f32.partialorder %v1377_v40, 0.0  ;;  %v1421_v47 = vmul.f32 %v6556_v12, %v1377_v40  ;;  %3159 = vmatpush.bf16.msrb.mxu1 %v5083_v49  ;;  %v5704_v49 = vld [vmem:[#allocation10 + $0x74] sm:$0xf0] }
 0x14d   : > { %v1389_v53 = vpop.f32.mrf.mxu2 }
 0x14e   : > { %v1429_v52 = vsel %vm1412_vm6, %v1377_v40, %v1421_v47  ;;  %v1390_v58 = vadd.f32 %v1389_v53, %v542_v36  ;;  %3148 = vmatpush.bf16.msrb.mxu0 %v4923_v50  ;;  %v4478_v36 = vld [vmem:[#allocation10 + $0x88] sm:$0xf]  ;;  %v5893_v50 = vld [vmem:[#allocation10 + $0x664] sm:$0xf] }
 0x14f   : > { %v6591_v57 = vpack.c.bf16 %v1429_v52, %v1429_v52  ;;  %v1402_v59 = vpop.f32.mrf.mxu3  ;;  %v1365_v60 = vpop.f32.mrf.mxu0  ;;  %v4479_v44 = vor.u32 %v5708_v37, %v4478_v36  ;;  %v4462_v47 = vld [vmem:[#allocation10 + $0x68] sm:$0xf]  ;;  %v4623_v52 = vor.u32 %v5744_v46, %v4622_v4  ;;  %v5929_v53 = vld [vmem:[#allocation10 + $0x784] sm:$0xf] }
 0x150   : > { %v1403_v8 = vadd.f32 %v1402_v59, %v1390_v58  ;;  %3160 = vmatpush.bf16.msrb.mxu1 %v5067_v5  ;;  %v5740_v58 = vld [vmem:[#allocation10 + $0x194] sm:$0xf0]  ;;  %v5227_v59 = vor.u32 %v5893_v50, %v5224_v51  ;;  %v4446_v60 = vld [vmem:[#allocation10 + $0x48] sm:$0xf]  ;;  %v5917_v36 = vld [vmem:[#allocation10 + $0x724] sm:$0xf] }
 0x151   : > { %v1378_v3 = vpop.f32.mrf.mxu1  ;;  %3071 = vmatmul.bf16.vlgmr.msrb.gmra.mxu2 %v6591_v57  ;;  %3149 = vmatmul.bf16.vlgmr.msrb.gmra.mxu0 %v6579_v42  ;;  %v4607_v5 = vor.u32 %v5740_v58, %v4606_v56  ;;  %v4447_v7 = vor.u32 %v5700_v61, %v4446_v60  ;;  %v4766_v4 = vld [vmem:[#allocation10 + $0x2c8] sm:$0xf]  ;;  %v5780_v51 = vld [vmem:[#allocation10 + $0x2d4] sm:$0xf0] }
 0x152   : > { %3167 = vmatpush.bf16.msrb.mxu2 %v5291_v54  ;;  %3193 = vmatpush.bf16.msra.mxu0 %v4527_v55  ;;  %vm1413_vm7 = vcmp.ge.f32.partialorder %v1403_v8, 0.0  ;;  %v1422_v19 = vmul.f32 %v6556_v12, %v1403_v8  ;;  %v5748_v12 = vld [vmem:[#allocation10 + $0x1d4] sm:$0xf0]  ;;  %v4463_v54 = vor.u32 %v5704_v49, %v4462_v47  ;;  %v5368_v55 = vld [vmem:[#allocation10 + $0x790] sm:$0xf0]  ;;  %v4767_v61 = vor.u32 %v5780_v51, %v4766_v4 }
 0x153   : > { %v4639_v40 = vor.u32 %v5748_v12, %v4638_v32  ;;  %v5371_v3 = vor.u32 %v5929_v53, %v5368_v55  ;;  %v5848_v32 = vld [vmem:[#allocation10 + $0x4f4] sm:$0xf0]  ;;  %v5022_v46 = vld [vmem:[#allocation10 + $0x4c8] sm:$0xf] }
 0x154   : > { %v1430_v23 = vsel %vm1413_vm7, %v1403_v8, %v1422_v19  ;;  %3161 = vmatpush.bf16.msrb.mxu1 %v5051_v22  ;;  %v5352_v8 = vld [vmem:[#allocation10 + $0x770] sm:$0xf0]  ;;  %v4591_v19 = vor.u32 %v5736_v10, %v4590_v9  ;;  %v5844_v47 = vld [vmem:[#allocation10 + $0x4d4] sm:$0xf0]  ;;  %v4542_v53 = vld [vmem:[#allocation10 + $0x108] sm:$0xf] }
 0x155   : > { %v6596_v28 = vpack.c.bf16 %v1430_v23, %v1430_v23  ;;  %v1391_v29 = vpop.f32.mrf.mxu2  ;;  %v5355_v18 = vor.u32 %v5925_v6, %v5352_v8  ;;  %v5336_v22 = vld [vmem:[#allocation10 + $0x750] sm:$0xf0]  ;;  %v4574_v23 = vld [vmem:[#allocation10 + $0x148] sm:$0xf]  ;;  %v5023_v56 = vor.u32 %v5844_v47, %v5022_v46  ;;  %v5816_v58 = vld [vmem:[#allocation10 + $0x3f4] sm:$0xf0] }
 0x156   : > { %3168 = vmatpush.bf16.msrb.mxu2 %v5275_v13  ;;  %3194 = vmatpush.bf16.msra.mxu0 %v4511_v14  ;;  %v4430_v13 = vld [vmem:[#allocation10 + $0x28] sm:$0xf]  ;;  %v5696_v14 = vld [vmem:[#allocation10 + $0x34] sm:$0xf0]  ;;  %v5339_v12 = vor.u32 %v5921_v20, %v5336_v22 }
 0x157   : > { %v1404_v34 = vpop.f32.mrf.mxu3  ;;  %3084 = vmatmul.bf16.vlgmr.msrb.gmra.mxu3 %v6596_v28  ;;  %3162 = vmatmul.bf16.vlgmr.msrb.gmra.mxu1 %v6583_v0  ;;  %v4431_v21 = vor.u32 %v5696_v14, %v4430_v13  ;;  %v5692_v29 = vld [vmem:[#allocation10 + $0x14] sm:$0xf0]  ;;  %v4910_v55 = vld [vmem:[#allocation10 + $0x3e8] sm:$0xf] }
 0x158   : > { %3180 = vmatpush.bf16.msrb.mxu3 %v5419_v24  ;;  %3206 = vmatpush.bf16.msra.mxu1 %v4655_v25  ;;  %v5732_v24 = vld [vmem:[#allocation10 + $0x154] sm:$0xf0]  ;;  %v5195_v25 = vor.u32 %v5885_v15, %v5192_v16  ;;  %v4782_v34 = vld [vmem:[#allocation10 + $0x2e8] sm:$0xf]  ;;  %v4415_v37 = vor.u32 %v5692_v29, %v4414_v27  ;;  %v4911_v8 = vor.u32 %v5816_v58, %v4910_v55 }
 0x159   : > { %v4575_v33 = vor.u32 %v5732_v24, %v4574_v23  ;;  %v4783_v45 = vor.u32 %v5784_v35, %v4782_v34  ;;  %v5880_v60 = vld [vmem:[#allocation10 + $0x5f4] sm:$0xf0]  ;;  %v4750_v6 = vld [vmem:[#allocation10 + $0x2a8] sm:$0xf] }
 0x15a   : > { %3169 = vmatpush.bf16.msrb.mxu2 %v5259_v30  ;;  %3195 = vmatpush.bf16.msra.mxu0 %v4495_v31  ;;  %v5176_v30 = vld [vmem:[#allocation10 + $0x610] sm:$0xf0]  ;;  %v5038_v31 = vld [vmem:[#allocation10 + $0x4e8] sm:$0xf]  ;;  %v5812_v13 = vld [vmem:[#allocation10 + $0x3d4] sm:$0xf0] }
 0x15b   : > { %v4894_v10 = vld [vmem:[#allocation10 + $0x3c8] sm:$0xf]  ;;  %v5876_v15 = vld [vmem:[#allocation10 + $0x5d4] sm:$0xf0] }
 0x15c   : > { %3181 = vmatpush.bf16.msrb.mxu3 %v5403_v38  ;;  %3207 = vmatpush.bf16.msra.mxu1 %v4639_v40  ;;  %v5320_v38 = vld [vmem:[#allocation10 + $0x730] sm:$0xf0]  ;;  %v4558_v40 = vld [vmem:[#allocation10 + $0x128] sm:$0xf]  ;;  %v5772_v22 = vld [vmem:[#allocation10 + $0x294] sm:$0xf0]  ;;  %v4895_v23 = vor.u32 %v5812_v13, %v4894_v10 }
 0x15d   : > { %v5323_v49 = vor.u32 %v5917_v36, %v5320_v38  ;;  %v4559_v50 = vor.u32 %v5728_v41, %v4558_v40  ;;  %v5150_v14 = vld [vmem:[#allocation10 + $0x5c8] sm:$0xf]  ;;  %v5768_v35 = vld [vmem:[#allocation10 + $0x274] sm:$0xf0] }
 0x15e   : > { %3170 = vmatpush.bf16.msrb.mxu2 %v5243_v1  ;;  %3196 = vmatpush.bf16.msra.mxu0 %v4479_v44  ;;  %v5179_v1 = vor.u32 %v5881_v26, %v5176_v30  ;;  %v5039_v44 = vor.u32 %v5848_v32, %v5038_v31  ;;  %v6607_v20 = vld [vmem:[%s6709_s5] sm:$0xf]  ;;  %v5151_v24 = vor.u32 %v5876_v15, %v5150_v14  ;;  %v5808_v26 = vld [vmem:[#allocation10 + $0x3b4] sm:$0xf0] }
 0x15f   : > { %v5134_v29 = vld [vmem:[#allocation10 + $0x5a8] sm:$0xf]  ;;  %v5872_v30 = vld [vmem:[#allocation10 + $0x5b4] sm:$0xf0]  ;;  %v1697_v31 = vperm.slane %v6607_v20, 0 }
 0x160   : > { %3182 = vmatpush.bf16.msrb.mxu3 %v5387_v43  ;;  %3208 = vmatpush.bf16.msra.mxu1 %v4623_v52  ;;  %v5913_v43 = vld [vmem:[#allocation10 + $0x704] sm:$0xf]  ;;  %v5304_v52 = vld [vmem:[#allocation10 + $0x710] sm:$0xf0]  ;;  %v4718_v34 = vld [vmem:[#allocation10 + $0x268] sm:$0xf]  ;;  %v5135_v38 = vor.u32 %v5872_v30, %v5134_v29 }
 0x161   : > { %3123 = vmatmul.bf16.vlgmr.msra.gmra.mxu2 %v6569_v17  ;;  %v4862_v40 = vld [vmem:[#allocation10 + $0x388] sm:$0xf]  ;;  %v4719_v46 = vor.u32 %v5768_v35, %v4718_v34  ;;  %v5764_v51 = vld [vmem:[#allocation10 + $0x254] sm:$0xf0] }
 0x162   : > { %3197 = vmatpush.bf16.msra.mxu0 %v4463_v54  ;;  %3171 = vmatpush.bf16.msrb.mxu2 %v5227_v59  ;;  %v5724_v54 = vld [vmem:[#allocation10 + $0x114] sm:$0xf0]  ;;  %v5166_v59 = vld [vmem:[#allocation10 + $0x5e8] sm:$0xf] }
 0x163   : > { %v5167_v9 = vor.u32 %v5880_v60, %v5166_v59  ;;  %v4958_v47 = vld [vmem:[#allocation10 + $0x448] sm:$0xf]  ;;  %v5864_v59 = vld [vmem:[#allocation10 + $0x574] sm:$0xf0] }
 0x164   : > { %3183 = vmatpush.bf16.msrb.mxu3 %v5371_v3  ;;  %3209 = vmatpush.bf16.msra.mxu1 %v4607_v5  ;;  %v5307_v3 = vor.u32 %v5913_v43, %v5304_v52  ;;  %v4543_v5 = vor.u32 %v5724_v54, %v4542_v53  ;;  %v4846_v53 = vld [vmem:[#allocation10 + $0x368] sm:$0xf]  ;;  %v5860_v14 = vld [vmem:[#allocation10 + $0x554] sm:$0xf0] }
 0x165   : > { %v5102_v58 = vld [vmem:[#allocation10 + $0x568] sm:$0xf] }
 0x166   : > { %3198 = vmatpush.bf16.msra.mxu0 %v4447_v7  ;;  %3172 = vmatpush.bf16.msrb.mxu2 %v5211_v11  ;;  %v5776_v7 = vld [vmem:[#allocation10 + $0x2b4] sm:$0xf0]  ;;  %v5007_v11 = vor.u32 %v5840_v2, %v5006_v62  ;;  %v4942_v62 = vld [vmem:[#allocation10 + $0x428] sm:$0xf] }
 0x167   : > { %3136 = vmatmul.bf16.vlgmr.msra.gmra.mxu3 %v6573_v48  ;;  %v4751_v16 = vor.u32 %v5776_v7, %v4750_v6  ;;  %v5824_v2 = vld [vmem:[#allocation10 + $0x434] sm:$0xf0]  ;;  %v5086_v13 = vld [vmem:[#allocation10 + $0x548] sm:$0xf] }
 0x168   : > { %3184 = vmatpush.bf16.msrb.mxu3 %v5355_v18  ;;  %3210 = vmatpush.bf16.msra.mxu1 %v4591_v19  ;;  %v4990_v18 = vld [vmem:[#allocation10 + $0x488] sm:$0xf]  ;;  %v5836_v19 = vld [vmem:[#allocation10 + $0x494] sm:$0xf0]  ;;  %v4943_v10 = vor.u32 %v5824_v2, %v4942_v62 }
 0x169   : > { %v4991_v27 = vor.u32 %v5836_v19, %v4990_v18  ;;  %v4926_v18 = vld [vmem:[#allocation10 + $0x408] sm:$0xf]  ;;  %v5820_v19 = vld [vmem:[#allocation10 + $0x414] sm:$0xf0] }
 0x16a   : > { %3199 = vmatpush.bf16.msra.mxu0 %v4431_v21  ;;  %3173 = vmatpush.bf16.msrb.mxu2 %v5195_v25  ;;  %v4734_v21 = vld [vmem:[#allocation10 + $0x288] sm:$0xf]  ;;  %v5904_v2 = vld [vmem:[#allocation10 + $0x6b4] sm:$0xf0] }
 0x16b   : > { %v4878_v25 = vld [vmem:[#allocation10 + $0x3a8] sm:$0xf]  ;;  %v4735_v32 = vor.u32 %v5772_v22, %v4734_v21  ;;  %v5756_v21 = vld [vmem:[#allocation10 + $0x214] sm:$0xf0]  ;;  %v5718_v22 = vld [vmem:[#allocation10 + $0xec] sm:$0xf] }
 0x16c   : > { %3185 = vmatpush.bf16.msrb.mxu3 %v5339_v12  ;;  %3211 = vmatpush.bf16.msra.mxu1 %v4575_v33  ;;  %v4974_v12 = vld [vmem:[#allocation10 + $0x468] sm:$0xf]  ;;  %v5832_v33 = vld [vmem:[#allocation10 + $0x474] sm:$0xf0] }
 0x16d   : > { %v4975_v41 = vor.u32 %v5832_v33, %v4974_v12  ;;  %v4814_v29 = vld [vmem:[#allocation10 + $0x328] sm:$0xf]  ;;  %v5856_v33 = vld [vmem:[#allocation10 + $0x534] sm:$0xf0] }
 0x16e   : > { %3200 = vmatpush.bf16.msra.mxu0 %v4415_v37  ;;  %3174 = vmatpush.bf16.msrb.mxu2 %v5179_v1  ;;  %v4879_v37 = vor.u32 %v5808_v26, %v4878_v25  ;;  %v5804_v1 = vld [vmem:[#allocation10 + $0x394] sm:$0xf0]  ;;  %v5087_v25 = vor.u32 %v5860_v14, %v5086_v13  ;;  %v5294_v26 = vld [vmem:[#allocation10 + $0x6e8] sm:$0xf] }
 0x16f   : > { %v4863_v43 = vor.u32 %v5804_v1, %v4862_v40  ;;  %v5070_v12 = vld [vmem:[#allocation10 + $0x528] sm:$0xf]  ;;  %v4512_v40 = vld [vmem:[#allocation10 + $0xd8] sm:$0xf0] }
 0x170   : > { %3186 = vmatpush.bf16.msrb.mxu3 %v5323_v49  ;;  %3212 = vmatpush.bf16.msra.mxu1 %v4559_v50  ;;  %v5828_v49 = vld [vmem:[#allocation10 + $0x454] sm:$0xf0]  ;;  %v4702_v50 = vld [vmem:[#allocation10 + $0x248] sm:$0xf]  ;;  %v5071_v1 = vor.u32 %v5856_v33, %v5070_v12 }
 0x171   : > { %3201 = vmatmul.bf16.vlgmr.msra.gmra.mxu0 %v6559_v39  ;;  %3175 = vmatmul.bf16.vlgmr.msrb.gmra.mxu2 %v6591_v57  ;;  %v2994_v36 = vpop.f32.mrf.mxu0  ;;  %v4959_v55 = vor.u32 %v5828_v49, %v4958_v47  ;;  %v5852_v47 = vld [vmem:[#allocation10 + $0x514] sm:$0xf0]  ;;  %v5422_v49 = vld [vmem:[#allocation10 + $0x7e8] sm:$0xf] }
 0x172   : > { %3245 = vmatpush.bf16.msrb.mxu0 %v5039_v44  ;;  %3219 = vmatpush.bf16.msra.mxu2 %v4783_v45  ;;  %v5118_v44 = vld [vmem:[#allocation10 + $0x588] sm:$0xf]  ;;  %v5868_v45 = vld [vmem:[#allocation10 + $0x594] sm:$0xf0]  ;;  %v2995_v4 = vadd.f32 %v2994_v36, %v1697_v31  ;;  %v4927_v31 = vor.u32 %v5820_v19, %v4926_v18 }
 0x173   : > { %v5119_v52 = vor.u32 %v5868_v45, %v5118_v44  ;;  %v5908_v44 = vld [vmem:[#allocation10 + $0x6d4] sm:$0xf0]  ;;  %v4798_v45 = vld [vmem:[#allocation10 + $0x308] sm:$0xf] }
 0x174   : > { %3187 = vmatpush.bf16.msrb.mxu3 %v5307_v3  ;;  %3213 = vmatpush.bf16.msra.mxu1 %v4543_v5  ;;  %v4686_v3 = vld [vmem:[#allocation10 + $0x228] sm:$0xf]  ;;  %v5760_v5 = vld [vmem:[#allocation10 + $0x234] sm:$0xf0] }
 0x175   : > { %v4687_v15 = vor.u32 %v5760_v5, %v4686_v3  ;;  %v5262_v62 = vld [vmem:[#allocation10 + $0x6a8] sm:$0xf]  ;;  %v5932_v33 = vld [vmem:[#allocation10 + $0x794] sm:$0xf0] }
 0x176   : > { %3246 = vmatpush.bf16.msrb.mxu0 %v5023_v56  ;;  %3220 = vmatpush.bf16.msra.mxu2 %v4767_v61  ;;  %v5800_v56 = vld [vmem:[#allocation10 + $0x374] sm:$0xf0]  ;;  %v4703_v61 = vor.u32 %v5764_v51, %v4702_v50  ;;  %v5406_v3 = vld [vmem:[#allocation10 + $0x7c8] sm:$0xf] }
 0x177   : > { %3214 = vmatmul.bf16.vlgmr.msra.gmra.mxu1 %v6563_v63  ;;  %3188 = vmatmul.bf16.vlgmr.msrb.gmra.mxu3 %v6596_v28  ;;  %v4847_v7 = vor.u32 %v5800_v56, %v4846_v53  ;;  %v5944_v51 = vld [vmem:[#allocation10 + $0x7f4] sm:$0xf0]  ;;  %v5390_v18 = vld [vmem:[#allocation10 + $0x7a8] sm:$0xf] }
 0x178   : > { %3232 = vmatpush.bf16.msra.mxu3 %v4911_v8  ;;  %3258 = vmatpush.bf16.msrb.mxu1 %v5167_v9  ;;  %v5103_v8 = vor.u32 %v5864_v59, %v5102_v58  ;;  %v4830_v9 = vld [vmem:[#allocation10 + $0x348] sm:$0xf]  ;;  %v5423_v59 = vor.u32 %v5944_v51, %v5422_v49  ;;  %v5734_v49 = vld [vmem:[#allocation10 + $0x16c] sm:$0xf] }
 0x179   : > { %v3007_v54 = vpop.f32.mrf.mxu1  ;;  %v2996_v6 = vpop.f32.mrf.mxu0  ;;  %v5694_v51 = vld [vmem:[#allocation10 + $0x2c] sm:$0xf] }
 0x17a   : > { %3247 = vmatpush.bf16.msrb.mxu0 %v5007_v11  ;;  %3221 = vmatpush.bf16.msra.mxu2 %v4751_v16  ;;  %v6612_v60 = vadd.f32 %v3007_v54, %v2995_v4  ;;  %v5796_v11 = vld [vmem:[#allocation10 + $0x354] sm:$0xf0]  ;;  %v4670_v16 = vld [vmem:[#allocation10 + $0x208] sm:$0xf]  ;;  %v5710_v54 = vld [vmem:[#allocation10 + $0xac] sm:$0xf] }
 0x17b   : > { %v4671_v34 = vor.u32 %v5756_v21, %v4670_v16  ;;  %v5788_v4 = vld [vmem:[#allocation10 + $0x314] sm:$0xf0] }
 0x17c   : > { %3233 = vmatpush.bf16.msra.mxu3 %v4895_v23  ;;  %3259 = vmatpush.bf16.msrb.mxu1 %v5151_v24  ;;  %v4528_v23 = vld [vmem:[#allocation10 + $0xf8] sm:$0xf0]  ;;  %v4831_v24 = vor.u32 %v5796_v11, %v4830_v9  ;;  %v4799_v56 = vor.u32 %v5788_v4, %v4798_v45  ;;  %v5940_v6 = vld [vmem:[#allocation10 + $0x7d4] sm:$0xf0]  ;;  %v5706_v9 = vld [vmem:[#allocation10 + $0x8c] sm:$0xf]  ;;  %v5263_v11 = vor.u32 %v5904_v2, %v5262_v62 }
 0x17d   : > { %v4531_v35 = vor.u32 %v5718_v22, %v4528_v23  ;;  %v5407_v13 = vor.u32 %v5940_v6, %v5406_v3  ;;  %v5900_v16 = vld [vmem:[#allocation10 + $0x694] sm:$0xf0]  ;;  %v5742_v22 = vld [vmem:[#allocation10 + $0x1ac] sm:$0xf]  ;;  %v4624_v23 = vld [vmem:[#allocation10 + $0x1b8] sm:$0xf0] }
 0x17e   : > { %3248 = vmatpush.bf16.msrb.mxu0 %v4991_v27  ;;  %3222 = vmatpush.bf16.msra.mxu2 %v4735_v32  ;;  %v5912_v27 = vld [vmem:[#allocation10 + $0x6f4] sm:$0xf0]  ;;  %v5358_v4 = vld [vmem:[#allocation10 + $0x768] sm:$0xf]  ;;  %v5730_v2 = vld [vmem:[#allocation10 + $0x14c] sm:$0xf] }
 0x17f   : > { %v5792_v32 = vld [vmem:[#allocation10 + $0x334] sm:$0xf0]  ;;  %v5295_v36 = vor.u32 %v5912_v27, %v5294_v26  ;;  %v4576_v3 = vld [vmem:[#allocation10 + $0x158] sm:$0xf0] }
 0x180   : > { %3234 = vmatpush.bf16.msra.mxu3 %v4879_v37  ;;  %3260 = vmatpush.bf16.msrb.mxu1 %v5135_v38  ;;  %v5278_v37 = vld [vmem:[#allocation10 + $0x6c8] sm:$0xf]  ;;  %v5714_v38 = vld [vmem:[#allocation10 + $0xcc] sm:$0xf]  ;;  %v5936_v21 = vld [vmem:[#allocation10 + $0x7b4] sm:$0xf0] }
 0x181   : > { %v3009_v30 = vpop.f32.mrf.mxu1  ;;  %v4515_v50 = vor.u32 %v5714_v38, %v4512_v40  ;;  %v5279_v53 = vor.u32 %v5908_v44, %v5278_v37  ;;  %v5391_v27 = vor.u32 %v5936_v21, %v5390_v18  ;;  %v5698_v37 = vld [vmem:[#allocation10 + $0x4c] sm:$0xf]  ;;  %v4448_v38 = vld [vmem:[#allocation10 + $0x58] sm:$0xf0]  ;;  %v5214_v44 = vld [vmem:[#allocation10 + $0x648] sm:$0xf] }
 0x182   : > { %3249 = vmatpush.bf16.msrb.mxu0 %v4975_v41  ;;  %3223 = vmatpush.bf16.msra.mxu2 %v4719_v46  ;;  %v4815_v41 = vor.u32 %v5792_v32, %v4814_v29  ;;  %v5054_v46 = vld [vmem:[#allocation10 + $0x508] sm:$0xf]  ;;  %v4627_v29 = vor.u32 %v5742_v22, %v4624_v23  ;;  %v5892_v45 = vld [vmem:[#allocation10 + $0x654] sm:$0xf0]  ;;  %v4416_v6 = vld [vmem:[#allocation10 + $0x18] sm:$0xf0] }
 0x183   : > { %v5055_v58 = vor.u32 %v5852_v47, %v5054_v46  ;;  %v5230_v30 = vld [vmem:[#allocation10 + $0x668] sm:$0xf]  ;;  %v4451_v46 = vor.u32 %v5698_v37, %v4448_v38  ;;  %v5928_v47 = vld [vmem:[#allocation10 + $0x774] sm:$0xf0]  ;;  %v5722_v37 = vld [vmem:[#allocation10 + $0x10c] sm:$0xf] }
 0x184   : > { %3235 = vmatpush.bf16.msra.mxu3 %v4863_v43  ;;  %3261 = vmatpush.bf16.msrb.mxu1 %v5119_v52  ;;  %v5750_v43 = vld [vmem:[#allocation10 + $0x1ec] sm:$0xf]  ;;  %v4656_v52 = vld [vmem:[#allocation10 + $0x1f8] sm:$0xf0]  ;;  %v5374_v32 = vld [vmem:[#allocation10 + $0x788] sm:$0xf] }
 0x185   : > { %v5924_v62 = vld [vmem:[#allocation10 + $0x754] sm:$0xf0]  ;;  %v5326_v21 = vld [vmem:[#allocation10 + $0x728] sm:$0xf]  ;;  %v4544_v38 = vld [vmem:[#allocation10 + $0x118] sm:$0xf0] }
 0x186   : > { %3250 = vmatpush.bf16.msrb.mxu0 %v4959_v55  ;;  %3224 = vmatpush.bf16.msra.mxu2 %v4703_v61  ;;  %v4496_v55 = vld [vmem:[#allocation10 + $0xb8] sm:$0xf0]  ;;  %v4659_v61 = vor.u32 %v5750_v43, %v4656_v52  ;;  %v5215_v52 = vor.u32 %v5892_v45, %v5214_v44  ;;  %v5920_v22 = vld [vmem:[#allocation10 + $0x734] sm:$0xf0]  ;;  %v5878_v45 = vld [vmem:[#allocation10 + $0x5ec] sm:$0xf] }
 0x187   : > { %v4499_v5 = vor.u32 %v5710_v54, %v4496_v55  ;;  %v4432_v43 = vld [vmem:[#allocation10 + $0x38] sm:$0xf0]  ;;  %v5198_v55 = vld [vmem:[#allocation10 + $0x628] sm:$0xf] }
 0x188   : > { %3236 = vmatpush.bf16.msra.mxu3 %v4847_v7  ;;  %3262 = vmatpush.bf16.msrb.mxu1 %v5103_v8  ;;  %v5746_v7 = vld [vmem:[#allocation10 + $0x1cc] sm:$0xf]  ;;  %v4640_v8 = vld [vmem:[#allocation10 + $0x1d8] sm:$0xf0] }
 0x189   : > { %v4643_v14 = vor.u32 %v5746_v7, %v4640_v8  ;;  %v4912_v44 = vld [vmem:[#allocation10 + $0x3f8] sm:$0xf0] }
 0x18a   : > { %3251 = vmatpush.bf16.msrb.mxu0 %v4943_v10  ;;  %3225 = vmatpush.bf16.msra.mxu2 %v4687_v15  ;;  %v4480_v10 = vld [vmem:[#allocation10 + $0x98] sm:$0xf0]  ;;  %v5246_v15 = vld [vmem:[#allocation10 + $0x688] sm:$0xf] }
 0x18b   : > { %v4483_v19 = vor.u32 %v5706_v9, %v4480_v10  ;;  %v5247_v26 = vor.u32 %v5900_v16, %v5246_v15  ;;  %v5846_v9 = vld [vmem:[#allocation10 + $0x4ec] sm:$0xf]  ;;  %v5040_v10 = vld [vmem:[#allocation10 + $0x4f8] sm:$0xf0]  ;;  %v5884_v15 = vld [vmem:[#allocation10 + $0x614] sm:$0xf0] }
 0x18c   : > { %3237 = vmatpush.bf16.msra.mxu3 %v4831_v24  ;;  %3263 = vmatpush.bf16.msrb.mxu1 %v5087_v25  ;;  %v5702_v24 = vld [vmem:[#allocation10 + $0x6c] sm:$0xf]  ;;  %v4464_v25 = vld [vmem:[#allocation10 + $0x78] sm:$0xf0]  ;;  %v5043_v23 = vor.u32 %v5846_v9, %v5040_v10 }
 0x18d   : > { %v4467_v12 = vor.u32 %v5702_v24, %v4464_v25  ;;  %v5782_v16 = vld [vmem:[#allocation10 + $0x2ec] sm:$0xf]  ;;  %v4560_v25 = vld [vmem:[#allocation10 + $0x138] sm:$0xf0] }
 0x18e   : > { %3252 = vmatpush.bf16.msrb.mxu0 %v4927_v31  ;;  %3226 = vmatpush.bf16.msra.mxu2 %v4671_v34  ;;  %v5896_v31 = vld [vmem:[#allocation10 + $0x674] sm:$0xf0]  ;;  %v5738_v34 = vld [vmem:[#allocation10 + $0x18c] sm:$0xf] }
 0x18f   : > { %v5231_v40 = vor.u32 %v5896_v31, %v5230_v30  ;;  %v5726_v24 = vld [vmem:[#allocation10 + $0x12c] sm:$0xf]  ;;  %v5327_v31 = vor.u32 %v5920_v22, %v5326_v21 }
 0x190   : > { %3238 = vmatpush.bf16.msra.mxu3 %v4815_v41  ;;  %3264 = vmatpush.bf16.msrb.mxu1 %v5071_v1  ;;  %v5375_v41 = vor.u32 %v5932_v33, %v5374_v32  ;;  %v5778_v32 = vld [vmem:[#allocation10 + $0x2cc] sm:$0xf]  ;;  %v5310_v33 = vld [vmem:[#allocation10 + $0x708] sm:$0xf] }
 0x191   : > { %3227 = vmatmul.bf16.vlgmr.msra.gmra.mxu2 %v6569_v17  ;;  %3253 = vmatmul.bf16.vlgmr.msrb.gmra.mxu0 %v6579_v42  ;;  %v5766_v22 = vld [vmem:[#allocation10 + $0x26c] sm:$0xf] }
 0x192   : > { %3297 = vmatpush.bf16.msra.mxu0 %v4531_v35  ;;  %3271 = vmatpush.bf16.msrb.mxu2 %v5295_v36  ;;  %v4608_v35 = vld [vmem:[#allocation10 + $0x198] sm:$0xf0] }
 0x193   : > { %v4611_v1 = vor.u32 %v5738_v34, %v4608_v35  ;;  %v4563_v34 = vor.u32 %v5726_v24, %v4560_v25  ;;  %v5916_v35 = vld [vmem:[#allocation10 + $0x714] sm:$0xf0] }
 0x194   : > { %3239 = vmatpush.bf16.msra.mxu3 %v4799_v56  ;;  %3265 = vmatpush.bf16.msrb.mxu1 %v5055_v58  ;;  %v6618_v36 = vpop.f32.mrf.mxu2  ;;  %v5888_v56 = vld [vmem:[#allocation10 + $0x634] sm:$0xf0]  ;;  %v5342_v58 = vld [vmem:[#allocation10 + $0x748] sm:$0xf] }
 0x195   : > { %v5199_v8 = vor.u32 %v5888_v56, %v5198_v55  ;;  %v5810_v56 = vld [vmem:[#allocation10 + $0x3cc] sm:$0xf] }
 0x196   : > { %3298 = vmatpush.bf16.msra.mxu0 %v4515_v50  ;;  %3272 = vmatpush.bf16.msrb.mxu2 %v5279_v53  ;;  %v4592_v50 = vld [vmem:[#allocation10 + $0x178] sm:$0xf0]  ;;  %v5359_v53 = vor.u32 %v5928_v47, %v5358_v4 }
 0x197   : > { %3240 = vmatmul.bf16.vlgmr.msra.gmra.mxu3 %v6573_v48  ;;  %3266 = vmatmul.bf16.vlgmr.msrb.gmra.mxu1 %v6583_v0  ;;  %v4595_v54 = vor.u32 %v5734_v49, %v4592_v50  ;;  %v5168_v4 = vld [vmem:[#allocation10 + $0x5f8] sm:$0xf0]  ;;  %v5311_v50 = vor.u32 %v5916_v35, %v5310_v33 }
 0x198   : > { %3284 = vmatpush.bf16.msrb.mxu3 %v5423_v59  ;;  %3310 = vmatpush.bf16.msra.mxu1 %v4659_v61  ;;  %v4435_v61 = vor.u32 %v5694_v51, %v4432_v43  ;;  %v5008_v47 = vld [vmem:[#allocation10 + $0x4b8] sm:$0xf0]  ;;  %v4547_v51 = vor.u32 %v5722_v37, %v4544_v38 }
 0x199   : > { %v4704_v35 = vld [vmem:[#allocation10 + $0x258] sm:$0xf0] }
 0x19a   : > { %3299 = vmatpush.bf16.msra.mxu0 %v4499_v5  ;;  %3273 = vmatpush.bf16.msrb.mxu2 %v5263_v11  ;;  %v6620_v59 = vpop.f32.mrf.mxu3  ;;  %v5690_v5 = vld [vmem:[#allocation10 + $0xc] sm:$0xf]  ;;  %v5343_v11 = vor.u32 %v5924_v62, %v5342_v58  ;;  %v4896_v58 = vld [vmem:[#allocation10 + $0x3d8] sm:$0xf0] }
 0x19b   : > { %v4419_v18 = vor.u32 %v5690_v5, %v4416_v6  ;;  %v5152_v62 = vld [vmem:[#allocation10 + $0x5d8] sm:$0xf0]  ;;  %v5770_v6 = vld [vmem:[#allocation10 + $0x28c] sm:$0xf] }
 0x19c   : > { %3285 = vmatpush.bf16.msrb.mxu3 %v5407_v13  ;;  %3311 = vmatpush.bf16.msra.mxu1 %v4643_v14  ;;  %v3022_v7 = vpop.f32.mrf.mxu2  ;;  %v4579_v13 = vor.u32 %v5730_v2, %v4576_v3  ;;  %v5182_v14 = vld [vmem:[#allocation10 + $0x608] sm:$0xf]  ;;  %v5834_v2 = vld [vmem:[#allocation10 + $0x48c] sm:$0xf]  ;;  %v4992_v3 = vld [vmem:[#allocation10 + $0x498] sm:$0xf0] }
 0x19d   : > { %v4736_v7 = vld [vmem:[#allocation10 + $0x298] sm:$0xf0]  ;;  %v4995_v10 = vor.u32 %v5834_v2, %v4992_v3 }
 0x19e   : > { %3300 = vmatpush.bf16.msra.mxu0 %v4483_v19  ;;  %3274 = vmatpush.bf16.msrb.mxu2 %v5247_v26  ;;  %v4784_v19 = vld [vmem:[#allocation10 + $0x2f8] sm:$0xf0]  ;;  %v5183_v26 = vor.u32 %v5884_v15, %v5182_v14  ;;  %v5870_v14 = vld [vmem:[#allocation10 + $0x5ac] sm:$0xf] }
 0x19f   : > { %v4787_v30 = vor.u32 %v5782_v16, %v4784_v19  ;;  %v5136_v15 = vld [vmem:[#allocation10 + $0x5b8] sm:$0xf0]  ;;  %v5830_v16 = vld [vmem:[#allocation10 + $0x46c] sm:$0xf]  ;;  %v4739_v19 = vor.u32 %v5770_v6, %v4736_v7 }
 0x1a0   : > { %3286 = vmatpush.bf16.msrb.mxu3 %v5391_v27  ;;  %3312 = vmatpush.bf16.msra.mxu1 %v4627_v29  ;;  %v5842_v27 = vld [vmem:[#allocation10 + $0x4cc] sm:$0xf]  ;;  %v5024_v29 = vld [vmem:[#allocation10 + $0x4d8] sm:$0xf0]  ;;  %v5139_v24 = vor.u32 %v5870_v14, %v5136_v15 }
 0x1a1   : > { %v5910_v6 = vld [vmem:[#allocation10 + $0x6ec] sm:$0xf]  ;;  %v4816_v14 = vld [vmem:[#allocation10 + $0x338] sm:$0xf0] }
 0x1a2   : > { %3301 = vmatpush.bf16.msra.mxu0 %v4467_v12  ;;  %3275 = vmatpush.bf16.msrb.mxu2 %v5231_v40  ;;  %v4768_v12 = vld [vmem:[#allocation10 + $0x2d8] sm:$0xf0]  ;;  %v3035_v40 = vpop.f32.mrf.mxu3 }
 0x1a3   : > { %v4771_v49 = vor.u32 %v5778_v32, %v4768_v12  ;;  %v4960_v32 = vld [vmem:[#allocation10 + $0x458] sm:$0xf0] }
 0x1a4   : > { %3287 = vmatpush.bf16.msrb.mxu3 %v5375_v41  ;;  %3313 = vmatpush.bf16.msra.mxu1 %v4611_v1  ;;  %v5027_v41 = vor.u32 %v5842_v27, %v5024_v29  ;;  %v5814_v1 = vld [vmem:[#allocation10 + $0x3ec] sm:$0xf]  ;;  %v4864_v27 = vld [vmem:[#allocation10 + $0x398] sm:$0xf0] }
 0x1a5   : > { %v4915_v43 = vor.u32 %v5814_v1, %v4912_v44  ;;  %v5866_v29 = vld [vmem:[#allocation10 + $0x58c] sm:$0xf]  ;;  %v4848_v1 = vld [vmem:[#allocation10 + $0x378] sm:$0xf0] }
 0x1a6   : > { %3302 = vmatpush.bf16.msra.mxu0 %v4451_v46  ;;  %3276 = vmatpush.bf16.msrb.mxu2 %v5215_v52  ;;  %v5838_v46 = vld [vmem:[#allocation10 + $0x4ac] sm:$0xf]  ;;  %v5952_v15 = vld [vmem:[#allocation12 + $0x38] sm:$0xff] }
 0x1a7   : > { %v5774_v52 = vld [vmem:[#allocation10 + $0x2ac] sm:$0xf]  ;;  %v5011_v55 = vor.u32 %v5838_v46, %v5008_v47  ;;  %v4944_v46 = vld [vmem:[#allocation10 + $0x438] sm:$0xf0] }
 0x1a8   : > { %3288 = vmatpush.bf16.msrb.mxu3 %v5359_v53  ;;  %3314 = vmatpush.bf16.msra.mxu1 %v4595_v54  ;;  %v4752_v53 = vld [vmem:[#allocation10 + $0x2b8] sm:$0xf0]  ;;  %v5171_v54 = vor.u32 %v5878_v45, %v5168_v4  ;;  %v5862_v44 = vld [vmem:[#allocation10 + $0x56c] sm:$0xf] }
 0x1a9   : > { %v4755_v5 = vor.u32 %v5774_v52, %v4752_v53  ;;  %v5104_v45 = vld [vmem:[#allocation10 + $0x578] sm:$0xf0]  ;;  %v5822_v4 = vld [vmem:[#allocation10 + $0x42c] sm:$0xf] }
 0x1aa   : > { %3303 = vmatpush.bf16.msra.mxu0 %v4435_v61  ;;  %3277 = vmatpush.bf16.msrb.mxu2 %v5199_v8  ;;  %v5874_v61 = vld [vmem:[#allocation10 + $0x5cc] sm:$0xf]  ;;  %v4947_v52 = vor.u32 %v5822_v4, %v4944_v46  ;;  %v5408_v4 = vld [vmem:[#allocation10 + $0x7d8] sm:$0xf0] }
 0x1ab   : > { %v5155_v9 = vor.u32 %v5874_v61, %v5152_v62  ;;  %v5794_v53 = vld [vmem:[#allocation10 + $0x34c] sm:$0xf]  ;;  %v4928_v61 = vld [vmem:[#allocation10 + $0x418] sm:$0xf0] }
 0x1ac   : > { %3289 = vmatpush.bf16.msrb.mxu3 %v5343_v11  ;;  %3315 = vmatpush.bf16.msra.mxu1 %v4579_v13  ;;  %v5806_v11 = vld [vmem:[#allocation10 + $0x3ac] sm:$0xf]  ;;  %v4880_v13 = vld [vmem:[#allocation10 + $0x3b8] sm:$0xf0] }
 0x1ad   : > { %v4883_v21 = vor.u32 %v5806_v11, %v4880_v13  ;;  %v5296_v11 = vld [vmem:[#allocation10 + $0x6f8] sm:$0xf0]  ;;  %v5790_v13 = vld [vmem:[#allocation10 + $0x32c] sm:$0xf] }
 0x1ae   : > { %3304 = vmatpush.bf16.msra.mxu0 %v4419_v18  ;;  %3278 = vmatpush.bf16.msrb.mxu2 %v5183_v26  ;;  %v6624_v8 = vpop.f32.mrf.mxu0  ;;  %v4976_v18 = vld [vmem:[#allocation10 + $0x478] sm:$0xf0]  ;;  %v5802_v26 = vld [vmem:[#allocation10 + $0x38c] sm:$0xf] }
 0x1af   : > { %v4979_v25 = vor.u32 %v5830_v16, %v4976_v18  ;;  %v4867_v33 = vor.u32 %v5802_v26, %v4864_v27  ;;  %v5854_v16 = vld [vmem:[#allocation10 + $0x52c] sm:$0xf]  ;;  %v5072_v18 = vld [vmem:[#allocation10 + $0x538] sm:$0xf0] }
 0x1b0   : > { %3290 = vmatpush.bf16.msrb.mxu3 %v5327_v31  ;;  %3316 = vmatpush.bf16.msra.mxu1 %v4563_v34  ;;  %v5826_v31 = vld [vmem:[#allocation10 + $0x44c] sm:$0xf]  ;;  %v5075_v26 = vor.u32 %v5854_v16, %v5072_v18  ;;  %v5960_v46 = vld [vmem:[#allocation12 + $0x78] sm:$0xff] }
 0x1b1   : > { %3305 = vmatmul.bf16.vlgmr.msra.gmra.mxu0 %v6559_v39  ;;  %3279 = vmatmul.bf16.vlgmr.msrb.gmra.mxu2 %v6591_v57  ;;  %v4899_v39 = vor.u32 %v5810_v56, %v4896_v58  ;;  %v5762_v34 = vld [vmem:[#allocation10 + $0x24c] sm:$0xf]  ;;  %v4963_v40 = vor.u32 %v5826_v31, %v4960_v32  ;;  %v5088_v56 = vld [vmem:[#allocation10 + $0x558] sm:$0xf0] }
 0x1b2   : > { %3349 = vmatpush.bf16.msrb.mxu0 %v5043_v23  ;;  %3323 = vmatpush.bf16.msra.mxu2 %v4787_v30  ;;  %v4720_v23 = vld [vmem:[#allocation10 + $0x278] sm:$0xf0]  ;;  %v4707_v47 = vor.u32 %v5762_v34, %v4704_v35  ;;  %v5818_v58 = vld [vmem:[#allocation10 + $0x40c] sm:$0xf] }
 0x1b3   : > { %v5120_v30 = vld [vmem:[#allocation10 + $0x598] sm:$0xf0]  ;;  %v4723_v12 = vor.u32 %v5766_v22, %v4720_v23  ;;  %v4819_v22 = vor.u32 %v5790_v13, %v4816_v14  ;;  %v5906_v23 = vld [vmem:[#allocation10 + $0x6cc] sm:$0xf]  ;;  %v5947_v13 = vld [vmem:[#allocation12 + $0x10] sm:$0xff] }
 0x1b4   : > { %3291 = vmatpush.bf16.msrb.mxu3 %v5311_v50  ;;  %3317 = vmatpush.bf16.msra.mxu1 %v4547_v51  ;;  %v5123_v38 = vor.u32 %v5866_v29, %v5120_v30  ;;  %v5758_v50 = vld [vmem:[#allocation10 + $0x22c] sm:$0xf]  ;;  %v4688_v51 = vld [vmem:[#allocation10 + $0x238] sm:$0xf0] }
 0x1b5   : > { %v4691_v62 = vor.u32 %v5758_v50, %v4688_v51  ;;  %v5786_v27 = vld [vmem:[#allocation10 + $0x30c] sm:$0xf]  ;;  %v4800_v29 = vld [vmem:[#allocation10 + $0x318] sm:$0xf0]  ;;  %v5949_v51 = vld [vmem:[#allocation12 + $0x20] sm:$0xff] }
 0x1b6   : > { %3350 = vmatpush.bf16.msrb.mxu0 %v5027_v41  ;;  %3324 = vmatpush.bf16.msra.mxu2 %v4771_v49  ;;  %v3048_v37 = vpop.f32.mrf.mxu0  ;;  %v5798_v41 = vld [vmem:[#allocation10 + $0x36c] sm:$0xf]  ;;  %v5056_v31 = vld [vmem:[#allocation10 + $0x518] sm:$0xf0]  ;;  %v4803_v35 = vor.u32 %v5786_v27, %v4800_v29 }
 0x1b7   : > { %3292 = vmatmul.bf16.vlgmr.msrb.gmra.mxu3 %v6596_v28  ;;  %3318 = vmatmul.bf16.vlgmr.msra.gmra.mxu1 %v6563_v63  ;;  %v6628_v63 = vpop.f32.mrf.mxu1  ;;  %v4851_v49 = vor.u32 %v5798_v41, %v4848_v1  ;;  %v5850_v30 = vld [vmem:[#allocation10 + $0x50c] sm:$0xf]  ;;  %v5264_v1 = vld [vmem:[#allocation10 + $0x6b8] sm:$0xf0] }
 0x1b8   : > { %3336 = vmatpush.bf16.msra.mxu3 %v4915_v43  ;;  %3362 = vmatpush.bf16.msrb.mxu1 %v5171_v54  ;;  %v5107_v43 = vor.u32 %v5862_v44, %v5104_v45  ;;  %v4832_v54 = vld [vmem:[#allocation10 + $0x358] sm:$0xf0]  ;;  %v5942_v32 = vld [vmem:[#allocation10 + $0x7ec] sm:$0xf] }
 0x1b9   : > { %v4835_v3 = vor.u32 %v5794_v53, %v4832_v54  ;;  %v5902_v41 = vld [vmem:[#allocation10 + $0x6ac] sm:$0xf]  ;;  %v5959_v53 = vld [vmem:[#allocation12 + $0x70] sm:$0xff]  ;;  %v5956_v27 = vld [vmem:[#allocation12 + $0x58] sm:$0xff] }
 0x1ba   : > { %3351 = vmatpush.bf16.msrb.mxu0 %v5011_v55  ;;  %3325 = vmatpush.bf16.msra.mxu2 %v4755_v5  ;;  %v5858_v55 = vld [vmem:[#allocation10 + $0x54c] sm:$0xf] }
 0x1bb   : > { %v5754_v5 = vld [vmem:[#allocation10 + $0x20c] sm:$0xf] }
 0x1bc   : > { %3337 = vmatpush.bf16.msra.mxu3 %v4899_v39  ;;  %3363 = vmatpush.bf16.msrb.mxu1 %v5155_v9  ;;  %v4672_v39 = vld [vmem:[#allocation10 + $0x218] sm:$0xf0]  ;;  %v5091_v9 = vor.u32 %v5858_v55, %v5088_v56  ;;  %v5950_v44 = vld [vmem:[#allocation12 + $0x28] sm:$0xff] }
 0x1bd   : > { %v5938_v45 = vld [vmem:[#allocation10 + $0x7cc] sm:$0xf] }
 0x1be   : > { %3352 = vmatpush.bf16.msrb.mxu0 %v4995_v10  ;;  %3326 = vmatpush.bf16.msra.mxu2 %v4739_v19  ;;  %v6630_v7 = vpop.f32.mrf.mxu0  ;;  %v4931_v10 = vor.u32 %v5818_v58, %v4928_v61  ;;  %v4675_v19 = vor.u32 %v5754_v5, %v4672_v39  ;;  %v5898_v50 = vld [vmem:[#allocation10 + $0x68c] sm:$0xf]  ;;  %v5232_v61 = vld [vmem:[#allocation10 + $0x678] sm:$0xf0] }
 0x1bf   : > { %v3061_v2 = vpop.f32.mrf.mxu1  ;;  %v5894_v58 = vld [vmem:[#allocation10 + $0x66c] sm:$0xf]  ;;  %v5376_v5 = vld [vmem:[#allocation10 + $0x798] sm:$0xf0] }
 0x1c0   : > { %3338 = vmatpush.bf16.msra.mxu3 %v4883_v21  ;;  %3364 = vmatpush.bf16.msrb.mxu1 %v5139_v24  ;;  %v5299_v21 = vor.u32 %v5910_v6, %v5296_v11  ;;  %v5280_v24 = vld [vmem:[#allocation10 + $0x6d8] sm:$0xf0]  ;;  %v3021_v2 = vadd.f32 %v6618_v36, %v6612_v60  ;;  %v5235_v6 = vor.u32 %v5894_v58, %v5232_v61  ;;  %v5926_v60 = vld [vmem:[#allocation10 + $0x76c] sm:$0xf] }
 0x1c1   : > { %v5283_v34 = vor.u32 %v5906_v23, %v5280_v24  ;;  %v5216_v11 = vld [vmem:[#allocation10 + $0x658] sm:$0xf0]  ;;  %v5946_v24 = vld [vmem:[#allocation12 + $0x8] sm:$0xff] }
 0x1c2   : > { %3353 = vmatpush.bf16.msrb.mxu0 %v4979_v25  ;;  %3327 = vmatpush.bf16.msra.mxu2 %v4723_v12  ;;  %v5951_v25 = vld [vmem:[#allocation12 + $0x30] sm:$0xff]  ;;  %v5424_v12 = vld [vmem:[#allocation10 + $0x7f8] sm:$0xf0] }
 0x1c3   : > { %v5360_v36 = vld [vmem:[#allocation10 + $0x778] sm:$0xf0] }
 0x1c4   : > { %3339 = vmatpush.bf16.msra.mxu3 %v4867_v33  ;;  %3365 = vmatpush.bf16.msrb.mxu1 %v5123_v38  ;;  %v5059_v38 = vor.u32 %v5850_v30, %v5056_v31  ;;  %v5200_v23 = vld [vmem:[#allocation10 + $0x638] sm:$0xf0]  ;;  %v6650_v30 = vstv %s6642_s14  ;;  %s6265_s14 = sshra.s32 %s3752_s19, 4  ;;  %s6266_s14 = int_to_ptr.hbm [resolvable:$true] %s6265_s14 }
 0x1c5   : > { %s6267_s12 = scalar_lea.hbm %s6266_s14, 8  ;;  %p6272_p12 = scmp.lt.s32.totalorder %s6266_s14, %s6712_s8 }
 0x1c6   : > { %3354 = vmatpush.bf16.msrb.mxu0 %v4963_v40  ;;  %3328 = vmatpush.bf16.msra.mxu2 %v4707_v47  ;;  %v3100_v37 = vpop.f32.mrf.mxu0  ;;  %v5427_v40 = vor.u32 %v5942_v32, %v5424_v12  ;;  %v5267_v47 = vor.u32 %v5902_v41, %v5264_v1  ;;  %v5328_v41 = vld [vmem:[#allocation10 + $0x738] sm:$0xf0]  ;;  %v5955_v1 = vld [vmem:[#allocation12 + $0x50] sm:$0xff]  ;;  %p6268_p1 = scmp.ne.s32.totalorder %s6266_s14, %s6267_s12  ;;  %p6273_p8 = scmp.lt.s32.totalorder %s6271_s21, %s6267_s12 }
 0x1c7   : > { %v6632_v33 = vpop.f32.mrf.mxu1  ;;  %v5945_v37 = vld [vmem:[#allocation12] sm:$0xff] }
 0x1c8   : > { %3340 = vmatpush.bf16.msra.mxu3 %v4851_v49  ;;  %3366 = vmatpush.bf16.msrb.mxu1 %v5107_v43  ;;  %v5411_v49 = vor.u32 %v5938_v45, %v5408_v4  ;;  %v5934_v43 = vld [vmem:[#allocation10 + $0x7ac] sm:$0xf]  ;;  %p6269_p3 = pnand %p6268_p1, %p6473_p13  ;;  %p6274_p7 = por %p6273_p8, %p6272_p12 }
 0x1ca   : > { %3355 = vmatpush.bf16.msrb.mxu0 %v4947_v52  ;;  %3329 = vmatpush.bf16.msra.mxu2 %v4691_v62  ;;  %v5392_v52 = vld [vmem:[#allocation10 + $0x7b8] sm:$0xf0]  ;;  %p6270_p5 = pneg %p6269_p3 }
 0x1cb   : > { %v5395_v56 = vor.u32 %v5934_v43, %v5392_v52  ;;  %v5948_v62 = vld [vmem:[#allocation12 + $0x18] sm:$0xff] }
 0x1cc   : > { %3341 = vmatpush.bf16.msra.mxu3 %v4835_v3  ;;  %3367 = vmatpush.bf16.msrb.mxu1 %v5091_v9  ;;  %v5930_v3 = vld [vmem:[#allocation10 + $0x78c] sm:$0xf]  ;;  %p6275_p9 = pnand %p6274_p7, %p6270_p5 }
 0x1cd   : > { %v5379_v9 = vor.u32 %v5930_v3, %v5376_v5 }
 0x1ce   : > { %3356 = vmatpush.bf16.msrb.mxu0 %v4931_v10  ;;  %3330 = vmatpush.bf16.msra.mxu2 %v4675_v19  ;;  %v6638_v55 = vpop.f32.mrf.mxu0  ;;  %v5890_v10 = vld [vmem:[#allocation10 + $0x64c] sm:$0xf] }
 0x1cf   : > { %v5219_v18 = vor.u32 %v5890_v10, %v5216_v11 }
 0x1d0   : > { %3342 = vmatpush.bf16.msra.mxu3 %v4819_v22  ;;  %3368 = vmatpush.bf16.msrb.mxu1 %v5075_v26  ;;  %v5886_v22 = vld [vmem:[#allocation10 + $0x62c] sm:$0xf]  ;;  %v5344_v26 = vld [vmem:[#allocation10 + $0x758] sm:$0xf0] }
 0x1d1   : > { %3357 = vmatmul.bf16.vlgmr.msrb.gmra.mxu0 %v6579_v42  ;;  %3331 = vmatmul.bf16.vlgmr.msra.gmra.mxu2 %v6569_v17  ;;  %v5248_v42 = vld [vmem:[#allocation10 + $0x698] sm:$0xf0]  ;;  %v3113_v17 = vpop.f32.mrf.mxu1  ;;  %v5203_v32 = vor.u32 %v5886_v22, %v5200_v23  ;;  %v5962_v23 = vld [vmem:[#allocation12 + $0x88] sm:$0xff] }
 0x1d2   : > { %3678 = vmatpush.bf16.msra.mxu0 %v5952_v15  ;;  %3375 = vmatpush.bf16.msrb.mxu2 %v5299_v21  ;;  %v5251_v54 = vor.u32 %v5898_v50, %v5248_v42  ;;  %v5957_v15 = vld [vmem:[#allocation12 + $0x60] sm:$0xff]  ;;  %v5363_v21 = vor.u32 %v5926_v60, %v5360_v36  ;;  %v5954_v50 = vld [vmem:[#allocation12 + $0x48] sm:$0xff]  ;;  %v1698_v17 = vperm.slane %v6607_v20, 1 }
 0x1d4   : > { %3343 = vmatpush.bf16.msra.mxu3 %v4803_v35  ;;  %3369 = vmatpush.bf16.msrb.mxu1 %v5059_v38  ;;  %v3072_v39 = vpop.f32.mrf.mxu2  ;;  %v5184_v35 = vld [vmem:[#allocation10 + $0x618] sm:$0xf0] }
 0x1d6   : > { %3679 = vmatpush.bf16.msra.mxu0 %v5951_v25  ;;  %3376 = vmatpush.bf16.msrb.mxu2 %v5283_v34  ;;  %v3152_v19 = vpop.f32.mrf.mxu0  ;;  %v5882_v34 = vld [vmem:[#allocation10 + $0x60c] sm:$0xf] }
 0x1d7   : > { %3344 = vmatmul.bf16.vlgmr.msra.gmra.mxu3 %v6573_v48  ;;  %3370 = vmatmul.bf16.vlgmr.msrb.gmra.mxu1 %v6583_v0  ;;  %v5958_v48 = vld [vmem:[#allocation12 + $0x68] sm:$0xff]  ;;  %v3034_v0 = vadd.f32 %v6620_v59, %v3021_v2  ;;  %v5187_v4 = vor.u32 %v5882_v34, %v5184_v35 }
 0x1d8   : > { %3388 = vmatpush.bf16.msrb.mxu3 %v5427_v40  ;;  %3691 = vmatpush.bf16.msra.mxu1 %v5960_v46  ;;  %v5918_v40 = vld [vmem:[#allocation10 + $0x72c] sm:$0xf] }
 0x1d9   : > { %v3047_v14 = vadd.f32 %v6624_v8, %v3034_v0  ;;  %v6647_v59 = vpop.f32.mrf.mxu1  ;;  %v5922_v8 = vld [vmem:[#allocation10 + $0x74c] sm:$0xf]  ;;  %v5331_v46 = vor.u32 %v5918_v40, %v5328_v41 }
 0x1da   : > { %3680 = vmatpush.bf16.msra.mxu0 %v5950_v44  ;;  %3377 = vmatpush.bf16.msrb.mxu2 %v5267_v47  ;;  %v3085_v29 = vpop.f32.mrf.mxu3  ;;  %v5347_v12 = vor.u32 %v5922_v8, %v5344_v26  ;;  %v5914_v47 = vld [vmem:[#allocation10 + $0x70c] sm:$0xf] }
 0x1db   : > { %v3060_v16 = vadd.f32 %v6628_v63, %v3047_v14 }
 0x1dc   : > { %3389 = vmatpush.bf16.msrb.mxu3 %v5411_v49  ;;  %3692 = vmatpush.bf16.msra.mxu1 %v5959_v53  ;;  %v3074_v31 = vpop.f32.mrf.mxu2  ;;  %v5312_v49 = vld [vmem:[#allocation10 + $0x718] sm:$0xf0]  ;;  %v5953_v53 = vld [vmem:[#allocation12 + $0x40] sm:$0xff] }
 0x1dd   : > { %v3073_v25 = vadd.f32 %v3072_v39, %v3060_v16  ;;  %v5315_v52 = vor.u32 %v5914_v47, %v5312_v49  ;;  %v5964_v16 = vld [vmem:[#allocation12 + $0x98] sm:$0xff] }
 0x1de   : > { %3681 = vmatpush.bf16.msra.mxu0 %v5949_v51  ;;  %3378 = vmatpush.bf16.msrb.mxu2 %v5251_v54  ;;  %v3099_v54 = vadd.f32 %v6630_v7, %v1698_v17  ;;  %v5973_v17 = vld [vmem:[#allocation12 + $0xe0] sm:$0xff] }
 0x1df   : > { %v3086_v63 = vadd.f32 %v3085_v29, %v3073_v25  ;;  %v5961_v25 = vld [vmem:[#allocation12 + $0x80] sm:$0xff] }
 0x1e0   : > { %3390 = vmatpush.bf16.msrb.mxu3 %v5395_v56  ;;  %3693 = vmatpush.bf16.msra.mxu1 %v5958_v48  ;;  %v3112_v58 = vadd.f32 %v6632_v33, %v3099_v54  ;;  %v5972_v54 = vld [vmem:[#allocation12 + $0xd8] sm:$0xff] }
 0x1e1   : > { %vm3401_vm8 = vcmp.ge.f32.partialorder %v3086_v63, 0.0  ;;  %v3406_v38 = vmul.f32 %v6650_v30, %v3086_v63  ;;  %v3165_v45 = vpop.f32.mrf.mxu1 }
 0x1e2   : > { %3682 = vmatpush.bf16.msra.mxu0 %v5948_v62  ;;  %3379 = vmatpush.bf16.msrb.mxu2 %v5235_v6  ;;  %v3087_v51 = vpop.f32.mrf.mxu3 }
 0x1e3   : > { %v3410_v44 = vsel %vm3401_vm8, %v3086_v63, %v3406_v38  ;;  %v5975_v51 = vld [vmem:[#allocation12 + $0xf0] sm:$0xff] }
 0x1e4   : > { %3391 = vmatpush.bf16.msrb.mxu3 %v5379_v9  ;;  %3694 = vmatpush.bf16.msra.mxu1 %v5957_v15  ;;  %v3414_v42 = vpack.c.bf16 %v3410_v44, %v3410_v44  ;;  %v3124_v43 = vpop.f32.mrf.mxu2  ;;  %v5968_v9 = vld [vmem:[#allocation12 + $0xb8] sm:$0xff]  ;;  %v5965_v15 = vld [vmem:[#allocation12 + $0xa0] sm:$0xff] }
 0x1e5   : > { %v3125_v62 = vadd.f32 %v3124_v43, %v3112_v58  ;;  %v5971_v58 = vld [vmem:[#allocation12 + $0xd0] sm:$0xff] }
 0x1e6   : > { %3683 = vmatpush.bf16.msra.mxu0 %v5947_v13  ;;  %3380 = vmatpush.bf16.msrb.mxu2 %v5219_v18  ;;  %v5967_v13 = vld [vmem:[#allocation12 + $0xb0] sm:$0xff] }
 0x1e7   : > { %v5963_v18 = vld [vmem:[#allocation12 + $0x90] sm:$0xff] }
 0x1e8   : > { %3392 = vmatpush.bf16.msrb.mxu3 %v5363_v21  ;;  %3695 = vmatpush.bf16.msra.mxu1 %v5956_v27  ;;  %v6085_v27 = vld [vmem:[%s6709_s5] sm:$0xf] }
 0x1e9   : > { %v1699_v29 = vperm.slane %v6085_v27, 2 }
 0x1ea   : > { %3684 = vmatpush.bf16.msra.mxu0 %v5946_v24  ;;  %3381 = vmatpush.bf16.msrb.mxu2 %v5203_v32  ;;  %v3137_v56 = vpop.f32.mrf.mxu3 }
 0x1eb   : > { %v3138_v3 = vadd.f32 %v3137_v56, %v3125_v62 }
 0x1ec   : > { %3393 = vmatpush.bf16.msrb.mxu3 %v5347_v12  ;;  %3696 = vmatpush.bf16.msra.mxu1 %v5955_v1  ;;  %v3126_v61 = vpop.f32.mrf.mxu2 }
 0x1ed   : > { %v3151_v48 = vadd.f32 %v6638_v55, %v3138_v3  ;;  %v5966_v55 = vld [vmem:[#allocation12 + $0xa8] sm:$0xff] }
 0x1ee   : > { %3685 = vmatpush.bf16.msra.mxu0 %v5945_v37  ;;  %3382 = vmatpush.bf16.msrb.mxu2 %v5187_v4  ;;  %v3202_v2 = vpop.f32.mrf.mxu0  ;;  %v5976_v4 = vld [vmem:[#allocation12 + $0xf8] sm:$0xff]  ;;  %v5970_v3 = vld [vmem:[#allocation12 + $0xc8] sm:$0xff] }
 0x1ef   : > { %v3203_v31 = vadd.f32 %v3202_v2, %v1699_v29 }
 0x1f0   : > { %3394 = vmatpush.bf16.msrb.mxu3 %v5331_v46  ;;  %3697 = vmatpush.bf16.msra.mxu1 %v5954_v50 }
 0x1f1   : > { %3686 = vmatmul.bf16.vlgmr.msra.gmra.mxu0 %v3414_v42  ;;  %3383 = vmatmul.bf16.vlgmr.msrb.gmra.mxu2 %v6591_v57  ;;  %v3164_v57 = vadd.f32 %v6647_v59, %v3151_v48  ;;  %v5969_v48 = vld [vmem:[#allocation12 + $0xc0] sm:$0xff] }
 0x1f2   : > { %v3139_v5 = vpop.f32.mrf.mxu3  ;;  %3704 = vmatpush.bf16.msra.mxu2 %v5968_v9 }
 0x1f4   : > { %3395 = vmatpush.bf16.msrb.mxu3 %v5315_v52  ;;  %3698 = vmatpush.bf16.msra.mxu1 %v5953_v53  ;;  %v3215_v0 = vpop.f32.mrf.mxu1  ;;  %v3176_v20 = vpop.f32.mrf.mxu2  ;;  %v5974_v52 = vld [vmem:[#allocation12 + $0xe8] sm:$0xff] }
 0x1f5   : > { %v3177_v6 = vadd.f32 %v3176_v20, %v3164_v57  ;;  %v3216_v32 = vadd.f32 %v3215_v0, %v3203_v31 }
 0x1f6   : > { %v3204_v39 = vpop.f32.mrf.mxu0  ;;  %3705 = vmatpush.bf16.msra.mxu2 %v5967_v13 }
 0x1f7   : > { %3396 = vmatmul.bf16.vlgmr.msrb.gmra.mxu3 %v6596_v28  ;;  %v1700_v39 = vperm.slane %v6085_v27, 3 }
 0x1f8   : > { %3717 = vmatpush.bf16.msra.mxu3 %v5976_v4 }
 0x1fa   : > { %v3189_v7 = vpop.f32.mrf.mxu3  ;;  %3706 = vmatpush.bf16.msra.mxu2 %v5966_v55 }
 0x1fb   : > { %v3190_v10 = vadd.f32 %v3189_v7, %v3177_v6 }
 0x1fc   : > { %v3217_v11 = vpop.f32.mrf.mxu1  ;;  %v3178_v28 = vpop.f32.mrf.mxu2  ;;  %3718 = vmatpush.bf16.msra.mxu3 %v5975_v51 }
 0x1fd   : > { %vm3402_vm9 = vcmp.ge.f32.partialorder %v3190_v10, 0.0  ;;  %v3407_v33 = vmul.f32 %v6650_v30, %v3190_v10 }
 0x1fe   : > { %3707 = vmatpush.bf16.msra.mxu2 %v5965_v15 }
 0x1ff   : > { %v3411_v14 = vsel %vm3402_vm9, %v3190_v10, %v3407_v33 }
 0x200   : > { %v3415_v60 = vpack.c.bf16 %v3411_v14, %v3411_v14  ;;  %3719 = vmatpush.bf16.msra.mxu3 %v5974_v52 }
 0x202   : > { %v3191_v36 = vpop.f32.mrf.mxu3  ;;  %3699 = vmatmul.bf16.vlgmr.msra.gmra.mxu1 %v3415_v60  ;;  %3708 = vmatpush.bf16.msra.mxu2 %v5964_v16 }
 0x204   : > { %3720 = vmatpush.bf16.msra.mxu3 %v5973_v17 }
 0x206   : > { %3709 = vmatpush.bf16.msra.mxu2 %v5963_v18 }
 0x208   : > { %3721 = vmatpush.bf16.msra.mxu3 %v5972_v54 }
 0x20a   : > { %3710 = vmatpush.bf16.msra.mxu2 %v5962_v23 }
 0x20c   : > { %3722 = vmatpush.bf16.msra.mxu3 %v5971_v58 }
 0x20e   : > { %v3254_v59 = vpop.f32.mrf.mxu0  ;;  %3711 = vmatpush.bf16.msra.mxu2 %v5961_v25 }
 0x210   : > { %3723 = vmatpush.bf16.msra.mxu3 %v5970_v3 }
 0x214   : > { %v3228_v19 = vpop.f32.mrf.mxu2  ;;  %v3267_v21 = vpop.f32.mrf.mxu1  ;;  %3724 = vmatpush.bf16.msra.mxu3 %v5969_v48 }
 0x215   : > { %v3229_v12 = vadd.f32 %v3228_v19, %v3216_v32 }
 0x216   : > { %v3256_v22 = vpop.f32.mrf.mxu0 }
 0x21a   : > { %v3241_v24 = vpop.f32.mrf.mxu3 }
 0x21b   : > { %v3242_v35 = vadd.f32 %v3241_v24, %v3229_v12 }
 0x21c   : > { %v3230_v8 = vpop.f32.mrf.mxu2  ;;  %v3269_v26 = vpop.f32.mrf.mxu1 }
 0x21d   : > { %v3255_v37 = vadd.f32 %v3254_v59, %v3242_v35 }
 0x21f   : > { %v3268_v1 = vadd.f32 %v3267_v21, %v3255_v37  ;;  %v6080_v21 = vld [vmem:[%s6711_s7] ss:$0 sm:$0xff] }
 0x222   : > { %v3243_v63 = vpop.f32.mrf.mxu3 }
 0x22e   : > { %v3306_v34 = vpop.f32.mrf.mxu0 }
 0x22f   : > { %v3307_v6 = vadd.f32 %v3306_v34, %v1700_v39 }
 0x234   : > { %v3280_v38 = vpop.f32.mrf.mxu2  ;;  %v3319_v40 = vpop.f32.mrf.mxu1 }
 0x235   : > { %v3281_v44 = vadd.f32 %v3280_v38, %v3268_v1  ;;  %v3320_v9 = vadd.f32 %v3319_v40, %v3307_v6 }
 0x236   : > { %v3308_v41 = vpop.f32.mrf.mxu0 }
 0x23a   : > { %v3293_v45 = vpop.f32.mrf.mxu3 }
 0x23b   : > { %v3294_v46 = vadd.f32 %v3293_v45, %v3281_v44 }
 0x23c   : > { %v3282_v49 = vpop.f32.mrf.mxu2  ;;  %v3321_v50 = vpop.f32.mrf.mxu1 }
 0x23d   : > { %vm3403_vm10 = vcmp.ge.f32.partialorder %v3294_v46, 0.0  ;;  %v3408_v47 = vmul.f32 %v6650_v30, %v3294_v46 }
 0x23f   : > { %v3412_v42 = vsel %vm3403_vm10, %v3294_v46, %v3408_v47 }
 0x240   : > { %v3416_v43 = vpack.c.bf16 %v3412_v42, %v3412_v42 }
 0x242   : > { %v3295_v53 = vpop.f32.mrf.mxu3  ;;  %3712 = vmatmul.bf16.vlgmr.msra.gmra.mxu2 %v3416_v43 }
 0x24e   : > { %v3358_v56 = vpop.f32.mrf.mxu0 }
 0x254   : > { %v3332_v61 = vpop.f32.mrf.mxu2  ;;  %v3371_v62 = vpop.f32.mrf.mxu1 }
 0x255   : > { %v3333_v7 = vadd.f32 %v3332_v61, %v3320_v9 }
 0x256   : > { %v3360_v2 = vpop.f32.mrf.mxu0 }
 0x25a   : > { %v3345_v5 = vpop.f32.mrf.mxu3 }
 0x25b   : > { %v3346_v11 = vadd.f32 %v3345_v5, %v3333_v7 }
 0x25c   : > { %v3334_v0 = vpop.f32.mrf.mxu2  ;;  %v3373_v20 = vpop.f32.mrf.mxu1 }
 0x25d   : > { %v3359_v28 = vadd.f32 %v3358_v56, %v3346_v11 }
 0x25f   : > { %v3372_v14 = vadd.f32 %v3371_v62, %v3359_v28 }
 0x262   : > { %v3347_v57 = vpop.f32.mrf.mxu3 }
 0x26e   : > { %v3687_v10 = vpop.f32.mrf.mxu0 }
 0x26f   : > { %v3688_v22 = vadd.f32 %v6080_v21, %v3687_v10 }
 0x274   : > { %v3384_v33 = vpop.f32.mrf.mxu2 }
 0x275   : > { %v3385_v60 = vadd.f32 %v3384_v33, %v3372_v14 }
 0x276   : > { %v3689_v13 = vpop.f32.mrf.mxu0 }
 0x27a   : > { %v3397_v55 = vpop.f32.mrf.mxu3 }
 0x27b   : > { %v3398_v36 = vadd.f32 %v3397_v55, %v3385_v60 }
 0x27c   : > { %v3386_v16 = vpop.f32.mrf.mxu2 }
 0x27d   : > { %vm3404_vm11 = vcmp.ge.f32.partialorder %v3398_v36, 0.0  ;;  %v3409_v15 = vmul.f32 %v6650_v30, %v3398_v36 }
 0x27f   : > { %v3413_v59 = vsel %vm3404_vm11, %v3398_v36, %v3409_v15  ;;  %v3700_v23 = vpop.f32.mrf.mxu1 }
 0x280   : > { %v3417_v18 = vpack.c.bf16 %v3413_v59, %v3413_v59  ;;  %v3701_v24 = vadd.f32 %v3700_v23, %v3688_v22 }
 0x282   : > { %v3399_v19 = vpop.f32.mrf.mxu3  ;;  %3725 = vmatmul.bf16.vlgmr.msra.gmra.mxu3 %v3417_v18 }
 0x287   : > { %v3702_v25 = vpop.f32.mrf.mxu1 }
 0x2c5   : > { %v3713_v8 = vpop.f32.mrf.mxu2 }
 0x2c6   : > { %v3714_v27 = vadd.f32 %v3713_v8, %v3701_v24 }
 0x2cd   : > { %v3715_v26 = vpop.f32.mrf.mxu2 }
 0x305   : > { %v3726_v29 = vpop.f32.mrf.mxu3 }
 0x306   : > { %v3727_v30 = vadd.f32 %v3726_v29, %v3714_v27 }
 0x308   : > { %v3730_v63 = vsub.f32 0.0, %v3727_v30 }
 0x30a   : > { %v3731_v31 = vmul.f32 1.442695, %v3730_v63 }
 0x30c   : > { %6081 = vpow2.f32 %v3731_v31 }
 0x30d   : > { %v3728_v32 = vpop.f32.mrf.mxu3 }
 0x312   : > { %v6082_v12 = vpop.eup %6081 }
 0x313   : > { %v3733_v34 = vadd.f32 1.0, %v6082_v12 }
 0x315   : > { %6083 = vrcp.f32 %v3733_v34 }
 0x31b   : > { %v6084_v35 = vpop.eup %6083 }
 0x31c   : > { %3735 = vst [vmem:[%s401_s25] sm:$0xff] %v6084_v35 }
 0x31d   : > { %6278 = shalt.err (!%p6275_p9)
}
 0x31e   : > { %5999 = dma.vmem_to_hbm [thread:$0]  (%p6473_p13), %s3750_s13, 128, %s3752_s19, %s3737_s26  }
 0x31f PF: > { %s3763_s11 = sand.u32 1, %s6317_s27   ;;  %p6723_p10 = scmp.ge.s32.totalorder %s6329_s30, 2 }
 0x320   : > { %s3764_s18 = scalar_lea.sflag [#allocation4], %s3763_s11 }
 0x321   : > { %p6022_p11 = pnand %p6723_p10, %p6478_p4 }
 0x323   : > { %p6023_p0 = pneg %p6022_p11 }
 0x325   : > { %6312 = dma.done.wait (%p6023_p0), %s3764_s18, 128  }
 0x326   : > { %6314 = vsyncadd (%p6023_p0), %s3764_s18, 4294967168  ;;  %p24_p2 = scmp.ge.s32.totalorder %s6453_s10, 4   ;;  %s6724_s27 = smov %s6321_s28 }
 0x327   : > { %s6725_s28 = smov %s6325_s29  ;;  %s6726_s29 = smov %s6465_s17 }
 0x328   : > { %s6727_s30 = smov %s6453_s10  ;;  %26 = sbr.rel (!%p24_p2) target bundleno = 11 (0xb), region = 118 }
 0x32d   :  { %3770 = vsyncpa [#allocation3], 1 }
 0x32e   :  { %3772 = vsyncpa [#allocation3 + $0x1], 1 }
 0x32f   :  { %3773 = vsyncpa [#allocation8], 1 }
 0x330   :  { %3774 = vsyncpa [#allocation11], 1 }
 0x331   :  { %3775 = vsyncpa [#allocation4], 1 }
 0x332   :  { %3777 = vsyncpa [#allocation4 + $0x1], 1 }
 0x333   :  { %3778 = vsyncpa [#allocation5], 1 }
 0x334   :  { %3780 = vsyncpa [#allocation5 + $0x1], 1 }

</bundles_post_ra>
